<compile_context>
chip_gen: v7x
topology: tpu7x:2x2x1
jax: 0.10.0
libtpu: 0.0.40
codegen_flags: <defaults>
</compile_context>

<pallas_src>
import functools
import math

import jax
import jax.numpy as jnp
from jax.experimental import pallas as pl

D_MODEL = 32
HEADS = 8
N_LAYERS = 2
FF_HIDDEN = 2048          # FeedForward default hidden_dim in the reference
VOCAB_SIZE = 50
EMB_ROWS = 64             # vocab padded to a friendly size (extra rows are 0)
MAX_SEQ_LEN = 80
LN_EPS = 1e-5             # nn.LayerNorm default eps
NEG_INF = -1e30           # finite stand-in for -inf (avoids inf-inf -> NaN)


# ------------------------------- the kernel --------------------------------

def decoder_kernel(tok_ref, enc_ref, pe_ref, emb_ref, bias_ref, vbd_ref,
                   w_sa_qkv_ref, b_sa_qkv_ref, w_sa_o_ref, b_sa_o_ref,
                   w_ca_qk_ref, b_ca_qk_ref, w_ca_v_ref, b_ca_v_ref,
                   w_ca_o_ref, b_ca_o_ref, ln_ref,
                   f1w_ref, f1b_ref, f2wt_ref, f2b_ref,
                   out_ref, *, heads, n_layers):
    bs, d = out_ref.shape
    dh = d // heads

    # ---- prologue: embedding gather (one-hot matmul) + positional encoding --
    vocab = emb_ref.shape[0]
    tok = tok_ref[...]                                         # (bs, 1) int32
    cls = jax.lax.broadcasted_iota(jnp.int32, (bs, vocab), 1)
    onehot = (cls == tok).astype(jnp.float32)                  # (bs, vocab)
    # embedding table is pre-scaled by sqrt(d_model) at init
    x = jnp.dot(onehot, emb_ref[...],
                preferred_element_type=jnp.float32) + pe_ref[...]

    enc = enc_ref[...]                                         # (bs, d)
    vbd = vbd_ref[...]                                         # (H*bs, d)
    self_bias = bias_ref[0]                                    # (bs, H*bs)
    cross_bias = bias_ref[1]                                   # (bs, H*bs)

    def dense(a, w, b):
        return jnp.dot(a.astype(w.dtype), w,
                       preferred_element_type=jnp.float32) + b

    def layer_norm(a, gamma, beta):
        mu = jnp.mean(a, axis=-1, keepdims=True)
        var = jnp.mean((a - mu) ** 2, axis=-1, keepdims=True)  # biased, as torch
        return (a - mu) * jax.lax.rsqrt(var + LN_EPS) * gamma + beta

    def mh_attention(q, k, v, w0, b0, bias):
        # Block-diagonal head trick: replicate K/V over heads along sublanes
        # and mask, so all per-head scores land in one lane-dense matmul.
        k_rep = jnp.concatenate([k] * heads, axis=0) * vbd      # (H*bs, d)
        v_rep = jnp.concatenate([v] * heads, axis=0) * vbd      # (H*bs, d)
        scores = jax.lax.dot_general(
            q, k_rep, (((1,), (1,)), ((), ())),
            preferred_element_type=jnp.float32) + bias           # (bs, H*bs)
        # Per-head softmax: max and denominator per head segment (numerical
        # safety), normalization deferred to after the AV matmul.
        p_parts, inv_parts = [], []
        for h in range(heads):
            s_h = scores[:, h * bs:(h + 1) * bs]                # (bs, bs)
            m_h = jnp.max(s_h, axis=-1, keepdims=True)
            p_h = jnp.exp(s_h - m_h)                            # masked -> 0
            d_h = jnp.sum(p_h, axis=-1, keepdims=True)          # >= 1
            p_parts.append(p_h)
            inv_parts.append(jnp.broadcast_to(
                pl.reciprocal(d_h, approx=True), (bs, dh)))
        p = jnp.concatenate(p_parts, axis=-1)                   # (bs, H*bs)
        inv = jnp.concatenate(inv_parts, axis=-1)               # (bs, d)
        o = jnp.dot(p, v_rep, preferred_element_type=jnp.float32) * inv
        return dense(o, w0, b0)

    # ---- unrolled decoder layers (activation never leaves VMEM/vregs) ------
    for l in range(n_layers):
        lnl = ln_ref[l]                                         # (6, d)
        # 1) masked self-attention (fused QKV, scaler folded into W_q) + norm
        qkv = dense(x, w_sa_qkv_ref[l], b_sa_qkv_ref[l])        # (bs, 3d)
        attn1 = mh_attention(qkv[:, 0:d], qkv[:, d:2 * d], qkv[:, 2 * d:3 * d],
                             w_sa_o_ref[l], b_sa_o_ref[l], self_bias)
        out1 = layer_norm(x + attn1, lnl[0:1, :], lnl[1:2, :])
        # 2) cross attention: Q = K = encoder_out, V = out1 (exactly as the
        #    reference calls `self.attention(encoder_out, encoder_out, out1)`)
        qk = dense(enc, w_ca_qk_ref[l], b_ca_qk_ref[l])         # (bs, 2d)
        v_ca = dense(out1, w_ca_v_ref[l], b_ca_v_ref[l])        # (bs, d)
        attn2 = mh_attention(qk[:, 0:d], qk[:, d:2 * d], v_ca,
                             w_ca_o_ref[l], b_ca_o_ref[l], cross_bias)
        out2 = layer_norm(out1 + attn2, lnl[2:3, :], lnl[3:4, :])
        # 3) feed forward (bf16 weights, f32 accumulation; f2w stored
        #    transposed (d, FF) so it is lane-dense) + add & norm
        hidden = jnp.maximum(dense(out2, f1w_ref[l], f1b_ref[l]), 0.0)
        ff = jax.lax.dot_general(
            hidden.astype(f2wt_ref.dtype), f2wt_ref[l],
            (((1,), (1,)), ((), ())),                           # hidden @ f2w^T
            preferred_element_type=jnp.float32) + f2b_ref[l]
        x = layer_norm(out2 + ff, lnl[4:5, :], lnl[5:6, :])

    out_ref[...] = x


def decoder_stack_pallas(tok, enc2, consts, params, heads=HEADS):
    bs, d = enc2.shape
    n_layers = params["w_sa_qkv"].shape[0]
    kernel = functools.partial(decoder_kernel, heads=heads, n_layers=n_layers)
    # No grid: every operand is a whole-array VMEM block (~0.6 MiB total) and
    # the layer loop is unrolled in the kernel -> one launch, one DMA each.
    return pl.pallas_call(
        kernel,
        out_shape=jax.ShapeDtypeStruct((bs, d), jnp.float32),
    )(tok, enc2, consts["pe_bs"], params["embedding"],
      consts["attn_bias"], consts["vbd"],
      params["w_sa_qkv"], params["b_sa_qkv"],
      params["w_sa_o"], params["b_sa_o"],
      params["w_ca_qk"], params["b_ca_qk"],
      params["w_ca_v"], params["b_ca_v"],
      params["w_ca_o"], params["b_ca_o"],
      params["ln"],
      params["f1w"], params["f1b"], params["f2w_t"], params["f2b"])


# ----------------------------- parameter setup -----------------------------

def _linear(key, fan_in, fan_out):
    kw, kb = jax.random.split(key)
    w = jax.random.normal(kw, (fan_in, fan_out), jnp.float32) / math.sqrt(fan_in)
    b = jax.random.normal(kb, (1, fan_out), jnp.float32) * 0.01
    return w, b


def init_decoder_params(key, vocab_size, d_model, n_layers, heads=HEADS):
    dh = d_model // heads
    scaler = dh ** (-0.5)
    # Column permutation mapping the reference einops '(d h)' interleaved head
    # split onto contiguous per-head blocks: new column h*dh + d <- old d*H + h.
    head_perm = (jnp.arange(dh)[None, :] * heads
                 + jnp.arange(heads)[:, None]).reshape(-1)

    params = {}
    key, ke = jax.random.split(key)
    emb = jax.random.normal(ke, (vocab_size, d_model), jnp.float32)
    # pad to EMB_ROWS and pre-scale by sqrt(d_model) (exact: scaling is linear)
    params["embedding"] = jnp.zeros((EMB_ROWS, d_model), jnp.float32).at[
        :vocab_size].set(emb * math.sqrt(d_model))

    # PositionEncoder buffer, built exactly as in the reference __init__
    # (note: no exp() on div_term — that is what the reference computes).
    position = jnp.arange(MAX_SEQ_LEN, dtype=jnp.float32)[:, None]
    div_term = jnp.arange(0, d_model, 2, dtype=jnp.float32) * (
        -math.log(10000.0) / d_model)
    params["pe"] = jnp.stack([jnp.sin(position * div_term),
                              jnp.cos(position * div_term)],
                             axis=-1).reshape(MAX_SEQ_LEN, d_model)

    def proj(k, permute, scale):
        w, b = _linear(k, d_model, d_model)
        if permute:
            w, b = w[:, head_perm], b[:, head_perm]
        return w * scale, b * scale

    names = ("w_sa_qkv", "b_sa_qkv", "w_sa_o", "b_sa_o",
             "w_ca_qk", "b_ca_qk", "w_ca_v", "b_ca_v", "w_ca_o", "b_ca_o",
             "ln", "f1w", "f1b", "f2w_t", "f2b")
    stacks = {n: [] for n in names}
    for _ in range(n_layers):
        keys = jax.random.split(key, 11)
        key = keys[0]
        saq_w, saq_b = proj(keys[1], True, scaler)   # scaler folded into Q
        sak_w, sak_b = proj(keys[2], True, 1.0)
        sav_w, sav_b = proj(keys[3], True, 1.0)
        sao_w, sao_b = _linear(keys[4], d_model, d_model)
        caq_w, caq_b = proj(keys[5], True, scaler)
        cak_w, cak_b = proj(keys[6], True, 1.0)
        cav_w, cav_b = proj(keys[7], True, 1.0)
        cao_w, cao_b = _linear(keys[8], d_model, d_model)
        f1w, f1b = _linear(keys[9], d_model, FF_HIDDEN)
        f2w, f2b = _linear(keys[10], FF_HIDDEN, d_model)

        stacks["w_sa_qkv"].append(
            jnp.concatenate([saq_w, sak_w, sav_w], axis=1).astype(jnp.bfloat16))
        stacks["b_sa_qkv"].append(jnp.concatenate([saq_b, sak_b, sav_b], axis=1))
        stacks["w_sa_o"].append(sao_w.astype(jnp.bfloat16))
        stacks["b_sa_o"].append(sao_b)
        stacks["w_ca_qk"].append(
            jnp.concatenate([caq_w, cak_w], axis=1).astype(jnp.bfloat16))
        stacks["b_ca_qk"].append(jnp.concatenate([caq_b, cak_b], axis=1))
        stacks["w_ca_v"].append(cav_w.astype(jnp.bfloat16))
        stacks["b_ca_v"].append(cav_b)
        stacks["w_ca_o"].append(cao_w.astype(jnp.bfloat16))
        stacks["b_ca_o"].append(cao_b)
        stacks["ln"].append(jnp.stack(
            [jnp.ones(d_model, jnp.float32), jnp.zeros(d_model, jnp.float32)] * 3,
            axis=0))                                            # [g1,b1,g2,b2,g3,b3]
        stacks["f1w"].append(f1w.astype(jnp.bfloat16))
        stacks["f1b"].append(f1b)
        stacks["f2w_t"].append(f2w.T.astype(jnp.bfloat16))      # (d, FF): lane-dense
        stacks["f2b"].append(f2b)

    for n in names:
        params[n] = jnp.stack(stacks[n])
    return params


def build_decoder_constants(params, batch, seq, d_model, heads, mask_f):
    """Mask-bias tables, block-diagonal head mask, tiled PE.  Built ONCE
    outside the jitted forward (depend only on static shapes / causal mask)."""
    bs = batch * seq
    hbs = heads * bs
    dh = d_model // heads
    col = jnp.arange(hbs)
    col_head = col // bs
    col_batch = (col % bs) // seq
    col_pos = col % seq
    row = jnp.arange(bs)
    row_batch = row // seq
    row_pos = row % seq

    cross_batch = row_batch[:, None] != col_batch[None, :]                # (bs, hbs)
    causal = mask_f[row_pos[:, None], col_pos[None, :]] > 0.0             # (bs, hbs)
    self_bias = jnp.where(cross_batch | causal, NEG_INF, 0.0).astype(jnp.float32)
    cross_bias = jnp.where(cross_batch, NEG_INF, 0.0).astype(jnp.float32)
    attn_bias = jnp.stack([self_bias, cross_bias], axis=0)                # (2, bs, hbs)

    vbd = (col_head[:, None] ==
           (jnp.arange(d_model) // dh)[None, :]).astype(jnp.float32)      # (hbs, d)

    # TODO(synk): reference slices pe[:, :seq_len] (a d_model slice that only
    # type-checks when seq_len == d_model); we use the conventional
    # pe[:seq_len, :] instead.
    pe_bs = jnp.tile(params["pe"][:seq, :], (batch, 1))                   # (bs, d)
    return {"attn_bias": attn_bias, "vbd": vbd, "pe_bs": pe_bs}


# ----------------------------- forward wrapper ------------------------------

@jax.jit
def decoder_forward(params, consts, dec_input, enc_output):
    batch, seq = dec_input.shape
    d_model = enc_output.shape[-1]
    tok = dec_input.reshape(batch * seq, 1).astype(jnp.int32)
    enc2 = enc_output.reshape(batch * seq, d_model).astype(jnp.float32)
    y2 = decoder_stack_pallas(tok, enc2, consts, params, heads=HEADS)
    return y2.reshape(batch, seq, d_model)


if __name__ == "__main__":
    key = jax.random.PRNGKey(0)
    kp, ki, ke = jax.random.split(key, 3)
    B, S = 2, 8
    params = init_decoder_params(kp, VOCAB_SIZE, D_MODEL, N_LAYERS, heads=HEADS)

    dec_input = jax.random.randint(ki, (B, S), 0, VOCAB_SIZE)            # tokens
    enc_output = jax.random.normal(ke, (B, S, D_MODEL), jnp.float32)
    # causal mask: 1.0 above the diagonal == masked (torch masked_fill semantics)
    mask_f = jnp.triu(jnp.ones((S, S), jnp.float32), k=1)

    consts = build_decoder_constants(params, B, S, D_MODEL, HEADS, mask_f)

    out = decoder_forward(params, consts, dec_input, enc_output)
    out = jax.block_until_ready(out)
    assert out.shape == (B, S, D_MODEL)
    assert bool(jnp.all(jnp.isfinite(out)))
    print("KERNEL_OK")
</pallas_src>

<mosaic_0001>
module attributes {stable_mosaic.version = 11 : i64} {
  func.func @decoder_kernel(%arg0: memref<16x1xi32, #tpu.memory_space<vmem>>, %arg1: memref<16x32xf32, #tpu.memory_space<vmem>>, %arg2: memref<16x32xf32, #tpu.memory_space<vmem>>, %arg3: memref<64x32xf32, #tpu.memory_space<vmem>>, %arg4: memref<2x16x128xf32, #tpu.memory_space<vmem>>, %arg5: memref<128x32xf32, #tpu.memory_space<vmem>>, %arg6: memref<2x32x96xbf16, #tpu.memory_space<vmem>>, %arg7: memref<2x1x96xf32, #tpu.memory_space<vmem>>, %arg8: memref<2x32x32xbf16, #tpu.memory_space<vmem>>, %arg9: memref<2x1x32xf32, #tpu.memory_space<vmem>>, %arg10: memref<2x32x64xbf16, #tpu.memory_space<vmem>>, %arg11: memref<2x1x64xf32, #tpu.memory_space<vmem>>, %arg12: memref<2x32x32xbf16, #tpu.memory_space<vmem>>, %arg13: memref<2x1x32xf32, #tpu.memory_space<vmem>>, %arg14: memref<2x32x32xbf16, #tpu.memory_space<vmem>>, %arg15: memref<2x1x32xf32, #tpu.memory_space<vmem>>, %arg16: memref<2x6x32xf32, #tpu.memory_space<vmem>>, %arg17: memref<2x32x2048xbf16, #tpu.memory_space<vmem>>, %arg18: memref<2x1x2048xf32, #tpu.memory_space<vmem>>, %arg19: memref<2x32x2048xbf16, #tpu.memory_space<vmem>>, %arg20: memref<2x1x32xf32, #tpu.memory_space<vmem>>, %arg21: memref<16x32xf32, #tpu.memory_space<vmem>>) attributes {dimension_semantics = [], scalar_prefetch = 0 : i64, scratch_operands = 0 : i64, tpu.core_type = #tpu.core_type<tc>} {
    %c0 = arith.constant 0 : index
    %c0_0 = arith.constant 0 : index
    %0 = vector.load %arg0[%c0, %c0_0] : memref<16x1xi32, #tpu.memory_space<vmem>>, vector<16x1xi32>
    %1 = tpu.iota {dimensions = array<i32: 1>} : vector<16x64xi32>
    %2 = vector.broadcast %0 : vector<16x1xi32> to vector<16x64xi32>
    %3 = arith.cmpi eq, %1, %2 : vector<16x64xi32>
    %4 = arith.extui %3 : vector<16x64xi1> to vector<16x64xi32>
    %5 = arith.sitofp %4 : vector<16x64xi32> to vector<16x64xf32>
    %c0_1 = arith.constant 0 : index
    %c0_2 = arith.constant 0 : index
    %6 = vector.load %arg3[%c0_1, %c0_2] : memref<64x32xf32, #tpu.memory_space<vmem>>, vector<64x32xf32>
    %cst = arith.constant dense<0.000000e+00> : vector<16x32xf32>
    %7 = tpu.matmul %5, %6, %cst {dimension_numbers = #tpu.dot_dimension_numbers<[1], [0], [0], [1], [0, 0, 1, 1], [], []>} : vector<16x64xf32>, vector<64x32xf32>, vector<16x32xf32> -> vector<16x32xf32>
    %c0_3 = arith.constant 0 : index
    %c0_4 = arith.constant 0 : index
    %8 = vector.load %arg2[%c0_3, %c0_4] : memref<16x32xf32, #tpu.memory_space<vmem>>, vector<16x32xf32>
    %9 = arith.addf %7, %8 : vector<16x32xf32>
    %c0_5 = arith.constant 0 : index
    %c0_6 = arith.constant 0 : index
    %10 = vector.load %arg1[%c0_5, %c0_6] : memref<16x32xf32, #tpu.memory_space<vmem>>, vector<16x32xf32>
    %c0_7 = arith.constant 0 : index
    %c0_8 = arith.constant 0 : index
    %11 = vector.load %arg5[%c0_7, %c0_8] : memref<128x32xf32, #tpu.memory_space<vmem>>, vector<128x32xf32>
    %c0_9 = arith.constant 0 : index
    %c0_10 = arith.constant 0 : index
    %c0_11 = arith.constant 0 : index
    %12 = vector.load %arg4[%c0_9, %c0_10, %c0_11] : memref<2x16x128xf32, #tpu.memory_space<vmem>>, vector<1x16x128xf32>
    %13 = vector.shape_cast %12 : vector<1x16x128xf32> to vector<16x128xf32>
    %c1 = arith.constant 1 : index
    %c0_12 = arith.constant 0 : index
    %c0_13 = arith.constant 0 : index
    %14 = vector.load %arg4[%c1, %c0_12, %c0_13] : memref<2x16x128xf32, #tpu.memory_space<vmem>>, vector<1x16x128xf32>
    %15 = vector.shape_cast %14 : vector<1x16x128xf32> to vector<16x128xf32>
    %c0_14 = arith.constant 0 : index
    %c0_15 = arith.constant 0 : index
    %c0_16 = arith.constant 0 : index
    %16 = vector.load %arg16[%c0_14, %c0_15, %c0_16] : memref<2x6x32xf32, #tpu.memory_space<vmem>>, vector<1x6x32xf32>
    %17 = vector.shape_cast %16 : vector<1x6x32xf32> to vector<6x32xf32>
    %c0_17 = arith.constant 0 : index
    %c0_18 = arith.constant 0 : index
    %c0_19 = arith.constant 0 : index
    %18 = vector.load %arg6[%c0_17, %c0_18, %c0_19] : memref<2x32x96xbf16, #tpu.memory_space<vmem>>, vector<1x32x96xbf16>
    %19 = vector.shape_cast %18 : vector<1x32x96xbf16> to vector<32x96xbf16>
    %c0_20 = arith.constant 0 : index
    %c0_21 = arith.constant 0 : index
    %c0_22 = arith.constant 0 : index
    %20 = vector.load %arg7[%c0_20, %c0_21, %c0_22] : memref<2x1x96xf32, #tpu.memory_space<vmem>>, vector<1x1x96xf32>
    %21 = vector.shape_cast %20 : vector<1x1x96xf32> to vector<1x96xf32>
    %22 = arith.truncf %9 : vector<16x32xf32> to vector<16x32xbf16>
    %cst_23 = arith.constant dense<0.000000e+00> : vector<16x96xf32>
    %23 = tpu.matmul %22, %19, %cst_23 {dimension_numbers = #tpu.dot_dimension_numbers<[1], [0], [0], [1], [0, 0, 1, 1], [], []>} : vector<16x32xbf16>, vector<32x96xbf16>, vector<16x96xf32> -> vector<16x96xf32>
    %24 = vector.broadcast %21 : vector<1x96xf32> to vector<16x96xf32>
    %25 = arith.addf %23, %24 : vector<16x96xf32>
    %26 = vector.extract_strided_slice %25 {offsets = [0, 0], sizes = [16, 32], strides = [1, 1]} : vector<16x96xf32> to vector<16x32xf32>
    %27 = vector.extract_strided_slice %25 {offsets = [0, 32], sizes = [16, 32], strides = [1, 1]} : vector<16x96xf32> to vector<16x32xf32>
    %28 = vector.extract_strided_slice %25 {offsets = [0, 64], sizes = [16, 32], strides = [1, 1]} : vector<16x96xf32> to vector<16x32xf32>
    %c0_24 = arith.constant 0 : index
    %c0_25 = arith.constant 0 : index
    %c0_26 = arith.constant 0 : index
    %29 = vector.load %arg8[%c0_24, %c0_25, %c0_26] : memref<2x32x32xbf16, #tpu.memory_space<vmem>>, vector<1x32x32xbf16>
    %30 = vector.shape_cast %29 : vector<1x32x32xbf16> to vector<32x32xbf16>
    %c0_27 = arith.constant 0 : index
    %c0_28 = arith.constant 0 : index
    %c0_29 = arith.constant 0 : index
    %31 = vector.load %arg9[%c0_27, %c0_28, %c0_29] : memref<2x1x32xf32, #tpu.memory_space<vmem>>, vector<1x1x32xf32>
    %32 = vector.shape_cast %31 : vector<1x1x32xf32> to vector<1x32xf32>
    %33 = tpu.concatenate %27, %27, %27, %27, %27, %27, %27, %27 in 0 : vector<16x32xf32>, vector<16x32xf32>, vector<16x32xf32>, vector<16x32xf32>, vector<16x32xf32>, vector<16x32xf32>, vector<16x32xf32>, vector<16x32xf32> -> vector<128x32xf32>
    %34 = arith.mulf %33, %11 : vector<128x32xf32>
    %35 = tpu.concatenate %28, %28, %28, %28, %28, %28, %28, %28 in 0 : vector<16x32xf32>, vector<16x32xf32>, vector<16x32xf32>, vector<16x32xf32>, vector<16x32xf32>, vector<16x32xf32>, vector<16x32xf32>, vector<16x32xf32> -> vector<128x32xf32>
    %36 = arith.mulf %35, %11 : vector<128x32xf32>
    %cst_30 = arith.constant dense<0.000000e+00> : vector<16x128xf32>
    %37 = tpu.matmul %26, %34, %cst_30 {dimension_numbers = #tpu.dot_dimension_numbers<[1], [1], [0], [0], [0, 0, 1, 0], [], []>} : vector<16x32xf32>, vector<128x32xf32>, vector<16x128xf32> -> vector<16x128xf32>
    %38 = arith.addf %37, %13 : vector<16x128xf32>
    %39 = vector.extract_strided_slice %38 {offsets = [0, 0], sizes = [16, 16], strides = [1, 1]} : vector<16x128xf32> to vector<16x16xf32>
    %cst_31 = arith.constant dense<0xFF800000> : vector<16xf32>
    %40 = vector.multi_reduction <maximumf>, %39, %cst_31 [1] : vector<16x16xf32> to vector<16xf32>
    %41 = vector.shape_cast %40 : vector<16xf32> to vector<16x1xf32>
    %42 = vector.broadcast %41 : vector<16x1xf32> to vector<16x16xf32>
    %43 = arith.subf %39, %42 : vector<16x16xf32>
    %44 = math.exp %43 : vector<16x16xf32>
    %cst_32 = arith.constant dense<0.000000e+00> : vector<16xf32>
    %45 = vector.multi_reduction <add>, %44, %cst_32 [1] : vector<16x16xf32> to vector<16xf32>
    %46 = vector.shape_cast %45 : vector<16xf32> to vector<16x1xf32>
    %47 = tpu.reciprocal %46 {approx = true} : vector<16x1xf32> -> vector<16x1xf32>
    %48 = vector.shape_cast %47 : vector<16x1xf32> to vector<16x1xf32>
    %49 = vector.broadcast %48 : vector<16x1xf32> to vector<16x4xf32>
    %50 = vector.extract_strided_slice %38 {offsets = [0, 16], sizes = [16, 16], strides = [1, 1]} : vector<16x128xf32> to vector<16x16xf32>
    %cst_33 = arith.constant dense<0xFF800000> : vector<16xf32>
    %51 = vector.multi_reduction <maximumf>, %50, %cst_33 [1] : vector<16x16xf32> to vector<16xf32>
    %52 = vector.shape_cast %51 : vector<16xf32> to vector<16x1xf32>
    %53 = vector.broadcast %52 : vector<16x1xf32> to vector<16x16xf32>
    %54 = arith.subf %50, %53 : vector<16x16xf32>
    %55 = math.exp %54 : vector<16x16xf32>
    %cst_34 = arith.constant dense<0.000000e+00> : vector<16xf32>
    %56 = vector.multi_reduction <add>, %55, %cst_34 [1] : vector<16x16xf32> to vector<16xf32>
    %57 = vector.shape_cast %56 : vector<16xf32> to vector<16x1xf32>
    %58 = tpu.reciprocal %57 {approx = true} : vector<16x1xf32> -> vector<16x1xf32>
    %59 = vector.shape_cast %58 : vector<16x1xf32> to vector<16x1xf32>
    %60 = vector.broadcast %59 : vector<16x1xf32> to vector<16x4xf32>
    %61 = vector.extract_strided_slice %38 {offsets = [0, 32], sizes = [16, 16], strides = [1, 1]} : vector<16x128xf32> to vector<16x16xf32>
    %cst_35 = arith.constant dense<0xFF800000> : vector<16xf32>
    %62 = vector.multi_reduction <maximumf>, %61, %cst_35 [1] : vector<16x16xf32> to vector<16xf32>
    %63 = vector.shape_cast %62 : vector<16xf32> to vector<16x1xf32>
    %64 = vector.broadcast %63 : vector<16x1xf32> to vector<16x16xf32>
    %65 = arith.subf %61, %64 : vector<16x16xf32>
    %66 = math.exp %65 : vector<16x16xf32>
    %cst_36 = arith.constant dense<0.000000e+00> : vector<16xf32>
    %67 = vector.multi_reduction <add>, %66, %cst_36 [1] : vector<16x16xf32> to vector<16xf32>
    %68 = vector.shape_cast %67 : vector<16xf32> to vector<16x1xf32>
    %69 = tpu.reciprocal %68 {approx = true} : vector<16x1xf32> -> vector<16x1xf32>
    %70 = vector.shape_cast %69 : vector<16x1xf32> to vector<16x1xf32>
    %71 = vector.broadcast %70 : vector<16x1xf32> to vector<16x4xf32>
    %72 = vector.extract_strided_slice %38 {offsets = [0, 48], sizes = [16, 16], strides = [1, 1]} : vector<16x128xf32> to vector<16x16xf32>
    %cst_37 = arith.constant dense<0xFF800000> : vector<16xf32>
    %73 = vector.multi_reduction <maximumf>, %72, %cst_37 [1] : vector<16x16xf32> to vector<16xf32>
    %74 = vector.shape_cast %73 : vector<16xf32> to vector<16x1xf32>
    %75 = vector.broadcast %74 : vector<16x1xf32> to vector<16x16xf32>
    %76 = arith.subf %72, %75 : vector<16x16xf32>
    %77 = math.exp %76 : vector<16x16xf32>
    %cst_38 = arith.constant dense<0.000000e+00> : vector<16xf32>
    %78 = vector.multi_reduction <add>, %77, %cst_38 [1] : vector<16x16xf32> to vector<16xf32>
    %79 = vector.shape_cast %78 : vector<16xf32> to vector<16x1xf32>
    %80 = tpu.reciprocal %79 {approx = true} : vector<16x1xf32> -> vector<16x1xf32>
    %81 = vector.shape_cast %80 : vector<16x1xf32> to vector<16x1xf32>
    %82 = vector.broadcast %81 : vector<16x1xf32> to vector<16x4xf32>
    %83 = vector.extract_strided_slice %38 {offsets = [0, 64], sizes = [16, 16], strides = [1, 1]} : vector<16x128xf32> to vector<16x16xf32>
    %cst_39 = arith.constant dense<0xFF800000> : vector<16xf32>
    %84 = vector.multi_reduction <maximumf>, %83, %cst_39 [1] : vector<16x16xf32> to vector<16xf32>
    %85 = vector.shape_cast %84 : vector<16xf32> to vector<16x1xf32>
    %86 = vector.broadcast %85 : vector<16x1xf32> to vector<16x16xf32>
    %87 = arith.subf %83, %86 : vector<16x16xf32>
    %88 = math.exp %87 : vector<16x16xf32>
    %cst_40 = arith.constant dense<0.000000e+00> : vector<16xf32>
    %89 = vector.multi_reduction <add>, %88, %cst_40 [1] : vector<16x16xf32> to vector<16xf32>
    %90 = vector.shape_cast %89 : vector<16xf32> to vector<16x1xf32>
    %91 = tpu.reciprocal %90 {approx = true} : vector<16x1xf32> -> vector<16x1xf32>
    %92 = vector.shape_cast %91 : vector<16x1xf32> to vector<16x1xf32>
    %93 = vector.broadcast %92 : vector<16x1xf32> to vector<16x4xf32>
    %94 = vector.extract_strided_slice %38 {offsets = [0, 80], sizes = [16, 16], strides = [1, 1]} : vector<16x128xf32> to vector<16x16xf32>
    %cst_41 = arith.constant dense<0xFF800000> : vector<16xf32>
    %95 = vector.multi_reduction <maximumf>, %94, %cst_41 [1] : vector<16x16xf32> to vector<16xf32>
    %96 = vector.shape_cast %95 : vector<16xf32> to vector<16x1xf32>
    %97 = vector.broadcast %96 : vector<16x1xf32> to vector<16x16xf32>
    %98 = arith.subf %94, %97 : vector<16x16xf32>
    %99 = math.exp %98 : vector<16x16xf32>
    %cst_42 = arith.constant dense<0.000000e+00> : vector<16xf32>
    %100 = vector.multi_reduction <add>, %99, %cst_42 [1] : vector<16x16xf32> to vector<16xf32>
    %101 = vector.shape_cast %100 : vector<16xf32> to vector<16x1xf32>
    %102 = tpu.reciprocal %101 {approx = true} : vector<16x1xf32> -> vector<16x1xf32>
    %103 = vector.shape_cast %102 : vector<16x1xf32> to vector<16x1xf32>
    %104 = vector.broadcast %103 : vector<16x1xf32> to vector<16x4xf32>
    %105 = vector.extract_strided_slice %38 {offsets = [0, 96], sizes = [16, 16], strides = [1, 1]} : vector<16x128xf32> to vector<16x16xf32>
    %cst_43 = arith.constant dense<0xFF800000> : vector<16xf32>
    %106 = vector.multi_reduction <maximumf>, %105, %cst_43 [1] : vector<16x16xf32> to vector<16xf32>
    %107 = vector.shape_cast %106 : vector<16xf32> to vector<16x1xf32>
    %108 = vector.broadcast %107 : vector<16x1xf32> to vector<16x16xf32>
    %109 = arith.subf %105, %108 : vector<16x16xf32>
    %110 = math.exp %109 : vector<16x16xf32>
    %cst_44 = arith.constant dense<0.000000e+00> : vector<16xf32>
    %111 = vector.multi_reduction <add>, %110, %cst_44 [1] : vector<16x16xf32> to vector<16xf32>
    %112 = vector.shape_cast %111 : vector<16xf32> to vector<16x1xf32>
    %113 = tpu.reciprocal %112 {approx = true} : vector<16x1xf32> -> vector<16x1xf32>
    %114 = vector.shape_cast %113 : vector<16x1xf32> to vector<16x1xf32>
    %115 = vector.broadcast %114 : vector<16x1xf32> to vector<16x4xf32>
    %116 = vector.extract_strided_slice %38 {offsets = [0, 112], sizes = [16, 16], strides = [1, 1]} : vector<16x128xf32> to vector<16x16xf32>
    %cst_45 = arith.constant dense<0xFF800000> : vector<16xf32>
    %117 = vector.multi_reduction <maximumf>, %116, %cst_45 [1] : vector<16x16xf32> to vector<16xf32>
    %118 = vector.shape_cast %117 : vector<16xf32> to vector<16x1xf32>
    %119 = vector.broadcast %118 : vector<16x1xf32> to vector<16x16xf32>
    %120 = arith.subf %116, %119 : vector<16x16xf32>
    %121 = math.exp %120 : vector<16x16xf32>
    %cst_46 = arith.constant dense<0.000000e+00> : vector<16xf32>
    %122 = vector.multi_reduction <add>, %121, %cst_46 [1] : vector<16x16xf32> to vector<16xf32>
    %123 = vector.shape_cast %122 : vector<16xf32> to vector<16x1xf32>
    %124 = tpu.reciprocal %123 {approx = true} : vector<16x1xf32> -> vector<16x1xf32>
    %125 = vector.shape_cast %124 : vector<16x1xf32> to vector<16x1xf32>
    %126 = vector.broadcast %125 : vector<16x1xf32> to vector<16x4xf32>
    %127 = tpu.concatenate %44, %55, %66, %77, %88, %99, %110, %121 in 1 : vector<16x16xf32>, vector<16x16xf32>, vector<16x16xf32>, vector<16x16xf32>, vector<16x16xf32>, vector<16x16xf32>, vector<16x16xf32>, vector<16x16xf32> -> vector<16x128xf32>
    %128 = tpu.concatenate %49, %60, %71, %82, %93, %104, %115, %126 in 1 : vector<16x4xf32>, vector<16x4xf32>, vector<16x4xf32>, vector<16x4xf32>, vector<16x4xf32>, vector<16x4xf32>, vector<16x4xf32>, vector<16x4xf32> -> vector<16x32xf32>
    %cst_47 = arith.constant dense<0.000000e+00> : vector<16x32xf32>
    %129 = tpu.matmul %127, %36, %cst_47 {dimension_numbers = #tpu.dot_dimension_numbers<[1], [0], [0], [1], [0, 0, 1, 1], [], []>} : vector<16x128xf32>, vector<128x32xf32>, vector<16x32xf32> -> vector<16x32xf32>
    %130 = arith.mulf %129, %128 : vector<16x32xf32>
    %131 = arith.truncf %130 : vector<16x32xf32> to vector<16x32xbf16>
    %cst_48 = arith.constant dense<0.000000e+00> : vector<16x32xf32>
    %132 = tpu.matmul %131, %30, %cst_48 {dimension_numbers = #tpu.dot_dimension_numbers<[1], [0], [0], [1], [0, 0, 1, 1], [], []>} : vector<16x32xbf16>, vector<32x32xbf16>, vector<16x32xf32> -> vector<16x32xf32>
    %133 = vector.broadcast %32 : vector<1x32xf32> to vector<16x32xf32>
    %134 = arith.addf %132, %133 : vector<16x32xf32>
    %135 = arith.addf %9, %134 : vector<16x32xf32>
    %136 = vector.extract_strided_slice %17 {offsets = [0, 0], sizes = [1, 32], strides = [1, 1]} : vector<6x32xf32> to vector<1x32xf32>
    %137 = vector.extract_strided_slice %17 {offsets = [1, 0], sizes = [1, 32], strides = [1, 1]} : vector<6x32xf32> to vector<1x32xf32>
    %cst_49 = arith.constant dense<0.000000e+00> : vector<16xf32>
    %138 = vector.multi_reduction <add>, %135, %cst_49 [1] : vector<16x32xf32> to vector<16xf32>
    %139 = vector.shape_cast %138 : vector<16xf32> to vector<16x1xf32>
    %cst_50 = arith.constant 3.200000e+01 : f32
    %140 = vector.broadcast %cst_50 : f32 to vector<16x1xf32>
    %141 = arith.divf %139, %140 : vector<16x1xf32>
    %142 = vector.broadcast %141 : vector<16x1xf32> to vector<16x32xf32>
    %143 = arith.subf %135, %142 : vector<16x32xf32>
    %144 = arith.mulf %143, %143 : vector<16x32xf32>
    %cst_51 = arith.constant dense<0.000000e+00> : vector<16xf32>
    %145 = vector.multi_reduction <add>, %144, %cst_51 [1] : vector<16x32xf32> to vector<16xf32>
    %146 = vector.shape_cast %145 : vector<16xf32> to vector<16x1xf32>
    %cst_52 = arith.constant 3.200000e+01 : f32
    %147 = vector.broadcast %cst_52 : f32 to vector<16x1xf32>
    %148 = arith.divf %146, %147 : vector<16x1xf32>
    %149 = vector.broadcast %141 : vector<16x1xf32> to vector<16x32xf32>
    %150 = arith.subf %135, %149 : vector<16x32xf32>
    %cst_53 = arith.constant 9.99999974E-6 : f32
    %151 = vector.broadcast %cst_53 : f32 to vector<16x1xf32>
    %152 = arith.addf %148, %151 : vector<16x1xf32>
    %153 = math.rsqrt %152 : vector<16x1xf32>
    %154 = vector.broadcast %153 : vector<16x1xf32> to vector<16x32xf32>
    %155 = arith.mulf %150, %154 : vector<16x32xf32>
    %156 = vector.broadcast %136 : vector<1x32xf32> to vector<16x32xf32>
    %157 = arith.mulf %155, %156 : vector<16x32xf32>
    %158 = vector.broadcast %137 : vector<1x32xf32> to vector<16x32xf32>
    %159 = arith.addf %157, %158 : vector<16x32xf32>
    %c0_54 = arith.constant 0 : index
    %c0_55 = arith.constant 0 : index
    %c0_56 = arith.constant 0 : index
    %160 = vector.load %arg10[%c0_54, %c0_55, %c0_56] : memref<2x32x64xbf16, #tpu.memory_space<vmem>>, vector<1x32x64xbf16>
    %161 = vector.shape_cast %160 : vector<1x32x64xbf16> to vector<32x64xbf16>
    %c0_57 = arith.constant 0 : index
    %c0_58 = arith.constant 0 : index
    %c0_59 = arith.constant 0 : index
    %162 = vector.load %arg11[%c0_57, %c0_58, %c0_59] : memref<2x1x64xf32, #tpu.memory_space<vmem>>, vector<1x1x64xf32>
    %163 = vector.shape_cast %162 : vector<1x1x64xf32> to vector<1x64xf32>
    %164 = arith.truncf %10 : vector<16x32xf32> to vector<16x32xbf16>
    %cst_60 = arith.constant dense<0.000000e+00> : vector<16x64xf32>
    %165 = tpu.matmul %164, %161, %cst_60 {dimension_numbers = #tpu.dot_dimension_numbers<[1], [0], [0], [1], [0, 0, 1, 1], [], []>} : vector<16x32xbf16>, vector<32x64xbf16>, vector<16x64xf32> -> vector<16x64xf32>
    %166 = vector.broadcast %163 : vector<1x64xf32> to vector<16x64xf32>
    %167 = arith.addf %165, %166 : vector<16x64xf32>
    %c0_61 = arith.constant 0 : index
    %c0_62 = arith.constant 0 : index
    %c0_63 = arith.constant 0 : index
    %168 = vector.load %arg12[%c0_61, %c0_62, %c0_63] : memref<2x32x32xbf16, #tpu.memory_space<vmem>>, vector<1x32x32xbf16>
    %169 = vector.shape_cast %168 : vector<1x32x32xbf16> to vector<32x32xbf16>
    %c0_64 = arith.constant 0 : index
    %c0_65 = arith.constant 0 : index
    %c0_66 = arith.constant 0 : index
    %170 = vector.load %arg13[%c0_64, %c0_65, %c0_66] : memref<2x1x32xf32, #tpu.memory_space<vmem>>, vector<1x1x32xf32>
    %171 = vector.shape_cast %170 : vector<1x1x32xf32> to vector<1x32xf32>
    %172 = arith.truncf %159 : vector<16x32xf32> to vector<16x32xbf16>
    %cst_67 = arith.constant dense<0.000000e+00> : vector<16x32xf32>
    %173 = tpu.matmul %172, %169, %cst_67 {dimension_numbers = #tpu.dot_dimension_numbers<[1], [0], [0], [1], [0, 0, 1, 1], [], []>} : vector<16x32xbf16>, vector<32x32xbf16>, vector<16x32xf32> -> vector<16x32xf32>
    %174 = vector.broadcast %171 : vector<1x32xf32> to vector<16x32xf32>
    %175 = arith.addf %173, %174 : vector<16x32xf32>
    %176 = vector.extract_strided_slice %167 {offsets = [0, 0], sizes = [16, 32], strides = [1, 1]} : vector<16x64xf32> to vector<16x32xf32>
    %177 = vector.extract_strided_slice %167 {offsets = [0, 32], sizes = [16, 32], strides = [1, 1]} : vector<16x64xf32> to vector<16x32xf32>
    %c0_68 = arith.constant 0 : index
    %c0_69 = arith.constant 0 : index
    %c0_70 = arith.constant 0 : index
    %178 = vector.load %arg14[%c0_68, %c0_69, %c0_70] : memref<2x32x32xbf16, #tpu.memory_space<vmem>>, vector<1x32x32xbf16>
    %179 = vector.shape_cast %178 : vector<1x32x32xbf16> to vector<32x32xbf16>
    %c0_71 = arith.constant 0 : index
    %c0_72 = arith.constant 0 : index
    %c0_73 = arith.constant 0 : index
    %180 = vector.load %arg15[%c0_71, %c0_72, %c0_73] : memref<2x1x32xf32, #tpu.memory_space<vmem>>, vector<1x1x32xf32>
    %181 = vector.shape_cast %180 : vector<1x1x32xf32> to vector<1x32xf32>
    %182 = tpu.concatenate %177, %177, %177, %177, %177, %177, %177, %177 in 0 : vector<16x32xf32>, vector<16x32xf32>, vector<16x32xf32>, vector<16x32xf32>, vector<16x32xf32>, vector<16x32xf32>, vector<16x32xf32>, vector<16x32xf32> -> vector<128x32xf32>
    %183 = arith.mulf %182, %11 : vector<128x32xf32>
    %184 = tpu.concatenate %175, %175, %175, %175, %175, %175, %175, %175 in 0 : vector<16x32xf32>, vector<16x32xf32>, vector<16x32xf32>, vector<16x32xf32>, vector<16x32xf32>, vector<16x32xf32>, vector<16x32xf32>, vector<16x32xf32> -> vector<128x32xf32>
    %185 = arith.mulf %184, %11 : vector<128x32xf32>
    %cst_74 = arith.constant dense<0.000000e+00> : vector<16x128xf32>
    %186 = tpu.matmul %176, %183, %cst_74 {dimension_numbers = #tpu.dot_dimension_numbers<[1], [1], [0], [0], [0, 0, 1, 0], [], []>} : vector<16x32xf32>, vector<128x32xf32>, vector<16x128xf32> -> vector<16x128xf32>
    %187 = arith.addf %186, %15 : vector<16x128xf32>
    %188 = vector.extract_strided_slice %187 {offsets = [0, 0], sizes = [16, 16], strides = [1, 1]} : vector<16x128xf32> to vector<16x16xf32>
    %cst_75 = arith.constant dense<0xFF800000> : vector<16xf32>
    %189 = vector.multi_reduction <maximumf>, %188, %cst_75 [1] : vector<16x16xf32> to vector<16xf32>
    %190 = vector.shape_cast %189 : vector<16xf32> to vector<16x1xf32>
    %191 = vector.broadcast %190 : vector<16x1xf32> to vector<16x16xf32>
    %192 = arith.subf %188, %191 : vector<16x16xf32>
    %193 = math.exp %192 : vector<16x16xf32>
    %cst_76 = arith.constant dense<0.000000e+00> : vector<16xf32>
    %194 = vector.multi_reduction <add>, %193, %cst_76 [1] : vector<16x16xf32> to vector<16xf32>
    %195 = vector.shape_cast %194 : vector<16xf32> to vector<16x1xf32>
    %196 = tpu.reciprocal %195 {approx = true} : vector<16x1xf32> -> vector<16x1xf32>
    %197 = vector.shape_cast %196 : vector<16x1xf32> to vector<16x1xf32>
    %198 = vector.broadcast %197 : vector<16x1xf32> to vector<16x4xf32>
    %199 = vector.extract_strided_slice %187 {offsets = [0, 16], sizes = [16, 16], strides = [1, 1]} : vector<16x128xf32> to vector<16x16xf32>
    %cst_77 = arith.constant dense<0xFF800000> : vector<16xf32>
    %200 = vector.multi_reduction <maximumf>, %199, %cst_77 [1] : vector<16x16xf32> to vector<16xf32>
    %201 = vector.shape_cast %200 : vector<16xf32> to vector<16x1xf32>
    %202 = vector.broadcast %201 : vector<16x1xf32> to vector<16x16xf32>
    %203 = arith.subf %199, %202 : vector<16x16xf32>
    %204 = math.exp %203 : vector<16x16xf32>
    %cst_78 = arith.constant dense<0.000000e+00> : vector<16xf32>
    %205 = vector.multi_reduction <add>, %204, %cst_78 [1] : vector<16x16xf32> to vector<16xf32>
    %206 = vector.shape_cast %205 : vector<16xf32> to vector<16x1xf32>
    %207 = tpu.reciprocal %206 {approx = true} : vector<16x1xf32> -> vector<16x1xf32>
    %208 = vector.shape_cast %207 : vector<16x1xf32> to vector<16x1xf32>
    %209 = vector.broadcast %208 : vector<16x1xf32> to vector<16x4xf32>
    %210 = vector.extract_strided_slice %187 {offsets = [0, 32], sizes = [16, 16], strides = [1, 1]} : vector<16x128xf32> to vector<16x16xf32>
    %cst_79 = arith.constant dense<0xFF800000> : vector<16xf32>
    %211 = vector.multi_reduction <maximumf>, %210, %cst_79 [1] : vector<16x16xf32> to vector<16xf32>
    %212 = vector.shape_cast %211 : vector<16xf32> to vector<16x1xf32>
    %213 = vector.broadcast %212 : vector<16x1xf32> to vector<16x16xf32>
    %214 = arith.subf %210, %213 : vector<16x16xf32>
    %215 = math.exp %214 : vector<16x16xf32>
    %cst_80 = arith.constant dense<0.000000e+00> : vector<16xf32>
    %216 = vector.multi_reduction <add>, %215, %cst_80 [1] : vector<16x16xf32> to vector<16xf32>
    %217 = vector.shape_cast %216 : vector<16xf32> to vector<16x1xf32>
    %218 = tpu.reciprocal %217 {approx = true} : vector<16x1xf32> -> vector<16x1xf32>
    %219 = vector.shape_cast %218 : vector<16x1xf32> to vector<16x1xf32>
    %220 = vector.broadcast %219 : vector<16x1xf32> to vector<16x4xf32>
    %221 = vector.extract_strided_slice %187 {offsets = [0, 48], sizes = [16, 16], strides = [1, 1]} : vector<16x128xf32> to vector<16x16xf32>
    %cst_81 = arith.constant dense<0xFF800000> : vector<16xf32>
    %222 = vector.multi_reduction <maximumf>, %221, %cst_81 [1] : vector<16x16xf32> to vector<16xf32>
    %223 = vector.shape_cast %222 : vector<16xf32> to vector<16x1xf32>
    %224 = vector.broadcast %223 : vector<16x1xf32> to vector<16x16xf32>
    %225 = arith.subf %221, %224 : vector<16x16xf32>
    %226 = math.exp %225 : vector<16x16xf32>
    %cst_82 = arith.constant dense<0.000000e+00> : vector<16xf32>
    %227 = vector.multi_reduction <add>, %226, %cst_82 [1] : vector<16x16xf32> to vector<16xf32>
    %228 = vector.shape_cast %227 : vector<16xf32> to vector<16x1xf32>
    %229 = tpu.reciprocal %228 {approx = true} : vector<16x1xf32> -> vector<16x1xf32>
    %230 = vector.shape_cast %229 : vector<16x1xf32> to vector<16x1xf32>
    %231 = vector.broadcast %230 : vector<16x1xf32> to vector<16x4xf32>
    %232 = vector.extract_strided_slice %187 {offsets = [0, 64], sizes = [16, 16], strides = [1, 1]} : vector<16x128xf32> to vector<16x16xf32>
    %cst_83 = arith.constant dense<0xFF800000> : vector<16xf32>
    %233 = vector.multi_reduction <maximumf>, %232, %cst_83 [1] : vector<16x16xf32> to vector<16xf32>
    %234 = vector.shape_cast %233 : vector<16xf32> to vector<16x1xf32>
    %235 = vector.broadcast %234 : vector<16x1xf32> to vector<16x16xf32>
    %236 = arith.subf %232, %235 : vector<16x16xf32>
    %237 = math.exp %236 : vector<16x16xf32>
    %cst_84 = arith.constant dense<0.000000e+00> : vector<16xf32>
    %238 = vector.multi_reduction <add>, %237, %cst_84 [1] : vector<16x16xf32> to vector<16xf32>
    %239 = vector.shape_cast %238 : vector<16xf32> to vector<16x1xf32>
    %240 = tpu.reciprocal %239 {approx = true} : vector<16x1xf32> -> vector<16x1xf32>
    %241 = vector.shape_cast %240 : vector<16x1xf32> to vector<16x1xf32>
    %242 = vector.broadcast %241 : vector<16x1xf32> to vector<16x4xf32>
    %243 = vector.extract_strided_slice %187 {offsets = [0, 80], sizes = [16, 16], strides = [1, 1]} : vector<16x128xf32> to vector<16x16xf32>
    %cst_85 = arith.constant dense<0xFF800000> : vector<16xf32>
    %244 = vector.multi_reduction <maximumf>, %243, %cst_85 [1] : vector<16x16xf32> to vector<16xf32>
    %245 = vector.shape_cast %244 : vector<16xf32> to vector<16x1xf32>
    %246 = vector.broadcast %245 : vector<16x1xf32> to vector<16x16xf32>
    %247 = arith.subf %243, %246 : vector<16x16xf32>
    %248 = math.exp %247 : vector<16x16xf32>
    %cst_86 = arith.constant dense<0.000000e+00> : vector<16xf32>
    %249 = vector.multi_reduction <add>, %248, %cst_86 [1] : vector<16x16xf32> to vector<16xf32>
    %250 = vector.shape_cast %249 : vector<16xf32> to vector<16x1xf32>
    %251 = tpu.reciprocal %250 {approx = true} : vector<16x1xf32> -> vector<16x1xf32>
    %252 = vector.shape_cast %251 : vector<16x1xf32> to vector<16x1xf32>
    %253 = vector.broadcast %252 : vector<16x1xf32> to vector<16x4xf32>
    %254 = vector.extract_strided_slice %187 {offsets = [0, 96], sizes = [16, 16], strides = [1, 1]} : vector<16x128xf32> to vector<16x16xf32>
    %cst_87 = arith.constant dense<0xFF800000> : vector<16xf32>
    %255 = vector.multi_reduction <maximumf>, %254, %cst_87 [1] : vector<16x16xf32> to vector<16xf32>
    %256 = vector.shape_cast %255 : vector<16xf32> to vector<16x1xf32>
    %257 = vector.broadcast %256 : vector<16x1xf32> to vector<16x16xf32>
    %258 = arith.subf %254, %257 : vector<16x16xf32>
    %259 = math.exp %258 : vector<16x16xf32>
    %cst_88 = arith.constant dense<0.000000e+00> : vector<16xf32>
    %260 = vector.multi_reduction <add>, %259, %cst_88 [1] : vector<16x16xf32> to vector<16xf32>
    %261 = vector.shape_cast %260 : vector<16xf32> to vector<16x1xf32>
    %262 = tpu.reciprocal %261 {approx = true} : vector<16x1xf32> -> vector<16x1xf32>
    %263 = vector.shape_cast %262 : vector<16x1xf32> to vector<16x1xf32>
    %264 = vector.broadcast %263 : vector<16x1xf32> to vector<16x4xf32>
    %265 = vector.extract_strided_slice %187 {offsets = [0, 112], sizes = [16, 16], strides = [1, 1]} : vector<16x128xf32> to vector<16x16xf32>
    %cst_89 = arith.constant dense<0xFF800000> : vector<16xf32>
    %266 = vector.multi_reduction <maximumf>, %265, %cst_89 [1] : vector<16x16xf32> to vector<16xf32>
    %267 = vector.shape_cast %266 : vector<16xf32> to vector<16x1xf32>
    %268 = vector.broadcast %267 : vector<16x1xf32> to vector<16x16xf32>
    %269 = arith.subf %265, %268 : vector<16x16xf32>
    %270 = math.exp %269 : vector<16x16xf32>
    %cst_90 = arith.constant dense<0.000000e+00> : vector<16xf32>
    %271 = vector.multi_reduction <add>, %270, %cst_90 [1] : vector<16x16xf32> to vector<16xf32>
    %272 = vector.shape_cast %271 : vector<16xf32> to vector<16x1xf32>
    %273 = tpu.reciprocal %272 {approx = true} : vector<16x1xf32> -> vector<16x1xf32>
    %274 = vector.shape_cast %273 : vector<16x1xf32> to vector<16x1xf32>
    %275 = vector.broadcast %274 : vector<16x1xf32> to vector<16x4xf32>
    %276 = tpu.concatenate %193, %204, %215, %226, %237, %248, %259, %270 in 1 : vector<16x16xf32>, vector<16x16xf32>, vector<16x16xf32>, vector<16x16xf32>, vector<16x16xf32>, vector<16x16xf32>, vector<16x16xf32>, vector<16x16xf32> -> vector<16x128xf32>
    %277 = tpu.concatenate %198, %209, %220, %231, %242, %253, %264, %275 in 1 : vector<16x4xf32>, vector<16x4xf32>, vector<16x4xf32>, vector<16x4xf32>, vector<16x4xf32>, vector<16x4xf32>, vector<16x4xf32>, vector<16x4xf32> -> vector<16x32xf32>
    %cst_91 = arith.constant dense<0.000000e+00> : vector<16x32xf32>
    %278 = tpu.matmul %276, %185, %cst_91 {dimension_numbers = #tpu.dot_dimension_numbers<[1], [0], [0], [1], [0, 0, 1, 1], [], []>} : vector<16x128xf32>, vector<128x32xf32>, vector<16x32xf32> -> vector<16x32xf32>
    %279 = arith.mulf %278, %277 : vector<16x32xf32>
    %280 = arith.truncf %279 : vector<16x32xf32> to vector<16x32xbf16>
    %cst_92 = arith.constant dense<0.000000e+00> : vector<16x32xf32>
    %281 = tpu.matmul %280, %179, %cst_92 {dimension_numbers = #tpu.dot_dimension_numbers<[1], [0], [0], [1], [0, 0, 1, 1], [], []>} : vector<16x32xbf16>, vector<32x32xbf16>, vector<16x32xf32> -> vector<16x32xf32>
    %282 = vector.broadcast %181 : vector<1x32xf32> to vector<16x32xf32>
    %283 = arith.addf %281, %282 : vector<16x32xf32>
    %284 = arith.addf %159, %283 : vector<16x32xf32>
    %285 = vector.extract_strided_slice %17 {offsets = [2, 0], sizes = [1, 32], strides = [1, 1]} : vector<6x32xf32> to vector<1x32xf32>
    %286 = vector.extract_strided_slice %17 {offsets = [3, 0], sizes = [1, 32], strides = [1, 1]} : vector<6x32xf32> to vector<1x32xf32>
    %cst_93 = arith.constant dense<0.000000e+00> : vector<16xf32>
    %287 = vector.multi_reduction <add>, %284, %cst_93 [1] : vector<16x32xf32> to vector<16xf32>
    %288 = vector.shape_cast %287 : vector<16xf32> to vector<16x1xf32>
    %cst_94 = arith.constant 3.200000e+01 : f32
    %289 = vector.broadcast %cst_94 : f32 to vector<16x1xf32>
    %290 = arith.divf %288, %289 : vector<16x1xf32>
    %291 = vector.broadcast %290 : vector<16x1xf32> to vector<16x32xf32>
    %292 = arith.subf %284, %291 : vector<16x32xf32>
    %293 = arith.mulf %292, %292 : vector<16x32xf32>
    %cst_95 = arith.constant dense<0.000000e+00> : vector<16xf32>
    %294 = vector.multi_reduction <add>, %293, %cst_95 [1] : vector<16x32xf32> to vector<16xf32>
    %295 = vector.shape_cast %294 : vector<16xf32> to vector<16x1xf32>
    %cst_96 = arith.constant 3.200000e+01 : f32
    %296 = vector.broadcast %cst_96 : f32 to vector<16x1xf32>
    %297 = arith.divf %295, %296 : vector<16x1xf32>
    %298 = vector.broadcast %290 : vector<16x1xf32> to vector<16x32xf32>
    %299 = arith.subf %284, %298 : vector<16x32xf32>
    %cst_97 = arith.constant 9.99999974E-6 : f32
    %300 = vector.broadcast %cst_97 : f32 to vector<16x1xf32>
    %301 = arith.addf %297, %300 : vector<16x1xf32>
    %302 = math.rsqrt %301 : vector<16x1xf32>
    %303 = vector.broadcast %302 : vector<16x1xf32> to vector<16x32xf32>
    %304 = arith.mulf %299, %303 : vector<16x32xf32>
    %305 = vector.broadcast %285 : vector<1x32xf32> to vector<16x32xf32>
    %306 = arith.mulf %304, %305 : vector<16x32xf32>
    %307 = vector.broadcast %286 : vector<1x32xf32> to vector<16x32xf32>
    %308 = arith.addf %306, %307 : vector<16x32xf32>
    %c0_98 = arith.constant 0 : index
    %c0_99 = arith.constant 0 : index
    %c0_100 = arith.constant 0 : index
    %309 = vector.load %arg17[%c0_98, %c0_99, %c0_100] : memref<2x32x2048xbf16, #tpu.memory_space<vmem>>, vector<1x32x2048xbf16>
    %310 = vector.shape_cast %309 : vector<1x32x2048xbf16> to vector<32x2048xbf16>
    %c0_101 = arith.constant 0 : index
    %c0_102 = arith.constant 0 : index
    %c0_103 = arith.constant 0 : index
    %311 = vector.load %arg18[%c0_101, %c0_102, %c0_103] : memref<2x1x2048xf32, #tpu.memory_space<vmem>>, vector<1x1x2048xf32>
    %312 = vector.shape_cast %311 : vector<1x1x2048xf32> to vector<1x2048xf32>
    %313 = arith.truncf %308 : vector<16x32xf32> to vector<16x32xbf16>
    %cst_104 = arith.constant dense<0.000000e+00> : vector<16x2048xf32>
    %314 = tpu.matmul %313, %310, %cst_104 {dimension_numbers = #tpu.dot_dimension_numbers<[1], [0], [0], [1], [0, 0, 1, 1], [], []>} : vector<16x32xbf16>, vector<32x2048xbf16>, vector<16x2048xf32> -> vector<16x2048xf32>
    %315 = vector.broadcast %312 : vector<1x2048xf32> to vector<16x2048xf32>
    %316 = arith.addf %314, %315 : vector<16x2048xf32>
    %cst_105 = arith.constant 0.000000e+00 : f32
    %317 = vector.broadcast %cst_105 : f32 to vector<16x2048xf32>
    %318 = arith.maximumf %316, %317 : vector<16x2048xf32>
    %319 = arith.truncf %318 : vector<16x2048xf32> to vector<16x2048xbf16>
    %c0_106 = arith.constant 0 : index
    %c0_107 = arith.constant 0 : index
    %c0_108 = arith.constant 0 : index
    %320 = vector.load %arg19[%c0_106, %c0_107, %c0_108] : memref<2x32x2048xbf16, #tpu.memory_space<vmem>>, vector<1x32x2048xbf16>
    %321 = vector.shape_cast %320 : vector<1x32x2048xbf16> to vector<32x2048xbf16>
    %cst_109 = arith.constant dense<0.000000e+00> : vector<16x32xf32>
    %322 = tpu.matmul %319, %321, %cst_109 {dimension_numbers = #tpu.dot_dimension_numbers<[1], [1], [0], [0], [0, 0, 1, 0], [], []>} : vector<16x2048xbf16>, vector<32x2048xbf16>, vector<16x32xf32> -> vector<16x32xf32>
    %c0_110 = arith.constant 0 : index
    %c0_111 = arith.constant 0 : index
    %c0_112 = arith.constant 0 : index
    %323 = vector.load %arg20[%c0_110, %c0_111, %c0_112] : memref<2x1x32xf32, #tpu.memory_space<vmem>>, vector<1x1x32xf32>
    %324 = vector.shape_cast %323 : vector<1x1x32xf32> to vector<1x32xf32>
    %325 = vector.broadcast %324 : vector<1x32xf32> to vector<16x32xf32>
    %326 = arith.addf %322, %325 : vector<16x32xf32>
    %327 = arith.addf %308, %326 : vector<16x32xf32>
    %328 = vector.extract_strided_slice %17 {offsets = [4, 0], sizes = [1, 32], strides = [1, 1]} : vector<6x32xf32> to vector<1x32xf32>
    %329 = vector.extract_strided_slice %17 {offsets = [5, 0], sizes = [1, 32], strides = [1, 1]} : vector<6x32xf32> to vector<1x32xf32>
    %cst_113 = arith.constant dense<0.000000e+00> : vector<16xf32>
    %330 = vector.multi_reduction <add>, %327, %cst_113 [1] : vector<16x32xf32> to vector<16xf32>
    %331 = vector.shape_cast %330 : vector<16xf32> to vector<16x1xf32>
    %cst_114 = arith.constant 3.200000e+01 : f32
    %332 = vector.broadcast %cst_114 : f32 to vector<16x1xf32>
    %333 = arith.divf %331, %332 : vector<16x1xf32>
    %334 = vector.broadcast %333 : vector<16x1xf32> to vector<16x32xf32>
    %335 = arith.subf %327, %334 : vector<16x32xf32>
    %336 = arith.mulf %335, %335 : vector<16x32xf32>
    %cst_115 = arith.constant dense<0.000000e+00> : vector<16xf32>
    %337 = vector.multi_reduction <add>, %336, %cst_115 [1] : vector<16x32xf32> to vector<16xf32>
    %338 = vector.shape_cast %337 : vector<16xf32> to vector<16x1xf32>
    %cst_116 = arith.constant 3.200000e+01 : f32
    %339 = vector.broadcast %cst_116 : f32 to vector<16x1xf32>
    %340 = arith.divf %338, %339 : vector<16x1xf32>
    %341 = vector.broadcast %333 : vector<16x1xf32> to vector<16x32xf32>
    %342 = arith.subf %327, %341 : vector<16x32xf32>
    %cst_117 = arith.constant 9.99999974E-6 : f32
    %343 = vector.broadcast %cst_117 : f32 to vector<16x1xf32>
    %344 = arith.addf %340, %343 : vector<16x1xf32>
    %345 = math.rsqrt %344 : vector<16x1xf32>
    %346 = vector.broadcast %345 : vector<16x1xf32> to vector<16x32xf32>
    %347 = arith.mulf %342, %346 : vector<16x32xf32>
    %348 = vector.broadcast %328 : vector<1x32xf32> to vector<16x32xf32>
    %349 = arith.mulf %347, %348 : vector<16x32xf32>
    %350 = vector.broadcast %329 : vector<1x32xf32> to vector<16x32xf32>
    %351 = arith.addf %349, %350 : vector<16x32xf32>
    %c1_118 = arith.constant 1 : index
    %c0_119 = arith.constant 0 : index
    %c0_120 = arith.constant 0 : index
    %352 = vector.load %arg16[%c1_118, %c0_119, %c0_120] : memref<2x6x32xf32, #tpu.memory_space<vmem>>, vector<1x6x32xf32>
    %353 = vector.shape_cast %352 : vector<1x6x32xf32> to vector<6x32xf32>
    %c1_121 = arith.constant 1 : index
    %c0_122 = arith.constant 0 : index
    %c0_123 = arith.constant 0 : index
    %354 = vector.load %arg6[%c1_121, %c0_122, %c0_123] : memref<2x32x96xbf16, #tpu.memory_space<vmem>>, vector<1x32x96xbf16>
    %355 = vector.shape_cast %354 : vector<1x32x96xbf16> to vector<32x96xbf16>
    %c1_124 = arith.constant 1 : index
    %c0_125 = arith.constant 0 : index
    %c0_126 = arith.constant 0 : index
    %356 = vector.load %arg7[%c1_124, %c0_125, %c0_126] : memref<2x1x96xf32, #tpu.memory_space<vmem>>, vector<1x1x96xf32>
    %357 = vector.shape_cast %356 : vector<1x1x96xf32> to vector<1x96xf32>
    %358 = arith.truncf %351 : vector<16x32xf32> to vector<16x32xbf16>
    %cst_127 = arith.constant dense<0.000000e+00> : vector<16x96xf32>
    %359 = tpu.matmul %358, %355, %cst_127 {dimension_numbers = #tpu.dot_dimension_numbers<[1], [0], [0], [1], [0, 0, 1, 1], [], []>} : vector<16x32xbf16>, vector<32x96xbf16>, vector<16x96xf32> -> vector<16x96xf32>
    %360 = vector.broadcast %357 : vector<1x96xf32> to vector<16x96xf32>
    %361 = arith.addf %359, %360 : vector<16x96xf32>
    %362 = vector.extract_strided_slice %361 {offsets = [0, 0], sizes = [16, 32], strides = [1, 1]} : vector<16x96xf32> to vector<16x32xf32>
    %363 = vector.extract_strided_slice %361 {offsets = [0, 32], sizes = [16, 32], strides = [1, 1]} : vector<16x96xf32> to vector<16x32xf32>
    %364 = vector.extract_strided_slice %361 {offsets = [0, 64], sizes = [16, 32], strides = [1, 1]} : vector<16x96xf32> to vector<16x32xf32>
    %c1_128 = arith.constant 1 : index
    %c0_129 = arith.constant 0 : index
    %c0_130 = arith.constant 0 : index
    %365 = vector.load %arg8[%c1_128, %c0_129, %c0_130] : memref<2x32x32xbf16, #tpu.memory_space<vmem>>, vector<1x32x32xbf16>
    %366 = vector.shape_cast %365 : vector<1x32x32xbf16> to vector<32x32xbf16>
    %c1_131 = arith.constant 1 : index
    %c0_132 = arith.constant 0 : index
    %c0_133 = arith.constant 0 : index
    %367 = vector.load %arg9[%c1_131, %c0_132, %c0_133] : memref<2x1x32xf32, #tpu.memory_space<vmem>>, vector<1x1x32xf32>
    %368 = vector.shape_cast %367 : vector<1x1x32xf32> to vector<1x32xf32>
    %369 = tpu.concatenate %363, %363, %363, %363, %363, %363, %363, %363 in 0 : vector<16x32xf32>, vector<16x32xf32>, vector<16x32xf32>, vector<16x32xf32>, vector<16x32xf32>, vector<16x32xf32>, vector<16x32xf32>, vector<16x32xf32> -> vector<128x32xf32>
    %370 = arith.mulf %369, %11 : vector<128x32xf32>
    %371 = tpu.concatenate %364, %364, %364, %364, %364, %364, %364, %364 in 0 : vector<16x32xf32>, vector<16x32xf32>, vector<16x32xf32>, vector<16x32xf32>, vector<16x32xf32>, vector<16x32xf32>, vector<16x32xf32>, vector<16x32xf32> -> vector<128x32xf32>
    %372 = arith.mulf %371, %11 : vector<128x32xf32>
    %cst_134 = arith.constant dense<0.000000e+00> : vector<16x128xf32>
    %373 = tpu.matmul %362, %370, %cst_134 {dimension_numbers = #tpu.dot_dimension_numbers<[1], [1], [0], [0], [0, 0, 1, 0], [], []>} : vector<16x32xf32>, vector<128x32xf32>, vector<16x128xf32> -> vector<16x128xf32>
    %374 = arith.addf %373, %13 : vector<16x128xf32>
    %375 = vector.extract_strided_slice %374 {offsets = [0, 0], sizes = [16, 16], strides = [1, 1]} : vector<16x128xf32> to vector<16x16xf32>
    %cst_135 = arith.constant dense<0xFF800000> : vector<16xf32>
    %376 = vector.multi_reduction <maximumf>, %375, %cst_135 [1] : vector<16x16xf32> to vector<16xf32>
    %377 = vector.shape_cast %376 : vector<16xf32> to vector<16x1xf32>
    %378 = vector.broadcast %377 : vector<16x1xf32> to vector<16x16xf32>
    %379 = arith.subf %375, %378 : vector<16x16xf32>
    %380 = math.exp %379 : vector<16x16xf32>
    %cst_136 = arith.constant dense<0.000000e+00> : vector<16xf32>
    %381 = vector.multi_reduction <add>, %380, %cst_136 [1] : vector<16x16xf32> to vector<16xf32>
    %382 = vector.shape_cast %381 : vector<16xf32> to vector<16x1xf32>
    %383 = tpu.reciprocal %382 {approx = true} : vector<16x1xf32> -> vector<16x1xf32>
    %384 = vector.shape_cast %383 : vector<16x1xf32> to vector<16x1xf32>
    %385 = vector.broadcast %384 : vector<16x1xf32> to vector<16x4xf32>
    %386 = vector.extract_strided_slice %374 {offsets = [0, 16], sizes = [16, 16], strides = [1, 1]} : vector<16x128xf32> to vector<16x16xf32>
    %cst_137 = arith.constant dense<0xFF800000> : vector<16xf32>
    %387 = vector.multi_reduction <maximumf>, %386, %cst_137 [1] : vector<16x16xf32> to vector<16xf32>
    %388 = vector.shape_cast %387 : vector<16xf32> to vector<16x1xf32>
    %389 = vector.broadcast %388 : vector<16x1xf32> to vector<16x16xf32>
    %390 = arith.subf %386, %389 : vector<16x16xf32>
    %391 = math.exp %390 : vector<16x16xf32>
    %cst_138 = arith.constant dense<0.000000e+00> : vector<16xf32>
    %392 = vector.multi_reduction <add>, %391, %cst_138 [1] : vector<16x16xf32> to vector<16xf32>
    %393 = vector.shape_cast %392 : vector<16xf32> to vector<16x1xf32>
    %394 = tpu.reciprocal %393 {approx = true} : vector<16x1xf32> -> vector<16x1xf32>
    %395 = vector.shape_cast %394 : vector<16x1xf32> to vector<16x1xf32>
    %396 = vector.broadcast %395 : vector<16x1xf32> to vector<16x4xf32>
    %397 = vector.extract_strided_slice %374 {offsets = [0, 32], sizes = [16, 16], strides = [1, 1]} : vector<16x128xf32> to vector<16x16xf32>
    %cst_139 = arith.constant dense<0xFF800000> : vector<16xf32>
    %398 = vector.multi_reduction <maximumf>, %397, %cst_139 [1] : vector<16x16xf32> to vector<16xf32>
    %399 = vector.shape_cast %398 : vector<16xf32> to vector<16x1xf32>
    %400 = vector.broadcast %399 : vector<16x1xf32> to vector<16x16xf32>
    %401 = arith.subf %397, %400 : vector<16x16xf32>
    %402 = math.exp %401 : vector<16x16xf32>
    %cst_140 = arith.constant dense<0.000000e+00> : vector<16xf32>
    %403 = vector.multi_reduction <add>, %402, %cst_140 [1] : vector<16x16xf32> to vector<16xf32>
    %404 = vector.shape_cast %403 : vector<16xf32> to vector<16x1xf32>
    %405 = tpu.reciprocal %404 {approx = true} : vector<16x1xf32> -> vector<16x1xf32>
    %406 = vector.shape_cast %405 : vector<16x1xf32> to vector<16x1xf32>
    %407 = vector.broadcast %406 : vector<16x1xf32> to vector<16x4xf32>
    %408 = vector.extract_strided_slice %374 {offsets = [0, 48], sizes = [16, 16], strides = [1, 1]} : vector<16x128xf32> to vector<16x16xf32>
    %cst_141 = arith.constant dense<0xFF800000> : vector<16xf32>
    %409 = vector.multi_reduction <maximumf>, %408, %cst_141 [1] : vector<16x16xf32> to vector<16xf32>
    %410 = vector.shape_cast %409 : vector<16xf32> to vector<16x1xf32>
    %411 = vector.broadcast %410 : vector<16x1xf32> to vector<16x16xf32>
    %412 = arith.subf %408, %411 : vector<16x16xf32>
    %413 = math.exp %412 : vector<16x16xf32>
    %cst_142 = arith.constant dense<0.000000e+00> : vector<16xf32>
    %414 = vector.multi_reduction <add>, %413, %cst_142 [1] : vector<16x16xf32> to vector<16xf32>
    %415 = vector.shape_cast %414 : vector<16xf32> to vector<16x1xf32>
    %416 = tpu.reciprocal %415 {approx = true} : vector<16x1xf32> -> vector<16x1xf32>
    %417 = vector.shape_cast %416 : vector<16x1xf32> to vector<16x1xf32>
    %418 = vector.broadcast %417 : vector<16x1xf32> to vector<16x4xf32>
    %419 = vector.extract_strided_slice %374 {offsets = [0, 64], sizes = [16, 16], strides = [1, 1]} : vector<16x128xf32> to vector<16x16xf32>
    %cst_143 = arith.constant dense<0xFF800000> : vector<16xf32>
    %420 = vector.multi_reduction <maximumf>, %419, %cst_143 [1] : vector<16x16xf32> to vector<16xf32>
    %421 = vector.shape_cast %420 : vector<16xf32> to vector<16x1xf32>
    %422 = vector.broadcast %421 : vector<16x1xf32> to vector<16x16xf32>
    %423 = arith.subf %419, %422 : vector<16x16xf32>
    %424 = math.exp %423 : vector<16x16xf32>
    %cst_144 = arith.constant dense<0.000000e+00> : vector<16xf32>
    %425 = vector.multi_reduction <add>, %424, %cst_144 [1] : vector<16x16xf32> to vector<16xf32>
    %426 = vector.shape_cast %425 : vector<16xf32> to vector<16x1xf32>
    %427 = tpu.reciprocal %426 {approx = true} : vector<16x1xf32> -> vector<16x1xf32>
    %428 = vector.shape_cast %427 : vector<16x1xf32> to vector<16x1xf32>
    %429 = vector.broadcast %428 : vector<16x1xf32> to vector<16x4xf32>
    %430 = vector.extract_strided_slice %374 {offsets = [0, 80], sizes = [16, 16], strides = [1, 1]} : vector<16x128xf32> to vector<16x16xf32>
    %cst_145 = arith.constant dense<0xFF800000> : vector<16xf32>
    %431 = vector.multi_reduction <maximumf>, %430, %cst_145 [1] : vector<16x16xf32> to vector<16xf32>
    %432 = vector.shape_cast %431 : vector<16xf32> to vector<16x1xf32>
    %433 = vector.broadcast %432 : vector<16x1xf32> to vector<16x16xf32>
    %434 = arith.subf %430, %433 : vector<16x16xf32>
    %435 = math.exp %434 : vector<16x16xf32>
    %cst_146 = arith.constant dense<0.000000e+00> : vector<16xf32>
    %436 = vector.multi_reduction <add>, %435, %cst_146 [1] : vector<16x16xf32> to vector<16xf32>
    %437 = vector.shape_cast %436 : vector<16xf32> to vector<16x1xf32>
    %438 = tpu.reciprocal %437 {approx = true} : vector<16x1xf32> -> vector<16x1xf32>
    %439 = vector.shape_cast %438 : vector<16x1xf32> to vector<16x1xf32>
    %440 = vector.broadcast %439 : vector<16x1xf32> to vector<16x4xf32>
    %441 = vector.extract_strided_slice %374 {offsets = [0, 96], sizes = [16, 16], strides = [1, 1]} : vector<16x128xf32> to vector<16x16xf32>
    %cst_147 = arith.constant dense<0xFF800000> : vector<16xf32>
    %442 = vector.multi_reduction <maximumf>, %441, %cst_147 [1] : vector<16x16xf32> to vector<16xf32>
    %443 = vector.shape_cast %442 : vector<16xf32> to vector<16x1xf32>
    %444 = vector.broadcast %443 : vector<16x1xf32> to vector<16x16xf32>
    %445 = arith.subf %441, %444 : vector<16x16xf32>
    %446 = math.exp %445 : vector<16x16xf32>
    %cst_148 = arith.constant dense<0.000000e+00> : vector<16xf32>
    %447 = vector.multi_reduction <add>, %446, %cst_148 [1] : vector<16x16xf32> to vector<16xf32>
    %448 = vector.shape_cast %447 : vector<16xf32> to vector<16x1xf32>
    %449 = tpu.reciprocal %448 {approx = true} : vector<16x1xf32> -> vector<16x1xf32>
    %450 = vector.shape_cast %449 : vector<16x1xf32> to vector<16x1xf32>
    %451 = vector.broadcast %450 : vector<16x1xf32> to vector<16x4xf32>
    %452 = vector.extract_strided_slice %374 {offsets = [0, 112], sizes = [16, 16], strides = [1, 1]} : vector<16x128xf32> to vector<16x16xf32>
    %cst_149 = arith.constant dense<0xFF800000> : vector<16xf32>
    %453 = vector.multi_reduction <maximumf>, %452, %cst_149 [1] : vector<16x16xf32> to vector<16xf32>
    %454 = vector.shape_cast %453 : vector<16xf32> to vector<16x1xf32>
    %455 = vector.broadcast %454 : vector<16x1xf32> to vector<16x16xf32>
    %456 = arith.subf %452, %455 : vector<16x16xf32>
    %457 = math.exp %456 : vector<16x16xf32>
    %cst_150 = arith.constant dense<0.000000e+00> : vector<16xf32>
    %458 = vector.multi_reduction <add>, %457, %cst_150 [1] : vector<16x16xf32> to vector<16xf32>
    %459 = vector.shape_cast %458 : vector<16xf32> to vector<16x1xf32>
    %460 = tpu.reciprocal %459 {approx = true} : vector<16x1xf32> -> vector<16x1xf32>
    %461 = vector.shape_cast %460 : vector<16x1xf32> to vector<16x1xf32>
    %462 = vector.broadcast %461 : vector<16x1xf32> to vector<16x4xf32>
    %463 = tpu.concatenate %380, %391, %402, %413, %424, %435, %446, %457 in 1 : vector<16x16xf32>, vector<16x16xf32>, vector<16x16xf32>, vector<16x16xf32>, vector<16x16xf32>, vector<16x16xf32>, vector<16x16xf32>, vector<16x16xf32> -> vector<16x128xf32>
    %464 = tpu.concatenate %385, %396, %407, %418, %429, %440, %451, %462 in 1 : vector<16x4xf32>, vector<16x4xf32>, vector<16x4xf32>, vector<16x4xf32>, vector<16x4xf32>, vector<16x4xf32>, vector<16x4xf32>, vector<16x4xf32> -> vector<16x32xf32>
    %cst_151 = arith.constant dense<0.000000e+00> : vector<16x32xf32>
    %465 = tpu.matmul %463, %372, %cst_151 {dimension_numbers = #tpu.dot_dimension_numbers<[1], [0], [0], [1], [0, 0, 1, 1], [], []>} : vector<16x128xf32>, vector<128x32xf32>, vector<16x32xf32> -> vector<16x32xf32>
    %466 = arith.mulf %465, %464 : vector<16x32xf32>
    %467 = arith.truncf %466 : vector<16x32xf32> to vector<16x32xbf16>
    %cst_152 = arith.constant dense<0.000000e+00> : vector<16x32xf32>
    %468 = tpu.matmul %467, %366, %cst_152 {dimension_numbers = #tpu.dot_dimension_numbers<[1], [0], [0], [1], [0, 0, 1, 1], [], []>} : vector<16x32xbf16>, vector<32x32xbf16>, vector<16x32xf32> -> vector<16x32xf32>
    %469 = vector.broadcast %368 : vector<1x32xf32> to vector<16x32xf32>
    %470 = arith.addf %468, %469 : vector<16x32xf32>
    %471 = arith.addf %351, %470 : vector<16x32xf32>
    %472 = vector.extract_strided_slice %353 {offsets = [0, 0], sizes = [1, 32], strides = [1, 1]} : vector<6x32xf32> to vector<1x32xf32>
    %473 = vector.extract_strided_slice %353 {offsets = [1, 0], sizes = [1, 32], strides = [1, 1]} : vector<6x32xf32> to vector<1x32xf32>
    %cst_153 = arith.constant dense<0.000000e+00> : vector<16xf32>
    %474 = vector.multi_reduction <add>, %471, %cst_153 [1] : vector<16x32xf32> to vector<16xf32>
    %475 = vector.shape_cast %474 : vector<16xf32> to vector<16x1xf32>
    %cst_154 = arith.constant 3.200000e+01 : f32
    %476 = vector.broadcast %cst_154 : f32 to vector<16x1xf32>
    %477 = arith.divf %475, %476 : vector<16x1xf32>
    %478 = vector.broadcast %477 : vector<16x1xf32> to vector<16x32xf32>
    %479 = arith.subf %471, %478 : vector<16x32xf32>
    %480 = arith.mulf %479, %479 : vector<16x32xf32>
    %cst_155 = arith.constant dense<0.000000e+00> : vector<16xf32>
    %481 = vector.multi_reduction <add>, %480, %cst_155 [1] : vector<16x32xf32> to vector<16xf32>
    %482 = vector.shape_cast %481 : vector<16xf32> to vector<16x1xf32>
    %cst_156 = arith.constant 3.200000e+01 : f32
    %483 = vector.broadcast %cst_156 : f32 to vector<16x1xf32>
    %484 = arith.divf %482, %483 : vector<16x1xf32>
    %485 = vector.broadcast %477 : vector<16x1xf32> to vector<16x32xf32>
    %486 = arith.subf %471, %485 : vector<16x32xf32>
    %cst_157 = arith.constant 9.99999974E-6 : f32
    %487 = vector.broadcast %cst_157 : f32 to vector<16x1xf32>
    %488 = arith.addf %484, %487 : vector<16x1xf32>
    %489 = math.rsqrt %488 : vector<16x1xf32>
    %490 = vector.broadcast %489 : vector<16x1xf32> to vector<16x32xf32>
    %491 = arith.mulf %486, %490 : vector<16x32xf32>
    %492 = vector.broadcast %472 : vector<1x32xf32> to vector<16x32xf32>
    %493 = arith.mulf %491, %492 : vector<16x32xf32>
    %494 = vector.broadcast %473 : vector<1x32xf32> to vector<16x32xf32>
    %495 = arith.addf %493, %494 : vector<16x32xf32>
    %c1_158 = arith.constant 1 : index
    %c0_159 = arith.constant 0 : index
    %c0_160 = arith.constant 0 : index
    %496 = vector.load %arg10[%c1_158, %c0_159, %c0_160] : memref<2x32x64xbf16, #tpu.memory_space<vmem>>, vector<1x32x64xbf16>
    %497 = vector.shape_cast %496 : vector<1x32x64xbf16> to vector<32x64xbf16>
    %c1_161 = arith.constant 1 : index
    %c0_162 = arith.constant 0 : index
    %c0_163 = arith.constant 0 : index
    %498 = vector.load %arg11[%c1_161, %c0_162, %c0_163] : memref<2x1x64xf32, #tpu.memory_space<vmem>>, vector<1x1x64xf32>
    %499 = vector.shape_cast %498 : vector<1x1x64xf32> to vector<1x64xf32>
    %500 = arith.truncf %10 : vector<16x32xf32> to vector<16x32xbf16>
    %cst_164 = arith.constant dense<0.000000e+00> : vector<16x64xf32>
    %501 = tpu.matmul %500, %497, %cst_164 {dimension_numbers = #tpu.dot_dimension_numbers<[1], [0], [0], [1], [0, 0, 1, 1], [], []>} : vector<16x32xbf16>, vector<32x64xbf16>, vector<16x64xf32> -> vector<16x64xf32>
    %502 = vector.broadcast %499 : vector<1x64xf32> to vector<16x64xf32>
    %503 = arith.addf %501, %502 : vector<16x64xf32>
    %c1_165 = arith.constant 1 : index
    %c0_166 = arith.constant 0 : index
    %c0_167 = arith.constant 0 : index
    %504 = vector.load %arg12[%c1_165, %c0_166, %c0_167] : memref<2x32x32xbf16, #tpu.memory_space<vmem>>, vector<1x32x32xbf16>
    %505 = vector.shape_cast %504 : vector<1x32x32xbf16> to vector<32x32xbf16>
    %c1_168 = arith.constant 1 : index
    %c0_169 = arith.constant 0 : index
    %c0_170 = arith.constant 0 : index
    %506 = vector.load %arg13[%c1_168, %c0_169, %c0_170] : memref<2x1x32xf32, #tpu.memory_space<vmem>>, vector<1x1x32xf32>
    %507 = vector.shape_cast %506 : vector<1x1x32xf32> to vector<1x32xf32>
    %508 = arith.truncf %495 : vector<16x32xf32> to vector<16x32xbf16>
    %cst_171 = arith.constant dense<0.000000e+00> : vector<16x32xf32>
    %509 = tpu.matmul %508, %505, %cst_171 {dimension_numbers = #tpu.dot_dimension_numbers<[1], [0], [0], [1], [0, 0, 1, 1], [], []>} : vector<16x32xbf16>, vector<32x32xbf16>, vector<16x32xf32> -> vector<16x32xf32>
    %510 = vector.broadcast %507 : vector<1x32xf32> to vector<16x32xf32>
    %511 = arith.addf %509, %510 : vector<16x32xf32>
    %512 = vector.extract_strided_slice %503 {offsets = [0, 0], sizes = [16, 32], strides = [1, 1]} : vector<16x64xf32> to vector<16x32xf32>
    %513 = vector.extract_strided_slice %503 {offsets = [0, 32], sizes = [16, 32], strides = [1, 1]} : vector<16x64xf32> to vector<16x32xf32>
    %c1_172 = arith.constant 1 : index
    %c0_173 = arith.constant 0 : index
    %c0_174 = arith.constant 0 : index
    %514 = vector.load %arg14[%c1_172, %c0_173, %c0_174] : memref<2x32x32xbf16, #tpu.memory_space<vmem>>, vector<1x32x32xbf16>
    %515 = vector.shape_cast %514 : vector<1x32x32xbf16> to vector<32x32xbf16>
    %c1_175 = arith.constant 1 : index
    %c0_176 = arith.constant 0 : index
    %c0_177 = arith.constant 0 : index
    %516 = vector.load %arg15[%c1_175, %c0_176, %c0_177] : memref<2x1x32xf32, #tpu.memory_space<vmem>>, vector<1x1x32xf32>
    %517 = vector.shape_cast %516 : vector<1x1x32xf32> to vector<1x32xf32>
    %518 = tpu.concatenate %513, %513, %513, %513, %513, %513, %513, %513 in 0 : vector<16x32xf32>, vector<16x32xf32>, vector<16x32xf32>, vector<16x32xf32>, vector<16x32xf32>, vector<16x32xf32>, vector<16x32xf32>, vector<16x32xf32> -> vector<128x32xf32>
    %519 = arith.mulf %518, %11 : vector<128x32xf32>
    %520 = tpu.concatenate %511, %511, %511, %511, %511, %511, %511, %511 in 0 : vector<16x32xf32>, vector<16x32xf32>, vector<16x32xf32>, vector<16x32xf32>, vector<16x32xf32>, vector<16x32xf32>, vector<16x32xf32>, vector<16x32xf32> -> vector<128x32xf32>
    %521 = arith.mulf %520, %11 : vector<128x32xf32>
    %cst_178 = arith.constant dense<0.000000e+00> : vector<16x128xf32>
    %522 = tpu.matmul %512, %519, %cst_178 {dimension_numbers = #tpu.dot_dimension_numbers<[1], [1], [0], [0], [0, 0, 1, 0], [], []>} : vector<16x32xf32>, vector<128x32xf32>, vector<16x128xf32> -> vector<16x128xf32>
    %523 = arith.addf %522, %15 : vector<16x128xf32>
    %524 = vector.extract_strided_slice %523 {offsets = [0, 0], sizes = [16, 16], strides = [1, 1]} : vector<16x128xf32> to vector<16x16xf32>
    %cst_179 = arith.constant dense<0xFF800000> : vector<16xf32>
    %525 = vector.multi_reduction <maximumf>, %524, %cst_179 [1] : vector<16x16xf32> to vector<16xf32>
    %526 = vector.shape_cast %525 : vector<16xf32> to vector<16x1xf32>
    %527 = vector.broadcast %526 : vector<16x1xf32> to vector<16x16xf32>
    %528 = arith.subf %524, %527 : vector<16x16xf32>
    %529 = math.exp %528 : vector<16x16xf32>
    %cst_180 = arith.constant dense<0.000000e+00> : vector<16xf32>
    %530 = vector.multi_reduction <add>, %529, %cst_180 [1] : vector<16x16xf32> to vector<16xf32>
    %531 = vector.shape_cast %530 : vector<16xf32> to vector<16x1xf32>
    %532 = tpu.reciprocal %531 {approx = true} : vector<16x1xf32> -> vector<16x1xf32>
    %533 = vector.shape_cast %532 : vector<16x1xf32> to vector<16x1xf32>
    %534 = vector.broadcast %533 : vector<16x1xf32> to vector<16x4xf32>
    %535 = vector.extract_strided_slice %523 {offsets = [0, 16], sizes = [16, 16], strides = [1, 1]} : vector<16x128xf32> to vector<16x16xf32>
    %cst_181 = arith.constant dense<0xFF800000> : vector<16xf32>
    %536 = vector.multi_reduction <maximumf>, %535, %cst_181 [1] : vector<16x16xf32> to vector<16xf32>
    %537 = vector.shape_cast %536 : vector<16xf32> to vector<16x1xf32>
    %538 = vector.broadcast %537 : vector<16x1xf32> to vector<16x16xf32>
    %539 = arith.subf %535, %538 : vector<16x16xf32>
    %540 = math.exp %539 : vector<16x16xf32>
    %cst_182 = arith.constant dense<0.000000e+00> : vector<16xf32>
    %541 = vector.multi_reduction <add>, %540, %cst_182 [1] : vector<16x16xf32> to vector<16xf32>
    %542 = vector.shape_cast %541 : vector<16xf32> to vector<16x1xf32>
    %543 = tpu.reciprocal %542 {approx = true} : vector<16x1xf32> -> vector<16x1xf32>
    %544 = vector.shape_cast %543 : vector<16x1xf32> to vector<16x1xf32>
    %545 = vector.broadcast %544 : vector<16x1xf32> to vector<16x4xf32>
    %546 = vector.extract_strided_slice %523 {offsets = [0, 32], sizes = [16, 16], strides = [1, 1]} : vector<16x128xf32> to vector<16x16xf32>
    %cst_183 = arith.constant dense<0xFF800000> : vector<16xf32>
    %547 = vector.multi_reduction <maximumf>, %546, %cst_183 [1] : vector<16x16xf32> to vector<16xf32>
    %548 = vector.shape_cast %547 : vector<16xf32> to vector<16x1xf32>
    %549 = vector.broadcast %548 : vector<16x1xf32> to vector<16x16xf32>
    %550 = arith.subf %546, %549 : vector<16x16xf32>
    %551 = math.exp %550 : vector<16x16xf32>
    %cst_184 = arith.constant dense<0.000000e+00> : vector<16xf32>
    %552 = vector.multi_reduction <add>, %551, %cst_184 [1] : vector<16x16xf32> to vector<16xf32>
    %553 = vector.shape_cast %552 : vector<16xf32> to vector<16x1xf32>
    %554 = tpu.reciprocal %553 {approx = true} : vector<16x1xf32> -> vector<16x1xf32>
    %555 = vector.shape_cast %554 : vector<16x1xf32> to vector<16x1xf32>
    %556 = vector.broadcast %555 : vector<16x1xf32> to vector<16x4xf32>
    %557 = vector.extract_strided_slice %523 {offsets = [0, 48], sizes = [16, 16], strides = [1, 1]} : vector<16x128xf32> to vector<16x16xf32>
    %cst_185 = arith.constant dense<0xFF800000> : vector<16xf32>
    %558 = vector.multi_reduction <maximumf>, %557, %cst_185 [1] : vector<16x16xf32> to vector<16xf32>
    %559 = vector.shape_cast %558 : vector<16xf32> to vector<16x1xf32>
    %560 = vector.broadcast %559 : vector<16x1xf32> to vector<16x16xf32>
    %561 = arith.subf %557, %560 : vector<16x16xf32>
    %562 = math.exp %561 : vector<16x16xf32>
    %cst_186 = arith.constant dense<0.000000e+00> : vector<16xf32>
    %563 = vector.multi_reduction <add>, %562, %cst_186 [1] : vector<16x16xf32> to vector<16xf32>
    %564 = vector.shape_cast %563 : vector<16xf32> to vector<16x1xf32>
    %565 = tpu.reciprocal %564 {approx = true} : vector<16x1xf32> -> vector<16x1xf32>
    %566 = vector.shape_cast %565 : vector<16x1xf32> to vector<16x1xf32>
    %567 = vector.broadcast %566 : vector<16x1xf32> to vector<16x4xf32>
    %568 = vector.extract_strided_slice %523 {offsets = [0, 64], sizes = [16, 16], strides = [1, 1]} : vector<16x128xf32> to vector<16x16xf32>
    %cst_187 = arith.constant dense<0xFF800000> : vector<16xf32>
    %569 = vector.multi_reduction <maximumf>, %568, %cst_187 [1] : vector<16x16xf32> to vector<16xf32>
    %570 = vector.shape_cast %569 : vector<16xf32> to vector<16x1xf32>
    %571 = vector.broadcast %570 : vector<16x1xf32> to vector<16x16xf32>
    %572 = arith.subf %568, %571 : vector<16x16xf32>
    %573 = math.exp %572 : vector<16x16xf32>
    %cst_188 = arith.constant dense<0.000000e+00> : vector<16xf32>
    %574 = vector.multi_reduction <add>, %573, %cst_188 [1] : vector<16x16xf32> to vector<16xf32>
    %575 = vector.shape_cast %574 : vector<16xf32> to vector<16x1xf32>
    %576 = tpu.reciprocal %575 {approx = true} : vector<16x1xf32> -> vector<16x1xf32>
    %577 = vector.shape_cast %576 : vector<16x1xf32> to vector<16x1xf32>
    %578 = vector.broadcast %577 : vector<16x1xf32> to vector<16x4xf32>
    %579 = vector.extract_strided_slice %523 {offsets = [0, 80], sizes = [16, 16], strides = [1, 1]} : vector<16x128xf32> to vector<16x16xf32>
    %cst_189 = arith.constant dense<0xFF800000> : vector<16xf32>
    %580 = vector.multi_reduction <maximumf>, %579, %cst_189 [1] : vector<16x16xf32> to vector<16xf32>
    %581 = vector.shape_cast %580 : vector<16xf32> to vector<16x1xf32>
    %582 = vector.broadcast %581 : vector<16x1xf32> to vector<16x16xf32>
    %583 = arith.subf %579, %582 : vector<16x16xf32>
    %584 = math.exp %583 : vector<16x16xf32>
    %cst_190 = arith.constant dense<0.000000e+00> : vector<16xf32>
    %585 = vector.multi_reduction <add>, %584, %cst_190 [1] : vector<16x16xf32> to vector<16xf32>
    %586 = vector.shape_cast %585 : vector<16xf32> to vector<16x1xf32>
    %587 = tpu.reciprocal %586 {approx = true} : vector<16x1xf32> -> vector<16x1xf32>
    %588 = vector.shape_cast %587 : vector<16x1xf32> to vector<16x1xf32>
    %589 = vector.broadcast %588 : vector<16x1xf32> to vector<16x4xf32>
    %590 = vector.extract_strided_slice %523 {offsets = [0, 96], sizes = [16, 16], strides = [1, 1]} : vector<16x128xf32> to vector<16x16xf32>
    %cst_191 = arith.constant dense<0xFF800000> : vector<16xf32>
    %591 = vector.multi_reduction <maximumf>, %590, %cst_191 [1] : vector<16x16xf32> to vector<16xf32>
    %592 = vector.shape_cast %591 : vector<16xf32> to vector<16x1xf32>
    %593 = vector.broadcast %592 : vector<16x1xf32> to vector<16x16xf32>
    %594 = arith.subf %590, %593 : vector<16x16xf32>
    %595 = math.exp %594 : vector<16x16xf32>
    %cst_192 = arith.constant dense<0.000000e+00> : vector<16xf32>
    %596 = vector.multi_reduction <add>, %595, %cst_192 [1] : vector<16x16xf32> to vector<16xf32>
    %597 = vector.shape_cast %596 : vector<16xf32> to vector<16x1xf32>
    %598 = tpu.reciprocal %597 {approx = true} : vector<16x1xf32> -> vector<16x1xf32>
    %599 = vector.shape_cast %598 : vector<16x1xf32> to vector<16x1xf32>
    %600 = vector.broadcast %599 : vector<16x1xf32> to vector<16x4xf32>
    %601 = vector.extract_strided_slice %523 {offsets = [0, 112], sizes = [16, 16], strides = [1, 1]} : vector<16x128xf32> to vector<16x16xf32>
    %cst_193 = arith.constant dense<0xFF800000> : vector<16xf32>
    %602 = vector.multi_reduction <maximumf>, %601, %cst_193 [1] : vector<16x16xf32> to vector<16xf32>
    %603 = vector.shape_cast %602 : vector<16xf32> to vector<16x1xf32>
    %604 = vector.broadcast %603 : vector<16x1xf32> to vector<16x16xf32>
    %605 = arith.subf %601, %604 : vector<16x16xf32>
    %606 = math.exp %605 : vector<16x16xf32>
    %cst_194 = arith.constant dense<0.000000e+00> : vector<16xf32>
    %607 = vector.multi_reduction <add>, %606, %cst_194 [1] : vector<16x16xf32> to vector<16xf32>
    %608 = vector.shape_cast %607 : vector<16xf32> to vector<16x1xf32>
    %609 = tpu.reciprocal %608 {approx = true} : vector<16x1xf32> -> vector<16x1xf32>
    %610 = vector.shape_cast %609 : vector<16x1xf32> to vector<16x1xf32>
    %611 = vector.broadcast %610 : vector<16x1xf32> to vector<16x4xf32>
    %612 = tpu.concatenate %529, %540, %551, %562, %573, %584, %595, %606 in 1 : vector<16x16xf32>, vector<16x16xf32>, vector<16x16xf32>, vector<16x16xf32>, vector<16x16xf32>, vector<16x16xf32>, vector<16x16xf32>, vector<16x16xf32> -> vector<16x128xf32>
    %613 = tpu.concatenate %534, %545, %556, %567, %578, %589, %600, %611 in 1 : vector<16x4xf32>, vector<16x4xf32>, vector<16x4xf32>, vector<16x4xf32>, vector<16x4xf32>, vector<16x4xf32>, vector<16x4xf32>, vector<16x4xf32> -> vector<16x32xf32>
    %cst_195 = arith.constant dense<0.000000e+00> : vector<16x32xf32>
    %614 = tpu.matmul %612, %521, %cst_195 {dimension_numbers = #tpu.dot_dimension_numbers<[1], [0], [0], [1], [0, 0, 1, 1], [], []>} : vector<16x128xf32>, vector<128x32xf32>, vector<16x32xf32> -> vector<16x32xf32>
    %615 = arith.mulf %614, %613 : vector<16x32xf32>
    %616 = arith.truncf %615 : vector<16x32xf32> to vector<16x32xbf16>
    %cst_196 = arith.constant dense<0.000000e+00> : vector<16x32xf32>
    %617 = tpu.matmul %616, %515, %cst_196 {dimension_numbers = #tpu.dot_dimension_numbers<[1], [0], [0], [1], [0, 0, 1, 1], [], []>} : vector<16x32xbf16>, vector<32x32xbf16>, vector<16x32xf32> -> vector<16x32xf32>
    %618 = vector.broadcast %517 : vector<1x32xf32> to vector<16x32xf32>
    %619 = arith.addf %617, %618 : vector<16x32xf32>
    %620 = arith.addf %495, %619 : vector<16x32xf32>
    %621 = vector.extract_strided_slice %353 {offsets = [2, 0], sizes = [1, 32], strides = [1, 1]} : vector<6x32xf32> to vector<1x32xf32>
    %622 = vector.extract_strided_slice %353 {offsets = [3, 0], sizes = [1, 32], strides = [1, 1]} : vector<6x32xf32> to vector<1x32xf32>
    %cst_197 = arith.constant dense<0.000000e+00> : vector<16xf32>
    %623 = vector.multi_reduction <add>, %620, %cst_197 [1] : vector<16x32xf32> to vector<16xf32>
    %624 = vector.shape_cast %623 : vector<16xf32> to vector<16x1xf32>
    %cst_198 = arith.constant 3.200000e+01 : f32
    %625 = vector.broadcast %cst_198 : f32 to vector<16x1xf32>
    %626 = arith.divf %624, %625 : vector<16x1xf32>
    %627 = vector.broadcast %626 : vector<16x1xf32> to vector<16x32xf32>
    %628 = arith.subf %620, %627 : vector<16x32xf32>
    %629 = arith.mulf %628, %628 : vector<16x32xf32>
    %cst_199 = arith.constant dense<0.000000e+00> : vector<16xf32>
    %630 = vector.multi_reduction <add>, %629, %cst_199 [1] : vector<16x32xf32> to vector<16xf32>
    %631 = vector.shape_cast %630 : vector<16xf32> to vector<16x1xf32>
    %cst_200 = arith.constant 3.200000e+01 : f32
    %632 = vector.broadcast %cst_200 : f32 to vector<16x1xf32>
    %633 = arith.divf %631, %632 : vector<16x1xf32>
    %634 = vector.broadcast %626 : vector<16x1xf32> to vector<16x32xf32>
    %635 = arith.subf %620, %634 : vector<16x32xf32>
    %cst_201 = arith.constant 9.99999974E-6 : f32
    %636 = vector.broadcast %cst_201 : f32 to vector<16x1xf32>
    %637 = arith.addf %633, %636 : vector<16x1xf32>
    %638 = math.rsqrt %637 : vector<16x1xf32>
    %639 = vector.broadcast %638 : vector<16x1xf32> to vector<16x32xf32>
    %640 = arith.mulf %635, %639 : vector<16x32xf32>
    %641 = vector.broadcast %621 : vector<1x32xf32> to vector<16x32xf32>
    %642 = arith.mulf %640, %641 : vector<16x32xf32>
    %643 = vector.broadcast %622 : vector<1x32xf32> to vector<16x32xf32>
    %644 = arith.addf %642, %643 : vector<16x32xf32>
    %c1_202 = arith.constant 1 : index
    %c0_203 = arith.constant 0 : index
    %c0_204 = arith.constant 0 : index
    %645 = vector.load %arg17[%c1_202, %c0_203, %c0_204] : memref<2x32x2048xbf16, #tpu.memory_space<vmem>>, vector<1x32x2048xbf16>
    %646 = vector.shape_cast %645 : vector<1x32x2048xbf16> to vector<32x2048xbf16>
    %c1_205 = arith.constant 1 : index
    %c0_206 = arith.constant 0 : index
    %c0_207 = arith.constant 0 : index
    %647 = vector.load %arg18[%c1_205, %c0_206, %c0_207] : memref<2x1x2048xf32, #tpu.memory_space<vmem>>, vector<1x1x2048xf32>
    %648 = vector.shape_cast %647 : vector<1x1x2048xf32> to vector<1x2048xf32>
    %649 = arith.truncf %644 : vector<16x32xf32> to vector<16x32xbf16>
    %cst_208 = arith.constant dense<0.000000e+00> : vector<16x2048xf32>
    %650 = tpu.matmul %649, %646, %cst_208 {dimension_numbers = #tpu.dot_dimension_numbers<[1], [0], [0], [1], [0, 0, 1, 1], [], []>} : vector<16x32xbf16>, vector<32x2048xbf16>, vector<16x2048xf32> -> vector<16x2048xf32>
    %651 = vector.broadcast %648 : vector<1x2048xf32> to vector<16x2048xf32>
    %652 = arith.addf %650, %651 : vector<16x2048xf32>
    %cst_209 = arith.constant 0.000000e+00 : f32
    %653 = vector.broadcast %cst_209 : f32 to vector<16x2048xf32>
    %654 = arith.maximumf %652, %653 : vector<16x2048xf32>
    %655 = arith.truncf %654 : vector<16x2048xf32> to vector<16x2048xbf16>
    %c1_210 = arith.constant 1 : index
    %c0_211 = arith.constant 0 : index
    %c0_212 = arith.constant 0 : index
    %656 = vector.load %arg19[%c1_210, %c0_211, %c0_212] : memref<2x32x2048xbf16, #tpu.memory_space<vmem>>, vector<1x32x2048xbf16>
    %657 = vector.shape_cast %656 : vector<1x32x2048xbf16> to vector<32x2048xbf16>
    %cst_213 = arith.constant dense<0.000000e+00> : vector<16x32xf32>
    %658 = tpu.matmul %655, %657, %cst_213 {dimension_numbers = #tpu.dot_dimension_numbers<[1], [1], [0], [0], [0, 0, 1, 0], [], []>} : vector<16x2048xbf16>, vector<32x2048xbf16>, vector<16x32xf32> -> vector<16x32xf32>
    %c1_214 = arith.constant 1 : index
    %c0_215 = arith.constant 0 : index
    %c0_216 = arith.constant 0 : index
    %659 = vector.load %arg20[%c1_214, %c0_215, %c0_216] : memref<2x1x32xf32, #tpu.memory_space<vmem>>, vector<1x1x32xf32>
    %660 = vector.shape_cast %659 : vector<1x1x32xf32> to vector<1x32xf32>
    %661 = vector.broadcast %660 : vector<1x32xf32> to vector<16x32xf32>
    %662 = arith.addf %658, %661 : vector<16x32xf32>
    %663 = arith.addf %644, %662 : vector<16x32xf32>
    %664 = vector.extract_strided_slice %353 {offsets = [4, 0], sizes = [1, 32], strides = [1, 1]} : vector<6x32xf32> to vector<1x32xf32>
    %665 = vector.extract_strided_slice %353 {offsets = [5, 0], sizes = [1, 32], strides = [1, 1]} : vector<6x32xf32> to vector<1x32xf32>
    %cst_217 = arith.constant dense<0.000000e+00> : vector<16xf32>
    %666 = vector.multi_reduction <add>, %663, %cst_217 [1] : vector<16x32xf32> to vector<16xf32>
    %667 = vector.shape_cast %666 : vector<16xf32> to vector<16x1xf32>
    %cst_218 = arith.constant 3.200000e+01 : f32
    %668 = vector.broadcast %cst_218 : f32 to vector<16x1xf32>
    %669 = arith.divf %667, %668 : vector<16x1xf32>
    %670 = vector.broadcast %669 : vector<16x1xf32> to vector<16x32xf32>
    %671 = arith.subf %663, %670 : vector<16x32xf32>
    %672 = arith.mulf %671, %671 : vector<16x32xf32>
    %cst_219 = arith.constant dense<0.000000e+00> : vector<16xf32>
    %673 = vector.multi_reduction <add>, %672, %cst_219 [1] : vector<16x32xf32> to vector<16xf32>
    %674 = vector.shape_cast %673 : vector<16xf32> to vector<16x1xf32>
    %cst_220 = arith.constant 3.200000e+01 : f32
    %675 = vector.broadcast %cst_220 : f32 to vector<16x1xf32>
    %676 = arith.divf %674, %675 : vector<16x1xf32>
    %677 = vector.broadcast %669 : vector<16x1xf32> to vector<16x32xf32>
    %678 = arith.subf %663, %677 : vector<16x32xf32>
    %cst_221 = arith.constant 9.99999974E-6 : f32
    %679 = vector.broadcast %cst_221 : f32 to vector<16x1xf32>
    %680 = arith.addf %676, %679 : vector<16x1xf32>
    %681 = math.rsqrt %680 : vector<16x1xf32>
    %682 = vector.broadcast %681 : vector<16x1xf32> to vector<16x32xf32>
    %683 = arith.mulf %678, %682 : vector<16x32xf32>
    %684 = vector.broadcast %664 : vector<1x32xf32> to vector<16x32xf32>
    %685 = arith.mulf %683, %684 : vector<16x32xf32>
    %686 = vector.broadcast %665 : vector<1x32xf32> to vector<16x32xf32>
    %687 = arith.addf %685, %686 : vector<16x32xf32>
    %c0_222 = arith.constant 0 : index
    %c0_223 = arith.constant 0 : index
    %688 = vector.load %arg21[%c0_222, %c0_223] : memref<16x32xf32, #tpu.memory_space<vmem>>, vector<16x32xf32>
    tpu.vector_store %arg21[%c0_222, %c0_223], %687 {strides = array<i32>} : memref<16x32xf32, #tpu.memory_space<vmem>>, vector<16x32xf32>,
    return
  }
}

</mosaic_0001>

<bundles_post_ra>
// kernel: decoder_forward.1
= control target key start
LH: loop header
LB: loop body
LE: loop exit
PB: predicated region body
PF: predicated region fallthrough
CT: control target
= control target key end

     0   :  { %s9976_s0 = inlined_call_operand.vmem [shape: s32[16,1], index: 0, kind: input, shape index: {}]   ;;  %s9977_s1 = inlined_call_operand.vmem [shape: f32[16,32], index: 1, kind: input, shape index: {}]   ;;  %s9978_s2 = inlined_call_operand.vmem [shape: f32[16,32], index: 2, kind: input, shape index: {}]   ;;  %s9979_s3 = inlined_call_operand.vmem [shape: f32[64,32], index: 3, kind: input, shape index: {}]   ;;  %s9980_s4 = inlined_call_operand.vmem [shape: f32[2,16,128], index: 4, kind: input, shape index: {}]   ;;  %s9981_s5 = inlined_call_operand.vmem [shape: f32[128,32], index: 5, kind: input, shape index: {}]   ;;  %s9982_s6 = inlined_call_operand.vmem [shape: bf16[2,32,96], index: 6, kind: input, shape index: {}]   ;;  %s9983_s7 = inlined_call_operand.hbm [shape: f32[2,1,96], index: 7, kind: input, shape index: {}]   ;;  %s9984_s8 = inlined_call_operand.vmem [shape: bf16[2,32,32], index: 8, kind: input, shape index: {}]   ;;  %s9985_s9 = inlined_call_operand.hbm [shape: f32[2,1,32], index: 9, kind: input, shape index: {}]   ;;  %s9986_s10 = inlined_call_operand.vmem [shape: bf16[2,32,64], index: 10, kind: input, shape index: {}]   ;;  %s9987_s11 = inlined_call_operand.hbm [shape: f32[2,1,64], index: 11, kind: input, shape index: {}]   ;;  %s9988_s12 = inlined_call_operand.vmem [shape: bf16[2,32,32], index: 12, kind: input, shape index: {}]   ;;  %s9989_s13 = inlined_call_operand.hbm [shape: f32[2,1,32], index: 13, kind: input, shape index: {}]   ;;  %s9990_s14 = inlined_call_operand.vmem [shape: bf16[2,32,32], index: 14, kind: input, shape index: {}]   ;;  %s9991_s15 = inlined_call_operand.hbm [shape: f32[2,1,32], index: 15, kind: input, shape index: {}]   ;;  %s9992_s16 = inlined_call_operand.vmem [shape: f32[2,6,32], index: 16, kind: input, shape index: {}]   ;;  %s9993_s17 = inlined_call_operand.hbm [shape: bf16[2,32,2048], index: 17, kind: input, shape index: {}]   ;;  %s9994_s18 = inlined_call_operand.vmem [shape: f32[2,1,2048], index: 18, kind: input, shape index: {}]   ;;  %s9995_s19 = inlined_call_operand.hbm [shape: bf16[2,32,2048], index: 19, kind: input, shape index: {}]   ;;  %s9996_s20 = inlined_call_operand.vmem [shape: f32[2,1,32], index: 20, kind: input, shape index: {}]   ;;  %s9997_s21 = inlined_call_operand.hbm [shape: f32[16,32], index: 21, kind: output, shape index: {}]  }
   0x1   :  { %10046 = sst [smem:[#allocation37_spill]] %s9976_s0 }
   0x2   :  { %10047 = sst [smem:[#allocation38_spill]] %s9977_s1 }
   0x3   :  { %10048 = sst [smem:[#allocation39_spill]] %s9978_s2 }
   0x4   :  { %10049 = sst [smem:[#allocation40_spill]] %s9979_s3 }
   0x5   :  { %10050 = sst [smem:[#allocation41_spill]] %s9980_s4 }
   0x6   :  { %10051 = sst [smem:[#allocation42_spill]] %s9981_s5 }
   0x7   :  { %26 = vsyncpa [#allocation3], 0 }
   0x8   :  { %27 = vsyncpa [#allocation6], 0 }
   0x9   :  { %28 = vsyncpa [#allocation9], 0 }
   0xa   :  { %29 = vsyncpa [#allocation12], 0 }
   0xb   :  { %30 = vsyncpa [#allocation4], 0  ;;  %s7939_s2 = smov [#allocation5]   ;;  %s7940_s26 = smov [#allocation8]  }
   0xc   :  { %s64_s25 = sshll.u32 %s7939_s2, 4  ;;  %s92_s27 = sshll.u32 %s7940_s26, 4  ;;  %s65_s25 = int_to_ptr.vmem [resolvable:$true] %s64_s25  ;;  %s8071_s27 = int_to_ptr.vmem [resolvable:$true] %s92_s27 }
   0xd   :  { %s7753_s29 = scalar_lea.hbm %s9985_s9, 32 }
   0xe   :  { %p7754_p0 = scmp.ne.s32.totalorder %s9985_s9, %s7753_s29  ;;  %p7757_p1 = scmp.lt.u32.totalorder %s7753_s29, %s9985_s9 }
  0x10   :  { %p7759_p2 = pnand %p7757_p1, %p7754_p0 }
  0x12   :  { %7762 = shalt.err (!%p7759_p2)
}
  0x13   :  { %s7763_s22 = scalar_lea.vmem %s65_s25, 32  ;;  %p7768_p4 = scmp.lt.s32.totalorder %s65_s25, %s65_s25 }
  0x14   :  { %p7764_p3 = scmp.ne.s32.totalorder %s65_s25, %s7763_s22  ;;  %p7769_p5 = scmp.lt.s32.totalorder %s7763_s22, %s7763_s22 }
  0x16   :  { %p7770_p6 = por %p7769_p5, %p7768_p4 }
  0x18   :  { %p7771_p7 = pnand %p7770_p6, %p7764_p3 }
  0x1a   :  { %7774 = shalt.err (!%p7771_p7)
}
  0x1b   :  { %s10004_s23 = smov 16   ;;  %s7942_s1 = smov 1  }
  0x1c   :  { %70 = dma.hbm_to_vmem [thread:$0]  %s9985_s9, 32, %s65_s25, [#allocation6], %s10004_s23, %s10004_s23, %s7942_s1  }
  0x1d   :  { %s7775_s28 = scalar_lea.hbm %s9989_s13, 32 }
  0x1e   :  { %p7776_p8 = scmp.ne.s32.totalorder %s9989_s13, %s7775_s28  ;;  %p7779_p9 = scmp.lt.u32.totalorder %s7775_s28, %s9989_s13 }
  0x20   :  { %p7781_p10 = pnand %p7779_p9, %p7776_p8 }
  0x22   :  { %7784 = shalt.err (!%p7781_p10)
}
  0x23   :  { %s7785_s5 = scalar_lea.vmem %s8071_s27, 32  ;;  %p7790_p12 = scmp.lt.s32.totalorder %s8071_s27, %s8071_s27 }
  0x24   :  { %p7786_p11 = scmp.ne.s32.totalorder %s8071_s27, %s7785_s5  ;;  %p7791_p13 = scmp.lt.s32.totalorder %s7785_s5, %s7785_s5 }
  0x26   :  { %p7792_p0 = por %p7791_p13, %p7790_p12 }
  0x28   :  { %p7793_p1 = pnand %p7792_p0, %p7786_p11 }
  0x2a   :  { %7796 = shalt.err (!%p7793_p1)
}
  0x2b   :  { %98 = dma.hbm_to_vmem [thread:$0]  %s9989_s13, 32, %s8071_s27, [#allocation9], %s10004_s23, %s10004_s23, %s7942_s1  }
  0x2c   :  { %s7943_s22 = smov [#allocation11]   ;;  %s7797_s3 = scalar_lea.hbm %s9993_s17, 8192 }
  0x2d   :  { %s120_s24 = sshll.u32 %s7943_s22, 4  ;;  %p7798_p2 = scmp.ne.s32.totalorder %s9993_s17, %s7797_s3  ;;  %s121_s24 = int_to_ptr.vmem [resolvable:$true] %s120_s24 }
  0x2e   :  { %p7801_p3 = scmp.lt.u32.totalorder %s7797_s3, %s9993_s17 }
  0x30   :  { %p7803_p4 = pnand %p7801_p3, %p7798_p2 }
  0x32   :  { %7806 = shalt.err (!%p7803_p4)
}
  0x33   :  { %s7807_s30 = scalar_lea.vmem %s121_s24, 8192  ;;  %p7812_p6 = scmp.lt.s32.totalorder %s121_s24, %s121_s24 }
  0x34   :  { %p7808_p5 = scmp.ne.s32.totalorder %s121_s24, %s7807_s30  ;;  %p7813_p7 = scmp.lt.s32.totalorder %s7807_s30, %s7807_s30 }
  0x36   :  { %p7814_p8 = por %p7813_p7, %p7812_p6 }
  0x38   :  { %p7815_p9 = pnand %p7814_p8, %p7808_p5 }
  0x3a   :  { %7818 = shalt.err (!%p7815_p9)
}
  0x3b   :  { %s7944_s13 = smov 1024   ;;  %s7945_s27 = smov 64  }
  0x3c   :  { %126 = dma.hbm_to_vmem [thread:$0]  %s9993_s17, 8192, %s121_s24, [#allocation12], %s7944_s13, %s7944_s13, %s7945_s27  }
  0x3d   :  { %s7946_s25 = smov [#allocation2]   ;;  %s7947_s2 = smov [#allocation7]  }
  0x3e   :  { %s50_s22 = sshll.u32 %s7946_s25, 4  ;;  %s78_s26 = sshll.u32 %s7947_s2, 4  ;;  %s51_s22 = int_to_ptr.vmem [resolvable:$true] %s50_s22  ;;  %s79_s26 = int_to_ptr.vmem [resolvable:$true] %s78_s26 }
  0x3f   :  { %s7819_s29 = scalar_lea.hbm %s9983_s7, 32 }
  0x40   :  { %p7820_p10 = scmp.ne.s32.totalorder %s9983_s7, %s7819_s29  ;;  %p7823_p11 = scmp.lt.u32.totalorder %s7819_s29, %s9983_s7 }
  0x42   :  { %p7825_p12 = pnand %p7823_p11, %p7820_p10 }
  0x44   :  { %7828 = shalt.err (!%p7825_p12)
}
  0x45   :  { %s7829_s17 = scalar_lea.vmem %s51_s22, 32  ;;  %p7834_p0 = scmp.lt.s32.totalorder %s51_s22, %s51_s22 }
  0x46   :  { %p7830_p13 = scmp.ne.s32.totalorder %s51_s22, %s7829_s17  ;;  %p7835_p1 = scmp.lt.s32.totalorder %s7829_s17, %s7829_s17 }
  0x48   :  { %p7836_p2 = por %p7835_p1, %p7834_p0 }
  0x4a   :  { %p7837_p3 = pnand %p7836_p2, %p7830_p13 }
  0x4c   :  { %7840 = shalt.err (!%p7837_p3)
}
  0x4d   :  { %s10052_s24 = smov 16   ;;  %s7841_s2 = scalar_lea.hbm %s9987_s11, 32 }
  0x4e   :  { %56 = dma.hbm_to_vmem [thread:$0]  %s9983_s7, 32, %s51_s22, [#allocation3], %s10052_s24, %s10052_s24, %s7942_s1  }
  0x4f   :  { %p7842_p4 = scmp.ne.s32.totalorder %s9987_s11, %s7841_s2  ;;  %p7845_p5 = scmp.lt.u32.totalorder %s7841_s2, %s9987_s11 }
  0x51   :  { %p7847_p6 = pnand %p7845_p5, %p7842_p4 }
  0x53   :  { %7850 = shalt.err (!%p7847_p6)
}
  0x54   :  { %s7851_s4 = scalar_lea.vmem %s79_s26, 32  ;;  %p7856_p8 = scmp.lt.s32.totalorder %s79_s26, %s79_s26 }
  0x55   :  { %p7852_p7 = scmp.ne.s32.totalorder %s79_s26, %s7851_s4  ;;  %p7857_p9 = scmp.lt.s32.totalorder %s7851_s4, %s7851_s4 }
  0x57   :  { %p7858_p10 = por %p7857_p9, %p7856_p8 }
  0x59   :  { %p7859_p11 = pnand %p7858_p10, %p7852_p7 }
  0x5b   :  { %7862 = shalt.err (!%p7859_p11)
}
  0x5c   :  { %84 = dma.hbm_to_vmem [thread:$0]  %s9987_s11, 32, %s79_s26, [#allocation6], %s10052_s24, %s10052_s24, %s7942_s1  }
  0x5d   :  { %s7948_s30 = smov [#allocation10]   ;;  %s7949_s5 = smov [#allocation13]  }
  0x5e   :  { %s106_s17 = sshll.u32 %s7948_s30, 4  ;;  %s134_s9 = sshll.u32 %s7949_s5, 4  ;;  %s107_s17 = int_to_ptr.vmem [resolvable:$true] %s106_s17  ;;  %s135_s9 = int_to_ptr.vmem [resolvable:$true] %s134_s9 }
  0x5f   :  { %s7863_s2 = scalar_lea.hbm %s9991_s15, 32 }
  0x60   :  { %p7864_p12 = scmp.ne.s32.totalorder %s9991_s15, %s7863_s2  ;;  %p7867_p13 = scmp.lt.u32.totalorder %s7863_s2, %s9991_s15 }
  0x62   :  { %p7869_p0 = pnand %p7867_p13, %p7864_p12 }
  0x64   :  { %7872 = shalt.err (!%p7869_p0)
}
  0x65   :  { %s7873_s11 = scalar_lea.vmem %s107_s17, 32  ;;  %p7878_p2 = scmp.lt.s32.totalorder %s107_s17, %s107_s17 }
  0x66   :  { %p7874_p1 = scmp.ne.s32.totalorder %s107_s17, %s7873_s11  ;;  %p7879_p3 = scmp.lt.s32.totalorder %s7873_s11, %s7873_s11 }
  0x68   :  { %p7880_p4 = por %p7879_p3, %p7878_p2 }
  0x6a   :  { %p7881_p5 = pnand %p7880_p4, %p7874_p1 }
  0x6c   :  { %7884 = shalt.err (!%p7881_p5)
}
  0x6d   :  { %112 = dma.hbm_to_vmem [thread:$0]  %s9991_s15, 32, %s107_s17, [#allocation9], %s10052_s24, %s10052_s24, %s7942_s1  }
  0x6e   :  { %s7885_s30 = scalar_lea.hbm %s9995_s19, 8192 }
  0x6f   :  { %p7886_p6 = scmp.ne.s32.totalorder %s9995_s19, %s7885_s30  ;;  %p7889_p7 = scmp.lt.u32.totalorder %s7885_s30, %s9995_s19 }
  0x71   :  { %p7891_p8 = pnand %p7889_p7, %p7886_p6 }
  0x73   :  { %7894 = shalt.err (!%p7891_p8)
}
  0x74   :  { %s7895_s3 = scalar_lea.vmem %s135_s9, 8192  ;;  %p7900_p10 = scmp.lt.s32.totalorder %s135_s9, %s135_s9 }
  0x75   :  { %p7896_p9 = scmp.ne.s32.totalorder %s135_s9, %s7895_s3  ;;  %p7901_p11 = scmp.lt.s32.totalorder %s7895_s3, %s7895_s3 }
  0x77   :  { %p7902_p12 = por %p7901_p11, %p7900_p10 }
  0x79   :  { %p7903_p13 = pnand %p7902_p12, %p7896_p9 }
  0x7b   :  { %7906 = shalt.err (!%p7903_p13)
}
  0x7c   :  { %140 = dma.hbm_to_vmem [thread:$0]  %s9995_s19, 8192, %s135_s9, [#allocation12], %s7944_s13, %s7944_s13, %s7945_s27  }
  0x7d   :  { %7929 = dma.done.wait [#allocation3], 32  }
  0x7e   :  { %7930 = vsyncadd [#allocation3], 4294967264 }
  0x7f   :  { %7931 = dma.done.wait [#allocation6], 64  }
  0x80   :  { %7932 = vsyncadd [#allocation6], 4294967232 }
  0x81   :  { %7933 = dma.done.wait [#allocation9], 64  }
  0x82   :  { %7934 = vsyncadd [#allocation9], 4294967232 }
  0x83   :  { %7935 = dma.done.wait [#allocation12], 16384  }
  0x84   :  { %7936 = vsyncadd [#allocation12], 4294950912  ;;  %v10012_v0 = vmov 0   ;;  %s10053_s29 = sld [smem:[#allocation37_spill]]  ;;  %s10054_s26 = sld [smem:[#allocation40_spill]]  ;;  %v10014_v10 = vmov 0.0   ;;  %v167_v17 = vlaneseq }
  0x85   :  { %7174 = vset.pattern.permute.xlu0 %v10012_v0  ;;  %6456 = vmatprep.subr.bf16.mxu1 %v10014_v10  ;;  %v7415_v15 = vld [vmem:[%s9982_s6] sm:$0xff]   ;;  %vm10009_vm0 = vcmask 523264   ;;  %v7416_v23 = vld [vmem:[%s9982_s6 + $0x8] sm:$0xff]   ;;  %vm7952_vm3 = vmmov 0   ;;  %s10055_s9 = sld [smem:[#allocation42_spill]]  ;;  %s7953_s22 = smov 32  }
  0x86   :  { %6457 = vmatpush3.bf16.msra.mxu1 %v7415_v15  ;;  %v168_v18 = vand.u32 127, %v167_v17  ;;  %6460 = vmatprep.mubr.msk.bf16.mxu1 %vm7952_vm3, %v10014_v10  ;;  %s10056_s11 = sld [smem:[#allocation39_spill]]  ;;  %vm10026_vm4 = vcmask 261120   ;;  %v5971_v57 = vld [vmem:[#allocation2] ss:$0 sm:$0xff]  ;;  %s7954_s13 = smov 96  }
  0x87   :  { %6458 = vmatprep.subr.bf16.mxu1 %v10014_v10  ;;  %vm8466_vm5 = vmpackc.low %vm10026_vm4, %vm10026_vm4  ;;  %s10071_s30 = sld [smem:[#allocation41_spill]]  ;;  %vm10023_vm6 = vcmask 654848   ;;  %vm676_vm7 = vcmask 130048   ;;  %vm10022_vm8 = vcmask 786048   ;;  %vm10021_vm9 = vcmask 261248   ;;  %s7955_s23 = smov 112  }
  0x88   :  { %vm10024_vm10 = vcmask 917248   ;;  %vm10020_vm11 = vcmask 392448   ;;  %vm10025_vm12 = vcmask 523648   ;;  %vm10011_vm13 = vcmask 1048448   ;;  %s7956_s2 = smov 80   ;;  %s7957_s3 = smov 48  }
  0x89   :  { %vm10010_vm14 = vcmask 392192   ;;  %vm10008_vm15 = vcmask 654336   ;;  %s10072_s7 = sld [smem:[#allocation38_spill]]  ;;  %s7958_s19 = smov [#allocation14]  }
  0x8a   :  { %v165_v1 = vld [vmem:[%s10053_s29] sm:$0xff]  ;;  %v182_v3 = vld [vmem:[%s10054_s26 + $0x8] sm:$0xff]  ;;  %v183_v4 = vld [vmem:[%s10054_s26 + $0x10] sm:$0xff]  ;;  %6459 = vmatpush3.bf16.msra.mxu1 %v7416_v23  ;;  %s5950_s4 = sshll.u32 %s7958_s19, 4  ;;  %s5951_s4 = int_to_ptr.vmem [resolvable:$true] %s5950_s4 }
  0x8b   :  { %v181_v2 = vld [vmem:[%s10054_s26] sm:$0xff]  ;;  %170 = vperm.xlu0 %7174, %v165_v1   ;;  %v184_v5 = vld [vmem:[%s10054_s26 + $0x18] sm:$0xff]  ;;  %v166_v6 = vld [vmem:[%s10053_s29 + $0x8] sm:$0xff]  ;;  %p7912_p1 = scmp.lt.s32.totalorder %s5951_s4, %s5951_s4 }
  0x8c   :  { %v6816_v7 = vpack.c.bf16 %v182_v3, %v181_v2  ;;  %v6820_v8 = vpack.c.bf16 %v184_v5, %v183_v4  ;;  %v185_v9 = vld [vmem:[%s10054_s26 + $0x20] sm:$0xff]  ;;  %v186_v11 = vld [vmem:[%s10054_s26 + $0x28] sm:$0xff]  ;;  %v187_v12 = vld [vmem:[%s10054_s26 + $0x30] sm:$0xff] }
  0x8d   :  { %v6824_v13 = vpack.c.bf16 %v186_v11, %v185_v9  ;;  %v188_v14 = vld [vmem:[%s10054_s26 + $0x38] sm:$0xff]  ;;  %v8232_v24 = vld [vmem:[%s10055_s9] sm:$0xff]  ;;  %v8237_v25 = vld [vmem:[%s10055_s9 + $0x10] sm:$0xff] }
  0x8e   :  { %6817 = vmatprep.subr.bf16.mxu0 %v6816_v7  ;;  %v6828_v16 = vpack.c.bf16 %v188_v14, %v187_v12  ;;  %387 = vrot.lane.b32.xlu1 %v8232_v24, %s7953_s22  ;;  %v8246_v26 = vld [vmem:[%s10055_s9 + $0x8] sm:$0xff]  ;;  %v8251_v27 = vld [vmem:[%s10055_s9 + $0x20] sm:$0xff]  ;;  %v8260_v28 = vld [vmem:[%s10055_s9 + $0x18] sm:$0xff] }
  0x8f   :  { %173 = vperm.xlu0 %7174, %v166_v6   ;;  %6819 = vmatpush3.bf16.msra.mxu0 %v6816_v7  ;;  %v8265_v29 = vld [vmem:[%s10055_s9 + $0x30] sm:$0xff]  ;;  %v8274_v30 = vld [vmem:[%s10055_s9 + $0x28] sm:$0xff]  ;;  %v8279_v31 = vld [vmem:[%s10055_s9 + $0x40] sm:$0xff] }
  0x90   :  { %6821 = vmatprep.subr.bf16.mxu0 %v6820_v8  ;;  %v8288_v32 = vld [vmem:[%s10055_s9 + $0x38] sm:$0xff]  ;;  %v8293_v33 = vld [vmem:[%s10055_s9 + $0x50] sm:$0xff]  ;;  %v8302_v34 = vld [vmem:[%s10055_s9 + $0x48] sm:$0xff] }
  0x91   :  { %v8307_v35 = vld [vmem:[%s10055_s9 + $0x60] sm:$0xff]  ;;  %v8316_v36 = vld [vmem:[%s10055_s9 + $0x58] sm:$0xff]  ;;  %v8321_v37 = vld [vmem:[%s10055_s9 + $0x70] sm:$0xff] }
  0x92   :  { %389 = vrot.lane.b32.xlu1 %v8246_v26, %s7953_s22  ;;  %v8330_v38 = vld [vmem:[%s10055_s9 + $0x68] sm:$0xff]  ;;  %v8337_v39 = vld [vmem:[%s10055_s9 + $0x78] sm:$0xff]  ;;  %v189_v41 = vld [vmem:[%s10056_s11] sm:$0xff] }
  0x93   :  { %6823 = vmatpush3.bf16.msra.mxu0 %v6820_v8  ;;  %391 = vrot.lane.b32.xlu0 %v8237_v25, %s7953_s22  ;;  %v190_v40 = vld [vmem:[%s10056_s11 + $0x8] sm:$0xff] }
  0x94   :  { %6825 = vmatprep.subr.bf16.mxu0 %v6824_v13 }
  0x96   :  { %393 = vrot.lane.b32.xlu1 %v8260_v28, %s7953_s22 }
  0x97   :  { %6827 = vmatpush3.bf16.msra.mxu0 %v6824_v13  ;;  %395 = vrot.lane.b32.xlu0 %v8251_v27, %s7953_s22 }
  0x98   :  { %6829 = vmatprep.subr.bf16.mxu0 %v6828_v16 }
  0x9a   :  { %397 = vrot.lane.b32.xlu1 %v8274_v30, %s7953_s22 }
  0x9b   :  { %6831 = vmatpush3.bf16.msra.mxu0 %v6828_v16  ;;  %399 = vrot.lane.b32.xlu0 %v8265_v29, %s7953_s22 }
  0x9e   :  { %401 = vrot.lane.b32.xlu1 %v8288_v32, %s7953_s22 }
  0x9f   :  { %403 = vrot.lane.b32.xlu0 %v8279_v31, %s7953_s22 }
  0xa2   :  { %405 = vrot.lane.b32.xlu1 %v8302_v34, %s7953_s22 }
  0xa3   :  { %407 = vrot.lane.b32.xlu0 %v8293_v33, %s7953_s22 }
  0xa6   :  { %409 = vrot.lane.b32.xlu1 %v8316_v36, %s7953_s22 }
  0xa7   :  { %411 = vrot.lane.b32.xlu0 %v8307_v35, %s7953_s22 }
  0xaa   :  { %413 = vrot.lane.b32.xlu1 %v8330_v38, %s7953_s22 }
  0xab   :  { %415 = vrot.lane.b32.xlu0 %v8321_v37, %s7953_s22 }
  0xae   :  { %417 = vrot.lane.b32.xlu1 %v8337_v39, %s7953_s22 }
 0x100   :  { %v8354_v47 = vpop.permute.xlu1 %387 }
 0x104   :  { %v8356_v48 = vpop.permute.xlu1 %389 }
 0x108   :  { %v8358_v49 = vpop.permute.xlu1 %393 }
 0x10a   :  { %v171_v19 = vpop.permute.xlu0 %170 }
 0x10b   :  { %vm175_vm1 = vcmp.eq.s32.totalorder %v168_v18, %v171_v19 }
 0x10c   :  { %v5965_v20 = vsel %vm175_vm1, 1.0, %v10014_v10  ;;  %v8362_v51 = vpop.permute.xlu1 %397  ;;  %vm10007_vm1 = vcmask 785408  }
 0x10d   :  { %6453 = vmatprep.mubr.msk.f32.mxu0 %vm10009_vm0, %v5965_v20 }
 0x10e   :  { %v174_v21 = vpop.permute.xlu0 %173 }
 0x10f   :  { %vm176_vm2 = vcmp.eq.s32.totalorder %v168_v18, %v174_v21 }
 0x110   :  { %v5966_v22 = vsel %vm176_vm2, 1.0, %v10014_v10  ;;  %v8366_v53 = vpop.permute.xlu1 %401  ;;  %vm10006_vm2 = vcmask 916480  }
 0x111   :  { %6454 = vmatmul.mubr.msk.f32.vlgmr.msra.gmra.mrb[0].mxu0 %vm10009_vm0, %v5966_v22 }
 0x112   :  { %v8360_v50 = vpop.permute.xlu0 %391 }
 0x114   :  { %v8370_v55 = vpop.permute.xlu1 %405 }
 0x116   :  { %v8364_v52 = vpop.permute.xlu0 %395 }
 0x118   :  { %v8374_v58 = vpop.permute.xlu1 %409 }
 0x11a   :  { %v8368_v54 = vpop.permute.xlu0 %399 }
 0x11c   :  { %v8392_v7 = vpop.permute.xlu1 %413 }
 0x11e   :  { %v8372_v56 = vpop.permute.xlu0 %403 }
 0x120   :  { %v8410_v21 = vpop.permute.xlu1 %417 }
 0x122   :  { %v8378_v62 = vpop.permute.xlu0 %407 }
 0x126   :  { %v8398_v13 = vpop.permute.xlu0 %411 }
 0x1e4   :  { %v6455_v42 = vpop.f32.mrb[0].mxu0 }
 0x1e5   :  { %v8347_v43 = vadd.f32 %v6455_v42, %v190_v40  ;;  %v264_v44 = vpop.f32.mrb[1].mxu0  ;;  %v8418_v40 = vpop.permute.xlu0 %415 }
 0x1e6   :  { %v8349_v45 = vadd.f32 %v264_v44, %v189_v41 }
 0x1e8   :  { %v302_v46 = vpack.c.bf16 %v8347_v43, %v8349_v45 }
 0x1ea   :  { %6461 = vmatmul.mubr.msk.bf16.vlgmr.msra.gmra.mrb[0].mxu1 %vm10026_vm4, %v302_v46 }
 0x2bd   :  { %v359_v59 = vpop.f32.mrb[0].mxu1 }
 0x2be   :  { %v8376_v60 = vadd.f32 %v5971_v57, %v359_v59  ;;  %v6462_v61 = vpop.f32.mrb[1].mxu1 }
 0x2bf   :  { %v362_v63 = vpop.f32.mrb[2].mxu1 }
 0x2c0   :  { %v8380_v1 = vadd.f32 %v5971_v57, %v362_v63  ;;  %v6463_v2 = vpop.f32.mrb[3].mxu1  ;;  %6496 = vmatprep.mubr.msk.f32.mxu1 %vm10026_vm4, %v8376_v60  ;;  %v435_v3 = vmul.f32 %v8354_v47, %v8376_v60  ;;  %v437_v5 = vmul.f32 %v8360_v50, %v8376_v60  ;;  %v439_v14 = vmul.f32 %v8364_v52, %v8376_v60 }
 0x2c1   :  { %v441_v15 = vmul.f32 %v8368_v54, %v8376_v60  ;;  %v443_v22 = vmul.f32 %v8372_v56, %v8376_v60  ;;  %v445_v23 = vmul.f32 %v8378_v62, %v8376_v60  ;;  %v447_v57 = vmul.f32 %v8398_v13, %v8376_v60 }
 0x2c2   :  { %v436_v4 = vmul.f32 %v8356_v48, %v8380_v1  ;;  %v438_v6 = vmul.f32 %v8358_v49, %v8380_v1  ;;  %v440_v11 = vmul.f32 %v8362_v51, %v8380_v1  ;;  %v442_v12 = vmul.f32 %v8366_v53, %v8380_v1 }
 0x2c3   :  { %v444_v19 = vmul.f32 %v8370_v55, %v8380_v1  ;;  %v446_v20 = vmul.f32 %v8374_v58, %v8380_v1  ;;  %v448_v44 = vmul.f32 %v8392_v7, %v8380_v1  ;;  %v450_v46 = vmul.f32 %v8410_v21, %v8380_v1 }
 0x2c4   :  { %v7175_v8 = vpack.i.bf16 %v436_v4, %v435_v3  ;;  %v7180_v9 = vpack.i.bf16 %v438_v6, %v437_v5  ;;  %v7185_v16 = vpack.i.bf16 %v440_v11, %v439_v14  ;;  %v7190_v18 = vpack.i.bf16 %v442_v12, %v441_v15 }
 0x2c5   :  { %v7195_v41 = vpack.i.bf16 %v444_v19, %v443_v22  ;;  %v7200_v42 = vpack.i.bf16 %v446_v20, %v445_v23  ;;  %v449_v59 = vmul.f32 %v8418_v40, %v8376_v60  ;;  %v7205_v61 = vpack.i.bf16 %v448_v44, %v447_v57 }
 0x2c6   :  { %7176 = vrot.lane.b32.xlu0 %v7175_v8, %s7954_s13  ;;  %7181 = vrot.lane.b32.xlu1 %v7180_v9, %s7954_s13 }
 0x2c7   :  { %v7210_v63 = vpack.i.bf16 %v450_v46, %v449_v59 }
 0x2ca   :  { %7186 = vrot.lane.b32.xlu0 %v7185_v16, %s7954_s13  ;;  %7191 = vrot.lane.b32.xlu1 %v7190_v18, %s7954_s13 }
 0x2ce   :  { %7196 = vrot.lane.b32.xlu0 %v7195_v41, %s7954_s13  ;;  %7201 = vrot.lane.b32.xlu1 %v7200_v42, %s7954_s13 }
 0x2d2   :  { %7206 = vrot.lane.b32.xlu0 %v7205_v61, %s7954_s13  ;;  %7211 = vrot.lane.b32.xlu1 %v7210_v63, %s7954_s13 }
 0x2d6   :  { %451 = vrot.lane.b32.xlu0 %v8232_v24, %s7945_s27  ;;  %453 = vrot.lane.b32.xlu1 %v8246_v26, %s7945_s27 }
 0x2da   :  { %455 = vrot.lane.b32.xlu0 %v8237_v25, %s7945_s27  ;;  %457 = vrot.lane.b32.xlu1 %v8260_v28, %s7945_s27 }
 0x2de   :  { %459 = vrot.lane.b32.xlu0 %v8251_v27, %s7945_s27  ;;  %461 = vrot.lane.b32.xlu1 %v8274_v30, %s7945_s27  ;;  %v10057_v30 = vmov 0 }
 0x2df   :  { %v10058_v30 = vsel %vm8466_vm5, 4294967295, %v10057_v30 }
 0x2e0   :  { %10059 = vst [vmem:[#allocation20_spill] sm:$0xff] %v10058_v30  ;;  %v9146_v30 = vld [vmem:[#allocation13 + $0xd0] sm:$0xff] }
 0x2e2   :  { %463 = vrot.lane.b32.xlu0 %v8265_v29, %s7945_s27  ;;  %465 = vrot.lane.b32.xlu1 %v8288_v32, %s7945_s27 }
 0x2e6   :  { %467 = vrot.lane.b32.xlu0 %v8279_v31, %s7945_s27  ;;  %469 = vrot.lane.b32.xlu1 %v8302_v34, %s7945_s27 }
 0x2ea   :  { %471 = vrot.lane.b32.xlu0 %v8293_v33, %s7945_s27  ;;  %473 = vrot.lane.b32.xlu1 %v8316_v36, %s7945_s27 }
 0x2ee   :  { %475 = vrot.lane.b32.xlu0 %v8307_v35, %s7945_s27  ;;  %477 = vrot.lane.b32.xlu1 %v8330_v38, %s7945_s27 }
 0x2f2   :  { %479 = vrot.lane.b32.xlu0 %v8321_v37, %s7945_s27  ;;  %481 = vrot.lane.b32.xlu1 %v8337_v39, %s7945_s27 }
 0x338   :  { %v7182_v24 = vpop.permute.xlu1 %7181  ;;  %v7177_v25 = vpop.permute.xlu0 %7176 }
 0x339   :  { %v7184_v26 = vunpack.i.h.bf16 %v7182_v24  ;;  %v7183_v27 = vunpack.i.l.bf16 %v7182_v24  ;;  %v7179_v28 = vunpack.i.h.bf16 %v7177_v25  ;;  %v7178_v29 = vunpack.i.l.bf16 %v7177_v25 }
 0x33b   :  { %v6832_v31 = vpack.c.bf16 %v7179_v28, %v7178_v29  ;;  %v6838_v34 = vpack.c.bf16 %v7184_v26, %v7183_v27 }
 0x33c   :  { %v7192_v32 = vpop.permute.xlu1 %7191  ;;  %v7187_v33 = vpop.permute.xlu0 %7186 }
 0x33d   :  { %6834 = vmatprep.subr.msk.bf16.mxu1 %vm8466_vm5, %v6832_v31  ;;  %v7189_v37 = vunpack.i.h.bf16 %v7187_v33  ;;  %v7188_v38 = vunpack.i.l.bf16 %v7187_v33  ;;  %v7194_v6 = vunpack.i.h.bf16 %v7192_v32  ;;  %v7193_v8 = vunpack.i.l.bf16 %v7192_v32 }
 0x33e   :  { %6837 = vmatpush3.bf16.xpose.msk.msra.mxu1 %vm8466_vm5, %v6832_v31 }
 0x33f   :  { %6840 = vmatprep.subr.msk.bf16.mxu1 %vm8466_vm5, %v6838_v34  ;;  %v6844_v3 = vpack.c.bf16 %v7189_v37, %v7188_v38  ;;  %v6850_v16 = vpack.c.bf16 %v7194_v6, %v7193_v8 }
 0x340   :  { %v7202_v35 = vpop.permute.xlu1 %7201  ;;  %v7197_v36 = vpop.permute.xlu0 %7196 }
 0x341   :  { %v7199_v41 = vunpack.i.h.bf16 %v7197_v36  ;;  %v7198_v42 = vunpack.i.l.bf16 %v7197_v36  ;;  %v7204_v29 = vunpack.i.h.bf16 %v7202_v35  ;;  %v7203_v31 = vunpack.i.l.bf16 %v7202_v35 }
 0x343   :  { %v6856_v63 = vpack.c.bf16 %v7199_v41, %v7198_v42  ;;  %v6862_v36 = vpack.c.bf16 %v7204_v29, %v7203_v31 }
 0x344   :  { %v7212_v39 = vpop.permute.xlu1 %7211  ;;  %v7207_v2 = vpop.permute.xlu0 %7206 }
 0x345   :  { %v7209_v37 = vunpack.i.h.bf16 %v7207_v2  ;;  %v7208_v35 = vunpack.i.l.bf16 %v7207_v2  ;;  %v7213_v6 = vunpack.i.l.bf16 %v7212_v39 }
 0x346   :  { %6843 = vmatpush3.bf16.xpose.msk.msra.mxu1 %vm8466_vm5, %v6838_v34 }
 0x347   :  { %6846 = vmatprep.subr.msk.bf16.mxu1 %vm8466_vm5, %v6844_v3  ;;  %v6868_v38 = vpack.c.bf16 %v7209_v37, %v7208_v35 }
 0x348   :  { %v8480_v4 = vpop.permute.xlu1 %453  ;;  %v8482_v5 = vpop.permute.xlu0 %451 }
 0x349   :  { %10060 = vst [vmem:[#allocation21_spill] sm:$0xff] %v8482_v5  ;;  %v499_v9 = vmul.f32 %v8482_v5, %v8376_v60  ;;  %v500_v11 = vmul.f32 %v8480_v4, %v8380_v1 }
 0x34b   :  { %v7215_v12 = vpack.i.bf16 %v500_v11, %v499_v9 }
 0x34c   :  { %v8488_v14 = vpop.permute.xlu1 %457  ;;  %v8490_v15 = vpop.permute.xlu0 %455 }
 0x34d   :  { %7216 = vrot.lane.b32.xlu0 %v7215_v12, %s7945_s27  ;;  %v501_v18 = vmul.f32 %v8490_v15, %v8376_v60  ;;  %v502_v19 = vmul.f32 %v8488_v14, %v8380_v1 }
 0x34e   :  { %6849 = vmatpush3.bf16.xpose.msk.msra.mxu1 %vm8466_vm5, %v6844_v3  ;;  %v7214_v3 = vunpack.i.h.bf16 %v7212_v39 }
 0x34f   :  { %6852 = vmatprep.subr.msk.bf16.mxu1 %vm8466_vm5, %v6850_v16  ;;  %v7220_v20 = vpack.i.bf16 %v502_v19, %v501_v18 }
 0x350   :  { %v8501_v22 = vpop.permute.xlu1 %461  ;;  %v8503_v23 = vpop.permute.xlu0 %459  ;;  %v6874_v8 = vpack.c.bf16 %v7214_v3, %v7213_v6 }
 0x351   :  { %7221 = vrot.lane.b32.xlu1 %v7220_v20, %s7945_s27  ;;  %v503_v44 = vmul.f32 %v8503_v23, %v8376_v60  ;;  %v504_v46 = vmul.f32 %v8501_v22, %v8380_v1 }
 0x353   :  { %v7225_v57 = vpack.i.bf16 %v504_v46, %v503_v44 }
 0x354   :  { %v8510_v59 = vpop.permute.xlu1 %465  ;;  %v8512_v61 = vpop.permute.xlu0 %463 }
 0x355   :  { %10061 = vst [vmem:[#allocation22_spill] sm:$0xff] %v8510_v59  ;;  %10062 = vst [vmem:[#allocation23_spill] sm:$0xff] %v8512_v61  ;;  %7226 = vrot.lane.b32.xlu1 %v7225_v57, %s7945_s27  ;;  %v505_v24 = vmul.f32 %v8512_v61, %v8376_v60  ;;  %v506_v25 = vmul.f32 %v8510_v59, %v8380_v1  ;;  %v9144_v59 = vld [vmem:[#allocation13 + $0x90] sm:$0xff] }
 0x356   :  { %6855 = vmatpush3.bf16.xpose.msk.msra.mxu1 %vm8466_vm5, %v6850_v16 }
 0x357   :  { %6858 = vmatprep.subr.msk.bf16.mxu1 %vm8466_vm5, %v6856_v63  ;;  %v7230_v26 = vpack.i.bf16 %v506_v25, %v505_v24 }
 0x358   :  { %v8523_v27 = vpop.permute.xlu1 %469  ;;  %v8525_v28 = vpop.permute.xlu0 %467 }
 0x359   :  { %10063 = vst [vmem:[#allocation24_spill] sm:$0xff] %v8523_v27  ;;  %10064 = vst [vmem:[#allocation25_spill] sm:$0xff] %v8525_v28  ;;  %7231 = vrot.lane.b32.xlu1 %v7230_v26, %s7945_s27  ;;  %v507_v32 = vmul.f32 %v8525_v28, %v8376_v60  ;;  %v508_v33 = vmul.f32 %v8523_v27, %v8380_v1 }
 0x35b   :  { %v7235_v34 = vpack.i.bf16 %v508_v33, %v507_v32 }
 0x35c   :  { %v8549_v2 = vpop.permute.xlu0 %471  ;;  %v8551_v9 = vpop.permute.xlu1 %473 }
 0x35d   :  { %7236 = vrot.lane.b32.xlu1 %v7235_v34, %s7945_s27  ;;  %10065 = vst [vmem:[#allocation26_spill] sm:$0xff] %v8549_v2  ;;  %10066 = vst [vmem:[#allocation27_spill] sm:$0xff] %v8551_v9 }
 0x35e   :  { %6861 = vmatpush3.bf16.xpose.msk.msra.mxu1 %vm8466_vm5, %v6856_v63 }
 0x35f   :  { %6864 = vmatprep.subr.msk.bf16.mxu1 %vm8466_vm5, %v6862_v36 }
 0x360   :  { %v8553_v11 = vpop.permute.xlu0 %475  ;;  %v8555_v39 = vpop.permute.xlu1 %477 }
 0x361   :  { %10067 = vst [vmem:[#allocation28_spill] sm:$0xff] %v8553_v11  ;;  %10068 = vst [vmem:[#allocation29_spill] sm:$0xff] %v8555_v39 }
 0x364   :  { %v8557_v12 = vpop.permute.xlu0 %479  ;;  %v8559_v16 = vpop.permute.xlu1 %481 }
 0x365   :  { %10069 = vst [vmem:[#allocation30_spill] sm:$0xff] %v8557_v12  ;;  %10070 = vst [vmem:[#allocation31_spill] sm:$0xff] %v8559_v16 }
 0x366   :  { %6867 = vmatpush3.bf16.xpose.msk.msra.mxu1 %vm8466_vm5, %v6862_v36 }
 0x367   :  { %6870 = vmatprep.subr.msk.bf16.mxu1 %vm8466_vm5, %v6868_v38 }
 0x36e   :  { %6873 = vmatpush3.bf16.xpose.msk.msra.mxu1 %vm8466_vm5, %v6868_v38  ;;  %v292_v38 = vld [vmem:[%s10071_s30 + $0x8] sm:$0xff] }
 0x36f   :  { %6876 = vmatprep.subr.msk.bf16.mxu1 %vm8466_vm5, %v6874_v8 }
 0x376   :  { %6879 = vmatpush3.bf16.xpose.msk.msra.mxu1 %vm8466_vm5, %v6874_v8 }
 0x37d   :  { %6497 = vmatmul.mubr.msk.f32.vlgmr.msra.gmra.mrb[4].mxu1 %vm10026_vm4, %v8380_v1 }
 0x3bf   :  { %v7217_v18 = vpop.permute.xlu0 %7216 }
 0x3c0   :  { %v7219_v19 = vunpack.i.h.bf16 %v7217_v18  ;;  %v7218_v20 = vunpack.i.l.bf16 %v7217_v18 }
 0x3c2   :  { %v6880_v41 = vpack.c.bf16 %v7219_v19, %v7218_v20 }
 0x3c3   :  { %v7222_v42 = vpop.permute.xlu1 %7221 }
 0x3c4   :  { %v7224_v44 = vunpack.i.h.bf16 %v7222_v42  ;;  %v7223_v46 = vunpack.i.l.bf16 %v7222_v42  ;;  %6881 = vmatprep.subr.bf16.mxu0 %v6880_v41 }
 0x3c5   :  { %6883 = vmatpush3.bf16.msra.mxu0 %v6880_v41 }
 0x3c6   :  { %v6884_v57 = vpack.c.bf16 %v7224_v44, %v7223_v46 }
 0x3c7   :  { %v7227_v63 = vpop.permute.xlu1 %7226 }
 0x3c8   :  { %v7229_v24 = vunpack.i.h.bf16 %v7227_v63  ;;  %v7228_v25 = vunpack.i.l.bf16 %v7227_v63  ;;  %6885 = vmatprep.subr.bf16.mxu0 %v6884_v57 }
 0x3c9   :  { %6887 = vmatpush3.bf16.msra.mxu0 %v6884_v57  ;;  %v291_v57 = vld [vmem:[%s10071_s30] sm:$0xff] }
 0x3ca   :  { %v6888_v26 = vpack.c.bf16 %v7229_v24, %v7228_v25 }
 0x3cb   :  { %v7232_v29 = vpop.permute.xlu1 %7231 }
 0x3cc   :  { %v7234_v31 = vunpack.i.h.bf16 %v7232_v29  ;;  %v7233_v32 = vunpack.i.l.bf16 %v7232_v29  ;;  %6889 = vmatprep.subr.bf16.mxu0 %v6888_v26  ;;  %v512_v29 = vmul.f32 %v8555_v39, %v8380_v1 }
 0x3cd   :  { %6891 = vmatpush3.bf16.msra.mxu0 %v6888_v26  ;;  %v511_v26 = vmul.f32 %v8553_v11, %v8376_v60 }
 0x3ce   :  { %v6892_v33 = vpack.c.bf16 %v7234_v31, %v7233_v32  ;;  %v509_v32 = vmul.f32 %v8549_v2, %v8376_v60 }
 0x3cf   :  { %v7237_v34 = vpop.permute.xlu1 %7236  ;;  %v7245_v31 = vpack.i.bf16 %v512_v29, %v511_v26 }
 0x3d0   :  { %v7239_v36 = vunpack.i.h.bf16 %v7237_v34  ;;  %v7238_v37 = vunpack.i.l.bf16 %v7237_v34  ;;  %6893 = vmatprep.subr.bf16.mxu0 %v6892_v33 }
 0x3d1   :  { %6895 = vmatpush3.bf16.msra.mxu0 %v6892_v33  ;;  %v510_v33 = vmul.f32 %v8551_v9, %v8380_v1 }
 0x3d2   :  { %v6896_v35 = vpack.c.bf16 %v7239_v36, %v7238_v37 }
 0x3d3   :  { %v7240_v34 = vpack.i.bf16 %v510_v33, %v509_v32 }
 0x3d4   :  { %6897 = vmatprep.subr.bf16.mxu0 %v6896_v35 }
 0x3d5   :  { %6899 = vmatpush3.bf16.msra.mxu0 %v6896_v35 }
 0x450   :  { %v6498_v3 = vpop.f32.mrb[4].mxu1 }
 0x451   :  { %v8564_v6 = vadd.f32 %v6498_v3, %v292_v38  ;;  %v667_v8 = vpop.f32.mrb[5].mxu1 }
 0x452   :  { %v8583_v63 = vadd.f32 %v667_v8, %v291_v57 }
 0x453   :  { %v788_v18 = vsel %vm10023_vm6, %v8564_v6, -inf  ;;  %v680_v19 = vsel %vm676_vm7, %v8564_v6, -inf  ;;  %v817_v20 = vsel %vm10022_vm8, %v8564_v6, -inf  ;;  %v701_v41 = vsel %vm10021_vm9, %v8564_v6, -inf }
 0x454   :  { %789 = vmax.xlane.f32.xlu1 %v788_v18  ;;  %681 = vmax.xlane.f32.xlu0 %v680_v19  ;;  %v846_v42 = vsel %vm10024_vm10, %v8564_v6, -inf  ;;  %v730_v44 = vsel %vm10020_vm11, %v8564_v6, -inf  ;;  %v759_v46 = vsel %vm10025_vm12, %v8564_v6, -inf  ;;  %v875_v24 = vsel %vm10011_vm13, %v8564_v6, -inf }
 0x455   :  { %v677_v25 = vsel %vm676_vm7, %v8583_v63, -inf  ;;  %v698_v36 = vsel %vm10021_vm9, %v8583_v63, -inf  ;;  %v727_v37 = vsel %vm10020_vm11, %v8583_v63, -inf  ;;  %v756_v35 = vsel %vm10025_vm12, %v8583_v63, -inf }
 0x456   :  { %v785_v38 = vsel %vm10023_vm6, %v8583_v63, -inf  ;;  %v814_v3 = vsel %vm10022_vm8, %v8583_v63, -inf  ;;  %v843_v8 = vsel %vm10024_vm10, %v8583_v63, -inf  ;;  %v872_v18 = vsel %vm10011_vm13, %v8583_v63, -inf }
 0x457   :  { %v513_v19 = vmul.f32 %v8557_v12, %v8376_v60  ;;  %vm935_vm13 = vcmask 228352  }
 0x458   :  { %818 = vmax.xlane.f32.xlu1 %v817_v20  ;;  %702 = vmax.xlane.f32.xlu0 %v701_v41  ;;  %v514_v20 = vmul.f32 %v8559_v16, %v8380_v1 }
 0x45a   :  { %v7250_v41 = vpack.i.bf16 %v514_v20, %v513_v19 }
 0x45c   :  { %847 = vmax.xlane.f32.xlu1 %v846_v42  ;;  %731 = vmax.xlane.f32.xlu0 %v730_v44 }
 0x460   :  { %760 = vmax.xlane.f32.xlu0 %v759_v46 }
 0x464   :  { %876 = vmax.xlane.f32.xlu0 %v875_v24 }
 0x468   :  { %678 = vmax.xlane.f32.xlu0 %v677_v25 }
 0x46d   :  { %7246 = vrot.lane.b32.xlu1 %v7245_v31, %s7945_s27 }
 0x47e   :  { %7241 = vrot.lane.b32.xlu0 %v7240_v34, %s7945_s27 }
 0x491   :  { %699 = vmax.xlane.f32.xlu1 %v698_v36 }
 0x495   :  { %728 = vmax.xlane.f32.xlu1 %v727_v37 }
 0x499   :  { %757 = vmax.xlane.f32.xlu1 %v756_v35 }
 0x49d   :  { %786 = vmax.xlane.f32.xlu1 %v785_v38 }
 0x4a1   :  { %815 = vmax.xlane.f32.xlu1 %v814_v3 }
 0x4a5   :  { %844 = vmax.xlane.f32.xlu1 %v843_v8 }
 0x4a9   :  { %873 = vmax.xlane.f32.xlu1 %v872_v18 }
 0x4ba   :  { %7251 = vrot.lane.b32.xlu1 %v7250_v41, %s7945_s27 }
 0x4e1   :  { %v682_v42 = vpop.xlane.xlu0 %681  ;;  %v790_v44 = vpop.xlane.xlu1 %789 }
 0x4e2   :  { %v684_v57 = vsub.f32 %v8564_v6, %v682_v42  ;;  %v792_v60 = vsub.f32 %v8564_v6, %v790_v44 }
 0x4e4   :  { %v687_v31 = vmul.f32 1.442695, %v684_v57  ;;  %v795_v37 = vmul.f32 1.442695, %v792_v60 }
 0x4e5   :  { %v703_v46 = vpop.xlane.xlu0 %702  ;;  %v819_v26 = vpop.xlane.xlu1 %818 }
 0x4e6   :  { %v705_v24 = vsub.f32 %v8564_v6, %v703_v46  ;;  %v821_v1 = vsub.f32 %v8564_v6, %v819_v26 }
 0x4e8   :  { %v708_v25 = vmul.f32 1.442695, %v705_v24  ;;  %v824_v35 = vmul.f32 1.442695, %v821_v1 }
 0x4e9   :  { %v732_v29 = vpop.xlane.xlu0 %731  ;;  %v848_v38 = vpop.xlane.xlu1 %847 }
 0x4ea   :  { %v734_v32 = vsub.f32 %v8564_v6, %v732_v29  ;;  %7435 = vpow2.f32 %v708_v25 }
 0x4eb   :  { %7437 = vpow2.f32 %v687_v31 }
 0x4ec   :  { %v737_v33 = vmul.f32 1.442695, %v734_v32 }
 0x4ed   :  { %v761_v34 = vpop.xlane.xlu0 %760  ;;  %v7247_v20 = vpop.permute.xlu1 %7246 }
 0x4ee   :  { %v763_v36 = vsub.f32 %v8564_v6, %v761_v34  ;;  %7439 = vpow2.f32 %v737_v33  ;;  %v7249_v44 = vunpack.i.h.bf16 %v7247_v20  ;;  %v7248_v24 = vunpack.i.l.bf16 %v7247_v20 }
 0x4ef   :  { %v850_v20 = vsub.f32 %v8564_v6, %v848_v38 }
 0x4f0   :  { %v766_v3 = vmul.f32 1.442695, %v763_v36  ;;  %v6904_v34 = vpack.c.bf16 %v7249_v44, %v7248_v24 }
 0x4f1   :  { %v877_v8 = vpop.xlane.xlu0 %876 }
 0x4f2   :  { %7441 = vpow2.f32 %v766_v3  ;;  %v879_v24 = vsub.f32 %v8564_v6, %v877_v8 }
 0x4f3   :  { %7443 = vpow2.f32 %v795_v37 }
 0x4f4   :  { %7445 = vpow2.f32 %v824_v35  ;;  %v7436_v18 = vpop.eup %7435 }
 0x4f5   :  { %v679_v19 = vpop.xlane.xlu0 %678  ;;  %714 = vrot.lane.b32.xlu1 %v7436_v18, %s7955_s23  ;;  %v8625_v41 = vpop.eup %7437 }
 0x4f6   :  { %v901_v57 = vsel %vm676_vm7, %v8625_v41, %v7436_v18 }
 0x4f8   :  { %v7440_v42 = vpop.eup %7439 }
 0x4f9   :  { %v7242_v46 = vpop.permute.xlu0 %7241  ;;  %743 = vrot.lane.b32.xlu1 %v7440_v42, %s7954_s13  ;;  %v903_v29 = vsel %vm10026_vm4, %v901_v57, %v7440_v42  ;;  %v853_v57 = vmul.f32 1.442695, %v850_v20 }
 0x4fa   :  { %v7244_v25 = vunpack.i.h.bf16 %v7242_v46  ;;  %v7243_v26 = vunpack.i.l.bf16 %v7242_v46 }
 0x4fc   :  { %v7442_v31 = vpop.eup %7441  ;;  %v6900_v32 = vpack.c.bf16 %v7244_v25, %v7243_v26 }
 0x4fd   :  { %v7444_v60 = vpop.eup %7443  ;;  %v906_v1 = vsel %vm10010_vm14, %v903_v29, %v7442_v31  ;;  %772 = vrot.lane.b32.xlu1 %v7442_v31, %s7956_s2  ;;  %v882_v31 = vmul.f32 1.442695, %v879_v24 }
 0x4fe   :  { %v7446_v33 = vpop.eup %7445  ;;  %6901 = vmatprep.subr.bf16.mxu0 %v6900_v32  ;;  %v908_v36 = vsel %vm10009_vm0, %v906_v1, %v7444_v60  ;;  %v683_v1 = vsub.f32 %v8583_v63, %v679_v19 }
 0x4ff   :  { %6903 = vmatpush3.bf16.msra.mxu0 %v6900_v32  ;;  %v8635_v37 = vsel %vm10008_vm15, %v908_v36, %v7446_v33 }
 0x500   :  { %6905 = vmatprep.subr.bf16.mxu0 %v6904_v34  ;;  %v685_v36 = vmul.f32 1.442695, %v683_v1 }
 0x501   :  { %801 = vrot.lane.b32.xlu1 %v7444_v60, %s7945_s27 }
 0x503   :  { %6907 = vmatpush3.bf16.msra.mxu0 %v6904_v34 }
 0x505   :  { %830 = vrot.lane.b32.xlu1 %v7446_v33, %s7957_s3 }
 0x51e   :  { %v700_v35 = vpop.xlane.xlu1 %699 }
 0x51f   :  { %v704_v3 = vsub.f32 %v8583_v63, %v700_v35 }
 0x521   :  { %v706_v18 = vmul.f32 1.442695, %v704_v3 }
 0x522   :  { %v729_v42 = vpop.xlane.xlu1 %728 }
 0x523   :  { %7447 = vpow2.f32 %v706_v18  ;;  %v733_v44 = vsub.f32 %v8583_v63, %v729_v42 }
 0x525   :  { %v735_v46 = vmul.f32 1.442695, %v733_v44 }
 0x526   :  { %v758_v25 = vpop.xlane.xlu1 %757 }
 0x527   :  { %7449 = vpow2.f32 %v735_v46  ;;  %v762_v26 = vsub.f32 %v8583_v63, %v758_v25 }
 0x528   :  { %7451 = vpow2.f32 %v853_v57 }
 0x529   :  { %v764_v29 = vmul.f32 1.442695, %v762_v26 }
 0x52a   :  { %v787_v32 = vpop.xlane.xlu1 %786 }
 0x52b   :  { %7453 = vpow2.f32 %v764_v29  ;;  %v791_v60 = vsub.f32 %v8583_v63, %v787_v32 }
 0x52c   :  { %7455 = vpow2.f32 %v882_v31 }
 0x52d   :  { %v7448_v38 = vpop.eup %7447  ;;  %v793_v33 = vmul.f32 1.442695, %v791_v60 }
 0x52e   :  { %712 = vrot.lane.b32.xlu1 %v7448_v38, %s7955_s23  ;;  %v816_v34 = vpop.xlane.xlu1 %815 }
 0x52f   :  { %7457 = vpow2.f32 %v793_v33  ;;  %v820_v6 = vsub.f32 %v8583_v63, %v816_v34 }
 0x531   :  { %v7450_v8 = vpop.eup %7449  ;;  %v822_v35 = vmul.f32 1.442695, %v820_v6 }
 0x532   :  { %741 = vrot.lane.b32.xlu1 %v7450_v8, %s7954_s13  ;;  %v845_v3 = vpop.xlane.xlu1 %844  ;;  %v7452_v20 = vpop.eup %7451 }
 0x533   :  { %7459 = vpow2.f32 %v822_v35  ;;  %v849_v18 = vsub.f32 %v8583_v63, %v845_v3  ;;  %v914_v3 = vsel %vm10007_vm1, %v8635_v37, %v7452_v20 }
 0x534   :  { %7461 = vpow2.f32 %v685_v36 }
 0x535   :  { %v7454_v42 = vpop.eup %7453  ;;  %v851_v19 = vmul.f32 1.442695, %v849_v18 }
 0x536   :  { %859 = vrot.lane.b32.xlu1 %v7452_v20, %s7953_s22  ;;  %v874_v44 = vpop.xlane.xlu1 %873  ;;  %770 = vrot.lane.b32.xlu0 %v7454_v42, %s7956_s2  ;;  %v7456_v57 = vpop.eup %7455 }
 0x537   :  { %7463 = vpow2.f32 %v851_v19  ;;  %v878_v46 = vsub.f32 %v8583_v63, %v874_v44  ;;  %v917_v19 = vsel %vm10006_vm2, %v914_v3, %v7456_v57 }
 0x539   :  { %v7458_v24 = vpop.eup %7457  ;;  %v880_v25 = vmul.f32 1.442695, %v878_v46 }
 0x53a   :  { %888 = vrot.lane.b32.xlu1 %v7456_v57, %s10052_s24  ;;  %v7252_v26 = vpop.permute.xlu1 %7251  ;;  %799 = vrot.lane.b32.xlu0 %v7458_v24, %s7945_s27 }
 0x53b   :  { %7465 = vpow2.f32 %v880_v25  ;;  %v7254_v29 = vunpack.i.h.bf16 %v7252_v26  ;;  %v7253_v31 = vunpack.i.l.bf16 %v7252_v26 }
 0x53d   :  { %v7460_v32 = vpop.eup %7459  ;;  %v6908_v60 = vpack.c.bf16 %v7254_v29, %v7253_v31 }
 0x53e   :  { %828 = vrot.lane.b32.xlu0 %v7460_v32, %s7957_s3  ;;  %v7462_v1 = vpop.eup %7461 }
 0x53f   :  { %6909 = vmatprep.subr.bf16.mxu0 %v6908_v60  ;;  %v900_v63 = vsel %vm676_vm7, %v7462_v1, %v7448_v38  ;;  %v689_v37 = vsel %vm676_vm7, %v7462_v1, 0.0 }
 0x540   :  { %6911 = vmatpush3.bf16.msra.mxu0 %v6908_v60  ;;  %v902_v34 = vsel %vm10026_vm4, %v900_v63, %v7450_v8 }
 0x541   :  { %v7464_v33 = vpop.eup %7463  ;;  %6534 = vmatprep.subr.bf16.mxu0 %v10014_v10  ;;  %v905_v6 = vsel %vm10010_vm14, %v902_v34, %v7454_v42  ;;  %v692_v42 = vsel %vm676_vm7, %v8625_v41, 0.0  ;;  %vm932_vm14 = vcmask 195584  }
 0x542   :  { %857 = vrot.lane.b32.xlu0 %v7464_v33, %s7953_s22  ;;  %v907_v36 = vsel %vm10009_vm0, %v905_v6, %v7458_v24  ;;  %vm929_vm0 = vcmask 162816  }
 0x543   :  { %v910_v35 = vsel %vm10008_vm15, %v907_v36, %v7460_v32  ;;  %vm924_vm15 = vcmask 97280  }
 0x544   :  { %v913_v38 = vsel %vm10007_vm1, %v910_v35, %v7464_v33  ;;  %vm921_vm1 = vcmask 64512  }
 0x545   :  { %v7466_v18 = vpop.eup %7465 }
 0x546   :  { %886 = vrot.lane.b32.xlu0 %v7466_v18, %s10052_s24  ;;  %v916_v8 = vsel %vm10006_vm2, %v913_v38, %v7466_v18  ;;  %vm918_vm2 = vcmask 31744  }
 0x547   :  { %6531 = vmatprep.mubr.f32.mxu0 %v916_v8 }
 0x548   :  { %6532 = vmatmul.mubr.f32.vlgmr.msra.gmra.mrb[2].mxu0 %v917_v19 }
 0x549   :  { %6538 = vmatprep.mubr.msk.bf16.mxu0 %vm7952_vm3, %v10014_v10 }
 0x55e   :  { %693 = vadd.xlane.f32.xlu1 %v692_v42 }
 0x565   :  { %690 = vadd.xlane.f32.xlu0 %v689_v37 }
 0x567   :  { %v715_v20 = vpop.permute.xlu1 %714 }
 0x568   :  { %v721_v44 = vsel %vm676_vm7, %v715_v20, 0.0 }
 0x569   :  { %722 = vadd.xlane.f32.xlu0 %v721_v44 }
 0x56b   :  { %v744_v46 = vpop.permute.xlu1 %743 }
 0x56c   :  { %v750_v24 = vsel %vm676_vm7, %v744_v46, 0.0  ;;  %v7417_v46 = vld [vmem:[%s9984_s8] sm:$0xff]  }
 0x56d   :  { %751 = vadd.xlane.f32.xlu1 %v750_v24  ;;  %6535 = vmatpush3.bf16.msra.mxu0 %v7417_v46  ;;  %v7418_v24 = vld [vmem:[%s9984_s8 + $0x8] sm:$0xff]  }
 0x56e   :  { %6536 = vmatprep.subr.bf16.mxu0 %v10014_v10 }
 0x56f   :  { %v773_v57 = vpop.permute.xlu1 %772 }
 0x570   :  { %v779_v25 = vsel %vm676_vm7, %v773_v57, 0.0 }
 0x571   :  { %780 = vadd.xlane.f32.xlu1 %v779_v25  ;;  %6537 = vmatpush3.bf16.msra.mxu0 %v7418_v24 }
 0x572   :  { %6542 = vmatprep.subr.bf16.mxu0 %v10014_v10 }
 0x573   :  { %v802_v26 = vpop.permute.xlu1 %801 }
 0x574   :  { %v808_v29 = vsel %vm676_vm7, %v802_v26, 0.0 }
 0x575   :  { %809 = vadd.xlane.f32.xlu1 %v808_v29 }
 0x577   :  { %v831_v41 = vpop.permute.xlu1 %830 }
 0x578   :  { %v837_v31 = vsel %vm676_vm7, %v831_v41, 0.0 }
 0x579   :  { %838 = vadd.xlane.f32.xlu1 %v837_v31 }
 0x5a0   :  { %v713_v32 = vpop.permute.xlu1 %712 }
 0x5a1   :  { %v718_v60 = vsel %vm676_vm7, %v713_v32, 0.0 }
 0x5a2   :  { %719 = vadd.xlane.f32.xlu0 %v718_v60 }
 0x5a4   :  { %v742_v1 = vpop.permute.xlu1 %741 }
 0x5a5   :  { %v747_v63 = vsel %vm676_vm7, %v742_v1, 0.0 }
 0x5a6   :  { %748 = vadd.xlane.f32.xlu0 %v747_v63 }
 0x5a8   :  { %v860_v33 = vpop.permute.xlu1 %859  ;;  %v771_v34 = vpop.permute.xlu0 %770 }
 0x5a9   :  { %v866_v6 = vsel %vm676_vm7, %v860_v33, 0.0  ;;  %v776_v36 = vsel %vm676_vm7, %v771_v34, 0.0 }
 0x5aa   :  { %867 = vadd.xlane.f32.xlu1 %v866_v6  ;;  %777 = vadd.xlane.f32.xlu0 %v776_v36 }
 0x5ac   :  { %v889_v35 = vpop.permute.xlu1 %888  ;;  %v800_v3 = vpop.permute.xlu0 %799 }
 0x5ad   :  { %v895_v18 = vsel %vm676_vm7, %v889_v35, 0.0  ;;  %v805_v38 = vsel %vm676_vm7, %v800_v3, 0.0 }
 0x5ae   :  { %896 = vadd.xlane.f32.xlu1 %v895_v18  ;;  %806 = vadd.xlane.f32.xlu0 %v805_v38 }
 0x5b0   :  { %v829_v8 = vpop.permute.xlu0 %828 }
 0x5b1   :  { %v834_v19 = vsel %vm676_vm7, %v829_v8, 0.0 }
 0x5b2   :  { %835 = vadd.xlane.f32.xlu0 %v834_v19 }
 0x5b4   :  { %v858_v42 = vpop.permute.xlu0 %857 }
 0x5b5   :  { %v863_v37 = vsel %vm676_vm7, %v858_v42, 0.0 }
 0x5b6   :  { %864 = vadd.xlane.f32.xlu0 %v863_v37 }
 0x5b8   :  { %v887_v20 = vpop.permute.xlu0 %886 }
 0x5b9   :  { %v892_v44 = vsel %vm676_vm7, %v887_v20, 0.0 }
 0x5ba   :  { %893 = vadd.xlane.f32.xlu0 %v892_v44 }
 0x5eb   :  { %v694_v26 = vpop.xlane.xlu1 %693 }
 0x5ec   :  { %7467 = vrcp.f32 %v694_v26 }
 0x5f2   :  { %v691_v41 = vpop.xlane.xlu0 %690 }
 0x5f3   :  { %7469 = vrcp.f32 %v691_v41 }
 0x5f6   :  { %v723_v32 = vpop.xlane.xlu0 %722  ;;  %v7468_v18 = vpop.eup %7467 }
 0x5f7   :  { %7471 = vrcp.f32 %v723_v32 }
 0x5fa   :  { %v752_v29 = vpop.xlane.xlu1 %751 }
 0x5fb   :  { %7473 = vrcp.f32 %v752_v29 }
 0x5fd   :  { %v7470_v38 = vpop.eup %7469 }
 0x5fe   :  { %v781_v31 = vpop.xlane.xlu1 %780 }
 0x5ff   :  { %7475 = vrcp.f32 %v781_v31 }
 0x601   :  { %v7472_v8 = vpop.eup %7471 }
 0x602   :  { %v810_v60 = vpop.xlane.xlu1 %809  ;;  %v920_v31 = vsel %vm918_vm2, %v7468_v18, %v7472_v8 }
 0x603   :  { %7477 = vrcp.f32 %v810_v60 }
 0x605   :  { %v7474_v42 = vpop.eup %7473 }
 0x606   :  { %v839_v33 = vpop.xlane.xlu1 %838  ;;  %v923_v60 = vsel %vm921_vm1, %v920_v31, %v7474_v42 }
 0x607   :  { %7479 = vrcp.f32 %v839_v33 }
 0x609   :  { %v7476_v37 = vpop.eup %7475 }
 0x60a   :  { %v926_v33 = vsel %vm924_vm15, %v923_v60, %v7476_v37 }
 0x60d   :  { %v7478_v20 = vpop.eup %7477 }
 0x611   :  { %v7480_v44 = vpop.eup %7479 }
 0x61b   :  { %v8696_v57 = vpop.f32.mrb[2].mxu0 }
 0x61c   :  { %v8698_v25 = vpop.f32.mrb[3].mxu0 }
 0x62f   :  { %v720_v1 = vpop.xlane.xlu0 %719 }
 0x630   :  { %7481 = vrcp.f32 %v720_v1 }
 0x633   :  { %v749_v63 = vpop.xlane.xlu0 %748 }
 0x634   :  { %7483 = vrcp.f32 %v749_v63 }
 0x637   :  { %v778_v34 = vpop.xlane.xlu0 %777  ;;  %v868_v6 = vpop.xlane.xlu1 %867 }
 0x638   :  { %7485 = vrcp.f32 %v868_v6 }
 0x639   :  { %7487 = vrcp.f32 %v778_v34 }
 0x63a   :  { %v7482_v24 = vpop.eup %7481 }
 0x63b   :  { %v807_v36 = vpop.xlane.xlu0 %806  ;;  %v897_v35 = vpop.xlane.xlu1 %896  ;;  %v919_v63 = vsel %vm918_vm2, %v7470_v38, %v7482_v24 }
 0x63c   :  { %7489 = vrcp.f32 %v897_v35 }
 0x63d   :  { %7491 = vrcp.f32 %v807_v36  ;;  %v928_v36 = vsel %vm676_vm7, %v926_v33, %v7478_v20 }
 0x63e   :  { %v7484_v26 = vpop.eup %7483  ;;  %v931_v18 = vsel %vm929_vm0, %v928_v36, %v7480_v44  ;;  %v7419_v44 = vld [vmem:[%s9986_s10] sm:$0xff]  }
 0x63f   :  { %v836_v3 = vpop.xlane.xlu0 %835  ;;  %v922_v6 = vsel %vm921_vm1, %v919_v63, %v7484_v26 }
 0x640   :  { %7493 = vrcp.f32 %v836_v3 }
 0x642   :  { %v7486_v29 = vpop.eup %7485 }
 0x643   :  { %v865_v19 = vpop.xlane.xlu0 %864  ;;  %v7488_v41 = vpop.eup %7487 }
 0x644   :  { %7495 = vrcp.f32 %v865_v19  ;;  %v925_v3 = vsel %vm924_vm15, %v922_v6, %v7488_v41  ;;  %v934_v19 = vsel %vm932_vm14, %v931_v18, %v7486_v29  ;;  %v7420_v29 = vld [vmem:[%s9986_s10 + $0x8] sm:$0xff]  }
 0x646   :  { %v7490_v32 = vpop.eup %7489 }
 0x647   :  { %v894_v46 = vpop.xlane.xlu0 %893  ;;  %v7492_v1 = vpop.eup %7491  ;;  %v937_v42 = vsel %vm935_vm13, %v934_v19, %v7490_v32  ;;  %v5993_v32 = vld [vmem:[#allocation5] ss:$0 sm:$0xff] }
 0x648   :  { %7497 = vrcp.f32 %v894_v46  ;;  %v927_v8 = vsel %vm676_vm7, %v925_v3, %v7492_v1  ;;  %v1078_v26 = vmul.f32 %v8696_v57, %v937_v42  ;;  %v274_v57 = vld [vmem:[%s10072_s7 + $0x8] sm:$0xff] }
 0x64a   :  { %v7494_v34 = vpop.eup %7493 }
 0x64b   :  { %v930_v38 = vsel %vm929_vm0, %v927_v8, %v7494_v34 }
 0x64e   :  { %v7496_v35 = vpop.eup %7495 }
 0x64f   :  { %v933_v46 = vsel %vm932_vm14, %v930_v38, %v7496_v35 }
 0x652   :  { %v7498_v37 = vpop.eup %7497 }
 0x653   :  { %v936_v24 = vsel %vm935_vm13, %v933_v46, %v7498_v37 }
 0x654   :  { %v1077_v20 = vmul.f32 %v8698_v25, %v936_v24  ;;  %v273_v25 = vld [vmem:[%s10072_s7] sm:$0xff] }
 0x655   :  { %v8732_v31 = vpack.c.bf16 %v274_v57, %v273_v25  ;;  %v5997_v25 = vld [vmem:[#allocation7] ss:$0 sm:$0xff] }
 0x656   :  { %v1079_v41 = vpack.c.bf16 %v1078_v26, %v1077_v20 }
 0x657   :  { %10073 = vst [vmem:[#allocation32_spill] sm:$0xff] %v8732_v31 }
 0x658   :  { %6539 = vmatmul.mubr.msk.bf16.vlgmr.msra.gmra.mrb[4].mxu0 %vm10026_vm4, %v1079_v41 }
 0x659   :  { %6543 = vmatpush3.bf16.msra.mxu0 %v7419_v44  ;;  %6546 = vmatprep.mubr.msk.bf16.mxu0 %vm7952_vm3, %v10014_v10 }
 0x65a   :  { %6544 = vmatprep.subr.bf16.mxu0 %v10014_v10 }
 0x65d   :  { %6545 = vmatpush3.bf16.msra.mxu0 %v7420_v29 }
 0x65e   :  { %6550 = vmatprep.subr.bf16.mxu0 %v10014_v10 }
 0x660   :  { %6547 = vmatmul.mubr.msk.bf16.vlgmr.msra.gmra.mrb[8].mxu0 %vm10026_vm4, %v8732_v31 }
 0x661   :  { %6554 = vmatprep.mubr.msk.bf16.mxu0 %vm7952_vm3, %v10014_v10 }
 0x72b   :  { %v1135_v60 = vpop.f32.mrb[4].mxu0 }
 0x72c   :  { %v1136_v1 = vadd.f32 %v5993_v32, %v1135_v60  ;;  %v6540_v63 = vpop.f32.mrb[5].mxu0 }
 0x72d   :  { %v1138_v33 = vpop.f32.mrb[6].mxu0 }
 0x72e   :  { %v1139_v34 = vadd.f32 %v5993_v32, %v1138_v33  ;;  %v6541_v6 = vpop.f32.mrb[7].mxu0  ;;  %v1142_v36 = vadd.f32 %v1136_v1, %v8349_v45 }
 0x730   :  { %v1143_v35 = vadd.f32 %v1139_v34, %v8347_v43  ;;  %v1144_v3 = vsel %vm10026_vm4, %v1142_v36, 0.0 }
 0x731   :  { %1145 = vadd.xlane.f32.xlu0 %v1144_v3 }
 0x732   :  { %v1147_v18 = vsel %vm10026_vm4, %v1143_v35, 0.0 }
 0x733   :  { %1148 = vadd.xlane.f32.xlu1 %v1147_v18  ;;  %v1244_v8 = vpop.f32.mrb[8].mxu0 }
 0x734   :  { %v6548_v19 = vpop.f32.mrb[9].mxu0  ;;  %v8755_v32 = vadd.f32 %v5997_v25, %v1244_v8 }
 0x735   :  { %v1247_v38 = vpop.f32.mrb[10].mxu0 }
 0x736   :  { %v6549_v42 = vpop.f32.mrb[11].mxu0  ;;  %v8753_v57 = vadd.f32 %v5997_v25, %v1247_v38  ;;  %v1326_v1 = vmul.f32 %v8755_v32, %v8360_v50  ;;  %v1324_v6 = vmul.f32 %v8755_v32, %v8354_v47  ;;  %v1332_v38 = vmul.f32 %v8755_v32, %v8372_v56 }
 0x737   :  { %v7422_v42 = vld [vmem:[%s9988_s12 + $0x8] sm:$0xff]  }
 0x738   :  { %v1327_v60 = vmul.f32 %v8753_v57, %v8358_v49  ;;  %v1325_v63 = vmul.f32 %v8753_v57, %v8356_v48  ;;  %v1329_v34 = vmul.f32 %v8753_v57, %v8362_v51  ;;  %v1333_v18 = vmul.f32 %v8753_v57, %v8370_v55 }
 0x739   :  { %v1331_v19 = vmul.f32 %v8753_v57, %v8366_v53 }
 0x73a   :  { %v7260_v33 = vpack.i.bf16 %v1327_v60, %v1326_v1  ;;  %v7255_v3 = vpack.i.bf16 %v1325_v63, %v1324_v6  ;;  %v1339_v60 = vmul.f32 %v8753_v57, %v8410_v21  ;;  %v1338_v1 = vmul.f32 %v8755_v32, %v8418_v40 }
 0x73c   :  { %v7290_v63 = vpack.i.bf16 %v1339_v60, %v1338_v1 }
 0x7be   :  { %v1146_v37 = vpop.xlane.xlu0 %1145 }
 0x7bf   :  { %v1151_v46 = vmul.f32 0.03125, %v1146_v37  ;;  %v1330_v37 = vmul.f32 %v8755_v32, %v8368_v54 }
 0x7c0   :  { %v1149_v24 = vpop.xlane.xlu1 %1148 }
 0x7c1   :  { %v8743_v20 = vsub.f32 %v1142_v36, %v1151_v46  ;;  %v1152_v26 = vmul.f32 0.03125, %v1149_v24  ;;  %v7421_v36 = vld [vmem:[%s9988_s12] sm:$0xff]   ;;  %v7275_v46 = vpack.i.bf16 %v1333_v18, %v1332_v38  ;;  %v1337_v24 = vmul.f32 %v8753_v57, %v8392_v7 }
 0x7c2   :  { %6551 = vmatpush3.bf16.msra.mxu0 %v7421_v36  ;;  %v8805_v38 = vshrl.u32 %v167_v17, 7 }
 0x7c3   :  { %v8745_v44 = vsub.f32 %v1143_v35, %v1152_v26  ;;  %v1155_v43 = vmul.f32 %v8743_v20, %v8743_v20  ;;  %v1328_v35 = vmul.f32 %v8755_v32, %v8364_v52  ;;  %6552 = vmatprep.subr.bf16.mxu0 %v10014_v10  ;;  %v7270_v26 = vpack.i.bf16 %v1331_v19, %v1330_v37 }
 0x7c4   :  { %v8810_v37 = vsub.s32 0, %v8805_v38 }
 0x7c5   :  { %v1157_v45 = vsel %vm10026_vm4, %v1155_v43, 0.0  ;;  %v1156_v41 = vmul.f32 %v8745_v44, %v8745_v44  ;;  %v7265_v8 = vpack.i.bf16 %v1329_v34, %v1328_v35  ;;  %v1335_v43 = vmul.f32 %v8753_v57, %v8374_v58 }
 0x7c6   :  { %1158 = vadd.xlane.f32.xlu0 %v1157_v45  ;;  %6553 = vmatpush3.bf16.msra.mxu0 %v7422_v42  ;;  %v1336_v45 = vmul.f32 %v8755_v32, %v8398_v13 }
 0x7c7   :  { %v1160_v29 = vsel %vm10026_vm4, %v1156_v41, 0.0  ;;  %v1334_v41 = vmul.f32 %v8755_v32, %v8378_v62 }
 0x7c8   :  { %1161 = vadd.xlane.f32.xlu1 %v1160_v29  ;;  %v7285_v29 = vpack.i.bf16 %v1337_v24, %v1336_v45 }
 0x7c9   :  { %v7280_v25 = vpack.i.bf16 %v1335_v43, %v1334_v41 }
 0x7d9   :  { %7261 = vrot.lane.b32.xlu1 %v7260_v33, %s7954_s13 }
 0x7dc   :  { %7256 = vrot.lane.b32.xlu0 %v7255_v3, %s7954_s13 }
 0x7dd   :  { %7266 = vrot.lane.b32.xlu1 %v7265_v8, %s7954_s13 }
 0x7e0   :  { %7276 = vrot.lane.b32.xlu0 %v7275_v46, %s7954_s13  ;;  %v8815_v46 = vld [vmem:[%s9992_s16] sm:$0x3f] }
 0x7e1   :  { %7271 = vrot.lane.b32.xlu1 %v7270_v26, %s7954_s13  ;;  %v1174_v24 = vrot.slane %v8815_v46, %v8810_v37  ;;  %v8820_v26 = vsub.s32 1, %v8805_v38 }
 0x7e4   :  { %7286 = vrot.lane.b32.xlu0 %v7285_v29, %s7954_s13 }
 0x7e5   :  { %7281 = vrot.lane.b32.xlu1 %v7280_v25, %s7954_s13  ;;  %v1180_v25 = vrot.slane %v8815_v46, %v8820_v26 }
 0x7e9   :  { %7291 = vrot.lane.b32.xlu1 %v7290_v63, %s7954_s13 }
 0x853   :  { %v1159_v33 = vpop.xlane.xlu0 %1158 }
 0x854   :  { %v1163_v34 = vmul.f32 0.03125, %v1159_v33 }
 0x855   :  { %v1162_v6 = vpop.xlane.xlu1 %1161 }
 0x856   :  { %v1165_v36 = vadd.f32 1e-05, %v1163_v34  ;;  %v1164_v35 = vmul.f32 0.03125, %v1162_v6 }
 0x857   :  { %v7257_v3 = vpop.permute.xlu0 %7256 }
 0x858   :  { %7499 = vrsqrt.f32 %v1165_v36  ;;  %v1166_v18 = vadd.f32 1e-05, %v1164_v35  ;;  %v7259_v8 = vunpack.i.h.bf16 %v7257_v3  ;;  %v7258_v19 = vunpack.i.l.bf16 %v7257_v3 }
 0x859   :  { %v7262_v60 = vpop.permute.xlu1 %7261 }
 0x85a   :  { %7501 = vrsqrt.f32 %v1166_v18  ;;  %v6912_v42 = vpack.c.bf16 %v7259_v8, %v7258_v19  ;;  %v7264_v63 = vunpack.i.h.bf16 %v7262_v60  ;;  %v7263_v33 = vunpack.i.l.bf16 %v7262_v60 }
 0x85c   :  { %6914 = vmatprep.subr.msk.bf16.mxu0 %vm8466_vm5, %v6912_v42  ;;  %v6918_v35 = vpack.c.bf16 %v7264_v63, %v7263_v33 }
 0x862   :  { %v7500_v17 = vpop.eup %7499 }
 0x863   :  { %v1169_v43 = vmul.f32 %v7500_v17, %v8743_v20  ;;  %v7267_v20 = vpop.permute.xlu1 %7266 }
 0x864   :  { %v7502_v45 = vpop.eup %7501  ;;  %v7268_v3 = vunpack.i.l.bf16 %v7267_v20 }
 0x865   :  { %v1175_v41 = vmul.f32 %v1174_v24, %v1169_v43  ;;  %v1170_v29 = vmul.f32 %v7502_v45, %v8745_v44  ;;  %v7269_v44 = vunpack.i.h.bf16 %v7267_v20 }
 0x867   :  { %v1176_v1 = vmul.f32 %v1174_v24, %v1170_v29  ;;  %v8826_v34 = vadd.f32 %v1180_v25, %v1175_v41  ;;  %v6924_v18 = vpack.c.bf16 %v7269_v44, %v7268_v3  ;;  %v7272_v8 = vpop.permute.xlu1 %7271 }
 0x868   :  { %v7274_v19 = vunpack.i.h.bf16 %v7272_v8  ;;  %v7273_v24 = vunpack.i.l.bf16 %v7272_v8 }
 0x869   :  { %v8828_v6 = vadd.f32 %v1180_v25, %v1176_v1 }
 0x86a   :  { %v6930_v17 = vpack.c.bf16 %v7274_v19, %v7273_v24 }
 0x86b   :  { %v1256_v36 = vpack.c.bf16 %v8828_v6, %v8826_v34  ;;  %v7282_v41 = vpop.permute.xlu1 %7281 }
 0x86c   :  { %v7284_v29 = vunpack.i.h.bf16 %v7282_v41  ;;  %v7283_v25 = vunpack.i.l.bf16 %v7282_v41  ;;  %v7716_v41 = vld [vmem:[%s10055_s9 + $0x10] sm:$0xff] }
 0x86d   :  { %6555 = vmatmul.mubr.msk.bf16.vlgmr.msra.gmra.mrb[12].mxu0 %vm10026_vm4, %v1256_v36 }
 0x86e   :  { %6917 = vmatpush3.bf16.xpose.msk.msra.mxu0 %vm8466_vm5, %v6912_v42  ;;  %6590 = vmatprep.mubr.msk.f32.mxu0 %vm10026_vm4, %v8755_v32  ;;  %v7277_v42 = vpop.permute.xlu0 %7276  ;;  %v6942_v60 = vpack.c.bf16 %v7284_v29, %v7283_v25 }
 0x86f   :  { %6920 = vmatprep.subr.msk.bf16.mxu0 %vm8466_vm5, %v6918_v35  ;;  %v7279_v32 = vunpack.i.h.bf16 %v7277_v42  ;;  %v7278_v43 = vunpack.i.l.bf16 %v7277_v42 }
 0x871   :  { %v6936_v45 = vpack.c.bf16 %v7279_v32, %v7278_v43  ;;  %v7715_v43 = vld [vmem:[%s10055_s9] sm:$0xff] }
 0x872   :  { %v7287_v1 = vpop.permute.xlu0 %7286 }
 0x873   :  { %v7289_v63 = vunpack.i.h.bf16 %v7287_v1  ;;  %v7288_v33 = vunpack.i.l.bf16 %v7287_v1 }
 0x875   :  { %v6948_v36 = vpack.c.bf16 %v7289_v63, %v7288_v33  ;;  %v7719_v63 = vld [vmem:[%s10055_s9 + $0x40] sm:$0xff] }
 0x876   :  { %6923 = vmatpush3.bf16.xpose.msk.msra.mxu0 %vm8466_vm5, %v6918_v35  ;;  %v7292_v35 = vpop.permute.xlu1 %7291 }
 0x877   :  { %6926 = vmatprep.subr.msk.bf16.mxu0 %vm8466_vm5, %v6924_v18  ;;  %v7294_v20 = vunpack.i.h.bf16 %v7292_v35  ;;  %v7293_v44 = vunpack.i.l.bf16 %v7292_v35 }
 0x879   :  { %v6954_v3 = vpack.c.bf16 %v7294_v20, %v7293_v44  ;;  %v7721_v20 = vld [vmem:[%s10055_s9 + $0x60] sm:$0xff] }
 0x87e   :  { %6929 = vmatpush3.bf16.xpose.msk.msra.mxu0 %vm8466_vm5, %v6924_v18  ;;  %v6001_v18 = vld [vmem:[#allocation8] ss:$0 sm:$0xff] }
 0x87f   :  { %6932 = vmatprep.subr.msk.bf16.mxu0 %vm8466_vm5, %v6930_v17 }
 0x886   :  { %6935 = vmatpush3.bf16.xpose.msk.msra.mxu0 %vm8466_vm5, %v6930_v17 }
 0x887   :  { %6938 = vmatprep.subr.msk.bf16.mxu0 %vm8466_vm5, %v6936_v45 }
 0x88e   :  { %6941 = vmatpush3.bf16.xpose.msk.msra.mxu0 %vm8466_vm5, %v6936_v45 }
 0x88f   :  { %6944 = vmatprep.subr.msk.bf16.mxu0 %vm8466_vm5, %v6942_v60 }
 0x896   :  { %6947 = vmatpush3.bf16.xpose.msk.msra.mxu0 %vm8466_vm5, %v6942_v60  ;;  %v7718_v60 = vld [vmem:[%s10055_s9 + $0x30] sm:$0xff] }
 0x897   :  { %6950 = vmatprep.subr.msk.bf16.mxu0 %vm8466_vm5, %v6948_v36 }
 0x89e   :  { %6953 = vmatpush3.bf16.xpose.msk.msra.mxu0 %vm8466_vm5, %v6948_v36  ;;  %v7720_v36 = vld [vmem:[%s10055_s9 + $0x50] sm:$0xff] }
 0x89f   :  { %6956 = vmatprep.subr.msk.bf16.mxu0 %vm8466_vm5, %v6954_v3 }
 0x8a6   :  { %6959 = vmatpush3.bf16.xpose.msk.msra.mxu0 %vm8466_vm5, %v6954_v3  ;;  %v7722_v3 = vld [vmem:[%s10055_s9 + $0x8] sm:$0xff] }
 0x8ad   :  { %6591 = vmatmul.mubr.msk.f32.vlgmr.msra.gmra.mrb[16].mxu0 %vm10026_vm4, %v8753_v57  ;;  %v7717_v57 = vld [vmem:[%s10055_s9 + $0x20] sm:$0xff] }
 0x8ae   :  { %2382 = vmatprep.mubr.bf16.mxu0 %v10012_v0 }
 0x940   :  { %v1312_v8 = vpop.f32.mrb[12].mxu0 }
 0x941   :  { %v1313_v19 = vadd.f32 %v6001_v18, %v1312_v8  ;;  %v6556_v24 = vpop.f32.mrb[13].mxu0  ;;  %v7723_v8 = vld [vmem:[%s10055_s9 + $0x18] sm:$0xff] }
 0x942   :  { %v1315_v17 = vpop.f32.mrb[14].mxu0 }
 0x943   :  { %v1316_v42 = vadd.f32 %v6001_v18, %v1315_v17  ;;  %v6557_v32 = vpop.f32.mrb[15].mxu0  ;;  %v1340_v45 = vmul.f32 %v7715_v43, %v1313_v19  ;;  %v1342_v29 = vmul.f32 %v7716_v41, %v1313_v19  ;;  %v1344_v25 = vmul.f32 %v7717_v57, %v1313_v19  ;;  %v7724_v17 = vld [vmem:[%s10055_s9 + $0x28] sm:$0xff]  ;;  %v7725_v43 = vld [vmem:[%s10055_s9 + $0x38] sm:$0xff] }
 0x944   :  { %v1346_v1 = vmul.f32 %v7718_v60, %v1313_v19  ;;  %v1348_v33 = vmul.f32 %v7719_v63, %v1313_v19  ;;  %v1350_v35 = vmul.f32 %v7720_v36, %v1313_v19  ;;  %v1352_v44 = vmul.f32 %v7721_v20, %v1313_v19  ;;  %v7726_v57 = vld [vmem:[%s10055_s9 + $0x48] sm:$0xff]  ;;  %v7727_v63 = vld [vmem:[%s10055_s9 + $0x58] sm:$0xff] }
 0x945   :  { %v1341_v18 = vmul.f32 %v7722_v3, %v1316_v42  ;;  %v1343_v24 = vmul.f32 %v7723_v8, %v1316_v42  ;;  %v1345_v32 = vmul.f32 %v7724_v17, %v1316_v42  ;;  %v1347_v41 = vmul.f32 %v7725_v43, %v1316_v42  ;;  %v7728_v20 = vld [vmem:[%s10055_s9 + $0x68] sm:$0xff]  ;;  %v7729_v8 = vld [vmem:[%s10055_s9 + $0x70] sm:$0xff] }
 0x946   :  { %v1349_v60 = vmul.f32 %v7726_v57, %v1316_v42  ;;  %v1351_v36 = vmul.f32 %v7727_v63, %v1316_v42  ;;  %v1353_v3 = vmul.f32 %v7728_v20, %v1316_v42  ;;  %v1354_v17 = vmul.f32 %v7729_v8, %v1313_v19  ;;  %v7730_v63 = vld [vmem:[%s10055_s9 + $0x78] sm:$0xff] }
 0x947   :  { %v6960_v43 = vpack.c.bf16 %v1341_v18, %v1340_v45  ;;  %v6964_v0 = vpack.c.bf16 %v1343_v24, %v1342_v29  ;;  %v6968_v10 = vpack.c.bf16 %v1345_v32, %v1344_v25  ;;  %v6972_v31 = vpack.c.bf16 %v1347_v41, %v1346_v1 }
 0x948   :  { %v6976_v57 = vpack.c.bf16 %v1349_v60, %v1348_v33  ;;  %v6980_v12 = vpack.c.bf16 %v1351_v36, %v1350_v35  ;;  %v6984_v16 = vpack.c.bf16 %v1353_v3, %v1352_v44  ;;  %v1355_v11 = vmul.f32 %v7730_v63, %v1316_v42 }
 0x949   :  { %6961 = vmatprep.subr.bf16.mxu1 %v6960_v43  ;;  %v10074_v19 = vmov 0.0  }
 0x94a   :  { %6963 = vmatpush3.bf16.msra.mxu1 %v6960_v43  ;;  %v6988_v20 = vpack.c.bf16 %v1355_v11, %v1354_v17  ;;  %v5970_v11 = vld [vmem:[%s10071_s30 + $0x18] sm:$0xff] }
 0x94b   :  { %6965 = vmatprep.subr.bf16.mxu1 %v6964_v0 }
 0x94e   :  { %6967 = vmatpush3.bf16.msra.mxu1 %v6964_v0 }
 0x94f   :  { %6969 = vmatprep.subr.bf16.mxu1 %v6968_v10 }
 0x952   :  { %6971 = vmatpush3.bf16.msra.mxu1 %v6968_v10 }
 0x953   :  { %6973 = vmatprep.subr.bf16.mxu1 %v6972_v31 }
 0x956   :  { %6975 = vmatpush3.bf16.msra.mxu1 %v6972_v31 }
 0x957   :  { %6977 = vmatprep.subr.bf16.mxu1 %v6976_v57 }
 0x95a   :  { %6979 = vmatpush3.bf16.msra.mxu1 %v6976_v57 }
 0x95b   :  { %6981 = vmatprep.subr.bf16.mxu1 %v6980_v12 }
 0x95e   :  { %6983 = vmatpush3.bf16.msra.mxu1 %v6980_v12 }
 0x95f   :  { %6985 = vmatprep.subr.bf16.mxu1 %v6984_v16 }
 0x962   :  { %6987 = vmatpush3.bf16.msra.mxu1 %v6984_v16  ;;  %v5969_v16 = vld [vmem:[%s10071_s30 + $0x10] sm:$0xff] }
 0x963   :  { %6989 = vmatprep.subr.bf16.mxu1 %v6988_v20 }
 0x966   :  { %6991 = vmatpush3.bf16.msra.mxu1 %v6988_v20 }
 0x967   :  { %6628 = vmatprep.subr.bf16.mxu1 %v10074_v19 }
 0x980   :  { %v6592_v42 = vpop.f32.mrb[16].mxu0 }
 0x981   :  { %v8920_v0 = vadd.f32 %v6592_v42, %v5970_v11  ;;  %v1508_v10 = vpop.f32.mrb[17].mxu0 }
 0x982   :  { %v8929_v45 = vadd.f32 %v5969_v16, %v1508_v10 }
 0x983   :  { %v1568_v31 = vsel %vm10020_vm11, %v8920_v0, -inf  ;;  %v1520_v12 = vsel %vm676_vm7, %v8920_v0, -inf  ;;  %v1596_v29 = vsel %vm10025_vm12, %v8920_v0, -inf  ;;  %v1540_v25 = vsel %vm10021_vm9, %v8920_v0, -inf }
 0x984   :  { %1569 = vmax.xlane.f32.xlu1 %v1568_v31  ;;  %1521 = vmax.xlane.f32.xlu0 %v1520_v12  ;;  %v1624_v1 = vsel %vm10023_vm6, %v8920_v0, -inf  ;;  %v1517_v33 = vsel %vm676_vm7, %v8929_v45, -inf  ;;  %v1652_v35 = vsel %vm10022_vm8, %v8920_v0, -inf  ;;  %v1565_v44 = vsel %vm10020_vm11, %v8929_v45, -inf }
 0x985   :  { %v1537_v18 = vsel %vm10021_vm9, %v8929_v45, -inf  ;;  %v1593_v24 = vsel %vm10025_vm12, %v8929_v45, -inf  ;;  %v1680_v32 = vsel %vm10024_vm10, %v8920_v0, -inf  ;;  %v1621_v41 = vsel %vm10023_vm6, %v8929_v45, -inf }
 0x986   :  { %vm10075_vm11 = vcmask 1048448   ;;  %v1649_v36 = vsel %vm10022_vm8, %v8929_v45, -inf  ;;  %v1677_v3 = vsel %vm10024_vm10, %v8929_v45, -inf  ;;  %vm10079_vm8 = vcmask 523264  }
 0x987   :  { %v1708_v60 = vsel %vm10075_vm11, %v8920_v0, -inf  ;;  %vm10076_vm9 = vmmov %vm10075_vm11  ;;  %vm10080_vm6 = vcmask 654336   ;;  %vm10082_vm12 = vcmask 785408  }
 0x988   :  { %1597 = vmax.xlane.f32.xlu1 %v1596_v29  ;;  %1541 = vmax.xlane.f32.xlu0 %v1540_v25  ;;  %v1705_v8 = vsel %vm10076_vm9, %v8929_v45, -inf  ;;  %vm10077_vm9 = vcmask 392192   ;;  %vm10081_vm10 = vmmov %vm10079_vm8 }
 0x989   :  { %vm10078_vm11 = vmmov %vm10077_vm9 }
 0x98c   :  { %1625 = vmax.xlane.f32.xlu1 %v1624_v1  ;;  %1518 = vmax.xlane.f32.xlu0 %v1517_v33 }
 0x990   :  { %1653 = vmax.xlane.f32.xlu1 %v1652_v35  ;;  %1566 = vmax.xlane.f32.xlu0 %v1565_v44 }
 0x994   :  { %1538 = vmax.xlane.f32.xlu1 %v1537_v18  ;;  %1594 = vmax.xlane.f32.xlu0 %v1593_v24 }
 0x998   :  { %1681 = vmax.xlane.f32.xlu1 %v1680_v32  ;;  %1622 = vmax.xlane.f32.xlu0 %v1621_v41 }
 0x99c   :  { %1709 = vmax.xlane.f32.xlu1 %v1708_v60  ;;  %1650 = vmax.xlane.f32.xlu0 %v1649_v36 }
 0x9a0   :  { %1678 = vmax.xlane.f32.xlu0 %v1677_v3 }
 0x9a4   :  { %1706 = vmax.xlane.f32.xlu0 %v1705_v8 }
 0xa11   :  { %v1570_v17 = vpop.xlane.xlu1 %1569  ;;  %v1522_v43 = vpop.xlane.xlu0 %1521 }
 0xa12   :  { %v1572_v11 = vsub.f32 %v8920_v0, %v1570_v17  ;;  %v1524_v35 = vsub.f32 %v8920_v0, %v1522_v43 }
 0xa14   :  { %v1575_v12 = vmul.f32 1.442695, %v1572_v11  ;;  %v1527_v3 = vmul.f32 1.442695, %v1524_v35 }
 0xa15   :  { %v1598_v57 = vpop.xlane.xlu1 %1597  ;;  %v1542_v63 = vpop.xlane.xlu0 %1541 }
 0xa16   :  { %v1544_v20 = vsub.f32 %v8920_v0, %v1542_v63  ;;  %v1600_v16 = vsub.f32 %v8920_v0, %v1598_v57 }
 0xa18   :  { %v1547_v42 = vmul.f32 1.442695, %v1544_v20  ;;  %v1603_v1 = vmul.f32 1.442695, %v1600_v16 }
 0xa19   :  { %v1626_v10 = vpop.xlane.xlu1 %1625  ;;  %v1519_v31 = vpop.xlane.xlu0 %1518 }
 0xa1a   :  { %7503 = vpow2.f32 %v1547_v42  ;;  %v1628_v33 = vsub.f32 %v8920_v0, %v1626_v10  ;;  %v1523_v44 = vsub.f32 %v8929_v45, %v1519_v31 }
 0xa1b   :  { %7505 = vpow2.f32 %v1575_v12 }
 0xa1c   :  { %7507 = vpow2.f32 %v1603_v1  ;;  %v1631_v60 = vmul.f32 1.442695, %v1628_v33  ;;  %v1525_v57 = vmul.f32 1.442695, %v1523_v44 }
 0xa1d   :  { %v1654_v29 = vpop.xlane.xlu1 %1653  ;;  %v1567_v25 = vpop.xlane.xlu0 %1566 }
 0xa1e   :  { %v1656_v36 = vsub.f32 %v8920_v0, %v1654_v29  ;;  %v1571_v63 = vsub.f32 %v8929_v45, %v1567_v25 }
 0xa20   :  { %v1659_v10 = vmul.f32 1.442695, %v1656_v36  ;;  %v1573_v12 = vmul.f32 1.442695, %v1571_v63 }
 0xa21   :  { %v1539_v18 = vpop.xlane.xlu1 %1538  ;;  %v1595_v24 = vpop.xlane.xlu0 %1594 }
 0xa22   :  { %v1543_v32 = vsub.f32 %v8929_v45, %v1539_v18  ;;  %v1599_v41 = vsub.f32 %v8929_v45, %v1595_v24 }
 0xa24   :  { %v1545_v8 = vmul.f32 1.442695, %v1543_v32  ;;  %v7504_v17 = vpop.eup %7503  ;;  %v1601_v11 = vmul.f32 1.442695, %v1599_v41 }
 0xa25   :  { %v1682_v20 = vpop.xlane.xlu1 %1681  ;;  %v1623_v43 = vpop.xlane.xlu0 %1622  ;;  %1553 = vrot.lane.b32.xlu1 %v7504_v17, %s7955_s23 }
 0xa26   :  { %7509 = vpow2.f32 %v1545_v8  ;;  %v1627_v42 = vsub.f32 %v8929_v45, %v1623_v43  ;;  %v7506_v31 = vpop.eup %7505  ;;  %v1684_v16 = vsub.f32 %v8920_v0, %v1682_v20 }
 0xa27   :  { %7511 = vpow2.f32 %v1631_v60  ;;  %v7508_v35 = vpop.eup %7507 }
 0xa28   :  { %7513 = vpow2.f32 %v1527_v3  ;;  %v1629_v1 = vmul.f32 1.442695, %v1627_v42  ;;  %v1687_v44 = vmul.f32 1.442695, %v1684_v16 }
 0xa29   :  { %7515 = vpow2.f32 %v1525_v57  ;;  %v1651_v29 = vpop.xlane.xlu0 %1650  ;;  %1581 = vrot.lane.b32.xlu1 %v7506_v31, %s7954_s13  ;;  %v1710_v25 = vpop.xlane.xlu1 %1709 }
 0xa2a   :  { %7517 = vpow2.f32 %v1601_v11  ;;  %v1655_v33 = vsub.f32 %v8929_v45, %v1651_v29  ;;  %v1712_v18 = vsub.f32 %v8920_v0, %v1710_v25 }
 0xa2b   :  { %7519 = vpow2.f32 %v1659_v10 }
 0xa2c   :  { %7521 = vpow2.f32 %v1573_v12  ;;  %v1657_v32 = vmul.f32 1.442695, %v1655_v33  ;;  %v1715_v8 = vmul.f32 1.442695, %v1712_v18 }
 0xa2d   :  { %v1679_v24 = vpop.xlane.xlu0 %1678  ;;  %7523 = vpow2.f32 %v1629_v1  ;;  %1609 = vrot.lane.b32.xlu1 %v7508_v35, %s7956_s2 }
 0xa2e   :  { %v1683_v41 = vsub.f32 %v8929_v45, %v1679_v24  ;;  %7525 = vpow2.f32 %v1687_v44 }
 0xa2f   :  { %7527 = vpow2.f32 %v1657_v32 }
 0xa30   :  { %v7510_v60 = vpop.eup %7509  ;;  %v1685_v36 = vmul.f32 1.442695, %v1683_v41 }
 0xa31   :  { %v7512_v3 = vpop.eup %7511  ;;  %1551 = vrot.lane.b32.xlu0 %v7510_v60, %s7955_s23  ;;  %v1707_v57 = vpop.xlane.xlu0 %1706 }
 0xa32   :  { %v7514_v63 = vpop.eup %7513  ;;  %1637 = vrot.lane.b32.xlu1 %v7512_v3, %s7945_s27  ;;  %v1711_v0 = vsub.f32 %v8929_v45, %v1707_v57  ;;  %7529 = vpow2.f32 %v1685_v36 }
 0xa33   :  { %v7516_v20 = vpop.eup %7515  ;;  %7531 = vpow2.f32 %v1715_v8  ;;  %v1734_v12 = vsel %vm676_vm7, %v7514_v63, %v7504_v17 }
 0xa34   :  { %v7518_v43 = vpop.eup %7517  ;;  %v1713_v11 = vmul.f32 1.442695, %v1711_v0  ;;  %v1733_v10 = vsel %vm676_vm7, %v7516_v20, %v7510_v60  ;;  %v1736_v45 = vsel %vm10026_vm4, %v1734_v12, %v7506_v31 }
 0xa35   :  { %v7520_v42 = vpop.eup %7519  ;;  %1607 = vrot.lane.b32.xlu0 %v7518_v43, %s7956_s2  ;;  %v1738_v18 = vsel %vm10078_vm11, %v1736_v45, %v7508_v35  ;;  %vm10085_vm11 = vmmov %vm10082_vm12 }
 0xa36   :  { %7533 = vpow2.f32 %v1713_v11  ;;  %1665 = vrot.lane.b32.xlu1 %v7520_v42, %s7957_s3  ;;  %v7522_v16 = vpop.eup %7521  ;;  %v1740_v31 = vsel %vm10081_vm10, %v1738_v18, %v7512_v3  ;;  %v1529_v3 = vsel %vm676_vm7, %v7516_v20, 0.0 }
 0xa37   :  { %v7524_v29 = vpop.eup %7523  ;;  %v1735_v1 = vsel %vm10026_vm4, %v1733_v10, %v7522_v16  ;;  %vm10083_vm4 = vmmov %vm10080_vm6 }
 0xa38   :  { %v7526_v25 = vpop.eup %7525  ;;  %v1737_v33 = vsel %vm10077_vm9, %v1735_v1, %v7518_v43  ;;  %v1742_v8 = vsel %vm10083_vm4, %v1740_v31, %v7520_v42  ;;  %vm10084_vm9 = vcmask 916480   ;;  %v1532_v43 = vsel %vm676_vm7, %v7514_v63, 0.0 }
 0xa39   :  { %1635 = vrot.lane.b32.xlu0 %v7524_v29, %s7945_s27  ;;  %v7528_v44 = vpop.eup %7527  ;;  %v1739_v17 = vsel %vm10079_vm8, %v1737_v33, %v7524_v29  ;;  %v1744_v57 = vsel %vm10085_vm11, %v1742_v8, %v7526_v25  ;;  %vm10086_vm8 = vmmov %vm10084_vm9  ;;  %vm10087_vm4 = vcmask 261120  }
 0xa3a   :  { %1579 = vrot.lane.b32.xlu1 %v7522_v16, %s7954_s13  ;;  %v1741_v41 = vsel %vm10080_vm6, %v1739_v17, %v7528_v44  ;;  %vm10089_vm6 = vmmov %vm10087_vm4 }
 0xa3b   :  { %vm10090_vm10 = vmmov %vm10087_vm4 }
 0xa3c   :  { %v7530_v24 = vpop.eup %7529  ;;  %vm10095_vm11 = vmmov %vm10087_vm4 }
 0xa3d   :  { %1663 = vrot.lane.b32.xlu0 %v7528_v44, %s7957_s3  ;;  %v7532_v32 = vpop.eup %7531  ;;  %v1743_v36 = vsel %vm10082_vm12, %v1741_v41, %v7530_v24  ;;  %vm10091_vm12 = vmmov %vm10087_vm4 }
 0xa3e   :  { %1693 = vrot.lane.b32.xlu1 %v7526_v25, %s7953_s22  ;;  %v1746_v0 = vsel %vm10086_vm8, %v1744_v57, %v7532_v32  ;;  %vm10096_vm8 = vmmov %vm10087_vm4 }
 0xa40   :  { %v7534_v60 = vpop.eup %7533 }
 0xa41   :  { %1691 = vrot.lane.b32.xlu0 %v7530_v24, %s7953_s22  ;;  %v1745_v35 = vsel %vm10084_vm9, %v1743_v36, %v7534_v60  ;;  %vm10092_vm9 = vmmov %vm10087_vm4 }
 0xa42   :  { %1721 = vrot.lane.b32.xlu1 %v7532_v32, %s10052_s24  ;;  %6625 = vmatprep.mubr.f32.mxu1 %v1745_v35 }
 0xa43   :  { %6626 = vmatmul.mubr.f32.vlgmr.msra.gmra.mrb[6].mxu1 %v1746_v0 }
 0xa44   :  { %6632 = vmatprep.mubr.msk.bf16.mxu1 %vm7952_vm3, %v10074_v19 }
 0xa45   :  { %1719 = vrot.lane.b32.xlu0 %v7534_v60, %s10052_s24 }
 0xa64   :  { %1530 = vadd.xlane.f32.xlu0 %v1529_v3 }
 0xa66   :  { %1533 = vadd.xlane.f32.xlu1 %v1532_v43 }
 0xa97   :  { %v1554_v11 = vpop.permute.xlu1 %1553 }
 0xa98   :  { %v1560_v42 = vsel %vm676_vm7, %v1554_v11, 0.0 }
 0xa99   :  { %1561 = vadd.xlane.f32.xlu0 %v1560_v42  ;;  %v7423_v42 = vld [vmem:[%s9990_s14] sm:$0xff]  }
 0xa9a   :  { %6629 = vmatpush3.bf16.msra.mxu1 %v7423_v42 }
 0xa9b   :  { %v1582_v10 = vpop.permute.xlu1 %1581  ;;  %6630 = vmatprep.subr.bf16.mxu1 %v10074_v19 }
 0xa9c   :  { %v1588_v12 = vsel %vm676_vm7, %v1582_v10, 0.0  ;;  %v7424_v10 = vld [vmem:[%s9990_s14 + $0x8] sm:$0xff]  }
 0xa9d   :  { %1589 = vadd.xlane.f32.xlu1 %v1588_v12 }
 0xa9e   :  { %6631 = vmatpush3.bf16.msra.mxu1 %v7424_v10 }
 0xa9f   :  { %v1610_v16 = vpop.permute.xlu1 %1609 }
 0xaa0   :  { %v1616_v29 = vsel %vm676_vm7, %v1610_v16, 0.0 }
 0xaa1   :  { %1617 = vadd.xlane.f32.xlu1 %v1616_v29 }
 0xaa3   :  { %v1552_v1 = vpop.permute.xlu0 %1551 }
 0xaa4   :  { %v1638_v45 = vpop.permute.xlu1 %1637  ;;  %v1557_v20 = vsel %vm676_vm7, %v1552_v1, 0.0 }
 0xaa5   :  { %v1644_v25 = vsel %vm676_vm7, %v1638_v45, 0.0  ;;  %1558 = vadd.xlane.f32.xlu0 %v1557_v20 }
 0xaa6   :  { %1645 = vadd.xlane.f32.xlu1 %v1644_v25 }
 0xaa7   :  { %v1608_v63 = vpop.permute.xlu0 %1607 }
 0xaa8   :  { %v1666_v33 = vpop.permute.xlu1 %1665  ;;  %v1613_v31 = vsel %vm676_vm7, %v1608_v63, 0.0 }
 0xaa9   :  { %v1672_v44 = vsel %vm676_vm7, %v1666_v33, 0.0 }
 0xaaa   :  { %1673 = vadd.xlane.f32.xlu1 %v1672_v44 }
 0xaab   :  { %v1636_v24 = vpop.permute.xlu0 %1635 }
 0xaac   :  { %v1580_v18 = vpop.permute.xlu1 %1579  ;;  %v1641_v35 = vsel %vm676_vm7, %v1636_v24, 0.0 }
 0xaad   :  { %v1585_v17 = vsel %vm676_vm7, %v1580_v18, 0.0 }
 0xaae   :  { %1586 = vadd.xlane.f32.xlu0 %v1585_v17 }
 0xaaf   :  { %v1664_v60 = vpop.permute.xlu0 %1663 }
 0xab0   :  { %v1694_v32 = vpop.permute.xlu1 %1693  ;;  %v1669_v0 = vsel %vm676_vm7, %v1664_v60, 0.0 }
 0xab1   :  { %v1700_v41 = vsel %vm676_vm7, %v1694_v32, 0.0 }
 0xab2   :  { %1701 = vadd.xlane.f32.xlu1 %v1700_v41  ;;  %1614 = vadd.xlane.f32.xlu0 %v1613_v31 }
 0xab3   :  { %v1692_v57 = vpop.permute.xlu0 %1691 }
 0xab4   :  { %v1722_v36 = vpop.permute.xlu1 %1721  ;;  %v1697_v3 = vsel %vm676_vm7, %v1692_v57, 0.0 }
 0xab5   :  { %v1728_v8 = vsel %vm676_vm7, %v1722_v36, 0.0 }
 0xab6   :  { %1729 = vadd.xlane.f32.xlu1 %v1728_v8  ;;  %1642 = vadd.xlane.f32.xlu0 %v1641_v35 }
 0xab7   :  { %v1720_v43 = vpop.permute.xlu0 %1719 }
 0xab8   :  { %v1725_v11 = vsel %vm676_vm7, %v1720_v43, 0.0 }
 0xaba   :  { %1670 = vadd.xlane.f32.xlu0 %v1669_v0 }
 0xabe   :  { %1698 = vadd.xlane.f32.xlu0 %v1697_v3 }
 0xac2   :  { %1726 = vadd.xlane.f32.xlu0 %v1725_v11 }
 0xaf1   :  { %v1531_v45 = vpop.xlane.xlu0 %1530 }
 0xaf2   :  { %7535 = vrcp.f32 %v1531_v45 }
 0xaf3   :  { %v1534_v29 = vpop.xlane.xlu1 %1533 }
 0xaf4   :  { %7537 = vrcp.f32 %v1534_v29 }
 0xafc   :  { %v7536_v60 = vpop.eup %7535 }
 0xafe   :  { %v7538_v36 = vpop.eup %7537 }
 0xb16   :  { %v9028_v12 = vpop.f32.mrb[6].mxu1 }
 0xb17   :  { %v9030_v16 = vpop.f32.mrb[7].mxu1 }
 0xb26   :  { %v1562_v25 = vpop.xlane.xlu0 %1561 }
 0xb27   :  { %7539 = vrcp.f32 %v1562_v25 }
 0xb2a   :  { %v1590_v1 = vpop.xlane.xlu1 %1589 }
 0xb2b   :  { %7541 = vrcp.f32 %v1590_v1 }
 0xb2e   :  { %v1618_v20 = vpop.xlane.xlu1 %1617 }
 0xb2f   :  { %7543 = vrcp.f32 %v1618_v20 }
 0xb31   :  { %v7540_v8 = vpop.eup %7539 }
 0xb32   :  { %v1559_v33 = vpop.xlane.xlu0 %1558  ;;  %v1748_v45 = vsel %vm918_vm2, %v7538_v36, %v7540_v8 }
 0xb33   :  { %v1646_v63 = vpop.xlane.xlu1 %1645  ;;  %7545 = vrcp.f32 %v1559_v33 }
 0xb34   :  { %7547 = vrcp.f32 %v1646_v63 }
 0xb35   :  { %v7542_v57 = vpop.eup %7541 }
 0xb36   :  { %v1750_v25 = vsel %vm921_vm1, %v1748_v45, %v7542_v57 }
 0xb37   :  { %v1674_v18 = vpop.xlane.xlu1 %1673 }
 0xb38   :  { %7549 = vrcp.f32 %v1674_v18 }
 0xb39   :  { %v7544_v0 = vpop.eup %7543 }
 0xb3b   :  { %v1587_v44 = vpop.xlane.xlu0 %1586 }
 0xb3c   :  { %7551 = vrcp.f32 %v1587_v44  ;;  %v1752_v44 = vsel %vm924_vm15, %v1750_v25, %v7544_v0 }
 0xb3d   :  { %v7546_v3 = vpop.eup %7545 }
 0xb3e   :  { %v7548_v43 = vpop.eup %7547  ;;  %v1747_v33 = vsel %vm918_vm2, %v7536_v60, %v7546_v3 }
 0xb3f   :  { %v1615_v24 = vpop.xlane.xlu0 %1614  ;;  %v1702_v17 = vpop.xlane.xlu1 %1701 }
 0xb40   :  { %7553 = vrcp.f32 %v1702_v17  ;;  %v1754_v17 = vsel %vm676_vm7, %v1752_v44, %v7548_v43 }
 0xb41   :  { %7555 = vrcp.f32 %v1615_v24 }
 0xb42   :  { %v7550_v42 = vpop.eup %7549 }
 0xb43   :  { %v1643_v32 = vpop.xlane.xlu0 %1642  ;;  %v1730_v41 = vpop.xlane.xlu1 %1729 }
 0xb44   :  { %7557 = vrcp.f32 %v1730_v41 }
 0xb45   :  { %7559 = vrcp.f32 %v1643_v32 }
 0xb46   :  { %v7552_v10 = vpop.eup %7551 }
 0xb47   :  { %v1671_v31 = vpop.xlane.xlu0 %1670  ;;  %v1749_v24 = vsel %vm921_vm1, %v1747_v33, %v7552_v10 }
 0xb48   :  { %7561 = vrcp.f32 %v1671_v31  ;;  %v1756_v31 = vsel %vm929_vm0, %v1754_v17, %v7550_v42  ;;  %v10088_v42 = vmov 0  }
 0xb4a   :  { %v7554_v29 = vpop.eup %7553 }
 0xb4b   :  { %v1699_v35 = vpop.xlane.xlu0 %1698  ;;  %v7556_v1 = vpop.eup %7555  ;;  %v1758_v8 = vsel %vm932_vm14, %v1756_v31, %v7554_v29 }
 0xb4c   :  { %7563 = vrcp.f32 %v1699_v35  ;;  %v1751_v41 = vsel %vm924_vm15, %v1749_v24, %v7556_v1  ;;  %v6023_v1 = vld [vmem:[#allocation10] ss:$0 sm:$0xff] }
 0xb4e   :  { %v7558_v20 = vpop.eup %7557 }
 0xb4f   :  { %v1727_v11 = vpop.xlane.xlu0 %1726  ;;  %v7560_v63 = vpop.eup %7559  ;;  %v1760_v60 = vsel %vm935_vm13, %v1758_v8, %v7558_v20 }
 0xb50   :  { %7565 = vrcp.f32 %v1727_v11  ;;  %v1753_v36 = vsel %vm676_vm7, %v1751_v41, %v7560_v63  ;;  %v1837_v11 = vmul.f32 %v9028_v12, %v1760_v60 }
 0xb52   :  { %v7562_v18 = vpop.eup %7561 }
 0xb53   :  { %v1755_v35 = vsel %vm929_vm0, %v1753_v36, %v7562_v18 }
 0xb56   :  { %v7564_v32 = vpop.eup %7563 }
 0xb57   :  { %v1757_v0 = vsel %vm932_vm14, %v1755_v35, %v7564_v32 }
 0xb5a   :  { %v7566_v57 = vpop.eup %7565 }
 0xb5b   :  { %v1759_v3 = vsel %vm935_vm13, %v1757_v0, %v7566_v57  ;;  %v1949_v57 = vld [vmem:[#allocation11 + $0x40] sm:$0xff]  ;;  %v1944_v0 = vld [vmem:[#allocation11 + $0x18] sm:$0xff] }
 0xb5c   :  { %v1836_v43 = vmul.f32 %v9030_v16, %v1759_v3 }
 0xb5e   :  { %v1838_v10 = vpack.c.bf16 %v1837_v11, %v1836_v43  ;;  %v1952_v43 = vld [vmem:[#allocation11 + $0x58] sm:$0xff] }
 0xb60   :  { %6633 = vmatmul.mubr.msk.bf16.vlgmr.msra.gmra.mrb[8].mxu1 %vm10087_vm4, %v1838_v10  ;;  %v6033_v10 = vcombine.low %v1944_v0, %v1952_v43 }
 0xb61   :  { %2253 = vmatprep.mubr.bf16.mxu1 %v10088_v42 }
 0xc33   :  { %v1894_v29 = vpop.f32.mrb[8].mxu1 }
 0xc34   :  { %v1895_v45 = vadd.f32 %v6023_v1, %v1894_v29  ;;  %v6634_v25 = vpop.f32.mrb[9].mxu1  ;;  %v1957_v29 = vld [vmem:[#allocation11 + $0x80] sm:$0xff] }
 0xc35   :  { %v1897_v63 = vpop.f32.mrb[10].mxu1  ;;  %v1960_v25 = vld [vmem:[#allocation11 + $0x98] sm:$0xff] }
 0xc36   :  { %v1901_v20 = vadd.f32 %v1895_v45, %v8826_v34  ;;  %v1898_v33 = vadd.f32 %v6023_v1, %v1897_v63  ;;  %v6635_v44 = vpop.f32.mrb[11].mxu1  ;;  %v6034_v1 = vcombine.high %v1944_v0, %v1952_v43  ;;  %v1965_v45 = vld [vmem:[#allocation11 + $0xc0] sm:$0xff]  ;;  %v9057_v43 = vsub.s32 2, %v8805_v38 }
 0xc37   :  { %v6044_v63 = vcombine.high %v1957_v29, %v1965_v45 }
 0xc38   :  { %v1902_v18 = vadd.f32 %v1898_v33, %v8828_v6  ;;  %v1903_v16 = vsel %vm10089_vm6, %v1901_v20, 0.0  ;;  %v1941_v6 = vld [vmem:[#allocation11] sm:$0xff]  ;;  %2350 = vmatprep.subr.bf16.mxu0 %v6034_v1  ;;  %v6043_v33 = vcombine.low %v1957_v29, %v1965_v45  ;;  %10093 = vst [vmem:[#allocation33_spill] sm:$0xff] %v9057_v43  ;;  %vm10097_vm6 = vmmov %vm10087_vm4 }
 0xc39   :  { %1904 = vadd.xlane.f32.xlu0 %v1903_v16  ;;  %v6028_v3 = vcombine.high %v1941_v6, %v1949_v57  ;;  %v6027_v11 = vcombine.low %v1941_v6, %v1949_v57  ;;  %2351 = vmatpush1.bf16.msra.mxu0 %v6033_v10  ;;  %v1942_v16 = vld [vmem:[#allocation11 + $0x8] sm:$0xff]  ;;  %v9062_v10 = vsub.s32 3, %v8805_v38 }
 0xc3a   :  { %v1906_v12 = vsel %vm10090_vm10, %v1902_v18, 0.0  ;;  %vm10098_vm10 = vmmov %vm10087_vm4 }
 0xc3b   :  { %1907 = vadd.xlane.f32.xlu1 %v1906_v12  ;;  %2221 = vmatprep.subr.bf16.mxu1 %v6028_v3  ;;  %v1950_v12 = vld [vmem:[#allocation11 + $0x48] sm:$0xff]  ;;  %10094 = vst [vmem:[#allocation34_spill] sm:$0xff] %v9062_v10 }
 0xc3c   :  { %2222 = vmatpush1.bf16.msra.mxu1 %v6027_v11  ;;  %v1932_v11 = vrot.slane %v8815_v46, %v9057_v43 }
 0xc3d   :  { %2223 = vmatprep.subr.bf16.mxu1 %v6044_v63 }
 0xc40   :  { %2224 = vmatpush1.bf16.msra.mxu1 %v6043_v33 }
 0xcc6   :  { %v1905_v24 = vpop.xlane.xlu0 %1904 }
 0xcc7   :  { %v1909_v17 = vmul.f32 0.03125, %v1905_v24  ;;  %v6029_v24 = vcombine.low %v1942_v16, %v1950_v12 }
 0xcc8   :  { %v1908_v32 = vpop.xlane.xlu1 %1907 }
 0xcc9   :  { %v1911_v41 = vsub.f32 %v1901_v20, %v1909_v17  ;;  %v1910_v31 = vmul.f32 0.03125, %v1908_v32  ;;  %v1968_v20 = vld [vmem:[#allocation11 + $0xd8] sm:$0xff]  ;;  %v6030_v17 = vcombine.high %v1942_v16, %v1950_v12  ;;  %v1946_v32 = vld [vmem:[#allocation11 + $0x28] sm:$0xff] }
 0xcca   :  { %v6049_v44 = vcombine.low %v1960_v25, %v1968_v20  ;;  %v1962_v16 = vld [vmem:[#allocation11 + $0xa8] sm:$0xff] }
 0xccb   :  { %v1912_v36 = vsub.f32 %v1902_v18, %v1910_v31  ;;  %v1913_v8 = vmul.f32 %v1911_v41, %v1911_v41  ;;  %v6050_v18 = vcombine.high %v1960_v25, %v1968_v20  ;;  %v1954_v31 = vld [vmem:[#allocation11 + $0x68] sm:$0xff]  ;;  %2264 = vmatprep.subr.bf16.mxu1 %v6030_v17  ;;  %v1938_v25 = vrot.slane %v8815_v46, %v9062_v10  ;;  %v1948_v46 = vld [vmem:[#allocation11 + $0x38] sm:$0xff] }
 0xccc   :  { %v1970_v12 = vld [vmem:[#allocation11 + $0xe8] sm:$0xff] }
 0xccd   :  { %v1915_v35 = vsel %vm10091_vm12, %v1913_v8, 0.0  ;;  %v1914_v34 = vmul.f32 %v1912_v36, %v1912_v36  ;;  %2352 = vmatprep.subr.bf16.mxu0 %v6050_v18  ;;  %v6038_v8 = vcombine.high %v1946_v32, %v1954_v31  ;;  %v1966_v18 = vld [vmem:[#allocation11 + $0xc8] sm:$0xff]  ;;  %vm10099_vm12 = vmmov %vm10087_vm4 }
 0xcce   :  { %1916 = vadd.xlane.f32.xlu0 %v1915_v35  ;;  %2353 = vmatpush1.bf16.msra.mxu0 %v6049_v44  ;;  %v6037_v35 = vcombine.low %v1946_v32, %v1954_v31  ;;  %v1958_v44 = vld [vmem:[#allocation11 + $0x88] sm:$0xff] }
 0xccf   :  { %v1918_v60 = vsel %vm10092_vm9, %v1914_v34, 0.0  ;;  %2436 = vmatprep.subr.bf16.mxu0 %v6038_v8  ;;  %v6054_v8 = vcombine.high %v1962_v16, %v1970_v12  ;;  %vm10100_vm9 = vmmov %vm10087_vm4 }
 0xcd0   :  { %1919 = vadd.xlane.f32.xlu1 %v1918_v60 }
 0xd5b   :  { %v1917_v34 = vpop.xlane.xlu0 %1916 }
 0xd5c   :  { %v1921_v60 = vmul.f32 0.03125, %v1917_v34  ;;  %v1943_v34 = vld [vmem:[#allocation11 + $0x10] sm:$0xff] }
 0xd5d   :  { %v1920_v6 = vpop.xlane.xlu1 %1919 }
 0xd5e   :  { %v1923_v57 = vadd.f32 1e-05, %v1921_v60  ;;  %v1922_v0 = vmul.f32 0.03125, %v1920_v6  ;;  %v1951_v60 = vld [vmem:[#allocation11 + $0x50] sm:$0xff]  ;;  %v1956_v6 = vld [vmem:[#allocation11 + $0x78] sm:$0xff] }
 0xd60   :  { %7567 = vrsqrt.f32 %v1923_v57  ;;  %v1924_v3 = vadd.f32 1e-05, %v1922_v0  ;;  %v6053_v57 = vcombine.low %v1962_v16, %v1970_v12  ;;  %v6032_v0 = vcombine.high %v1943_v34, %v1951_v60  ;;  %v1961_v12 = vld [vmem:[#allocation11 + $0xa0] sm:$0xff] }
 0xd62   :  { %7569 = vrsqrt.f32 %v1924_v3  ;;  %v6042_v3 = vcombine.high %v1948_v46, %v1956_v6 }
 0xd6a   :  { %v7568_v1 = vpop.eup %7567 }
 0xd6b   :  { %v1927_v29 = vmul.f32 %v7568_v1, %v1911_v41  ;;  %v6046_v41 = vcombine.high %v1958_v44, %v1966_v18  ;;  %v1967_v1 = vld [vmem:[#allocation11 + $0xd0] sm:$0xff] }
 0xd6c   :  { %v7570_v45 = vpop.eup %7569 }
 0xd6d   :  { %v1933_v63 = vmul.f32 %v1932_v11, %v1927_v29  ;;  %v1928_v20 = vmul.f32 %v7570_v45, %v1912_v36  ;;  %v6045_v36 = vcombine.low %v1958_v44, %v1966_v18  ;;  %v1964_v29 = vld [vmem:[#allocation11 + $0xb8] sm:$0xff] }
 0xd6e   :  { %v1972_v45 = vld [vmem:[#allocation11 + $0xf8] sm:$0xff] }
 0xd6f   :  { %v1934_v33 = vmul.f32 %v1932_v11, %v1928_v20  ;;  %v9066_v17 = vadd.f32 %v1938_v25, %v1933_v63  ;;  %v1959_v11 = vld [vmem:[#allocation11 + $0x90] sm:$0xff]  ;;  %v6041_v63 = vcombine.low %v1948_v46, %v1956_v6  ;;  %v1945_v20 = vld [vmem:[#allocation11 + $0x20] sm:$0xff]  ;;  %v6057_v18 = vcombine.low %v1964_v29, %v1972_v45 }
 0xd70   :  { %v6047_v44 = vcombine.low %v1959_v11, %v1967_v1  ;;  %v1955_v46 = vld [vmem:[#allocation11 + $0x70] sm:$0xff] }
 0xd71   :  { %v9068_v32 = vadd.f32 %v1938_v25, %v1934_v33  ;;  %v6031_v25 = vcombine.low %v1943_v34, %v1951_v60  ;;  %v1953_v33 = vld [vmem:[#allocation11 + $0x60] sm:$0xff]  ;;  %v1947_v60 = vld [vmem:[#allocation11 + $0x30] sm:$0xff] }
 0xd72   :  { %v6036_v16 = vcombine.high %v1945_v20, %v1953_v33 }
 0xd73   :  { %v9072_v31 = vpack.c.bf16 %v9068_v32, %v9066_v17 }
 0xd75   :  { %6059 = vmatmul.mubr.msk.bf16.vlgmr.msra.gmra.mrb[12].mxu1 %vm10095_vm11, %v9072_v31  ;;  %6062 = vmatmul.mubr.msk.bf16.vlgmr.msra.gmra.mrb[20].mxu0 %vm10096_vm8, %v9072_v31  ;;  %vm10101_vm11 = vmmov %vm10087_vm4 }
 0xd76   :  { %2265 = vmatpush1.bf16.msra.mxu1 %v6029_v24  ;;  %2437 = vmatpush1.bf16.msra.mxu0 %v6037_v35  ;;  %v6048_v24 = vcombine.high %v1959_v11, %v1967_v1  ;;  %v6058_v35 = vcombine.high %v1964_v29, %v1972_v45  ;;  %v2613_v1 = vld [vmem:[#allocation13] sm:$0xff]  ;;  %vm10106_vm8 = vmmov %vm10087_vm4 }
 0xd77   :  { %2266 = vmatprep.subr.bf16.mxu1 %v6046_v41  ;;  %2438 = vmatprep.subr.bf16.mxu0 %v6054_v8  ;;  %v1969_v41 = vld [vmem:[#allocation11 + $0xe0] sm:$0xff]  ;;  %v6035_v8 = vcombine.low %v1945_v20, %v1953_v33  ;;  %v2614_v20 = vld [vmem:[#allocation13 + $0x8] sm:$0xff] }
 0xd78   :  { %2296 = vmatprep.mubr.bf16.mxu1 %v10088_v42  ;;  %2468 = vmatprep.mubr.bf16.mxu0 %v10088_v42  ;;  %v6052_v34 = vcombine.high %v1961_v12, %v1969_v41  ;;  %v6051_v6 = vcombine.low %v1961_v12, %v1969_v41  ;;  %v2621_v29 = vld [vmem:[#allocation13 + $0x40] sm:$0xff]  ;;  %v2630_v41 = vld [vmem:[#allocation13 + $0x88] sm:$0xff] }
 0xd7a   :  { %2267 = vmatpush1.bf16.msra.mxu1 %v6045_v36  ;;  %2439 = vmatpush1.bf16.msra.mxu0 %v6053_v57  ;;  %v6040_v36 = vcombine.high %v1947_v60, %v1955_v46  ;;  %v1963_v57 = vld [vmem:[#allocation11 + $0xb0] sm:$0xff] }
 0xd7b   :  { %2307 = vmatprep.subr.bf16.mxu1 %v6032_v0  ;;  %2522 = vmatprep.subr.bf16.mxu0 %v6042_v3  ;;  %v1971_v0 = vld [vmem:[#allocation11 + $0xf0] sm:$0xff]  ;;  %v6039_v3 = vcombine.low %v1947_v60, %v1955_v46 }
 0xd7c   :  { %v6056_v11 = vcombine.high %v1963_v57, %v1971_v0  ;;  %v6055_v45 = vcombine.low %v1963_v57, %v1971_v0  ;;  %v9104_v57 = vld [vmem:[#allocation13 + $0x18] sm:$0xff] }
 0xd7d   :  { %6060 = vmatmul.mubr.msk.bf16.vlgmr.msra.gmra.mrb[16].mxu1 %vm10087_vm4, %v9072_v31  ;;  %6064 = vmatmul.mubr.msk.bf16.vlgmr.msra.gmra.mrb[24].mxu0 %vm10097_vm6, %v9072_v31  ;;  %v9106_v0 = vld [vmem:[#allocation13 + $0x58] sm:$0xff]  ;;  %vm10107_vm6 = vmmov %vm10087_vm4 }
 0xd7e   :  { %2308 = vmatpush1.bf16.msra.mxu1 %v6031_v25  ;;  %2523 = vmatpush1.bf16.msra.mxu0 %v6041_v63  ;;  %v6069_v25 = vcombine.high %v2613_v1, %v2621_v29  ;;  %v6068_v63 = vcombine.low %v2613_v1, %v2621_v29  ;;  %v9113_v1 = vsub.s32 6, %v8805_v38  ;;  %v9118_v29 = vld [vmem:[%s9994_s18] sm:$0xff] }
 0xd7f   :  { %2309 = vmatprep.subr.bf16.mxu1 %v6048_v24  ;;  %2524 = vmatprep.subr.bf16.mxu0 %v6058_v35  ;;  %v2629_v24 = vld [vmem:[#allocation13 + $0x80] sm:$0xff]  ;;  %v1989_v39 = vrot.slane %v9118_v29, %v9057_v43 }
 0xd80   :  { %2339 = vmatprep.mubr.bf16.mxu1 %v10088_v42  ;;  %2554 = vmatprep.mubr.bf16.mxu0 %v10088_v42  ;;  %v2637_v35 = vld [vmem:[#allocation13 + $0xc0] sm:$0xff]  ;;  %10102 = vst [vmem:[#allocation35_spill] sm:$0xff] %v9113_v1 }
 0xd81   :  { %v6085_v33 = vcombine.high %v2629_v24, %v2637_v35 }
 0xd82   :  { %2310 = vmatpush1.bf16.msra.mxu1 %v6047_v44  ;;  %2525 = vmatpush1.bf16.msra.mxu0 %v6057_v18  ;;  %v2622_v44 = vld [vmem:[#allocation13 + $0x48] sm:$0xff]  ;;  %v6084_v18 = vcombine.low %v2629_v24, %v2637_v35  ;;  %v1985_v24 = vrot.slane %v9118_v29, %v8820_v26 }
 0xd83   :  { %2393 = vmatprep.subr.bf16.mxu1 %v6036_v16  ;;  %v6070_v16 = vcombine.low %v2614_v20, %v2622_v44  ;;  %v6071_v12 = vcombine.high %v2614_v20, %v2622_v44  ;;  %v9134_v44 = vld [vmem:[%s9994_s18 + $0x8] sm:$0xff] }
 0xd84   :  { %v2021_v2 = vrot.slane %v9134_v44, %v9057_v43 }
 0xd85   :  { %6061 = vmatmul.mubr.msk.bf16.vlgmr.msra.gmra.mrb[20].mxu1 %vm10098_vm10, %v9072_v31  ;;  %6066 = vmatmul.mubr.msk.bf16.vlgmr.msra.gmra.mrb[28].mxu0 %vm10099_vm12, %v9072_v31  ;;  %vm10108_vm10 = vmmov %vm10087_vm4 }
 0xd86   :  { %2394 = vmatpush1.bf16.msra.mxu1 %v6035_v8  ;;  %2425 = vmatprep.mubr.bf16.mxu1 %v10088_v42  ;;  %v2638_v8 = vld [vmem:[#allocation13 + $0xc8] sm:$0xff]  ;;  %vm10109_vm12 = vmmov %vm10087_vm4 }
 0xd87   :  { %2395 = vmatprep.subr.bf16.mxu1 %v6052_v34  ;;  %2853 = vmatprep.subr.bf16.mxu0 %v6071_v12  ;;  %v9096_v34 = vld [vmem:[#allocation13 + $0x10] sm:$0xff]  ;;  %v6087_v60 = vcombine.high %v2630_v41, %v2638_v8  ;;  %v6086_v46 = vcombine.low %v2630_v41, %v2638_v8 }
 0xd8a   :  { %2396 = vmatpush1.bf16.msra.mxu1 %v6051_v6 }
 0xd8b   :  { %2479 = vmatprep.subr.bf16.mxu1 %v6040_v36  ;;  %2854 = vmatpush1.bf16.xpose.msra.mxu0 %v6070_v16 }
 0xd8c   :  { %2855 = vmatprep.subr.bf16.mxu0 %v6087_v60 }
 0xd8d   :  { %6063 = vmatmul.mubr.msk.bf16.vlgmr.msra.gmra.mrb[24].mxu1 %vm10100_vm9, %v9072_v31  ;;  %vm10110_vm9 = vmmov %vm10087_vm4 }
 0xd8e   :  { %2480 = vmatpush1.bf16.msra.mxu1 %v6039_v3  ;;  %2511 = vmatprep.mubr.bf16.mxu1 %v10088_v42 }
 0xd8f   :  { %2481 = vmatprep.subr.bf16.mxu1 %v6056_v11  ;;  %v6075_v11 = vcombine.high %v9104_v57, %v9106_v0 }
 0xd92   :  { %2482 = vmatpush1.bf16.msra.mxu1 %v6055_v45  ;;  %v9121_v45 = vsub.s32 7, %v8805_v38 }
 0xd93   :  { %2812 = vmatprep.subr.bf16.mxu1 %v6069_v25  ;;  %2856 = vmatpush1.bf16.xpose.msra.mxu0 %v6086_v46  ;;  %v1981_v25 = vrot.slane %v9118_v29, %v8810_v37 }
 0xd94   :  { %2935 = vmatprep.subr.bf16.mxu0 %v6075_v11  ;;  %10103 = vst [vmem:[#allocation36_spill] sm:$0xff] %v9121_v45  ;;  %v2009_v35 = vrot.slane %v9118_v29, %v9121_v45 }
 0xd95   :  { %6065 = vmatmul.mubr.msk.bf16.vlgmr.msra.gmra.mrb[28].mxu1 %vm10101_vm11, %v9072_v31  ;;  %v9098_v31 = vld [vmem:[#allocation13 + $0x50] sm:$0xff]  ;;  %vm10113_vm11 = vmmov %vm10087_vm4 }
 0xd96   :  { %v6073_v36 = vcombine.high %v9096_v34, %v9098_v31 }
 0xd9b   :  { %2813 = vmatpush1.bf16.xpose.msra.mxu1 %v6068_v63  ;;  %v2005_v63 = vrot.slane %v9118_v29, %v9113_v1 }
 0xd9c   :  { %2814 = vmatprep.subr.bf16.mxu1 %v6085_v33 }
 0xda3   :  { %2815 = vmatpush1.bf16.xpose.msra.mxu1 %v6084_v18 }
 0xda4   :  { %2894 = vmatprep.subr.bf16.mxu1 %v6073_v36 }
 0xe48   :  { %v2255_v20 = vpop.f32.mrb[12].mxu1  ;;  %v2384_v33 = vpop.f32.mrb[20].mxu0 }
 0xe49   :  { %v2256_v18 = vadd.f32 %v2255_v20, %v1981_v25  ;;  %v2385_v16 = vadd.f32 %v2384_v33, %v2005_v63  ;;  %v2257_v12 = vpop.f32.mrb[13].mxu1  ;;  %v2386_v41 = vpop.f32.mrb[21].mxu0  ;;  %v1993_v20 = vrot.slane %v9118_v29, %v9062_v10  ;;  %v2025_v33 = vrot.slane %v9134_v44, %v9062_v10 }
 0xe4a   :  { %v2258_v8 = vadd.f32 %v2257_v12, %v1985_v24  ;;  %v2387_v60 = vadd.f32 %v2386_v41, %v2009_v35  ;;  %v2259_v46 = vpop.f32.mrb[14].mxu1  ;;  %v2388_v36 = vpop.f32.mrb[22].mxu0 }
 0xe4b   :  { %v2260_v11 = vadd.f32 %v2259_v46, %v1981_v25  ;;  %v2389_v3 = vadd.f32 %v2388_v36, %v2005_v63  ;;  %v2261_v6 = vpop.f32.mrb[15].mxu1  ;;  %v2390_v42 = vpop.f32.mrb[23].mxu0  ;;  %v2565_v12 = vmax.f32 %v2256_v18, 0.0  ;;  %v2571_v41 = vmax.f32 %v2385_v16, 0.0 }
 0xe4c   :  { %v2262_v9 = vadd.f32 %v2261_v6, %v1985_v24  ;;  %v2391_v28 = vadd.f32 %v2390_v42, %v2009_v35  ;;  %v2566_v46 = vmax.f32 %v2258_v8, 0.0  ;;  %v2572_v36 = vmax.f32 %v2387_v60, 0.0 }
 0xe4d   :  { %v2581_v25 = vmax.f32 %v2260_v11, 0.0  ;;  %v2587_v63 = vmax.f32 %v2389_v3, 0.0  ;;  %v9151_v24 = vsub.s32 4, %v8805_v38  ;;  %v9156_v3 = vsub.s32 5, %v8805_v38 }
 0xe4e   :  { %v2582_v27 = vmax.f32 %v2262_v9, 0.0  ;;  %v2588_v61 = vmax.f32 %v2391_v28, 0.0  ;;  %v6089_v11 = vcombine.high %v9144_v59, %v9146_v30 }
 0xe4f   :  { %v2597_v6 = vpack.c.bf16 %v2581_v25, %v2565_v12  ;;  %v9148_v42 = vpack.c.bf16 %v2587_v63, %v2571_v41  ;;  %v1997_v38 = vrot.slane %v9118_v29, %v9151_v24 }
 0xe50   :  { %v2598_v35 = vpack.c.bf16 %v2582_v27, %v2566_v46  ;;  %v9153_v10 = vpack.c.bf16 %v2588_v61, %v2572_v36  ;;  %v2298_v18 = vpop.f32.mrb[16].mxu1  ;;  %v2470_v16 = vpop.f32.mrb[24].mxu0 }
 0xe51   :  { %v2299_v9 = vadd.f32 %v2298_v18, %v1989_v39  ;;  %v2471_v28 = vadd.f32 %v2470_v16, %v2021_v2  ;;  %v2300_v8 = vpop.f32.mrb[17].mxu1  ;;  %v2472_v60 = vpop.f32.mrb[25].mxu0  ;;  %v2037_v18 = vrot.slane %v9134_v44, %v9113_v1 }
 0xe52   :  { %v2301_v12 = vadd.f32 %v2300_v8, %v1993_v20  ;;  %v2473_v41 = vadd.f32 %v2472_v60, %v2025_v33  ;;  %v2302_v25 = vpop.f32.mrb[18].mxu1  ;;  %v2474_v63 = vpop.f32.mrb[26].mxu0  ;;  %2844 = vmatprep.mubr.bf16.mxu1 %v2598_v35  ;;  %v10104_v8 = vcombine.low %v9096_v34, %v9098_v31  ;;  %v2001_v35 = vrot.slane %v9118_v29, %v9156_v3  ;;  %v9177_v29 = vld [vmem:[#allocation13 + $0x20] sm:$0xff] }
 0xe53   :  { %v2303_v27 = vadd.f32 %v2302_v25, %v1989_v39  ;;  %v2475_v61 = vadd.f32 %v2474_v63, %v2021_v2  ;;  %v2304_v46 = vpop.f32.mrb[19].mxu1  ;;  %v2476_v36 = vpop.f32.mrb[27].mxu0  ;;  %2845 = vmatmul.mubr.bf16.vlgmr.msra.gmra.mrb[32].mxu1 %v2597_v6  ;;  %v2041_v2 = vrot.slane %v9134_v44, %v9121_v45  ;;  %v2567_v39 = vmax.f32 %v2299_v9, 0.0 }
 0xe54   :  { %v2305_v16 = vadd.f32 %v2304_v46, %v1993_v20  ;;  %v2477_v43 = vadd.f32 %v2476_v36, %v2025_v33  ;;  %2895 = vmatpush1.bf16.xpose.msra.mxu1 %v10104_v8  ;;  %v2575_v6 = vmax.f32 %v2471_v28, 0.0  ;;  %v2568_v63 = vmax.f32 %v2301_v12, 0.0  ;;  %v9171_v33 = vld [vmem:[#allocation13 + $0x98] sm:$0xff]  ;;  %v2625_v36 = vld [vmem:[#allocation13 + $0x60] sm:$0xff] }
 0xe55   :  { %v2583_v60 = vmax.f32 %v2303_v27, 0.0  ;;  %v2591_v25 = vmax.f32 %v2475_v61, 0.0  ;;  %2896 = vmatprep.subr.bf16.mxu1 %v6089_v11  ;;  %v2576_v5 = vmax.f32 %v2473_v41, 0.0  ;;  %v9173_v46 = vld [vmem:[#allocation13 + $0xd8] sm:$0xff]  ;;  %v6088_v11 = vcombine.low %v9144_v59, %v9146_v30 }
 0xe56   :  { %v2584_v1 = vmax.f32 %v2305_v16, 0.0  ;;  %v2592_v20 = vmax.f32 %v2477_v43, 0.0  ;;  %v6091_v16 = vcombine.high %v9171_v33, %v9173_v46  ;;  %v2013_v30 = vrot.slane %v9134_v44, %v8810_v37 }
 0xe57   :  { %v2599_v34 = vpack.c.bf16 %v2583_v60, %v2567_v39  ;;  %v9175_v31 = vpack.c.bf16 %v2591_v25, %v2575_v6 }
 0xe58   :  { %v2600_v8 = vpack.c.bf16 %v2584_v1, %v2568_v63  ;;  %v9179_v9 = vpack.c.bf16 %v2592_v20, %v2576_v5  ;;  %v2341_v28 = vpop.f32.mrb[20].mxu1  ;;  %v2556_v27 = vpop.f32.mrb[28].mxu0  ;;  %v6077_v5 = vcombine.high %v9177_v29, %v2625_v36 }
 0xe59   :  { %v2342_v12 = vadd.f32 %v2341_v28, %v1997_v38  ;;  %v2557_v43 = vadd.f32 %v2556_v27, %v2037_v18  ;;  %v2343_v41 = vpop.f32.mrb[21].mxu1  ;;  %v2558_v61 = vpop.f32.mrb[29].mxu0  ;;  %v10105_v27 = vcombine.low %v9104_v57, %v9106_v0  ;;  %v2626_v57 = vld [vmem:[#allocation13 + $0x68] sm:$0xff] }
 0xe5a   :  { %v2344_v39 = vadd.f32 %v2343_v41, %v2001_v35  ;;  %v2559_v6 = vadd.f32 %v2558_v61, %v2041_v2  ;;  %v2345_v60 = vpop.f32.mrb[22].mxu1  ;;  %v2560_v25 = vpop.f32.mrb[30].mxu0  ;;  %2885 = vmatprep.mubr.bf16.mxu0 %v2600_v8  ;;  %v2017_v8 = vrot.slane %v9134_v44, %v8820_v26 }
 0xe5b   :  { %v2346_v1 = vadd.f32 %v2345_v60, %v1997_v38  ;;  %v2561_v63 = vadd.f32 %v2560_v25, %v2037_v18  ;;  %v2347_v20 = vpop.f32.mrb[23].mxu1  ;;  %v2562_v45 = vpop.f32.mrb[31].mxu0  ;;  %2886 = vmatmul.mubr.bf16.vlgmr.msra.gmra.mrb[32].mxu0 %v2599_v34  ;;  %v2569_v41 = vmax.f32 %v2342_v12, 0.0  ;;  %v2579_v61 = vmax.f32 %v2557_v43, 0.0  ;;  %v2633_v34 = vld [vmem:[#allocation13 + $0xa0] sm:$0xff] }
 0xe5c   :  { %v2348_v59 = vadd.f32 %v2347_v20, %v2001_v35  ;;  %v2563_v28 = vadd.f32 %v2562_v45, %v2041_v2  ;;  %2897 = vmatpush1.bf16.xpose.msra.mxu1 %v6088_v11  ;;  %2936 = vmatpush1.bf16.xpose.msra.mxu0 %v10105_v27  ;;  %v2641_v60 = vld [vmem:[#allocation13 + $0xe0] sm:$0xff]  ;;  %v2570_v25 = vmax.f32 %v2344_v39, 0.0  ;;  %v2580_v35 = vmax.f32 %v2559_v6, 0.0  ;;  %v2618_v11 = vld [vmem:[#allocation13 + $0x28] sm:$0xff] }
 0xe5d   :  { %v2585_v38 = vmax.f32 %v2346_v1, 0.0  ;;  %v2595_v18 = vmax.f32 %v2561_v63, 0.0  ;;  %2967 = vmatprep.mubr.bf16.mxu0 %v9153_v10  ;;  %2937 = vmatprep.subr.bf16.mxu0 %v6091_v16  ;;  %v6090_v10 = vcombine.low %v9171_v33, %v9173_v46  ;;  %v6076_v16 = vcombine.low %v9177_v29, %v2625_v36 }
 0xe5e   :  { %v2586_v45 = vmax.f32 %v2348_v59, 0.0  ;;  %v2596_v2 = vmax.f32 %v2563_v28, 0.0  ;;  %2976 = vmatprep.subr.bf16.mxu1 %v6077_v5  ;;  %v6093_v6 = vcombine.high %v2633_v34, %v2641_v60  ;;  %v6079_v63 = vcombine.high %v2618_v11, %v2626_v57 }
 0xe5f   :  { %v2601_v0 = vpack.c.bf16 %v2585_v38, %v2569_v41  ;;  %v9194_v20 = vpack.c.bf16 %v2595_v18, %v2579_v61  ;;  %v2029_v33 = vrot.slane %v9134_v44, %v9151_v24  ;;  %v2033_v36 = vrot.slane %v9134_v44, %v9156_v3 }
 0xe60   :  { %v2602_v27 = vpack.c.bf16 %v2586_v45, %v2570_v25  ;;  %v9196_v12 = vpack.c.bf16 %v2596_v2, %v2580_v35  ;;  %v2427_v43 = vpop.f32.mrb[24].mxu1  ;;  %v2634_v25 = vld [vmem:[#allocation13 + $0xa8] sm:$0xff]  ;;  %v2619_v45 = vld [vmem:[#allocation13 + $0x30] sm:$0xff] }
 0xe61   :  { %v2428_v1 = vadd.f32 %v2427_v43, %v2013_v30  ;;  %v2429_v39 = vpop.f32.mrb[25].mxu1  ;;  %v2642_v35 = vld [vmem:[#allocation13 + $0xe8] sm:$0xff]  ;;  %v2627_v2 = vld [vmem:[#allocation13 + $0x70] sm:$0xff]  ;;  %v6078_v43 = vcombine.low %v2618_v11, %v2626_v57 }
 0xe62   :  { %v2430_v59 = vadd.f32 %v2429_v39, %v2017_v8  ;;  %v2431_v5 = vpop.f32.mrb[26].mxu1  ;;  %2926 = vmatprep.mubr.bf16.mxu1 %v2602_v27  ;;  %v6092_v27 = vcombine.low %v2633_v34, %v2641_v60  ;;  %v2635_v11 = vld [vmem:[#allocation13 + $0xb0] sm:$0xff] }
 0xe63   :  { %v2432_v28 = vadd.f32 %v2431_v5, %v2013_v30  ;;  %v2433_v41 = vpop.f32.mrb[27].mxu1  ;;  %2927 = vmatmul.mubr.bf16.vlgmr.msra.gmra.mrb[36].mxu1 %v2601_v0  ;;  %v2573_v38 = vmax.f32 %v2428_v1, 0.0  ;;  %v6095_v1 = vcombine.high %v2634_v25, %v2642_v35  ;;  %v2643_v57 = vld [vmem:[#allocation13 + $0xf0] sm:$0xff] }
 0xe64   :  { %v2434_v61 = vadd.f32 %v2433_v41, %v2017_v8  ;;  %2938 = vmatpush1.bf16.xpose.msra.mxu0 %v6090_v10  ;;  %2977 = vmatpush1.bf16.xpose.msra.mxu1 %v6076_v16  ;;  %v2574_v46 = vmax.f32 %v2430_v59, 0.0 }
 0xe65   :  { %v2589_v18 = vmax.f32 %v2432_v28, 0.0  ;;  %2978 = vmatprep.subr.bf16.mxu1 %v6093_v6  ;;  %3017 = vmatprep.subr.bf16.mxu0 %v6079_v63  ;;  %v6081_v63 = vcombine.high %v2619_v45, %v2627_v2 }
 0xe66   :  { %v2590_v29 = vmax.f32 %v2434_v61, 0.0 }
 0xe67   :  { %v2605_v30 = vpack.c.bf16 %v2589_v18, %v2573_v38  ;;  %v2620_v38 = vld [vmem:[#allocation13 + $0x38] sm:$0xff] }
 0xe68   :  { %v2606_v8 = vpack.c.bf16 %v2590_v29, %v2574_v46  ;;  %v2513_v0 = vpop.f32.mrb[28].mxu1  ;;  %v2628_v18 = vld [vmem:[#allocation13 + $0x78] sm:$0xff]  ;;  %v6094_v46 = vcombine.low %v2634_v25, %v2642_v35  ;;  %v6097_v29 = vcombine.high %v2635_v11, %v2643_v57 }
 0xe69   :  { %v2514_v10 = vadd.f32 %v2513_v0, %v2029_v33  ;;  %v2515_v16 = vpop.f32.mrb[29].mxu1  ;;  %v6096_v0 = vcombine.low %v2635_v11, %v2643_v57 }
 0xe6a   :  { %v2516_v39 = vadd.f32 %v2515_v16, %v2033_v36  ;;  %v2517_v6 = vpop.f32.mrb[30].mxu1  ;;  %3008 = vmatprep.mubr.bf16.mxu1 %v2606_v8  ;;  %v2644_v8 = vld [vmem:[#allocation13 + $0xf8] sm:$0xff] }
 0xe6b   :  { %v2518_v59 = vadd.f32 %v2517_v6, %v2029_v33  ;;  %2968 = vmatmul.mubr.bf16.vlgmr.msra.gmra.mrb[36].mxu0 %v9148_v42  ;;  %v2519_v44 = vpop.f32.mrb[31].mxu1  ;;  %v2577_v28 = vmax.f32 %v2514_v10, 0.0  ;;  %v6080_v42 = vcombine.low %v2619_v45, %v2627_v2 }
 0xe6c   :  { %v2520_v5 = vadd.f32 %v2519_v44, %v2033_v36  ;;  %2979 = vmatpush1.bf16.xpose.msra.mxu1 %v6092_v27  ;;  %3018 = vmatpush1.bf16.xpose.msra.mxu0 %v6078_v43  ;;  %v2578_v34 = vmax.f32 %v2516_v39, 0.0  ;;  %v6083_v36 = vcombine.high %v2620_v38, %v2628_v18  ;;  %v6082_v27 = vcombine.low %v2620_v38, %v2628_v18 }
 0xe6d   :  { %v2593_v41 = vmax.f32 %v2518_v59, 0.0  ;;  %3049 = vmatprep.mubr.bf16.mxu0 %v9179_v9  ;;  %3019 = vmatprep.subr.bf16.mxu0 %v6095_v1  ;;  %v2636_v9 = vld [vmem:[#allocation13 + $0xb8] sm:$0xff] }
 0xe6e   :  { %v2594_v60 = vmax.f32 %v2520_v5, 0.0  ;;  %3058 = vmatprep.subr.bf16.mxu1 %v6081_v63  ;;  %v6099_v43 = vcombine.high %v2636_v9, %v2644_v8  ;;  %v6098_v25 = vcombine.low %v2636_v9, %v2644_v8 }
 0xe6f   :  { %v2609_v61 = vpack.c.bf16 %v2593_v41, %v2577_v28 }
 0xe70   :  { %v2610_v33 = vpack.c.bf16 %v2594_v60, %v2578_v34 }
 0xe73   :  { %3009 = vmatmul.mubr.bf16.vlgmr.msra.gmra.mrb[40].mxu1 %v2605_v30 }
 0xe74   :  { %3020 = vmatpush1.bf16.xpose.msra.mxu0 %v6094_v46  ;;  %3059 = vmatpush1.bf16.xpose.msra.mxu1 %v6080_v42 }
 0xe75   :  { %3090 = vmatprep.mubr.bf16.mxu1 %v2610_v33  ;;  %3060 = vmatprep.subr.bf16.mxu1 %v6097_v29 }
 0xe76   :  { %3099 = vmatprep.subr.bf16.mxu0 %v6083_v36 }
 0xe7b   :  { %3050 = vmatmul.mubr.bf16.vlgmr.msra.gmra.mrb[40].mxu0 %v9175_v31  ;;  %v6067_v31 = vld [vmem:[%s9996_s20] ss:$0 sm:$0xff] }
 0xe7c   :  { %3061 = vmatpush1.bf16.xpose.msra.mxu1 %v6096_v0  ;;  %3100 = vmatpush1.bf16.xpose.msra.mxu0 %v6082_v27 }
 0xe7d   :  { %3131 = vmatprep.mubr.bf16.mxu0 %v9196_v12  ;;  %3101 = vmatprep.subr.bf16.mxu0 %v6099_v43 }
 0xe7e   :  { %6636 = vmatprep.subr.bf16.mxu1 %v10074_v19 }
 0xe83   :  { %3091 = vmatmul.mubr.bf16.vlgmr.msra.gmra.mrb[44].mxu1 %v2609_v61 }
 0xe84   :  { %3102 = vmatpush1.bf16.xpose.msra.mxu0 %v6098_v25  ;;  %6640 = vmatprep.mubr.msk.bf16.mxu1 %vm7952_vm3, %v10074_v19 }
 0xe8b   :  { %3132 = vmatmul.mubr.bf16.vlgmr.msra.gmra.mrb[44].mxu0 %v9194_v20 }
 0xf26   :  { %v2846_v35 = vpop.f32.mrb[32].mxu1 }
 0xf27   :  { %v2848_v30 = vpop.f32.mrb[33].mxu1  ;;  %v2847_v12 = vadd.f32 %v6067_v31, %v2846_v35 }
 0xf28   :  { %v2849_v45 = vpop.f32.mrb[34].mxu1 }
 0xf29   :  { %v2851_v2 = vpop.f32.mrb[35].mxu1  ;;  %v2850_v16 = vadd.f32 %v6067_v31, %v2849_v45 }
 0xf2e   :  { %v2887_v10 = vpop.f32.mrb[32].mxu0 }
 0xf2f   :  { %v2888_v1 = vadd.f32 %v2887_v10, %v2847_v12  ;;  %v2889_v39 = vpop.f32.mrb[33].mxu0 }
 0xf30   :  { %v2890_v6 = vpop.f32.mrb[34].mxu0 }
 0xf31   :  { %v2891_v63 = vadd.f32 %v2890_v6, %v2850_v16  ;;  %v2892_v59 = vpop.f32.mrb[35].mxu0 }
 0xf36   :  { %v2928_v44 = vpop.f32.mrb[36].mxu1 }
 0xf37   :  { %v2929_v5 = vadd.f32 %v2928_v44, %v2888_v1  ;;  %v2930_v28 = vpop.f32.mrb[37].mxu1 }
 0xf38   :  { %v2931_v20 = vpop.f32.mrb[38].mxu1 }
 0xf39   :  { %v2932_v41 = vadd.f32 %v2931_v20, %v2891_v63  ;;  %v2933_v34 = vpop.f32.mrb[39].mxu1 }
 0xf3e   :  { %v2969_v60 = vpop.f32.mrb[36].mxu0 }
 0xf3f   :  { %v2970_v11 = vadd.f32 %v2969_v60, %v2929_v5  ;;  %v2971_v57 = vpop.f32.mrb[37].mxu0 }
 0xf40   :  { %v2972_v61 = vpop.f32.mrb[38].mxu0 }
 0xf41   :  { %v2973_v38 = vadd.f32 %v2972_v61, %v2932_v41  ;;  %v2974_v18 = vpop.f32.mrb[39].mxu0 }
 0xf46   :  { %v3010_v33 = vpop.f32.mrb[40].mxu1 }
 0xf47   :  { %v3011_v46 = vadd.f32 %v3010_v33, %v2970_v11  ;;  %v3012_v42 = vpop.f32.mrb[41].mxu1 }
 0xf48   :  { %v3013_v29 = vpop.f32.mrb[42].mxu1 }
 0xf49   :  { %v3014_v36 = vadd.f32 %v3013_v29, %v2973_v38  ;;  %v3015_v9 = vpop.f32.mrb[43].mxu1 }
 0xf4e   :  { %v3051_v8 = vpop.f32.mrb[40].mxu0 }
 0xf4f   :  { %v3052_v0 = vadd.f32 %v3051_v8, %v3011_v46  ;;  %v3053_v27 = vpop.f32.mrb[41].mxu0  ;;  %v7426_v46 = vld [vmem:[%s9982_s6 + $0x18] sm:$0xff]  }
 0xf50   :  { %v3054_v43 = vpop.f32.mrb[42].mxu0  ;;  %v7731_v27 = vld [vmem:[%s9992_s16] sm:$0x3f] }
 0xf51   :  { %v3055_v25 = vadd.f32 %v3054_v43, %v3014_v36  ;;  %v3056_v35 = vpop.f32.mrb[43].mxu0  ;;  %v3171_v43 = vrot.slane %v7731_v27, %v9151_v24 }
 0xf56   :  { %v3092_v30 = vpop.f32.mrb[44].mxu1 }
 0xf57   :  { %v3093_v45 = vadd.f32 %v3092_v30, %v3052_v0  ;;  %v3094_v2 = vpop.f32.mrb[45].mxu1 }
 0xf58   :  { %v3095_v31 = vpop.f32.mrb[46].mxu1 }
 0xf59   :  { %v3096_v12 = vadd.f32 %v3095_v31, %v3055_v25  ;;  %v3097_v10 = vpop.f32.mrb[47].mxu1  ;;  %v3177_v31 = vrot.slane %v7731_v27, %v9156_v3 }
 0xf5e   :  { %v3133_v16 = vpop.f32.mrb[44].mxu0 }
 0xf5f   :  { %v3134_v1 = vadd.f32 %v3133_v16, %v3093_v45  ;;  %v3135_v39 = vpop.f32.mrb[45].mxu0 }
 0xf60   :  { %v3136_v6 = vpop.f32.mrb[46].mxu0  ;;  %v6105_v39 = vld [vmem:[#allocation2 + $0x1] ss:$0 sm:$0xff] }
 0xf61   :  { %v3140_v63 = vadd.f32 %v3134_v1, %v9066_v17  ;;  %v3137_v59 = vadd.f32 %v3136_v6, %v3096_v12  ;;  %v3138_v44 = vpop.f32.mrb[47].mxu0 }
 0xf63   :  { %v3141_v5 = vadd.f32 %v3137_v59, %v9068_v32  ;;  %v3142_v28 = vsel %vm10106_vm8, %v3140_v63, 0.0  ;;  %v7425_v32 = vld [vmem:[%s9982_s6 + $0x10] sm:$0xff]   ;;  %vm10114_vm8 = vcmask 392448  }
 0xf64   :  { %3143 = vadd.xlane.f32.xlu0 %v3142_v28  ;;  %6637 = vmatpush3.bf16.msra.mxu1 %v7425_v32 }
 0xf65   :  { %v3145_v20 = vsel %vm10087_vm4, %v3141_v5, 0.0  ;;  %6638 = vmatprep.subr.bf16.mxu1 %v10074_v19  ;;  %vm10115_vm4 = vcmask 523648  }
 0xf66   :  { %3146 = vadd.xlane.f32.xlu1 %v3145_v20 }
 0xf68   :  { %6639 = vmatpush3.bf16.msra.mxu1 %v7426_v46 }
 0xff1   :  { %v3144_v41 = vpop.xlane.xlu0 %3143 }
 0xff2   :  { %v3148_v34 = vmul.f32 0.03125, %v3144_v41 }
 0xff3   :  { %v3147_v60 = vpop.xlane.xlu1 %3146 }
 0xff4   :  { %v3150_v11 = vsub.f32 %v3140_v63, %v3148_v34  ;;  %v3149_v57 = vmul.f32 0.03125, %v3147_v60 }
 0xff6   :  { %v3151_v61 = vsub.f32 %v3141_v5, %v3149_v57  ;;  %v3152_v38 = vmul.f32 %v3150_v11, %v3150_v11 }
 0xff8   :  { %v3154_v18 = vsel %vm10107_vm6, %v3152_v38, 0.0  ;;  %v3153_v17 = vmul.f32 %v3151_v61, %v3151_v61  ;;  %vm10116_vm6 = vcmask 261248  }
 0xff9   :  { %3155 = vadd.xlane.f32.xlu0 %v3154_v18 }
 0xffa   :  { %v3157_v33 = vsel %vm10108_vm10, %v3153_v17, 0.0  ;;  %vm10117_vm10 = vcmask 917248  }
 0xffb   :  { %3158 = vadd.xlane.f32.xlu1 %v3157_v33 }
0x1086   :  { %v3156_v42 = vpop.xlane.xlu0 %3155 }
0x1087   :  { %v3160_v29 = vmul.f32 0.03125, %v3156_v42 }
0x1088   :  { %v3159_v36 = vpop.xlane.xlu1 %3158 }
0x1089   :  { %v3162_v9 = vadd.f32 1e-05, %v3160_v29  ;;  %v3161_v8 = vmul.f32 0.03125, %v3159_v36 }
0x108b   :  { %7571 = vrsqrt.f32 %v3162_v9  ;;  %v3163_v0 = vadd.f32 1e-05, %v3161_v8 }
0x108d   :  { %7573 = vrsqrt.f32 %v3163_v0 }
0x1095   :  { %v7572_v25 = vpop.eup %7571 }
0x1096   :  { %v3166_v35 = vmul.f32 %v7572_v25, %v3150_v11 }
0x1097   :  { %v7574_v30 = vpop.eup %7573 }
0x1098   :  { %v3172_v45 = vmul.f32 %v3171_v43, %v3166_v35  ;;  %v3167_v2 = vmul.f32 %v7574_v30, %v3151_v61 }
0x109a   :  { %v3173_v12 = vmul.f32 %v3171_v43, %v3167_v2  ;;  %v9234_v10 = vadd.f32 %v3177_v31, %v3172_v45 }
0x109c   :  { %v9236_v16 = vadd.f32 %v3177_v31, %v3173_v12 }
0x109e   :  { %v3189_v1 = vpack.c.bf16 %v9236_v16, %v9234_v10 }
0x10a0   :  { %6641 = vmatmul.mubr.msk.bf16.vlgmr.msra.gmra.mrb[48].mxu1 %vm10109_vm12, %v3189_v1  ;;  %vm10118_vm12 = vcmask 654848  }
0x1173   :  { %v3245_v6 = vpop.f32.mrb[48].mxu1 }
0x1174   :  { %v9241_v63 = vadd.f32 %v6105_v39, %v3245_v6  ;;  %v6642_v59 = vpop.f32.mrb[49].mxu1 }
0x1175   :  { %v3248_v44 = vpop.f32.mrb[50].mxu1 }
0x1176   :  { %v9243_v5 = vadd.f32 %v6105_v39, %v3248_v44  ;;  %v6643_v28 = vpop.f32.mrb[51].mxu1  ;;  %6676 = vmatprep.mubr.msk.f32.mxu0 %vm10110_vm9, %v9241_v63  ;;  %v3261_v20 = vmul.f32 %v9241_v63, %v8360_v50  ;;  %v3259_v34 = vmul.f32 %v9241_v63, %v8354_v47  ;;  %v3263_v18 = vmul.f32 %v9241_v63, %v8364_v52 }
0x1177   :  { %v3267_v17 = vmul.f32 %v9241_v63, %v8372_v56  ;;  %v3265_v29 = vmul.f32 %v9241_v63, %v8368_v54  ;;  %v3271_v36 = vmul.f32 %v9241_v63, %v8398_v13  ;;  %v3269_v43 = vmul.f32 %v9241_v63, %v8378_v62 }
0x1178   :  { %v3262_v41 = vmul.f32 %v9243_v5, %v8358_v49  ;;  %v3260_v60 = vmul.f32 %v9243_v5, %v8356_v48  ;;  %v3264_v61 = vmul.f32 %v9243_v5, %v8362_v51  ;;  %v3268_v38 = vmul.f32 %v9243_v5, %v8370_v55 }
0x1179   :  { %v3266_v46 = vmul.f32 %v9243_v5, %v8366_v53  ;;  %v3272_v42 = vmul.f32 %v9243_v5, %v8392_v7  ;;  %v3270_v0 = vmul.f32 %v9243_v5, %v8374_v58  ;;  %v3278_v27 = vmul.f32 %v9243_v5, %v8488_v14 }
0x117a   :  { %v7300_v11 = vpack.i.bf16 %v3262_v41, %v3261_v20  ;;  %v7295_v57 = vpack.i.bf16 %v3260_v60, %v3259_v34  ;;  %v7305_v33 = vpack.i.bf16 %v3264_v61, %v3263_v18  ;;  %v7315_v32 = vpack.i.bf16 %v3268_v38, %v3267_v17 }
0x117b   :  { %v7310_v9 = vpack.i.bf16 %v3266_v46, %v3265_v29  ;;  %v7325_v8 = vpack.i.bf16 %v3272_v42, %v3271_v36  ;;  %v3277_v25 = vmul.f32 %v9241_v63, %v8490_v15  ;;  %v7320_v35 = vpack.i.bf16 %v3270_v0, %v3269_v43 }
0x117c   :  { %7301 = vrot.lane.b32.xlu1 %v7300_v11, %s7954_s13  ;;  %7296 = vrot.lane.b32.xlu0 %v7295_v57, %s7954_s13  ;;  %v3274_v45 = vmul.f32 %v9243_v5, %v8410_v21  ;;  %v3280_v2 = vmul.f32 %v9243_v5, %v8501_v22  ;;  %v3273_v14 = vmul.f32 %v9241_v63, %v8418_v40  ;;  %v10111_v22 = vld [vmem:[#allocation21_spill] sm:$0xff]  ;;  %vm10119_vm9 = vcmask 786048   ;;  %v7735_v57 = vld [vmem:[%s10055_s9 + $0x10] sm:$0xff] }
0x117d   :  { %v7340_v30 = vpack.i.bf16 %v3278_v27, %v3277_v25  ;;  %v3279_v31 = vmul.f32 %v9241_v63, %v8503_v23  ;;  %v3276_v1 = vmul.f32 %v9243_v5, %v8480_v4  ;;  %v3275_v39 = vmul.f32 %v9241_v63, %v10111_v22 }
0x117e   :  { %v7330_v12 = vpack.i.bf16 %v3274_v45, %v3273_v14 }
0x117f   :  { %v7345_v15 = vpack.i.bf16 %v3280_v2, %v3279_v31  ;;  %v7335_v6 = vpack.i.bf16 %v3276_v1, %v3275_v39 }
0x1180   :  { %7306 = vrot.lane.b32.xlu1 %v7305_v33, %s7954_s13  ;;  %7316 = vrot.lane.b32.xlu0 %v7315_v32, %s7954_s13 }
0x1184   :  { %7311 = vrot.lane.b32.xlu1 %v7310_v9, %s7954_s13  ;;  %7326 = vrot.lane.b32.xlu0 %v7325_v8, %s7954_s13 }
0x1188   :  { %7321 = vrot.lane.b32.xlu1 %v7320_v35, %s7954_s13  ;;  %7341 = vrot.lane.b32.xlu0 %v7340_v30, %s7945_s27 }
0x118c   :  { %7331 = vrot.lane.b32.xlu1 %v7330_v12, %s7954_s13  ;;  %7346 = vrot.lane.b32.xlu0 %v7345_v15, %s7945_s27 }
0x1190   :  { %7336 = vrot.lane.b32.xlu1 %v7335_v6, %s7945_s27 }
0x11ee   :  { %v7302_v59 = vpop.permute.xlu1 %7301  ;;  %v7297_v44 = vpop.permute.xlu0 %7296 }
0x11ef   :  { %v7304_v28 = vunpack.i.h.bf16 %v7302_v59  ;;  %v7303_v20 = vunpack.i.l.bf16 %v7302_v59  ;;  %v7299_v23 = vunpack.i.h.bf16 %v7297_v44  ;;  %v7298_v41 = vunpack.i.l.bf16 %v7297_v44 }
0x11f1   :  { %v6992_v34 = vpack.c.bf16 %v7299_v23, %v7298_v41  ;;  %v6998_v4 = vpack.c.bf16 %v7304_v28, %v7303_v20 }
0x11f2   :  { %v7307_v60 = vpop.permute.xlu1 %7306  ;;  %v7317_v11 = vpop.permute.xlu0 %7316 }
0x11f3   :  { %6994 = vmatprep.subr.msk.bf16.mxu0 %vm8466_vm5, %v6992_v34  ;;  %v7309_v38 = vunpack.i.h.bf16 %v7307_v60  ;;  %v7308_v18 = vunpack.i.l.bf16 %v7307_v60  ;;  %v7319_v45 = vunpack.i.h.bf16 %v7317_v11  ;;  %v7318_v2 = vunpack.i.l.bf16 %v7317_v11  ;;  %v7732_v60 = vld [vmem:[%s10071_s30 + $0x8] sm:$0xff] }
0x11f4   :  { %6997 = vmatpush3.bf16.xpose.msk.msra.mxu0 %vm8466_vm5, %v6992_v34 }
0x11f5   :  { %7000 = vmatprep.subr.msk.bf16.mxu0 %vm8466_vm5, %v6998_v4  ;;  %v7004_v32 = vpack.c.bf16 %v7309_v38, %v7308_v18  ;;  %v7016_v15 = vpack.c.bf16 %v7319_v45, %v7318_v2  ;;  %v10125_v2 = vld [vmem:[#allocation25_spill] sm:$0xff] }
0x11f6   :  { %v7312_v61 = vpop.permute.xlu1 %7311  ;;  %v7327_v17 = vpop.permute.xlu0 %7326 }
0x11f7   :  { %v7314_v46 = vunpack.i.h.bf16 %v7312_v61  ;;  %v7313_v42 = vunpack.i.l.bf16 %v7312_v61  ;;  %v7329_v59 = vunpack.i.h.bf16 %v7327_v17  ;;  %v7328_v44 = vunpack.i.l.bf16 %v7327_v17 }
0x11f9   :  { %v7010_v9 = vpack.c.bf16 %v7314_v46, %v7313_v42  ;;  %v7028_v28 = vpack.c.bf16 %v7329_v59, %v7328_v44  ;;  %v10129_v44 = vld [vmem:[#allocation28_spill] sm:$0xff] }
0x11fa   :  { %v7322_v33 = vpop.permute.xlu1 %7321  ;;  %v7342_v29 = vpop.permute.xlu0 %7341 }
0x11fb   :  { %v7344_v0 = vunpack.i.h.bf16 %v7342_v29  ;;  %v7343_v27 = vunpack.i.l.bf16 %v7342_v29  ;;  %v7324_v22 = vunpack.i.h.bf16 %v7322_v33  ;;  %v7323_v39 = vunpack.i.l.bf16 %v7322_v33  ;;  %v7733_v33 = vld [vmem:[%s10071_s30] sm:$0xff] }
0x11fc   :  { %7003 = vmatpush3.bf16.xpose.msk.msra.mxu0 %vm8466_vm5, %v6998_v4 }
0x11fd   :  { %7006 = vmatprep.subr.msk.bf16.mxu0 %vm8466_vm5, %v7004_v32  ;;  %v7044_v12 = vpack.c.bf16 %v7344_v0, %v7343_v27  ;;  %v7022_v6 = vpack.c.bf16 %v7324_v22, %v7323_v39  ;;  %v10122_v0 = vld [vmem:[#allocation22_spill] sm:$0xff] }
0x11fe   :  { %v7332_v36 = vpop.permute.xlu1 %7331  ;;  %v7347_v35 = vpop.permute.xlu0 %7346  ;;  %v3282_v27 = vmul.f32 %v9243_v5, %v10122_v0 }
0x11ff   :  { %v7349_v14 = vunpack.i.h.bf16 %v7347_v35  ;;  %v7348_v31 = vunpack.i.l.bf16 %v7347_v35  ;;  %v7334_v20 = vunpack.i.h.bf16 %v7332_v36  ;;  %v7333_v23 = vunpack.i.l.bf16 %v7332_v36 }
0x1201   :  { %v7048_v1 = vpack.c.bf16 %v7349_v14, %v7348_v31  ;;  %v7034_v41 = vpack.c.bf16 %v7334_v20, %v7333_v23  ;;  %v3283_v14 = vmul.f32 %v9241_v63, %v10125_v2 }
0x1202   :  { %v7337_v8 = vpop.permute.xlu1 %7336 }
0x1203   :  { %v7339_v43 = vunpack.i.h.bf16 %v7337_v8  ;;  %v7338_v25 = vunpack.i.l.bf16 %v7337_v8 }
0x1204   :  { %7009 = vmatpush3.bf16.xpose.msk.msra.mxu0 %vm8466_vm5, %v7004_v32 }
0x1205   :  { %7012 = vmatprep.subr.msk.bf16.mxu0 %vm8466_vm5, %v7010_v9  ;;  %v7040_v30 = vpack.c.bf16 %v7339_v43, %v7338_v25  ;;  %v10123_v43 = vld [vmem:[#allocation23_spill] sm:$0xff] }
0x1206   :  { %v3281_v25 = vmul.f32 %v9241_v63, %v10123_v43 }
0x1207   :  { %7041 = vmatprep.subr.bf16.mxu1 %v7040_v30 }
0x1208   :  { %7043 = vmatpush3.bf16.msra.mxu1 %v7040_v30  ;;  %v7350_v35 = vpack.i.bf16 %v3282_v27, %v3281_v25  ;;  %v10124_v30 = vld [vmem:[#allocation24_spill] sm:$0xff] }
0x1209   :  { %7045 = vmatprep.subr.bf16.mxu1 %v7044_v12  ;;  %v3284_v45 = vmul.f32 %v9243_v5, %v10124_v30 }
0x120b   :  { %v7355_v31 = vpack.i.bf16 %v3284_v45, %v3283_v14 }
0x120c   :  { %7015 = vmatpush3.bf16.xpose.msk.msra.mxu0 %vm8466_vm5, %v7010_v9  ;;  %7047 = vmatpush3.bf16.msra.mxu1 %v7044_v12  ;;  %v10126_v12 = vld [vmem:[#allocation27_spill] sm:$0xff] }
0x120d   :  { %7018 = vmatprep.subr.msk.bf16.mxu0 %vm8466_vm5, %v7016_v15  ;;  %7049 = vmatprep.subr.bf16.mxu1 %v7048_v1 }
0x1210   :  { %7051 = vmatpush3.bf16.msra.mxu1 %v7048_v1  ;;  %v10127_v1 = vld [vmem:[#allocation26_spill] sm:$0xff] }
0x1211   :  { %v3285_v22 = vmul.f32 %v9241_v63, %v10127_v1 }
0x1214   :  { %7021 = vmatpush3.bf16.xpose.msk.msra.mxu0 %vm8466_vm5, %v7016_v15  ;;  %v3286_v15 = vmul.f32 %v9243_v5, %v10126_v12 }
0x1215   :  { %7024 = vmatprep.subr.msk.bf16.mxu0 %vm8466_vm5, %v7022_v6 }
0x1216   :  { %v7360_v39 = vpack.i.bf16 %v3286_v15, %v3285_v22 }
0x121c   :  { %7027 = vmatpush3.bf16.xpose.msk.msra.mxu0 %vm8466_vm5, %v7022_v6  ;;  %v10128_v6 = vld [vmem:[#allocation29_spill] sm:$0xff] }
0x121d   :  { %7030 = vmatprep.subr.msk.bf16.mxu0 %vm8466_vm5, %v7028_v28  ;;  %v3288_v59 = vmul.f32 %v9243_v5, %v10128_v6 }
0x1224   :  { %7033 = vmatpush3.bf16.xpose.msk.msra.mxu0 %vm8466_vm5, %v7028_v28  ;;  %v3287_v28 = vmul.f32 %v9241_v63, %v10129_v44 }
0x1225   :  { %7036 = vmatprep.subr.msk.bf16.mxu0 %vm8466_vm5, %v7034_v41 }
0x1226   :  { %v7365_v20 = vpack.i.bf16 %v3288_v59, %v3287_v28 }
0x122c   :  { %7039 = vmatpush3.bf16.xpose.msk.msra.mxu0 %vm8466_vm5, %v7034_v41 }
0x1233   :  { %6677 = vmatmul.mubr.msk.f32.vlgmr.msra.gmra.mrb[18].mxu0 %vm10113_vm11, %v9243_v5  ;;  %vm10120_vm11 = vmmov %vm10116_vm6 }
0x1306   :  { %v6678_v34 = vpop.f32.mrb[18].mxu0 }
0x1307   :  { %v9339_v11 = vadd.f32 %v7732_v60, %v6678_v34  ;;  %v3443_v4 = vpop.f32.mrb[19].mxu0 }
0x1308   :  { %v9352_v32 = vadd.f32 %v7733_v33, %v3443_v4 }
0x1309   :  { %v3503_v61 = vsel %vm10114_vm8, %v9339_v11, -inf  ;;  %v3455_v38 = vsel %vm676_vm7, %v9339_v11, -inf  ;;  %v3531_v18 = vsel %vm10115_vm4, %v9339_v11, -inf  ;;  %v3475_v17 = vsel %vm10116_vm6, %v9339_v11, -inf }
0x130a   :  { %3504 = vmax.xlane.f32.xlu1 %v3503_v61  ;;  %3456 = vmax.xlane.f32.xlu0 %v3455_v38  ;;  %v3615_v46 = vsel %vm10117_vm10, %v9339_v11, -inf  ;;  %v3559_v42 = vsel %vm10118_vm12, %v9339_v11, -inf  ;;  %v3587_v29 = vsel %vm10119_vm9, %v9339_v11, -inf  ;;  %v3472_v36 = vsel %vm10120_vm11, %v9352_v32, -inf  ;;  %vm10132_vm10 = vmmov %vm10118_vm12  ;;  %v10136_v38 = vld [vmem:[#allocation31_spill] sm:$0xff] }
0x130b   :  { %vm10121_vm8 = vcmask 1048448   ;;  %v3452_v8 = vsel %vm676_vm7, %v9352_v32, -inf  ;;  %vm10130_vm4 = vcmask 392448   ;;  %vm10131_vm6 = vcmask 523648   ;;  %vm10133_vm12 = vmmov %vm10119_vm9 }
0x130c   :  { %v3643_v9 = vsel %vm10121_vm8, %v9339_v11, -inf  ;;  %v3500_v23 = vsel %vm10130_vm4, %v9352_v32, -inf  ;;  %v3528_v41 = vsel %vm10131_vm6, %v9352_v32, -inf  ;;  %v3556_v34 = vsel %vm10132_vm10, %v9352_v32, -inf  ;;  %vm10135_vm11 = vmmov %vm10121_vm8 }
0x130d   :  { %v3584_v60 = vsel %vm10133_vm12, %v9352_v32, -inf  ;;  %vm10134_vm9 = vcmask 917248   ;;  %v3640_v61 = vsel %vm10135_vm11, %v9352_v32, -inf  ;;  %vm10138_vm8 = vcmask 261120  }
0x130e   :  { %3532 = vmax.xlane.f32.xlu1 %v3531_v18  ;;  %3476 = vmax.xlane.f32.xlu0 %v3475_v17  ;;  %v3612_v4 = vsel %vm10134_vm9, %v9352_v32, -inf  ;;  %v3290_v18 = vmul.f32 %v9243_v5, %v10136_v38  ;;  %v10137_v17 = vld [vmem:[#allocation30_spill] sm:$0xff]  ;;  %vm10139_vm4 = vcmask 392192   ;;  %vm10140_vm6 = vcmask 523264   ;;  %vm10144_vm11 = vmmov %vm10138_vm8 }
0x130f   :  { %v3289_v33 = vmul.f32 %v9241_v63, %v10137_v17  ;;  %vm10141_vm10 = vcmask 654336   ;;  %vm10142_vm12 = vcmask 785408   ;;  %vm10143_vm9 = vcmask 916480  }
0x1312   :  { %3616 = vmax.xlane.f32.xlu1 %v3615_v46  ;;  %3560 = vmax.xlane.f32.xlu0 %v3559_v42  ;;  %v7370_v46 = vpack.i.bf16 %v3290_v18, %v3289_v33 }
0x1316   :  { %3588 = vmax.xlane.f32.xlu0 %v3587_v29  ;;  %3473 = vmax.xlane.f32.xlu1 %v3472_v36 }
0x131a   :  { %3644 = vmax.xlane.f32.xlu0 %v3643_v9 }
0x131e   :  { %3453 = vmax.xlane.f32.xlu0 %v3452_v8 }
0x1327   :  { %7351 = vrot.lane.b32.xlu1 %v7350_v35, %s7945_s27 }
0x1334   :  { %7356 = vrot.lane.b32.xlu0 %v7355_v31, %s7945_s27 }
0x1338   :  { %7361 = vrot.lane.b32.xlu0 %v7360_v39, %s7945_s27 }
0x133c   :  { %7366 = vrot.lane.b32.xlu0 %v7365_v20, %s7945_s27 }
0x135b   :  { %3501 = vmax.xlane.f32.xlu0 %v3500_v23 }
0x135f   :  { %3529 = vmax.xlane.f32.xlu0 %v3528_v41 }
0x1363   :  { %3557 = vmax.xlane.f32.xlu0 %v3556_v34 }
0x1367   :  { %3585 = vmax.xlane.f32.xlu0 %v3584_v60 }
0x136b   :  { %3613 = vmax.xlane.f32.xlu0 %v3612_v4 }
0x136f   :  { %3641 = vmax.xlane.f32.xlu0 %v3640_v61 }
0x1385   :  { %7371 = vrot.lane.b32.xlu0 %v7370_v46, %s7945_s27 }
0x1397   :  { %v3505_v42 = vpop.xlane.xlu1 %3504  ;;  %v3457_v29 = vpop.xlane.xlu0 %3456 }
0x1398   :  { %v3459_v36 = vsub.f32 %v9339_v11, %v3457_v29  ;;  %v3507_v9 = vsub.f32 %v9339_v11, %v3505_v42 }
0x139a   :  { %v3462_v27 = vmul.f32 1.442695, %v3459_v36  ;;  %v3510_v5 = vmul.f32 1.442695, %v3507_v9 }
0x139b   :  { %v3533_v8 = vpop.xlane.xlu1 %3532  ;;  %v3477_v0 = vpop.xlane.xlu0 %3476 }
0x139c   :  { %v3535_v43 = vsub.f32 %v9339_v11, %v3533_v8  ;;  %v3479_v25 = vsub.f32 %v9339_v11, %v3477_v0  ;;  %7575 = vpow2.f32 %v3462_v27 }
0x139e   :  { %v3482_v35 = vmul.f32 1.442695, %v3479_v25  ;;  %v3538_v30 = vmul.f32 1.442695, %v3535_v43 }
0x139f   :  { %v3617_v63 = vpop.xlane.xlu1 %3616  ;;  %v3561_v45 = vpop.xlane.xlu0 %3560 }
0x13a0   :  { %v3619_v2 = vsub.f32 %v9339_v11, %v3617_v63  ;;  %v3563_v14 = vsub.f32 %v9339_v11, %v3561_v45  ;;  %7577 = vpow2.f32 %v3482_v35 }
0x13a1   :  { %7579 = vpow2.f32 %v3510_v5 }
0x13a2   :  { %v3566_v31 = vmul.f32 1.442695, %v3563_v14  ;;  %7581 = vpow2.f32 %v3538_v30  ;;  %v3622_v12 = vmul.f32 1.442695, %v3619_v2 }
0x13a3   :  { %v3589_v15 = vpop.xlane.xlu0 %3588  ;;  %v3474_v1 = vpop.xlane.xlu1 %3473 }
0x13a4   :  { %v3591_v22 = vsub.f32 %v9339_v11, %v3589_v15  ;;  %v3478_v39 = vsub.f32 %v9352_v32, %v3474_v1  ;;  %7583 = vpow2.f32 %v3566_v31 }
0x13a5   :  { %7585 = vpow2.f32 %v3622_v12 }
0x13a6   :  { %v3594_v6 = vmul.f32 1.442695, %v3591_v22  ;;  %v3480_v59 = vmul.f32 1.442695, %v3478_v39  ;;  %v7576_v34 = vpop.eup %7575 }
0x13a7   :  { %v3645_v44 = vpop.xlane.xlu0 %3644  ;;  %v7352_v28 = vpop.permute.xlu1 %7351  ;;  %v3467_v39 = vsel %vm676_vm7, %v7576_v34, 0.0 }
0x13a8   :  { %7587 = vpow2.f32 %v3594_v6  ;;  %v3647_v20 = vsub.f32 %v9339_v11, %v3645_v44  ;;  %v7354_v23 = vunpack.i.h.bf16 %v7352_v28  ;;  %v7353_v41 = vunpack.i.l.bf16 %v7352_v28 }
0x13a9   :  { %7589 = vpow2.f32 %v3480_v59 }
0x13aa   :  { %v3650_v60 = vmul.f32 1.442695, %v3647_v20  ;;  %v7052_v4 = vpack.c.bf16 %v7354_v23, %v7353_v41  ;;  %v7578_v61 = vpop.eup %7577 }
0x13ab   :  { %v3454_v38 = vpop.xlane.xlu0 %3453  ;;  %v7580_v18 = vpop.eup %7579  ;;  %3488 = vrot.lane.b32.xlu1 %v7578_v61, %s7955_s23  ;;  %v3669_v17 = vsel %vm676_vm7, %v7576_v34, %v7578_v61 }
0x13ac   :  { %7591 = vpow2.f32 %v3650_v60  ;;  %7053 = vmatprep.subr.bf16.mxu1 %v7052_v4  ;;  %v7582_v33 = vpop.eup %7581  ;;  %v3671_v46 = vsel %vm10138_vm8, %v3669_v17, %v7580_v18  ;;  %v3458_v41 = vsub.f32 %v9352_v32, %v3454_v38  ;;  %vm10145_vm8 = vmmov %vm10139_vm4 }
0x13ad   :  { %7055 = vmatpush3.bf16.msra.mxu1 %v7052_v4  ;;  %v3673_v11 = vsel %vm10139_vm4, %v3671_v46, %v7582_v33  ;;  %vm10146_vm4 = vmmov %vm10140_vm6 }
0x13ae   :  { %v7584_v42 = vpop.eup %7583 }
0x13af   :  { %v7357_v29 = vpop.permute.xlu0 %7356  ;;  %3516 = vrot.lane.b32.xlu1 %v7580_v18, %s7954_s13  ;;  %v3675_v8 = vsel %vm10140_vm6, %v3673_v11, %v7584_v42  ;;  %v7586_v0 = vpop.eup %7585  ;;  %v3460_v18 = vmul.f32 1.442695, %v3458_v41  ;;  %vm10147_vm6 = vmmov %vm10141_vm10 }
0x13b0   :  { %v7359_v36 = vunpack.i.h.bf16 %v7357_v29  ;;  %v7358_v9 = vunpack.i.l.bf16 %v7357_v29 }
0x13b2   :  { %v7588_v27 = vpop.eup %7587  ;;  %v7056_v43 = vpack.c.bf16 %v7359_v36, %v7358_v9 }
0x13b3   :  { %v9418_v25 = vpop.eup %7589  ;;  %v7362_v5 = vpop.permute.xlu0 %7361  ;;  %v3677_v35 = vsel %vm10141_vm10, %v3675_v8, %v7588_v27  ;;  %3544 = vrot.lane.b32.xlu1 %v7582_v33, %s7956_s2  ;;  %vm10148_vm10 = vmmov %vm10142_vm12 }
0x13b4   :  { %3486 = vrot.lane.b32.xlu0 %v9418_v25, %s7955_s23  ;;  %v7364_v30 = vunpack.i.h.bf16 %v7362_v5  ;;  %v7363_v63 = vunpack.i.l.bf16 %v7362_v5  ;;  %v3679_v45 = vsel %vm10142_vm12, %v3677_v35, %v7586_v0  ;;  %7057 = vmatprep.subr.bf16.mxu1 %v7056_v43  ;;  %vm10149_vm12 = vmmov %vm10143_vm9 }
0x13b5   :  { %7059 = vmatpush3.bf16.msra.mxu1 %v7056_v43 }
0x13b6   :  { %v7592_v2 = vpop.eup %7591  ;;  %v7060_v14 = vpack.c.bf16 %v7364_v30, %v7363_v63 }
0x13b7   :  { %v7367_v31 = vpop.permute.xlu0 %7366  ;;  %v9426_v12 = vsel %vm10143_vm9, %v3679_v45, %v7592_v2  ;;  %3572 = vrot.lane.b32.xlu1 %v7584_v42, %s7945_s27  ;;  %vm10150_vm9 = vmmov %vm10144_vm11 }
0x13b8   :  { %v7369_v15 = vunpack.i.h.bf16 %v7367_v31  ;;  %v7368_v1 = vunpack.i.l.bf16 %v7367_v31  ;;  %7061 = vmatprep.subr.bf16.mxu1 %v7060_v14 }
0x13b9   :  { %7063 = vmatpush3.bf16.msra.mxu1 %v7060_v14 }
0x13ba   :  { %v7064_v22 = vpack.c.bf16 %v7369_v15, %v7368_v1 }
0x13bb   :  { %3600 = vrot.lane.b32.xlu1 %v7588_v27, %s7957_s3 }
0x13bc   :  { %7065 = vmatprep.subr.bf16.mxu1 %v7064_v22 }
0x13bd   :  { %7067 = vmatpush3.bf16.msra.mxu1 %v7064_v22 }
0x13bf   :  { %3628 = vrot.lane.b32.xlu1 %v7586_v0, %s7953_s22 }
0x13c3   :  { %3656 = vrot.lane.b32.xlu1 %v7592_v2, %s10052_s24 }
0x13e7   :  { %3468 = vadd.xlane.f32.xlu1 %v3467_v39 }
0x13e8   :  { %v3502_v6 = vpop.xlane.xlu0 %3501 }
0x13e9   :  { %v3506_v59 = vsub.f32 %v9352_v32, %v3502_v6 }
0x13eb   :  { %v3508_v44 = vmul.f32 1.442695, %v3506_v59 }
0x13ec   :  { %v3530_v28 = vpop.xlane.xlu0 %3529 }
0x13ed   :  { %7593 = vpow2.f32 %v3508_v44  ;;  %v3534_v20 = vsub.f32 %v9352_v32, %v3530_v28 }
0x13ef   :  { %v3536_v23 = vmul.f32 1.442695, %v3534_v20 }
0x13f0   :  { %v3558_v60 = vpop.xlane.xlu0 %3557 }
0x13f1   :  { %7595 = vpow2.f32 %v3536_v23  ;;  %v3562_v4 = vsub.f32 %v9352_v32, %v3558_v60 }
0x13f3   :  { %v3564_v61 = vmul.f32 1.442695, %v3562_v4 }
0x13f4   :  { %v3586_v17 = vpop.xlane.xlu0 %3585 }
0x13f5   :  { %7597 = vpow2.f32 %v3564_v61  ;;  %v3590_v34 = vsub.f32 %v9352_v32, %v3586_v17 }
0x13f6   :  { %7599 = vpow2.f32 %v3460_v18 }
0x13f7   :  { %v7594_v33 = vpop.eup %7593  ;;  %v3592_v46 = vmul.f32 1.442695, %v3590_v34 }
0x13f8   :  { %3514 = vrot.lane.b32.xlu0 %v7594_v33, %s7954_s13  ;;  %v3614_v11 = vpop.xlane.xlu0 %3613 }
0x13f9   :  { %7601 = vpow2.f32 %v3592_v46  ;;  %v3618_v42 = vsub.f32 %v9352_v32, %v3614_v11 }
0x13fb   :  { %v7596_v38 = vpop.eup %7595  ;;  %v3620_v29 = vmul.f32 1.442695, %v3618_v42 }
0x13fc   :  { %3542 = vrot.lane.b32.xlu0 %v7596_v38, %s7956_s2  ;;  %v3642_v36 = vpop.xlane.xlu0 %3641 }
0x13fd   :  { %7603 = vpow2.f32 %v3620_v29  ;;  %v3646_v9 = vsub.f32 %v9352_v32, %v3642_v36 }
0x13ff   :  { %v7598_v8 = vpop.eup %7597  ;;  %v3648_v0 = vmul.f32 1.442695, %v3646_v9 }
0x1400   :  { %3570 = vrot.lane.b32.xlu0 %v7598_v8, %s7945_s27  ;;  %v7372_v27 = vpop.permute.xlu0 %7371  ;;  %v7600_v35 = vpop.eup %7599 }
0x1401   :  { %7605 = vpow2.f32 %v3648_v0  ;;  %v7374_v43 = vunpack.i.h.bf16 %v7372_v27  ;;  %v7373_v5 = vunpack.i.l.bf16 %v7372_v27  ;;  %v3668_v45 = vsel %vm676_vm7, %v7600_v35, %v9418_v25 }
0x1402   :  { %v3670_v32 = vsel %vm10144_vm11, %v3668_v45, %v7594_v33  ;;  %v3464_v59 = vsel %vm676_vm7, %v7600_v35, 0.0  ;;  %vm10152_vm11 = vmmov %vm10150_vm9 }
0x1403   :  { %v7602_v30 = vpop.eup %7601  ;;  %v7068_v63 = vpack.c.bf16 %v7374_v43, %v7373_v5  ;;  %v3672_v14 = vsel %vm10145_vm8, %v3670_v32, %v7596_v38  ;;  %vm10153_vm8 = vmmov %vm10150_vm9 }
0x1404   :  { %3598 = vrot.lane.b32.xlu0 %v7602_v30, %s7957_s3  ;;  %v3674_v31 = vsel %vm10146_vm4, %v3672_v14, %v7598_v8  ;;  %vm10154_vm4 = vmmov %vm10153_vm8 }
0x1405   :  { %7069 = vmatprep.subr.bf16.mxu1 %v7068_v63  ;;  %v3676_v15 = vsel %vm10147_vm6, %v3674_v31, %v7602_v30  ;;  %v7427_v30 = vld [vmem:[%s9984_s8 + $0x10] sm:$0xff]   ;;  %vm10155_vm6 = vmmov %vm10154_vm4 }
0x1406   :  { %7071 = vmatpush3.bf16.msra.mxu1 %v7068_v63  ;;  %v7428_v63 = vld [vmem:[%s9984_s8 + $0x18] sm:$0xff]  }
0x1407   :  { %v7604_v2 = vpop.eup %7603  ;;  %6714 = vmatprep.subr.bf16.mxu1 %v10074_v19 }
0x1408   :  { %3626 = vrot.lane.b32.xlu0 %v7604_v2, %s7953_s22  ;;  %v3678_v22 = vsel %vm10148_vm10, %v3676_v15, %v7604_v2  ;;  %vm10156_vm10 = vmmov %vm10154_vm4 }
0x140b   :  { %v7606_v1 = vpop.eup %7605 }
0x140c   :  { %3654 = vrot.lane.b32.xlu0 %v7606_v1, %s10052_s24  ;;  %v3680_v25 = vsel %vm10149_vm12, %v3678_v22, %v7606_v1  ;;  %vm10157_vm12 = vmmov %vm10154_vm4 }
0x140d   :  { %6711 = vmatprep.mubr.f32.mxu1 %v3680_v25 }
0x140e   :  { %6712 = vmatmul.mubr.f32.vlgmr.msra.gmra.mrb[52].mxu1 %v9426_v12 }
0x140f   :  { %6718 = vmatprep.mubr.msk.bf16.mxu1 %vm7952_vm3, %v10074_v19  ;;  %6715 = vmatpush3.bf16.msra.mxu1 %v7427_v30 }
0x1410   :  { %6716 = vmatprep.subr.bf16.mxu1 %v10074_v19 }
0x1413   :  { %6717 = vmatpush3.bf16.msra.mxu1 %v7428_v63 }
0x1414   :  { %6722 = vmatprep.subr.bf16.mxu1 %v10074_v19 }
0x141d   :  { %v3489_v39 = vpop.permute.xlu1 %3488 }
0x141e   :  { %v3495_v44 = vsel %vm676_vm7, %v3489_v39, 0.0 }
0x1421   :  { %v3517_v6 = vpop.permute.xlu1 %3516 }
0x1422   :  { %v3523_v20 = vsel %vm676_vm7, %v3517_v6, 0.0 }
0x1425   :  { %v3545_v28 = vpop.permute.xlu1 %3544 }
0x1426   :  { %v3551_v41 = vsel %vm676_vm7, %v3545_v28, 0.0  ;;  %v3487_v61 = vpop.permute.xlu0 %3486 }
0x1427   :  { %v3492_v17 = vsel %vm676_vm7, %v3487_v61, 0.0 }
0x1429   :  { %v3573_v23 = vpop.permute.xlu1 %3572 }
0x142a   :  { %v3579_v12 = vsel %vm676_vm7, %v3573_v23, 0.0 }
0x142b   :  { %3465 = vadd.xlane.f32.xlu0 %v3464_v59 }
0x142d   :  { %v3601_v60 = vpop.permute.xlu1 %3600 }
0x142e   :  { %v3607_v4 = vsel %vm676_vm7, %v3601_v60, 0.0 }
0x142f   :  { %3496 = vadd.xlane.f32.xlu0 %v3495_v44 }
0x1431   :  { %v3629_v18 = vpop.permute.xlu1 %3628 }
0x1432   :  { %v3635_v34 = vsel %vm676_vm7, %v3629_v18, 0.0 }
0x1433   :  { %3524 = vadd.xlane.f32.xlu0 %v3523_v20 }
0x1435   :  { %v3657_v33 = vpop.permute.xlu1 %3656 }
0x1436   :  { %v3663_v46 = vsel %vm676_vm7, %v3657_v33, 0.0 }
0x1437   :  { %3552 = vadd.xlane.f32.xlu0 %v3551_v41 }
0x143b   :  { %3580 = vadd.xlane.f32.xlu0 %v3579_v12 }
0x143f   :  { %3608 = vadd.xlane.f32.xlu0 %v3607_v4 }
0x1443   :  { %3493 = vadd.xlane.f32.xlu0 %v3492_v17 }
0x1447   :  { %3636 = vadd.xlane.f32.xlu0 %v3635_v34 }
0x144b   :  { %3664 = vadd.xlane.f32.xlu0 %v3663_v46 }
0x146a   :  { %v3515_v11 = vpop.permute.xlu0 %3514 }
0x146b   :  { %v3520_v42 = vsel %vm676_vm7, %v3515_v11, 0.0 }
0x146c   :  { %3521 = vadd.xlane.f32.xlu1 %v3520_v42 }
0x146e   :  { %v3543_v38 = vpop.permute.xlu0 %3542 }
0x146f   :  { %v3548_v29 = vsel %vm676_vm7, %v3543_v38, 0.0 }
0x1470   :  { %3549 = vadd.xlane.f32.xlu1 %v3548_v29 }
0x1472   :  { %v3571_v36 = vpop.permute.xlu0 %3570 }
0x1473   :  { %v3576_v9 = vsel %vm676_vm7, %v3571_v36, 0.0 }
0x1474   :  { %3577 = vadd.xlane.f32.xlu1 %v3576_v9  ;;  %v3469_v25 = vpop.xlane.xlu1 %3468 }
0x1475   :  { %7607 = vrcp.f32 %v3469_v25 }
0x1476   :  { %v3599_v8 = vpop.permute.xlu0 %3598 }
0x1477   :  { %v3604_v0 = vsel %vm676_vm7, %v3599_v8, 0.0 }
0x1478   :  { %3605 = vadd.xlane.f32.xlu1 %v3604_v0 }
0x147a   :  { %v3627_v27 = vpop.permute.xlu0 %3626 }
0x147b   :  { %v3632_v43 = vsel %vm676_vm7, %v3627_v27, 0.0 }
0x147c   :  { %3633 = vadd.xlane.f32.xlu1 %v3632_v43 }
0x147e   :  { %v3655_v5 = vpop.permute.xlu0 %3654 }
0x147f   :  { %v3660_v35 = vsel %vm676_vm7, %v3655_v5, 0.0  ;;  %v7608_v41 = vpop.eup %7607 }
0x1480   :  { %3661 = vadd.xlane.f32.xlu1 %v3660_v35 }
0x14b8   :  { %v3466_v45 = vpop.xlane.xlu0 %3465 }
0x14b9   :  { %7609 = vrcp.f32 %v3466_v45 }
0x14bc   :  { %v3497_v2 = vpop.xlane.xlu0 %3496 }
0x14bd   :  { %7611 = vrcp.f32 %v3497_v2 }
0x14c0   :  { %v3525_v32 = vpop.xlane.xlu0 %3524 }
0x14c1   :  { %7613 = vrcp.f32 %v3525_v32 }
0x14c3   :  { %v7610_v12 = vpop.eup %7609 }
0x14c4   :  { %v3553_v15 = vpop.xlane.xlu0 %3552 }
0x14c5   :  { %7615 = vrcp.f32 %v3553_v15 }
0x14c7   :  { %v7612_v60 = vpop.eup %7611 }
0x14c8   :  { %v3581_v1 = vpop.xlane.xlu0 %3580  ;;  %v3683_v29 = vsel %vm918_vm2, %v7608_v41, %v7612_v60 }
0x14c9   :  { %7617 = vrcp.f32 %v3581_v1 }
0x14cb   :  { %v7614_v61 = vpop.eup %7613 }
0x14cc   :  { %v3609_v22 = vpop.xlane.xlu0 %3608  ;;  %v3685_v9 = vsel %vm921_vm1, %v3683_v29, %v7614_v61 }
0x14cd   :  { %7619 = vrcp.f32 %v3609_v22 }
0x14cf   :  { %v7616_v18 = vpop.eup %7615 }
0x14d0   :  { %v3494_v39 = vpop.xlane.xlu0 %3493  ;;  %v3687_v27 = vsel %vm924_vm15, %v3685_v9, %v7616_v18 }
0x14d1   :  { %7621 = vrcp.f32 %v3494_v39 }
0x14d3   :  { %v7618_v17 = vpop.eup %7617 }
0x14d4   :  { %v3637_v59 = vpop.xlane.xlu0 %3636  ;;  %v3689_v5 = vsel %vm676_vm7, %v3687_v27, %v7618_v17 }
0x14d5   :  { %7623 = vrcp.f32 %v3637_v59 }
0x14d7   :  { %v7620_v34 = vpop.eup %7619 }
0x14d8   :  { %v3665_v20 = vpop.xlane.xlu0 %3664  ;;  %v3691_v63 = vsel %vm929_vm0, %v3689_v5, %v7620_v34 }
0x14d9   :  { %7625 = vrcp.f32 %v3665_v20  ;;  %v7430_v20 = vld [vmem:[%s9986_s10 + $0x18] sm:$0xff]  }
0x14db   :  { %v7622_v46 = vpop.eup %7621 }
0x14dc   :  { %v3682_v0 = vsel %vm918_vm2, %v7610_v12, %v7622_v46 }
0x14df   :  { %v7624_v11 = vpop.eup %7623 }
0x14e0   :  { %v3693_v2 = vsel %vm932_vm14, %v3691_v63, %v7624_v11 }
0x14e1   :  { %v6713_v14 = vpop.f32.mrb[52].mxu1 }
0x14e2   :  { %v3826_v31 = vpop.f32.mrb[53].mxu1 }
0x14e3   :  { %v7626_v42 = vpop.eup %7625 }
0x14e4   :  { %v3695_v15 = vsel %vm935_vm13, %v3693_v2, %v7626_v42 }
0x14f9   :  { %v3522_v6 = vpop.xlane.xlu1 %3521 }
0x14fa   :  { %7627 = vrcp.f32 %v3522_v6  ;;  %v3836_v6 = vmul.f32 %v6713_v14, %v3695_v15  ;;  %v10151_v14 = vld [vmem:[#allocation32_spill] sm:$0xff] }
0x14fd   :  { %v3550_v44 = vpop.xlane.xlu1 %3549 }
0x14fe   :  { %7629 = vrcp.f32 %v3550_v44  ;;  %v7429_v44 = vld [vmem:[%s9986_s10 + $0x10] sm:$0xff]  }
0x1501   :  { %v3578_v28 = vpop.xlane.xlu1 %3577 }
0x1502   :  { %7631 = vrcp.f32 %v3578_v28 }
0x1504   :  { %v7628_v38 = vpop.eup %7627 }
0x1505   :  { %v3606_v23 = vpop.xlane.xlu1 %3605  ;;  %v3684_v35 = vsel %vm921_vm1, %v3682_v0, %v7628_v38 }
0x1506   :  { %7633 = vrcp.f32 %v3606_v23 }
0x1508   :  { %v7630_v36 = vpop.eup %7629 }
0x1509   :  { %v3634_v4 = vpop.xlane.xlu1 %3633  ;;  %v3686_v45 = vsel %vm924_vm15, %v3684_v35, %v7630_v36  ;;  %v6139_v35 = vld [vmem:[#allocation7 + $0x1] ss:$0 sm:$0xff] }
0x150a   :  { %7635 = vrcp.f32 %v3634_v4 }
0x150c   :  { %v7632_v8 = vpop.eup %7631 }
0x150d   :  { %v3662_v33 = vpop.xlane.xlu1 %3661  ;;  %v3688_v32 = vsel %vm676_vm7, %v3686_v45, %v7632_v8 }
0x150e   :  { %7637 = vrcp.f32 %v3662_v33 }
0x1510   :  { %v7634_v43 = vpop.eup %7633 }
0x1511   :  { %v3690_v1 = vsel %vm929_vm0, %v3688_v32, %v7634_v43 }
0x1514   :  { %v7636_v30 = vpop.eup %7635 }
0x1515   :  { %v3692_v25 = vsel %vm932_vm14, %v3690_v1, %v7636_v30 }
0x1518   :  { %v7638_v22 = vpop.eup %7637 }
0x1519   :  { %v3694_v39 = vsel %vm935_vm13, %v3692_v25, %v7638_v22 }
0x151a   :  { %v3835_v59 = vmul.f32 %v3826_v31, %v3694_v39  ;;  %v6131_v31 = vld [vmem:[#allocation5 + $0x1] ss:$0 sm:$0xff] }
0x151c   :  { %v3837_v28 = vpack.c.bf16 %v3836_v6, %v3835_v59 }
0x151e   :  { %6719 = vmatmul.mubr.msk.bf16.vlgmr.msra.gmra.mrb[56].mxu1 %vm10150_vm9, %v3837_v28  ;;  %v7432_v28 = vld [vmem:[%s9988_s12 + $0x18] sm:$0xff]   ;;  %vm10158_vm9 = vmmov %vm10154_vm4 }
0x151f   :  { %6723 = vmatpush3.bf16.msra.mxu1 %v7429_v44  ;;  %6726 = vmatprep.mubr.msk.bf16.mxu1 %vm7952_vm3, %v10074_v19 }
0x1520   :  { %6724 = vmatprep.subr.bf16.mxu1 %v10074_v19 }
0x1523   :  { %6725 = vmatpush3.bf16.msra.mxu1 %v7430_v20 }
0x1524   :  { %6730 = vmatprep.subr.bf16.mxu1 %v10074_v19 }
0x1526   :  { %6727 = vmatmul.mubr.msk.bf16.vlgmr.msra.gmra.mrb[60].mxu1 %vm10152_vm11, %v10151_v14  ;;  %vm10159_vm11 = vmmov %vm10154_vm4 }
0x1527   :  { %6734 = vmatprep.mubr.msk.bf16.mxu1 %vm7952_vm3, %v10074_v19 }
0x15f1   :  { %v3893_v23 = vpop.f32.mrb[56].mxu1 }
0x15f2   :  { %v3894_v41 = vadd.f32 %v6131_v31, %v3893_v23  ;;  %v6720_v12 = vpop.f32.mrb[57].mxu1 }
0x15f3   :  { %v3896_v60 = vpop.f32.mrb[58].mxu1 }
0x15f4   :  { %v3900_v4 = vadd.f32 %v3894_v41, %v9234_v10  ;;  %v3897_v61 = vadd.f32 %v6131_v31, %v3896_v60  ;;  %v6721_v18 = vpop.f32.mrb[59].mxu1 }
0x15f6   :  { %v3901_v17 = vadd.f32 %v3897_v61, %v9236_v16  ;;  %v3902_v34 = vsel %vm10153_vm8, %v3900_v4, 0.0  ;;  %v9580_v61 = vld [vmem:[%s9992_s16 + $0x8] sm:$0x3f] }
0x15f7   :  { %3903 = vadd.xlane.f32.xlu1 %v3902_v34  ;;  %v3931_v18 = vrot.slane %v9580_v61, %v8810_v37 }
0x15f8   :  { %v3905_v33 = vsel %vm10154_vm4, %v3901_v17, 0.0  ;;  %vm10163_vm4 = vcmask 392448  }
0x15f9   :  { %3906 = vadd.xlane.f32.xlu0 %v3905_v33  ;;  %v3999_v46 = vpop.f32.mrb[60].mxu1 }
0x15fa   :  { %v6728_v11 = vpop.f32.mrb[61].mxu1  ;;  %v9526_v63 = vadd.f32 %v6139_v35, %v3999_v46 }
0x15fb   :  { %v4002_v42 = vpop.f32.mrb[62].mxu1 }
0x15fc   :  { %v6729_v38 = vpop.f32.mrb[63].mxu1  ;;  %v9524_v30 = vadd.f32 %v6139_v35, %v4002_v42  ;;  %v4083_v2 = vmul.f32 %v9526_v63, %v8354_v47  ;;  %v4087_v1 = vmul.f32 %v9526_v63, %v8364_v52  ;;  %v4089_v47 = vmul.f32 %v9526_v63, %v8368_v54 }
0x15fd   :  { %v3937_v42 = vrot.slane %v9580_v61, %v8820_v26 }
0x15fe   :  { %v4084_v45 = vmul.f32 %v9524_v30, %v8356_v48  ;;  %v4088_v15 = vmul.f32 %v9524_v30, %v8362_v51  ;;  %v4086_v22 = vmul.f32 %v9524_v30, %v8358_v49  ;;  %v4090_v39 = vmul.f32 %v9524_v30, %v8366_v53 }
0x15ff   :  { %v4085_v48 = vmul.f32 %v9526_v63, %v8360_v50  ;;  %v4092_v6 = vmul.f32 %v9524_v30, %v8370_v55  ;;  %v4094_v49 = vmul.f32 %v9524_v30, %v8374_v58  ;;  %v4091_v53 = vmul.f32 %v9526_v63, %v8372_v56  ;;  %v7431_v55 = vld [vmem:[%s9988_s12 + $0x10] sm:$0xff]  }
0x1600   :  { %v7375_v32 = vpack.i.bf16 %v4084_v45, %v4083_v2  ;;  %v7385_v25 = vpack.i.bf16 %v4088_v15, %v4087_v1  ;;  %v7390_v52 = vpack.i.bf16 %v4090_v39, %v4089_v47  ;;  %v4093_v50 = vmul.f32 %v9526_v63, %v8378_v62  ;;  %6731 = vmatpush3.bf16.msra.mxu1 %v7431_v55 }
0x1601   :  { %v7380_v51 = vpack.i.bf16 %v4086_v22, %v4085_v48  ;;  %v7395_v59 = vpack.i.bf16 %v4092_v6, %v4091_v53  ;;  %v4096_v54 = vmul.f32 %v9524_v30, %v8392_v7  ;;  %v4098_v58 = vmul.f32 %v9524_v30, %v8410_v21  ;;  %6732 = vmatprep.subr.bf16.mxu1 %v10074_v19 }
0x1602   :  { %v7400_v44 = vpack.i.bf16 %v4094_v49, %v4093_v50  ;;  %v4095_v56 = vmul.f32 %v9526_v63, %v8398_v13  ;;  %v4097_v62 = vmul.f32 %v9526_v63, %v8418_v40 }
0x1604   :  { %v7405_v7 = vpack.i.bf16 %v4096_v54, %v4095_v56  ;;  %v7410_v20 = vpack.i.bf16 %v4098_v58, %v4097_v62  ;;  %6733 = vmatpush3.bf16.msra.mxu1 %v7432_v28  ;;  %v6147_v58 = vld [vmem:[#allocation8 + $0x1] ss:$0 sm:$0xff] }
0x1684   :  { %v3904_v29 = vpop.xlane.xlu1 %3903 }
0x1685   :  { %v3908_v36 = vmul.f32 0.03125, %v3904_v29 }
0x1686   :  { %v3907_v9 = vpop.xlane.xlu0 %3906 }
0x1687   :  { %v9514_v8 = vsub.f32 %v3900_v4, %v3908_v36  ;;  %v3909_v10 = vmul.f32 0.03125, %v3907_v9 }
0x1689   :  { %v9516_v0 = vsub.f32 %v3901_v17, %v3909_v10  ;;  %v3912_v16 = vmul.f32 %v9514_v8, %v9514_v8 }
0x168b   :  { %v3914_v27 = vsel %vm10155_vm6, %v3912_v16, 0.0  ;;  %v3913_v43 = vmul.f32 %v9516_v0, %v9516_v0  ;;  %vm10164_vm6 = vmmov %vm10163_vm4 }
0x168c   :  { %3915 = vadd.xlane.f32.xlu1 %v3914_v27 }
0x168d   :  { %v3917_v5 = vsel %vm10156_vm10, %v3913_v43, 0.0  ;;  %vm10165_vm10 = vcmask 523648  }
0x168e   :  { %3918 = vadd.xlane.f32.xlu0 %v3917_v5 }
0x169d   :  { %7376 = vrot.lane.b32.xlu1 %v7375_v32, %s7954_s13 }
0x16a1   :  { %7386 = vrot.lane.b32.xlu1 %v7385_v25, %s7954_s13 }
0x16a4   :  { %7381 = vrot.lane.b32.xlu0 %v7380_v51, %s7954_s13 }
0x16a5   :  { %7391 = vrot.lane.b32.xlu1 %v7390_v52, %s7954_s13 }
0x16a8   :  { %7396 = vrot.lane.b32.xlu0 %v7395_v59, %s7954_s13 }
0x16a9   :  { %7401 = vrot.lane.b32.xlu1 %v7400_v44, %s7954_s13  ;;  %v10160_v44 = vmov 0  }
0x16ac   :  { %7406 = vrot.lane.b32.xlu0 %v7405_v7, %s7954_s13 }
0x16ad   :  { %7411 = vrot.lane.b32.xlu1 %v7410_v20, %s7954_s13 }
0x1719   :  { %v3916_v13 = vpop.xlane.xlu1 %3915 }
0x171a   :  { %v3920_v21 = vmul.f32 0.03125, %v3916_v13 }
0x171b   :  { %v3919_v14 = vpop.xlane.xlu0 %3918 }
0x171c   :  { %v3922_v31 = vadd.f32 1e-05, %v3920_v21  ;;  %v3921_v23 = vmul.f32 0.03125, %v3919_v14  ;;  %v7734_v21 = vld [vmem:[%s10055_s9] sm:$0xff] }
0x171d   :  { %v7377_v41 = vpop.permute.xlu1 %7376 }
0x171e   :  { %7639 = vrsqrt.f32 %v3922_v31  ;;  %v3923_v40 = vadd.f32 1e-05, %v3921_v23  ;;  %v7379_v12 = vunpack.i.h.bf16 %v7377_v41  ;;  %v7378_v60 = vunpack.i.l.bf16 %v7377_v41  ;;  %v7737_v41 = vld [vmem:[%s10055_s9 + $0x30] sm:$0xff] }
0x171f   :  { %v7382_v38 = vpop.permute.xlu0 %7381 }
0x1720   :  { %7641 = vrsqrt.f32 %v3923_v40  ;;  %v7072_v4 = vpack.c.bf16 %v7379_v12, %v7378_v60  ;;  %v7384_v36 = vunpack.i.h.bf16 %v7382_v38  ;;  %v7383_v9 = vunpack.i.l.bf16 %v7382_v38  ;;  %v7738_v12 = vld [vmem:[%s10055_s9 + $0x40] sm:$0xff]  ;;  %v7743_v38 = vld [vmem:[%s10055_s9 + $0x28] sm:$0xff] }
0x1722   :  { %7074 = vmatprep.subr.msk.bf16.mxu1 %vm8466_vm5, %v7072_v4  ;;  %v7078_v43 = vpack.c.bf16 %v7384_v36, %v7383_v9  ;;  %v7744_v36 = vld [vmem:[%s10055_s9 + $0x38] sm:$0xff] }
0x1723   :  { %v7397_v1 = vpop.permute.xlu0 %7396 }
0x1724   :  { %v7398_v22 = vunpack.i.l.bf16 %v7397_v1 }
0x1727   :  { %v7407_v6 = vpop.permute.xlu0 %7406 }
0x1728   :  { %v7640_v17 = vpop.eup %7639  ;;  %v7409_v52 = vunpack.i.h.bf16 %v7407_v6  ;;  %v7408_v49 = vunpack.i.l.bf16 %v7407_v6 }
0x1729   :  { %v3926_v34 = vmul.f32 %v7640_v17, %v9514_v8  ;;  %v7387_v8 = vpop.permute.xlu1 %7386  ;;  %v7740_v17 = vld [vmem:[%s10055_s9 + $0x60] sm:$0xff] }
0x172a   :  { %v7642_v33 = vpop.eup %7641  ;;  %v7388_v5 = vunpack.i.l.bf16 %v7387_v8  ;;  %v7108_v53 = vpack.c.bf16 %v7409_v52, %v7408_v49  ;;  %v7750_v52 = vld [vmem:[%s10071_s30 + $0x18] sm:$0xff] }
0x172b   :  { %v3932_v46 = vmul.f32 %v3931_v18, %v3926_v34  ;;  %v3927_v11 = vmul.f32 %v7642_v33, %v9516_v0  ;;  %v7389_v0 = vunpack.i.h.bf16 %v7387_v8  ;;  %v7741_v33 = vld [vmem:[%s10055_s9 + $0x8] sm:$0xff]  ;;  %v7746_v8 = vld [vmem:[%s10055_s9 + $0x58] sm:$0xff] }
0x172d   :  { %v3933_v29 = vmul.f32 %v3931_v18, %v3927_v11  ;;  %v9588_v10 = vadd.f32 %v3937_v42, %v3932_v46  ;;  %v7084_v35 = vpack.c.bf16 %v7389_v0, %v7388_v5  ;;  %v7392_v45 = vpop.permute.xlu1 %7391  ;;  %v7742_v11 = vld [vmem:[%s10055_s9 + $0x18] sm:$0xff]  ;;  %v7747_v5 = vld [vmem:[%s10055_s9 + $0x68] sm:$0xff] }
0x172e   :  { %v7394_v2 = vunpack.i.h.bf16 %v7392_v45  ;;  %v7393_v32 = vunpack.i.l.bf16 %v7392_v45  ;;  %v7748_v45 = vld [vmem:[%s10055_s9 + $0x70] sm:$0xff] }
0x172f   :  { %v9590_v16 = vadd.f32 %v3937_v42, %v3933_v29 }
0x1730   :  { %v7090_v15 = vpack.c.bf16 %v7394_v2, %v7393_v32 }
0x1731   :  { %v4013_v27 = vpack.c.bf16 %v9590_v16, %v9588_v10  ;;  %v7402_v39 = vpop.permute.xlu1 %7401 }
0x1732   :  { %v7404_v48 = vunpack.i.h.bf16 %v7402_v39  ;;  %v7403_v47 = vunpack.i.l.bf16 %v7402_v39 }
0x1733   :  { %6735 = vmatmul.mubr.msk.bf16.vlgmr.msra.gmra.mrb[64].mxu1 %vm10157_vm12, %v4013_v27  ;;  %v7745_v27 = vld [vmem:[%s10055_s9 + $0x48] sm:$0xff]  ;;  %vm10166_vm12 = vmmov %vm10165_vm10 }
0x1734   :  { %7077 = vmatpush3.bf16.xpose.msk.msra.mxu1 %vm8466_vm5, %v7072_v4  ;;  %6770 = vmatprep.mubr.msk.f32.mxu1 %vm10158_vm9, %v9526_v63  ;;  %v7399_v63 = vunpack.i.h.bf16 %v7397_v1  ;;  %v7102_v51 = vpack.c.bf16 %v7404_v48, %v7403_v47  ;;  %v7739_v4 = vld [vmem:[%s10055_s9 + $0x50] sm:$0xff]  ;;  %v7749_v48 = vld [vmem:[%s10055_s9 + $0x78] sm:$0xff]  ;;  %vm10167_vm9 = vcmask 654848  }
0x1735   :  { %7080 = vmatprep.subr.msk.bf16.mxu1 %vm8466_vm5, %v7078_v43  ;;  %v7412_v50 = vpop.permute.xlu1 %7411 }
0x1736   :  { %v7096_v25 = vpack.c.bf16 %v7399_v63, %v7398_v22  ;;  %v7414_v59 = vunpack.i.h.bf16 %v7412_v50  ;;  %v7413_v54 = vunpack.i.l.bf16 %v7412_v50  ;;  %v7751_v50 = vld [vmem:[%s10071_s30 + $0x10] sm:$0xff] }
0x1738   :  { %v7114_v55 = vpack.c.bf16 %v7414_v59, %v7413_v54 }
0x173c   :  { %7083 = vmatpush3.bf16.xpose.msk.msra.mxu1 %vm8466_vm5, %v7078_v43 }
0x173d   :  { %7086 = vmatprep.subr.msk.bf16.mxu1 %vm8466_vm5, %v7084_v35 }
0x1744   :  { %7089 = vmatpush3.bf16.xpose.msk.msra.mxu1 %vm8466_vm5, %v7084_v35 }
0x1745   :  { %7092 = vmatprep.subr.msk.bf16.mxu1 %vm8466_vm5, %v7090_v15 }
0x174c   :  { %7095 = vmatpush3.bf16.xpose.msk.msra.mxu1 %vm8466_vm5, %v7090_v15 }
0x174d   :  { %7098 = vmatprep.subr.msk.bf16.mxu1 %vm8466_vm5, %v7096_v25 }
0x1754   :  { %7101 = vmatpush3.bf16.xpose.msk.msra.mxu1 %vm8466_vm5, %v7096_v25 }
0x1755   :  { %7104 = vmatprep.subr.msk.bf16.mxu1 %vm8466_vm5, %v7102_v51 }
0x175c   :  { %7107 = vmatpush3.bf16.xpose.msk.msra.mxu1 %vm8466_vm5, %v7102_v51 }
0x175d   :  { %7110 = vmatprep.subr.msk.bf16.mxu1 %vm8466_vm5, %v7108_v53 }
0x1764   :  { %7113 = vmatpush3.bf16.xpose.msk.msra.mxu1 %vm8466_vm5, %v7108_v53 }
0x1765   :  { %7116 = vmatprep.subr.msk.bf16.mxu1 %vm8466_vm5, %v7114_v55 }
0x176c   :  { %7119 = vmatpush3.bf16.xpose.msk.msra.mxu1 %vm8466_vm5, %v7114_v55  ;;  %vm10161_vm5 = vcmask 261248  }
0x176d   :  { %vm10162_vm8 = vmmov %vm10161_vm5 }
0x1773   :  { %6771 = vmatmul.mubr.msk.f32.vlgmr.msra.gmra.mrb[54].mxu1 %vm10159_vm11, %v9524_v30  ;;  %v7736_v30 = vld [vmem:[%s10055_s9 + $0x20] sm:$0xff]  ;;  %vm10168_vm11 = vmmov %vm10167_vm9 }
0x1774   :  { %5143 = vmatprep.mubr.bf16.mxu1 %v10160_v44 }
0x1806   :  { %v4069_v56 = vpop.f32.mrb[64].mxu1 }
0x1807   :  { %v4070_v62 = vadd.f32 %v6147_v58, %v4069_v56  ;;  %v6736_v7 = vpop.f32.mrb[65].mxu1 }
0x1808   :  { %v4072_v28 = vpop.f32.mrb[66].mxu1 }
0x1809   :  { %v4073_v20 = vadd.f32 %v6147_v58, %v4072_v28  ;;  %v6737_v13 = vpop.f32.mrb[67].mxu1  ;;  %v4099_v14 = vmul.f32 %v7734_v21, %v4070_v62  ;;  %v4101_v31 = vmul.f32 %v7735_v57, %v4070_v62  ;;  %v4103_v23 = vmul.f32 %v7736_v30, %v4070_v62 }
0x180a   :  { %v4105_v40 = vmul.f32 %v7737_v41, %v4070_v62  ;;  %v4107_v60 = vmul.f32 %v7738_v12, %v4070_v62  ;;  %v4109_v18 = vmul.f32 %v7739_v4, %v4070_v62  ;;  %v4111_v34 = vmul.f32 %v7740_v17, %v4070_v62 }
0x180b   :  { %v4100_v46 = vmul.f32 %v7741_v33, %v4073_v20  ;;  %v4102_v42 = vmul.f32 %v7742_v11, %v4073_v20  ;;  %v4104_v29 = vmul.f32 %v7743_v38, %v4073_v20  ;;  %v4106_v9 = vmul.f32 %v7744_v36, %v4073_v20 }
0x180c   :  { %v4108_v43 = vmul.f32 %v7745_v27, %v4073_v20  ;;  %v4110_v0 = vmul.f32 %v7746_v8, %v4073_v20  ;;  %v4112_v35 = vmul.f32 %v7747_v5, %v4073_v20  ;;  %v4113_v2 = vmul.f32 %v7748_v45, %v4070_v62 }
0x180d   :  { %v7120_v32 = vpack.c.bf16 %v4100_v46, %v4099_v14  ;;  %v7124_v15 = vpack.c.bf16 %v4102_v42, %v4101_v31  ;;  %v7128_v1 = vpack.c.bf16 %v4104_v29, %v4103_v23  ;;  %v7132_v63 = vpack.c.bf16 %v4106_v9, %v4105_v40 }
0x180e   :  { %v7136_v22 = vpack.c.bf16 %v4108_v43, %v4107_v60  ;;  %v7140_v25 = vpack.c.bf16 %v4110_v0, %v4109_v18  ;;  %v7144_v39 = vpack.c.bf16 %v4112_v35, %v4111_v34  ;;  %v4114_v47 = vmul.f32 %v7749_v48, %v4073_v20 }
0x180f   :  { %7121 = vmatprep.subr.bf16.mxu0 %v7120_v32 }
0x1810   :  { %7123 = vmatpush3.bf16.msra.mxu0 %v7120_v32  ;;  %v7148_v51 = vpack.c.bf16 %v4114_v47, %v4113_v2 }
0x1811   :  { %7125 = vmatprep.subr.bf16.mxu0 %v7124_v15 }
0x1814   :  { %7127 = vmatpush3.bf16.msra.mxu0 %v7124_v15 }
0x1815   :  { %7129 = vmatprep.subr.bf16.mxu0 %v7128_v1 }
0x1818   :  { %7131 = vmatpush3.bf16.msra.mxu0 %v7128_v1 }
0x1819   :  { %7133 = vmatprep.subr.bf16.mxu0 %v7132_v63 }
0x181c   :  { %7135 = vmatpush3.bf16.msra.mxu0 %v7132_v63 }
0x181d   :  { %7137 = vmatprep.subr.bf16.mxu0 %v7136_v22 }
0x1820   :  { %7139 = vmatpush3.bf16.msra.mxu0 %v7136_v22 }
0x1821   :  { %7141 = vmatprep.subr.bf16.mxu0 %v7140_v25 }
0x1824   :  { %7143 = vmatpush3.bf16.msra.mxu0 %v7140_v25 }
0x1825   :  { %7145 = vmatprep.subr.bf16.mxu0 %v7144_v39 }
0x1828   :  { %7147 = vmatpush3.bf16.msra.mxu0 %v7144_v39 }
0x1829   :  { %7149 = vmatprep.subr.bf16.mxu0 %v7148_v51 }
0x182c   :  { %7151 = vmatpush3.bf16.msra.mxu0 %v7148_v51 }
0x182d   :  { %6808 = vmatprep.subr.bf16.mxu0 %v10074_v19 }
0x1846   :  { %v6772_v6 = vpop.f32.mrb[54].mxu1 }
0x1847   :  { %v9682_v49 = vadd.f32 %v7750_v52, %v6772_v6  ;;  %v4267_v53 = vpop.f32.mrb[55].mxu1 }
0x1848   :  { %v9687_v59 = vadd.f32 %v7751_v50, %v4267_v53 }
0x1849   :  { %v4279_v54 = vsel %vm676_vm7, %v9682_v49, -inf  ;;  %v4299_v58 = vsel %vm10162_vm8, %v9682_v49, -inf  ;;  %v4327_v62 = vsel %vm10164_vm6, %v9682_v49, -inf  ;;  %v4355_v28 = vsel %vm10166_vm12, %v9682_v49, -inf }
0x184a   :  { %4280 = vmax.xlane.f32.xlu0 %v4279_v54  ;;  %v4296_v55 = vsel %vm10161_vm5, %v9687_v59, -inf  ;;  %v4324_v56 = vsel %vm10163_vm4, %v9687_v59, -inf  ;;  %v4352_v7 = vsel %vm10165_vm10, %v9687_v59, -inf  ;;  %v4380_v20 = vsel %vm10167_vm9, %v9687_v59, -inf }
0x184b   :  { %4297 = vmax.xlane.f32.xlu1 %v4296_v55  ;;  %v4383_v13 = vsel %vm10168_vm11, %v9682_v49, -inf  ;;  %vm10169_vm5 = vcmask 786048   ;;  %vm10171_vm4 = vcmask 917248   ;;  %v4276_v31 = vsel %vm676_vm7, %v9687_v59, -inf }
0x184c   :  { %v4408_v21 = vsel %vm10169_vm5, %v9687_v59, -inf  ;;  %vm10170_vm8 = vmmov %vm10169_vm5  ;;  %v4436_v57 = vsel %vm10171_vm4, %v9687_v59, -inf  ;;  %vm10172_vm6 = vcmask 1048448   ;;  %vm10175_vm9 = vcmask 261120  }
0x184d   :  { %v4411_v14 = vsel %vm10170_vm8, %v9682_v49, -inf  ;;  %v4464_v30 = vsel %vm10172_vm6, %v9687_v59, -inf  ;;  %vm10173_vm10 = vmmov %vm10171_vm4  ;;  %vm10176_vm11 = vcmask 392192   ;;  %vm10177_vm5 = vcmask 523264  }
0x184e   :  { %4300 = vmax.xlane.f32.xlu0 %v4299_v58  ;;  %v4439_v23 = vsel %vm10173_vm10, %v9682_v49, -inf  ;;  %vm10174_vm12 = vmmov %vm10172_vm6  ;;  %vm10179_vm4 = vcmask 654336   ;;  %vm10181_vm10 = vcmask 785408  }
0x184f   :  { %4325 = vmax.xlane.f32.xlu1 %v4324_v56  ;;  %v4467_v41 = vsel %vm10174_vm12, %v9682_v49, -inf  ;;  %vm10178_vm8 = vmmov %vm10175_vm9 }
0x1850   :  { %vm10180_vm6 = vmmov %vm10176_vm11 }
0x1851   :  { %vm10182_vm12 = vmmov %vm10177_vm5 }
0x1852   :  { %4328 = vmax.xlane.f32.xlu0 %v4327_v62 }
0x1853   :  { %4353 = vmax.xlane.f32.xlu1 %v4352_v7 }
0x1856   :  { %4356 = vmax.xlane.f32.xlu0 %v4355_v28 }
0x1857   :  { %4381 = vmax.xlane.f32.xlu1 %v4380_v20 }
0x185a   :  { %4384 = vmax.xlane.f32.xlu0 %v4383_v13 }
0x185b   :  { %4409 = vmax.xlane.f32.xlu1 %v4408_v21 }
0x185e   :  { %4412 = vmax.xlane.f32.xlu0 %v4411_v14 }
0x185f   :  { %4437 = vmax.xlane.f32.xlu1 %v4436_v57 }
0x1862   :  { %4277 = vmax.xlane.f32.xlu0 %v4276_v31 }
0x1863   :  { %4465 = vmax.xlane.f32.xlu1 %v4464_v30 }
0x1866   :  { %4440 = vmax.xlane.f32.xlu0 %v4439_v23 }
0x186a   :  { %4468 = vmax.xlane.f32.xlu0 %v4467_v41 }
0x18d7   :  { %v4281_v40 = vpop.xlane.xlu0 %4280 }
0x18d8   :  { %v4298_v12 = vpop.xlane.xlu1 %4297  ;;  %v4283_v51 = vsub.f32 %v9682_v49, %v4281_v40 }
0x18d9   :  { %v4302_v32 = vsub.f32 %v9687_v59, %v4298_v12 }
0x18da   :  { %v4286_v28 = vmul.f32 1.442695, %v4283_v51 }
0x18db   :  { %v4301_v60 = vpop.xlane.xlu0 %4300  ;;  %v4304_v6 = vmul.f32 1.442695, %v4302_v32 }
0x18dc   :  { %v4303_v4 = vsub.f32 %v9682_v49, %v4301_v60  ;;  %v4326_v18 = vpop.xlane.xlu1 %4325 }
0x18dd   :  { %v4330_v1 = vsub.f32 %v9687_v59, %v4326_v18 }
0x18de   :  { %v4306_v17 = vmul.f32 1.442695, %v4303_v4 }
0x18df   :  { %v4329_v34 = vpop.xlane.xlu0 %4328  ;;  %v4332_v50 = vmul.f32 1.442695, %v4330_v1 }
0x18e0   :  { %7643 = vpow2.f32 %v4306_v17  ;;  %v4331_v33 = vsub.f32 %v9682_v49, %v4329_v34  ;;  %v4354_v46 = vpop.xlane.xlu1 %4353 }
0x18e1   :  { %v4358_v11 = vsub.f32 %v9687_v59, %v4354_v46 }
0x18e2   :  { %v4334_v42 = vmul.f32 1.442695, %v4331_v33 }
0x18e3   :  { %v4360_v38 = vmul.f32 1.442695, %v4358_v11  ;;  %v4357_v29 = vpop.xlane.xlu0 %4356 }
0x18e4   :  { %7645 = vpow2.f32 %v4334_v42  ;;  %v4359_v36 = vsub.f32 %v9682_v49, %v4357_v29  ;;  %v4382_v9 = vpop.xlane.xlu1 %4381 }
0x18e5   :  { %7647 = vpow2.f32 %v4360_v38  ;;  %v4386_v27 = vsub.f32 %v9687_v59, %v4382_v9 }
0x18e6   :  { %v4362_v43 = vmul.f32 1.442695, %v4359_v36 }
0x18e7   :  { %v4388_v8 = vmul.f32 1.442695, %v4386_v27  ;;  %v4385_v0 = vpop.xlane.xlu0 %4384 }
0x18e8   :  { %7649 = vpow2.f32 %v4362_v43  ;;  %v4387_v5 = vsub.f32 %v9682_v49, %v4385_v0  ;;  %v4410_v35 = vpop.xlane.xlu1 %4409 }
0x18e9   :  { %7651 = vpow2.f32 %v4388_v8  ;;  %v4414_v45 = vsub.f32 %v9687_v59, %v4410_v35 }
0x18ea   :  { %v9728_v2 = vpop.eup %7643  ;;  %v4390_v15 = vmul.f32 1.442695, %v4387_v5 }
0x18eb   :  { %v4416_v63 = vmul.f32 1.442695, %v4414_v45  ;;  %v4413_v22 = vpop.xlane.xlu0 %4412  ;;  %4312 = vrot.lane.b32.xlu0 %v9728_v2, %s7955_s23 }
0x18ec   :  { %7653 = vpow2.f32 %v4390_v15  ;;  %v4415_v25 = vsub.f32 %v9682_v49, %v4413_v22  ;;  %v4438_v39 = vpop.xlane.xlu1 %4437 }
0x18ed   :  { %7655 = vpow2.f32 %v4416_v63  ;;  %v4442_v48 = vsub.f32 %v9687_v59, %v4438_v39 }
0x18ee   :  { %v7646_v47 = vpop.eup %7645  ;;  %v4418_v52 = vmul.f32 1.442695, %v4415_v25 }
0x18ef   :  { %v7648_v53 = vpop.eup %7647  ;;  %v4444_v54 = vmul.f32 1.442695, %v4442_v48  ;;  %4340 = vrot.lane.b32.xlu1 %v7646_v47, %s7954_s13  ;;  %v4278_v55 = vpop.xlane.xlu0 %4277 }
0x18f0   :  { %7657 = vpow2.f32 %v4418_v52  ;;  %v4282_v58 = vsub.f32 %v9687_v59, %v4278_v55  ;;  %v4466_v56 = vpop.xlane.xlu1 %4465  ;;  %4366 = vrot.lane.b32.xlu0 %v7648_v53, %s7956_s2 }
0x18f1   :  { %7659 = vpow2.f32 %v4444_v54  ;;  %v4470_v62 = vsub.f32 %v9687_v59, %v4466_v56 }
0x18f2   :  { %v7650_v7 = vpop.eup %7649  ;;  %7661 = vpow2.f32 %v4304_v6  ;;  %v4284_v20 = vmul.f32 1.442695, %v4282_v58 }
0x18f3   :  { %v7652_v13 = vpop.eup %7651  ;;  %7663 = vpow2.f32 %v4332_v50  ;;  %v4472_v21 = vmul.f32 1.442695, %v4470_v62  ;;  %4368 = vrot.lane.b32.xlu1 %v7650_v7, %s7956_s2  ;;  %v4441_v14 = vpop.xlane.xlu0 %4440 }
0x18f4   :  { %7665 = vpow2.f32 %v4284_v20  ;;  %v4443_v57 = vsub.f32 %v9682_v49, %v4441_v14  ;;  %4394 = vrot.lane.b32.xlu0 %v7652_v13, %s7945_s27 }
0x18f5   :  { %7667 = vpow2.f32 %v4472_v21 }
0x18f6   :  { %v7654_v31 = vpop.eup %7653  ;;  %7669 = vpow2.f32 %v4286_v28  ;;  %v4446_v30 = vmul.f32 1.442695, %v4443_v57 }
0x18f7   :  { %v7656_v59 = vpop.eup %7655  ;;  %4396 = vrot.lane.b32.xlu1 %v7654_v31, %s7945_s27  ;;  %v4469_v23 = vpop.xlane.xlu0 %4468 }
0x18f8   :  { %v4471_v41 = vsub.f32 %v9682_v49, %v4469_v23  ;;  %4422 = vrot.lane.b32.xlu0 %v7656_v59, %s7957_s3  ;;  %7671 = vpow2.f32 %v4446_v30 }
0x18fa   :  { %v7658_v40 = vpop.eup %7657  ;;  %v4474_v12 = vmul.f32 1.442695, %v4471_v41  ;;  %v7433_v41 = vld [vmem:[%s9990_s14 + $0x10] sm:$0xff]  }
0x18fb   :  { %v7660_v60 = vpop.eup %7659  ;;  %4424 = vrot.lane.b32.xlu1 %v7658_v40, %s7957_s3 }
0x18fc   :  { %v7662_v4 = vpop.eup %7661  ;;  %7673 = vpow2.f32 %v4474_v12  ;;  %4450 = vrot.lane.b32.xlu0 %v7660_v60, %s7953_s22 }
0x18fd   :  { %v7664_v18 = vpop.eup %7663 }
0x18fe   :  { %v7666_v17 = vpop.eup %7665 }
0x18ff   :  { %v7668_v34 = vpop.eup %7667  ;;  %4310 = vrot.lane.b32.xlu1 %v7662_v4, %s7955_s23  ;;  %v4492_v33 = vsel %vm676_vm7, %v7666_v17, %v7662_v4  ;;  %v4288_v32 = vsel %vm676_vm7, %v7666_v17, 0.0 }
0x1900   :  { %v7670_v49 = vpop.eup %7669  ;;  %4478 = vrot.lane.b32.xlu0 %v7668_v34, %s10052_s24  ;;  %v4494_v46 = vsel %vm10175_vm9, %v4492_v33, %v7664_v18  ;;  %vm10183_vm9 = vcmask 916480  }
0x1901   :  { %v4496_v11 = vsel %vm10176_vm11, %v4494_v46, %v7648_v53  ;;  %v4493_v42 = vsel %vm676_vm7, %v7670_v49, %v9728_v2  ;;  %vm10184_vm11 = vmmov %vm10179_vm4  ;;  %v4291_v15 = vsel %vm676_vm7, %v7670_v49, 0.0 }
0x1902   :  { %v4498_v38 = vsel %vm10177_vm5, %v4496_v11, %v7652_v13  ;;  %v4495_v29 = vsel %vm10178_vm8, %v4493_v42, %v7646_v47  ;;  %v7672_v36 = vpop.eup %7671  ;;  %vm10185_vm5 = vmmov %vm10181_vm10 }
0x1903   :  { %4338 = vrot.lane.b32.xlu1 %v7664_v18, %s7954_s13  ;;  %v4500_v9 = vsel %vm10179_vm4, %v4498_v38, %v7656_v59  ;;  %v4497_v27 = vsel %vm10180_vm6, %v4495_v29, %v7650_v7  ;;  %vm10186_vm8 = vmmov %vm10183_vm9 }
0x1904   :  { %v4502_v43 = vsel %vm10181_vm10, %v4500_v9, %v7660_v60  ;;  %v4499_v8 = vsel %vm10182_vm12, %v4497_v27, %v7654_v31 }
0x1905   :  { %v4504_v0 = vsel %vm10183_vm9, %v4502_v43, %v7668_v34  ;;  %v4501_v5 = vsel %vm10184_vm11, %v4499_v8, %v7658_v40  ;;  %v7434_v40 = vld [vmem:[%s9990_s14 + $0x18] sm:$0xff]  }
0x1906   :  { %v7674_v35 = vpop.eup %7673  ;;  %6805 = vmatprep.mubr.f32.mxu0 %v4504_v0  ;;  %v4503_v45 = vsel %vm10185_vm5, %v4501_v5, %v7672_v36 }
0x1907   :  { %4452 = vrot.lane.b32.xlu1 %v7672_v36, %s7953_s22  ;;  %v4505_v2 = vsel %vm10186_vm8, %v4503_v45, %v7674_v35 }
0x1908   :  { %6806 = vmatmul.mubr.f32.vlgmr.msra.gmra.mrb[48].mxu0 %v4505_v2 }
0x1909   :  { %6812 = vmatprep.mubr.msk.bf16.mxu0 %vm7952_vm3, %v10074_v19  ;;  %6809 = vmatpush3.bf16.msra.mxu0 %v7433_v41  ;;  %vm10187_vm3 = vcmask 261120  }
0x190a   :  { %6810 = vmatprep.subr.bf16.mxu0 %v10074_v19 }
0x190b   :  { %4480 = vrot.lane.b32.xlu1 %v7674_v35, %s10052_s24 }
0x190d   :  { %6811 = vmatpush3.bf16.msra.mxu0 %v7434_v40 }
0x191f   :  { %4289 = vadd.xlane.f32.xlu0 %v4288_v32 }
0x192f   :  { %4292 = vadd.xlane.f32.xlu1 %v4291_v15 }
0x195d   :  { %v4313_v1 = vpop.permute.xlu0 %4312 }
0x195e   :  { %v4319_v63 = vsel %vm676_vm7, %v4313_v1, 0.0 }
0x195f   :  { %4320 = vadd.xlane.f32.xlu0 %v4319_v63 }
0x1961   :  { %v4341_v22 = vpop.permute.xlu1 %4340 }
0x1962   :  { %v4347_v25 = vsel %vm676_vm7, %v4341_v22, 0.0  ;;  %v4367_v53 = vpop.permute.xlu0 %4366 }
0x1963   :  { %4348 = vadd.xlane.f32.xlu0 %v4347_v25  ;;  %v4372_v7 = vsel %vm676_vm7, %v4367_v53, 0.0 }
0x1965   :  { %v4369_v39 = vpop.permute.xlu1 %4368 }
0x1966   :  { %v4375_v48 = vsel %vm676_vm7, %v4369_v39, 0.0  ;;  %v4395_v55 = vpop.permute.xlu0 %4394 }
0x1967   :  { %4376 = vadd.xlane.f32.xlu0 %v4375_v48  ;;  %v4400_v21 = vsel %vm676_vm7, %v4395_v55, 0.0 }
0x1969   :  { %v4397_v47 = vpop.permute.xlu1 %4396 }
0x196a   :  { %v4403_v51 = vsel %vm676_vm7, %v4397_v47, 0.0  ;;  %v4423_v20 = vpop.permute.xlu0 %4422 }
0x196b   :  { %4404 = vadd.xlane.f32.xlu0 %v4403_v51  ;;  %v4428_v31 = vsel %vm676_vm7, %v4423_v20, 0.0 }
0x196d   :  { %v4425_v6 = vpop.permute.xlu1 %4424 }
0x196e   :  { %v4431_v52 = vsel %vm676_vm7, %v4425_v6, 0.0  ;;  %v4451_v57 = vpop.permute.xlu0 %4450 }
0x196f   :  { %4432 = vadd.xlane.f32.xlu0 %v4431_v52  ;;  %v4456_v30 = vsel %vm676_vm7, %v4451_v57, 0.0 }
0x1971   :  { %v4311_v50 = vpop.permute.xlu1 %4310 }
0x1972   :  { %v4316_v54 = vsel %vm676_vm7, %v4311_v50, 0.0  ;;  %v4479_v59 = vpop.permute.xlu0 %4478 }
0x1973   :  { %4317 = vadd.xlane.f32.xlu0 %v4316_v54  ;;  %v4484_v23 = vsel %vm676_vm7, %v4479_v59, 0.0 }
0x1975   :  { %v4339_v58 = vpop.permute.xlu1 %4338 }
0x1976   :  { %v4344_v56 = vsel %vm676_vm7, %v4339_v58, 0.0 }
0x1977   :  { %4345 = vadd.xlane.f32.xlu1 %v4344_v56 }
0x1979   :  { %v4453_v62 = vpop.permute.xlu1 %4452 }
0x197a   :  { %v4459_v28 = vsel %vm676_vm7, %v4453_v62, 0.0 }
0x197b   :  { %4460 = vadd.xlane.f32.xlu0 %v4459_v28  ;;  %4373 = vadd.xlane.f32.xlu1 %v4372_v7 }
0x197d   :  { %v4481_v13 = vpop.permute.xlu1 %4480 }
0x197e   :  { %v4487_v14 = vsel %vm676_vm7, %v4481_v13, 0.0 }
0x197f   :  { %4488 = vadd.xlane.f32.xlu0 %v4487_v14  ;;  %4401 = vadd.xlane.f32.xlu1 %v4400_v21 }
0x1983   :  { %4429 = vadd.xlane.f32.xlu1 %v4428_v31 }
0x1987   :  { %4457 = vadd.xlane.f32.xlu1 %v4456_v30  ;;  %v6173_v30 = vld [vmem:[#allocation10 + $0x1] ss:$0 sm:$0xff] }
0x198b   :  { %4485 = vadd.xlane.f32.xlu1 %v4484_v23 }
0x19ac   :  { %v4290_v4 = vpop.xlane.xlu0 %4289 }
0x19ad   :  { %7675 = vrcp.f32 %v4290_v4 }
0x19b7   :  { %v7676_v27 = vpop.eup %7675 }
0x19bc   :  { %v4293_v49 = vpop.xlane.xlu1 %4292 }
0x19bd   :  { %7677 = vrcp.f32 %v4293_v49 }
0x19c7   :  { %v7678_v43 = vpop.eup %7677 }
0x19db   :  { %v9794_v12 = vpop.f32.mrb[48].mxu0 }
0x19dc   :  { %v9796_v60 = vpop.f32.mrb[49].mxu0 }
0x19ec   :  { %v4321_v18 = vpop.xlane.xlu0 %4320 }
0x19ed   :  { %7679 = vrcp.f32 %v4321_v18 }
0x19f0   :  { %v4349_v17 = vpop.xlane.xlu0 %4348 }
0x19f1   :  { %7681 = vrcp.f32 %v4349_v17 }
0x19f4   :  { %v4377_v34 = vpop.xlane.xlu0 %4376 }
0x19f5   :  { %7683 = vrcp.f32 %v4377_v34 }
0x19f7   :  { %v7680_v8 = vpop.eup %7679 }
0x19f8   :  { %v4405_v33 = vpop.xlane.xlu0 %4404  ;;  %v4507_v25 = vsel %vm918_vm2, %v7678_v43, %v7680_v8 }
0x19f9   :  { %7685 = vrcp.f32 %v4405_v33 }
0x19fb   :  { %v7682_v5 = vpop.eup %7681 }
0x19fc   :  { %v4433_v46 = vpop.xlane.xlu0 %4432  ;;  %v4509_v48 = vsel %vm921_vm1, %v4507_v25, %v7682_v5  ;;  %v4717_v5 = vld [vmem:[#allocation11 + $0x180] sm:$0xff]  ;;  %v4710_v25 = vld [vmem:[#allocation11 + $0x148] sm:$0xff] }
0x19fd   :  { %7687 = vrcp.f32 %v4433_v46 }
0x19ff   :  { %v7684_v35 = vpop.eup %7683 }
0x1a00   :  { %v4318_v42 = vpop.xlane.xlu0 %4317  ;;  %v4511_v6 = vsel %vm924_vm15, %v4509_v48, %v7684_v35  ;;  %v4725_v35 = vld [vmem:[#allocation11 + $0x1c0] sm:$0xff]  ;;  %v4714_v48 = vld [vmem:[#allocation11 + $0x168] sm:$0xff] }
0x1a01   :  { %7689 = vrcp.f32 %v4318_v42 }
0x1a03   :  { %v7686_v45 = vpop.eup %7685 }
0x1a04   :  { %v4346_v11 = vpop.xlane.xlu1 %4345  ;;  %v4513_v50 = vsel %vm676_vm7, %v4511_v6, %v7686_v45 }
0x1a05   :  { %7691 = vrcp.f32 %v4346_v11 }
0x1a07   :  { %v7688_v2 = vpop.eup %7687 }
0x1a08   :  { %v4374_v38 = vpop.xlane.xlu1 %4373  ;;  %v4461_v19 = vpop.xlane.xlu0 %4460  ;;  %v4515_v58 = vsel %vm929_vm0, %v4513_v50, %v7688_v2 }
0x1a09   :  { %7693 = vrcp.f32 %v4374_v38 }
0x1a0a   :  { %7695 = vrcp.f32 %v4461_v19 }
0x1a0b   :  { %v7690_v15 = vpop.eup %7689 }
0x1a0c   :  { %v4402_v29 = vpop.xlane.xlu1 %4401  ;;  %v4489_v9 = vpop.xlane.xlu0 %4488  ;;  %v4506_v51 = vsel %vm918_vm2, %v7676_v27, %v7690_v15  ;;  %v4704_v27 = vld [vmem:[#allocation11 + $0x118] sm:$0xff] }
0x1a0d   :  { %7697 = vrcp.f32 %v4402_v29  ;;  %v4720_v15 = vld [vmem:[#allocation11 + $0x198] sm:$0xff] }
0x1a0e   :  { %7699 = vrcp.f32 %v4489_v9  ;;  %v4709_v9 = vld [vmem:[#allocation11 + $0x140] sm:$0xff] }
0x1a0f   :  { %v7692_v1 = vpop.eup %7691 }
0x1a10   :  { %v4430_v36 = vpop.xlane.xlu1 %4429  ;;  %v4508_v53 = vsel %vm921_vm1, %v4506_v51, %v7692_v1  ;;  %v4728_v1 = vld [vmem:[#allocation11 + $0x1d8] sm:$0xff] }
0x1a11   :  { %7701 = vrcp.f32 %v4430_v36 }
0x1a13   :  { %v7694_v63 = vpop.eup %7693 }
0x1a14   :  { %v4458_v0 = vpop.xlane.xlu1 %4457  ;;  %v7696_v22 = vpop.eup %7695  ;;  %v4510_v55 = vsel %vm924_vm15, %v4508_v53, %v7694_v63  ;;  %v4702_v63 = vld [vmem:[#allocation11 + $0x108] sm:$0xff] }
0x1a15   :  { %7703 = vrcp.f32 %v4458_v0  ;;  %v4517_v62 = vsel %vm932_vm14, %v4515_v58, %v7696_v22  ;;  %v4712_v0 = vld [vmem:[#allocation11 + $0x158] sm:$0xff]  ;;  %v6202_v22 = vcombine.high %v4720_v15, %v4728_v1  ;;  %v6181_v51 = vcombine.low %v4702_v63, %v4710_v25 }
0x1a16   :  { %v6185_v45 = vcombine.low %v4704_v27, %v4712_v0  ;;  %v6186_v2 = vcombine.high %v4704_v27, %v4712_v0  ;;  %v6182_v53 = vcombine.high %v4702_v63, %v4710_v25  ;;  %v4707_v25 = vld [vmem:[#allocation11 + $0x130] sm:$0xff] }
0x1a17   :  { %v7698_v39 = vpop.eup %7697 }
0x1a18   :  { %v4486_v32 = vpop.xlane.xlu1 %4485  ;;  %v7700_v47 = vpop.eup %7699  ;;  %v4512_v56 = vsel %vm676_vm7, %v4510_v55, %v7698_v39  ;;  %v4706_v39 = vld [vmem:[#allocation11 + $0x128] sm:$0xff]  ;;  %5111 = vmatprep.subr.bf16.mxu1 %v6186_v2 }
0x1a19   :  { %7705 = vrcp.f32 %v4486_v32  ;;  %v4519_v28 = vsel %vm935_vm13, %v4517_v62, %v7700_v47  ;;  %v6196_v32 = vcombine.high %v4717_v5, %v4725_v35  ;;  %v6195_v47 = vcombine.low %v4717_v5, %v4725_v35  ;;  %5112 = vmatpush1.bf16.msra.mxu1 %v6185_v45  ;;  %v4705_v5 = vld [vmem:[#allocation11 + $0x120] sm:$0xff] }
0x1a1a   :  { %v4596_v57 = vmul.f32 %v9794_v12, %v4519_v28  ;;  %v6189_v6 = vcombine.low %v4706_v39, %v4714_v48  ;;  %5113 = vmatprep.subr.bf16.mxu1 %v6202_v22  ;;  %v6190_v50 = vcombine.high %v4706_v39, %v4714_v48  ;;  %v10192_v28 = vld [vmem:[#allocation33_spill] sm:$0xff]  ;;  %v4713_v35 = vld [vmem:[#allocation11 + $0x160] sm:$0xff]  ;;  %v4715_v39 = vld [vmem:[#allocation11 + $0x170] sm:$0xff] }
0x1a1b   :  { %v7702_v52 = vpop.eup %7701  ;;  %v6187_v63 = vcombine.low %v4705_v5, %v4713_v35 }
0x1a1c   :  { %v4514_v7 = vsel %vm929_vm0, %v4512_v56, %v7702_v52  ;;  %vm10188_vm0 = vmmov %vm10187_vm3  ;;  %v6201_v52 = vcombine.low %v4720_v15, %v4728_v1  ;;  %v4721_v15 = vld [vmem:[#allocation11 + $0x1a0] sm:$0xff] }
0x1a1d   :  { %vm10189_vm7 = vmmov %vm10188_vm0  ;;  %v4729_v1 = vld [vmem:[#allocation11 + $0x1e0] sm:$0xff] }
0x1a1e   :  { %5114 = vmatpush1.bf16.msra.mxu1 %v6201_v52  ;;  %vm10194_vm15 = vmmov %vm10188_vm0  ;;  %v6204_v22 = vcombine.high %v4721_v15, %v4729_v1  ;;  %v6203_v48 = vcombine.low %v4721_v15, %v4729_v1  ;;  %v6191_v52 = vcombine.low %v4707_v25, %v4715_v39 }
0x1a1f   :  { %v7704_v54 = vpop.eup %7703  ;;  %5197 = vmatprep.subr.bf16.mxu1 %v6190_v50  ;;  %vm10195_vm1 = vmmov %vm10188_vm0  ;;  %v5375_v50 = vld [vmem:[#allocation13 + $0x100] sm:$0xff] }
0x1a20   :  { %v4516_v13 = vsel %vm932_vm14, %v4514_v7, %v7704_v54  ;;  %vm10191_vm14 = vmmov %vm10188_vm0 }
0x1a21   :  { %vm10196_vm2 = vmmov %vm10188_vm0 }
0x1a22   :  { %vm10197_vm4 = vmmov %vm10188_vm0 }
0x1a23   :  { %v7706_v20 = vpop.eup %7705  ;;  %vm10198_vm6 = vmmov %vm10188_vm0 }
0x1a24   :  { %v4518_v21 = vsel %vm935_vm13, %v4516_v13, %v7706_v20  ;;  %vm10190_vm13 = vmmov %vm10188_vm0  ;;  %v4691_v20 = vrot.slane %v9580_v61, %v10192_v28 }
0x1a25   :  { %v4595_v14 = vmul.f32 %v9796_v60, %v4518_v21  ;;  %vm10199_vm10 = vmmov %vm10188_vm0 }
0x1a26   :  { %vm10200_vm12 = vmmov %vm10188_vm0 }
0x1a27   :  { %v4597_v31 = vpack.c.bf16 %v4596_v57, %v4595_v14  ;;  %v10193_v57 = vld [vmem:[#allocation34_spill] sm:$0xff]  ;;  %vm10201_vm9 = vmmov %vm10188_vm0 }
0x1a28   :  { %vm10204_vm11 = vmmov %vm10188_vm0 }
0x1a29   :  { %6813 = vmatmul.mubr.msk.bf16.vlgmr.msra.gmra.mrb[52].mxu0 %vm10187_vm3, %v4597_v31  ;;  %v4697_v31 = vrot.slane %v9580_v61, %v10193_v57  ;;  %v4708_v61 = vld [vmem:[#allocation11 + $0x138] sm:$0xff]  ;;  %vm10205_vm5 = vmmov %vm10188_vm0 }
0x1a2a   :  { %5014 = vmatprep.mubr.bf16.mxu0 %v10160_v44  ;;  %vm10206_vm8 = vmmov %vm10188_vm0 }
0x1a2b   :  { %vm10207_vm3 = vmmov %vm10188_vm0 }
0x1afc   :  { %v4653_v59 = vpop.f32.mrb[52].mxu0 }
0x1afd   :  { %v4654_v23 = vadd.f32 %v6173_v30, %v4653_v59  ;;  %v6814_v41 = vpop.f32.mrb[53].mxu0 }
0x1afe   :  { %v4656_v40 = vpop.f32.mrb[54].mxu0  ;;  %v4718_v41 = vld [vmem:[#allocation11 + $0x188] sm:$0xff] }
0x1aff   :  { %v4660_v4 = vadd.f32 %v4654_v23, %v9588_v10  ;;  %v4657_v18 = vadd.f32 %v6173_v30, %v4656_v40  ;;  %v6815_v17 = vpop.f32.mrb[55].mxu0  ;;  %v4726_v40 = vld [vmem:[#allocation11 + $0x1c8] sm:$0xff] }
0x1b01   :  { %v4661_v34 = vadd.f32 %v4657_v18, %v9590_v16  ;;  %v4662_v60 = vsel %vm10188_vm0, %v4660_v4, 0.0  ;;  %v4701_v16 = vld [vmem:[#allocation11 + $0x100] sm:$0xff]  ;;  %v4730_v18 = vld [vmem:[#allocation11 + $0x1e8] sm:$0xff] }
0x1b02   :  { %4663 = vadd.xlane.f32.xlu1 %v4662_v60  ;;  %v6179_v43 = vcombine.low %v4701_v16, %v4709_v9  ;;  %v6180_v8 = vcombine.high %v4701_v16, %v4709_v9  ;;  %v4724_v16 = vld [vmem:[#allocation11 + $0x1b8] sm:$0xff] }
0x1b03   :  { %v4665_v12 = vsel %vm10189_vm7, %v4661_v34, 0.0  ;;  %v4732_v9 = vld [vmem:[#allocation11 + $0x1f8] sm:$0xff]  ;;  %vm10208_vm7 = vmmov %vm10188_vm0 }
0x1b04   :  { %4666 = vadd.xlane.f32.xlu0 %v4665_v12  ;;  %4982 = vmatprep.subr.bf16.mxu0 %v6180_v8  ;;  %v6198_v12 = vcombine.high %v4718_v41, %v4726_v40  ;;  %v6210_v0 = vcombine.high %v4724_v16, %v4732_v9  ;;  %v6209_v2 = vcombine.low %v4724_v16, %v4732_v9 }
0x1b05   :  { %4983 = vmatpush1.bf16.msra.mxu0 %v6179_v43 }
0x1b06   :  { %4984 = vmatprep.subr.bf16.mxu0 %v6196_v32  ;;  %v6188_v32 = vcombine.high %v4705_v5, %v4713_v35 }
0x1b09   :  { %4985 = vmatpush1.bf16.msra.mxu0 %v6195_v47  ;;  %v6192_v47 = vcombine.high %v4707_v25, %v4715_v39 }
0x1b0a   :  { %5025 = vmatprep.subr.bf16.mxu0 %v6182_v53 }
0x1b8f   :  { %v4664_v33 = vpop.xlane.xlu1 %4663 }
0x1b90   :  { %v4668_v49 = vmul.f32 0.03125, %v4664_v33 }
0x1b91   :  { %v4667_v46 = vpop.xlane.xlu0 %4666 }
0x1b92   :  { %v4670_v11 = vsub.f32 %v4660_v4, %v4668_v49  ;;  %v4669_v42 = vmul.f32 0.03125, %v4667_v46  ;;  %v4722_v4 = vld [vmem:[#allocation11 + $0x1a8] sm:$0xff]  ;;  %v4703_v49 = vld [vmem:[#allocation11 + $0x110] sm:$0xff] }
0x1b93   :  { %v6206_v33 = vcombine.high %v4722_v4, %v4730_v18  ;;  %v4711_v46 = vld [vmem:[#allocation11 + $0x150] sm:$0xff] }
0x1b94   :  { %v4671_v38 = vsub.f32 %v4661_v34, %v4669_v42  ;;  %v4672_v19 = vmul.f32 %v4670_v11, %v4670_v11  ;;  %v6197_v42 = vcombine.low %v4718_v41, %v4726_v40  ;;  %v6183_v27 = vcombine.low %v4703_v49, %v4711_v46 }
0x1b96   :  { %v4674_v29 = vsel %vm10190_vm13, %v4672_v19, 0.0  ;;  %v4673_v10 = vmul.f32 %v4671_v38, %v4671_v38  ;;  %v6184_v19 = vcombine.high %v4703_v49, %v4711_v46 }
0x1b97   :  { %4675 = vadd.xlane.f32.xlu1 %v4674_v29 }
0x1b98   :  { %v4677_v36 = vsel %vm10191_vm14, %v4673_v10, 0.0  ;;  %v4719_v10 = vld [vmem:[#allocation11 + $0x190] sm:$0xff] }
0x1b99   :  { %4678 = vadd.xlane.f32.xlu0 %v4677_v36  ;;  %v4727_v36 = vld [vmem:[#allocation11 + $0x1d0] sm:$0xff] }
0x1b9a   :  { %v6200_v8 = vcombine.high %v4719_v10, %v4727_v36  ;;  %v6199_v45 = vcombine.low %v4719_v10, %v4727_v36 }
0x1c24   :  { %v4676_v54 = vpop.xlane.xlu1 %4675 }
0x1c25   :  { %v4680_v55 = vmul.f32 0.03125, %v4676_v54  ;;  %v5383_v54 = vld [vmem:[#allocation13 + $0x140] sm:$0xff] }
0x1c26   :  { %v4679_v58 = vpop.xlane.xlu0 %4678 }
0x1c27   :  { %v4682_v56 = vadd.f32 1e-05, %v4680_v55  ;;  %v4681_v62 = vmul.f32 0.03125, %v4679_v58  ;;  %v6222_v58 = vcombine.high %v5375_v50, %v5383_v54 }
0x1c29   :  { %7707 = vrsqrt.f32 %v4682_v56  ;;  %v4683_v7 = vadd.f32 1e-05, %v4681_v62  ;;  %v6221_v56 = vcombine.low %v5375_v50, %v5383_v54  ;;  %v5391_v62 = vld [vmem:[#allocation13 + $0x180] sm:$0xff] }
0x1c2b   :  { %7709 = vrsqrt.f32 %v4683_v7  ;;  %v5399_v7 = vld [vmem:[#allocation13 + $0x1c0] sm:$0xff] }
0x1c33   :  { %v7708_v13 = vpop.eup %7707 }
0x1c34   :  { %v4686_v21 = vmul.f32 %v7708_v13, %v4670_v11  ;;  %v4716_v11 = vld [vmem:[#allocation11 + $0x178] sm:$0xff]  ;;  %v6237_v13 = vcombine.low %v5391_v62, %v5399_v7 }
0x1c35   :  { %v7710_v14 = vpop.eup %7709  ;;  %v6194_v29 = vcombine.high %v4708_v61, %v4716_v11  ;;  %v6193_v43 = vcombine.low %v4708_v61, %v4716_v11  ;;  %v6177_v61 = vld [vmem:[%s9994_s18 + $0x10] sm:$0xff] }
0x1c36   :  { %v4692_v30 = vmul.f32 %v4691_v20, %v4686_v21  ;;  %v4687_v59 = vmul.f32 %v7710_v14, %v4671_v38  ;;  %v6205_v38 = vcombine.low %v4722_v4, %v4730_v18  ;;  %v6238_v21 = vcombine.high %v5391_v62, %v5399_v7  ;;  %v5384_v14 = vld [vmem:[#allocation13 + $0x148] sm:$0xff]  ;;  %v9858_v4 = vld [vmem:[#allocation13 + $0x150] sm:$0xff] }
0x1c37   :  { %v4742_v11 = vrot.slane %v6177_v61, %v8810_v37  ;;  %v4754_v25 = vrot.slane %v6177_v61, %v10193_v57  ;;  %v9890_v62 = vld [vmem:[#allocation13 + $0x190] sm:$0xff] }
0x1c38   :  { %v4693_v23 = vmul.f32 %v4691_v20, %v4687_v59  ;;  %v9826_v17 = vadd.f32 %v4697_v31, %v4692_v30  ;;  %v5376_v20 = vld [vmem:[#allocation13 + $0x108] sm:$0xff]  ;;  %v9892_v7 = vld [vmem:[#allocation13 + $0x1d0] sm:$0xff] }
0x1c39   :  { %v6224_v30 = vcombine.high %v5376_v20, %v5384_v14  ;;  %v5400_v59 = vld [vmem:[#allocation13 + $0x1c8] sm:$0xff] }
0x1c3a   :  { %v9828_v34 = vadd.f32 %v4697_v31, %v4693_v23  ;;  %v6223_v31 = vcombine.low %v5376_v20, %v5384_v14  ;;  %v9856_v23 = vld [vmem:[#allocation13 + $0x110] sm:$0xff] }
0x1c3b   :  { %v6225_v18 = vcombine.low %v9856_v23, %v9858_v4 }
0x1c3c   :  { %v9832_v60 = vpack.c.bf16 %v9828_v34, %v9826_v17 }
0x1c3e   :  { %6211 = vmatmul.mubr.msk.bf16.vlgmr.msra.gmra.mrb[56].mxu0 %vm10194_vm15, %v9832_v60  ;;  %6214 = vmatmul.mubr.msk.bf16.vlgmr.msra.gmra.mrb[68].mxu1 %vm10195_vm1, %v9832_v60 }
0x1c3f   :  { %5026 = vmatpush1.bf16.msra.mxu0 %v6181_v51  ;;  %5198 = vmatpush1.bf16.msra.mxu1 %v6189_v6  ;;  %v4723_v51 = vld [vmem:[#allocation11 + $0x1b0] sm:$0xff] }
0x1c40   :  { %5027 = vmatprep.subr.bf16.mxu0 %v6198_v12  ;;  %5199 = vmatprep.subr.bf16.mxu1 %v6206_v33  ;;  %v4731_v6 = vld [vmem:[#allocation11 + $0x1f0] sm:$0xff]  ;;  %v9864_v12 = vld [vmem:[#allocation13 + $0x118] sm:$0xff] }
0x1c41   :  { %5057 = vmatprep.mubr.bf16.mxu0 %v10160_v44  ;;  %5229 = vmatprep.mubr.bf16.mxu1 %v10160_v44  ;;  %v6208_v53 = vcombine.high %v4723_v51, %v4731_v6  ;;  %v6207_v55 = vcombine.low %v4723_v51, %v4731_v6  ;;  %v9866_v33 = vld [vmem:[#allocation13 + $0x158] sm:$0xff] }
0x1c42   :  { %v6227_v49 = vcombine.low %v9864_v12, %v9866_v33  ;;  %v6228_v46 = vcombine.high %v9864_v12, %v9866_v33  ;;  %v5388_v12 = vld [vmem:[#allocation13 + $0x168] sm:$0xff] }
0x1c43   :  { %5028 = vmatpush1.bf16.msra.mxu0 %v6197_v42  ;;  %5200 = vmatpush1.bf16.msra.mxu1 %v6205_v38  ;;  %v10202_v42 = vld [vmem:[#allocation35_spill] sm:$0xff] }
0x1c44   :  { %5068 = vmatprep.subr.bf16.mxu0 %v6184_v19  ;;  %5283 = vmatprep.subr.bf16.mxu1 %v6194_v29  ;;  %v4766_v38 = vrot.slane %v6177_v61, %v10202_v42  ;;  %v4746_v19 = vrot.slane %v6177_v61, %v8820_v26  ;;  %v10203_v29 = vld [vmem:[#allocation36_spill] sm:$0xff] }
0x1c45   :  { %v4770_v10 = vrot.slane %v6177_v61, %v10203_v29 }
0x1c46   :  { %6212 = vmatmul.mubr.msk.bf16.vlgmr.msra.gmra.mrb[60].mxu0 %vm10196_vm2, %v9832_v60  ;;  %6216 = vmatmul.mubr.msk.bf16.vlgmr.msra.gmra.mrb[72].mxu1 %vm10197_vm4, %v9832_v60 }
0x1c47   :  { %5069 = vmatpush1.bf16.msra.mxu0 %v6183_v27  ;;  %5284 = vmatpush1.bf16.msra.mxu1 %v6193_v43 }
0x1c48   :  { %5070 = vmatprep.subr.bf16.mxu0 %v6200_v8  ;;  %5285 = vmatprep.subr.bf16.mxu1 %v6210_v0  ;;  %v9882_v0 = vld [vmem:[%s9994_s18 + $0x18] sm:$0xff] }
0x1c49   :  { %5100 = vmatprep.mubr.bf16.mxu0 %v10160_v44  ;;  %5315 = vmatprep.mubr.bf16.mxu1 %v10160_v44  ;;  %v4786_v51 = vrot.slane %v9882_v0, %v10193_v57 }
0x1c4b   :  { %5071 = vmatpush1.bf16.msra.mxu0 %v6199_v45  ;;  %5286 = vmatpush1.bf16.msra.mxu1 %v6209_v2 }
0x1c4c   :  { %5154 = vmatprep.subr.bf16.mxu0 %v6188_v32  ;;  %5616 = vmatprep.subr.bf16.mxu1 %v6224_v30 }
0x1c4e   :  { %6213 = vmatmul.mubr.msk.bf16.vlgmr.msra.gmra.mrb[64].mxu0 %vm10198_vm6, %v9832_v60  ;;  %6218 = vmatmul.mubr.msk.bf16.vlgmr.msra.gmra.mrb[76].mxu1 %vm10199_vm10, %v9832_v60 }
0x1c4f   :  { %5155 = vmatpush1.bf16.msra.mxu0 %v6187_v63  ;;  %5186 = vmatprep.mubr.bf16.mxu0 %v10160_v44 }
0x1c50   :  { %5156 = vmatprep.subr.bf16.mxu0 %v6204_v22  ;;  %v4750_v22 = vrot.slane %v6177_v61, %v10192_v28 }
0x1c53   :  { %5157 = vmatpush1.bf16.msra.mxu0 %v6203_v48 }
0x1c54   :  { %5240 = vmatprep.subr.bf16.mxu0 %v6192_v47  ;;  %5617 = vmatpush1.bf16.xpose.msra.mxu1 %v6223_v31  ;;  %v4782_v47 = vrot.slane %v9882_v0, %v10192_v28 }
0x1c56   :  { %6215 = vmatmul.mubr.msk.bf16.vlgmr.msra.gmra.mrb[68].mxu0 %vm10200_vm12, %v9832_v60 }
0x1c57   :  { %5241 = vmatpush1.bf16.msra.mxu0 %v6191_v52  ;;  %5272 = vmatprep.mubr.bf16.mxu0 %v10160_v44  ;;  %v5392_v44 = vld [vmem:[#allocation13 + $0x188] sm:$0xff] }
0x1c58   :  { %5242 = vmatprep.subr.bf16.mxu0 %v6208_v53  ;;  %v6239_v41 = vcombine.low %v5392_v44, %v5400_v59  ;;  %v6240_v40 = vcombine.high %v5392_v44, %v5400_v59 }
0x1c5a   :  { %5618 = vmatprep.subr.bf16.mxu1 %v6240_v40 }
0x1c5b   :  { %5243 = vmatpush1.bf16.msra.mxu0 %v6207_v55 }
0x1c5c   :  { %5575 = vmatprep.subr.bf16.mxu0 %v6222_v58  ;;  %5619 = vmatpush1.bf16.xpose.msra.mxu1 %v6239_v41  ;;  %v6242_v41 = vcombine.high %v9890_v62, %v9892_v7 }
0x1c5d   :  { %5698 = vmatprep.subr.bf16.mxu1 %v6228_v46 }
0x1c5e   :  { %6217 = vmatmul.mubr.msk.bf16.vlgmr.msra.gmra.mrb[72].mxu0 %vm10201_vm9, %v9832_v60  ;;  %v6226_v60 = vcombine.high %v9856_v23, %v9858_v4 }
0x1c64   :  { %5576 = vmatpush1.bf16.xpose.msra.mxu0 %v6221_v56 }
0x1c65   :  { %5577 = vmatprep.subr.bf16.mxu0 %v6238_v21 }
0x1c6c   :  { %5578 = vmatpush1.bf16.xpose.msra.mxu0 %v6237_v13 }
0x1c6d   :  { %5657 = vmatprep.subr.bf16.mxu0 %v6226_v60 }
0x1d11   :  { %v5016_v36 = vpop.f32.mrb[56].mxu0  ;;  %v5145_v16 = vpop.f32.mrb[68].mxu1 }
0x1d12   :  { %v5017_v9 = vadd.f32 %v5016_v36, %v4742_v11  ;;  %v5146_v27 = vadd.f32 %v5145_v16, %v4766_v38  ;;  %v5018_v43 = vpop.f32.mrb[57].mxu0  ;;  %v5147_v8 = vpop.f32.mrb[69].mxu1  ;;  %v4758_v16 = vrot.slane %v6177_v61, %v9151_v24 }
0x1d13   :  { %v5019_v5 = vadd.f32 %v5018_v43, %v4746_v19  ;;  %v5148_v35 = vadd.f32 %v5147_v8, %v4770_v10  ;;  %v5020_v45 = vpop.f32.mrb[58].mxu0  ;;  %v5149_v2 = vpop.f32.mrb[70].mxu1  ;;  %v4762_v8 = vrot.slane %v6177_v61, %v9156_v3  ;;  %v5387_v61 = vld [vmem:[#allocation13 + $0x160] sm:$0xff] }
0x1d14   :  { %v5021_v32 = vadd.f32 %v5020_v45, %v4742_v11  ;;  %v5150_v15 = vadd.f32 %v5149_v2, %v4766_v38  ;;  %v5022_v1 = vpop.f32.mrb[59].mxu0  ;;  %v5151_v63 = vpop.f32.mrb[71].mxu1  ;;  %v5326_v6 = vmax.f32 %v5017_v9, 0.0  ;;  %v5332_v52 = vmax.f32 %v5146_v27, 0.0 }
0x1d15   :  { %v5023_v39 = vadd.f32 %v5022_v1, %v4746_v19  ;;  %v5152_v48 = vadd.f32 %v5151_v63, %v4770_v10  ;;  %v5327_v54 = vmax.f32 %v5019_v5, 0.0  ;;  %v5333_v55 = vmax.f32 %v5148_v35, 0.0 }
0x1d16   :  { %v5342_v53 = vmax.f32 %v5021_v32, 0.0  ;;  %v5348_v50 = vmax.f32 %v5150_v15, 0.0  ;;  %v4798_v9 = vrot.slane %v9882_v0, %v10202_v42  ;;  %v4802_v5 = vrot.slane %v9882_v0, %v10203_v29 }
0x1d17   :  { %v5343_v58 = vmax.f32 %v5023_v39, 0.0  ;;  %v5349_v56 = vmax.f32 %v5152_v48, 0.0 }
0x1d18   :  { %v5358_v20 = vpack.c.bf16 %v5342_v53, %v5326_v6  ;;  %v9894_v13 = vpack.c.bf16 %v5348_v50, %v5332_v52 }
0x1d19   :  { %v5359_v21 = vpack.c.bf16 %v5343_v58, %v5327_v54  ;;  %v9896_v28 = vpack.c.bf16 %v5349_v56, %v5333_v55  ;;  %v5059_v14 = vpop.f32.mrb[60].mxu0  ;;  %v5231_v57 = vpop.f32.mrb[72].mxu1 }
0x1d1a   :  { %v5060_v31 = vadd.f32 %v5059_v14, %v4750_v22  ;;  %v5232_v30 = vadd.f32 %v5231_v57, %v4782_v47  ;;  %v5061_v44 = vpop.f32.mrb[61].mxu0  ;;  %v5233_v59 = vpop.f32.mrb[73].mxu1 }
0x1d1b   :  { %v5062_v40 = vadd.f32 %v5061_v44, %v4754_v25  ;;  %v5234_v60 = vadd.f32 %v5233_v59, %v4786_v51  ;;  %v5063_v46 = vpop.f32.mrb[62].mxu0  ;;  %v5235_v11 = vpop.f32.mrb[74].mxu1  ;;  %5607 = vmatprep.mubr.bf16.mxu0 %v5359_v21  ;;  %v4778_v59 = vrot.slane %v9882_v0, %v8820_v26 }
0x1d1c   :  { %v5064_v38 = vadd.f32 %v5063_v46, %v4750_v22  ;;  %v5236_v19 = vadd.f32 %v5235_v11, %v4782_v47  ;;  %v5065_v10 = vpop.f32.mrb[63].mxu0  ;;  %v5237_v36 = vpop.f32.mrb[75].mxu1  ;;  %5608 = vmatmul.mubr.bf16.vlgmr.msra.gmra.mrb[76].mxu0 %v5358_v20  ;;  %v5328_v35 = vmax.f32 %v5060_v31, 0.0  ;;  %v5336_v45 = vmax.f32 %v5232_v30, 0.0  ;;  %v9909_v22 = vld [vmem:[#allocation13 + $0x198] sm:$0xff]  ;;  %v5395_v11 = vld [vmem:[#allocation13 + $0x1a0] sm:$0xff] }
0x1d1d   :  { %v5066_v27 = vadd.f32 %v5065_v10, %v4754_v25  ;;  %v5238_v43 = vadd.f32 %v5237_v36, %v4786_v51  ;;  %5658 = vmatpush1.bf16.xpose.msra.mxu0 %v6225_v18  ;;  %v5329_v15 = vmax.f32 %v5062_v40, 0.0  ;;  %v5337_v1 = vmax.f32 %v5234_v60, 0.0  ;;  %v9911_v25 = vld [vmem:[#allocation13 + $0x1d8] sm:$0xff]  ;;  %v9915_v18 = vld [vmem:[#allocation13 + $0x120] sm:$0xff] }
0x1d1e   :  { %v5344_v2 = vmax.f32 %v5064_v38, 0.0  ;;  %v5352_v32 = vmax.f32 %v5236_v19, 0.0  ;;  %5659 = vmatprep.subr.bf16.mxu0 %v6242_v41  ;;  %v6241_v51 = vcombine.low %v9890_v62, %v9892_v7  ;;  %v6244_v54 = vcombine.high %v9909_v22, %v9911_v25  ;;  %v5403_v38 = vld [vmem:[#allocation13 + $0x1e0] sm:$0xff] }
0x1d1f   :  { %v5345_v63 = vmax.f32 %v5066_v27, 0.0  ;;  %v5353_v42 = vmax.f32 %v5238_v43, 0.0  ;;  %v6230_v21 = vcombine.high %v9915_v18, %v5387_v61  ;;  %v4774_v62 = vrot.slane %v9882_v0, %v8810_v37 }
0x1d20   :  { %v5360_v23 = vpack.c.bf16 %v5344_v2, %v5328_v35  ;;  %v9913_v4 = vpack.c.bf16 %v5352_v32, %v5336_v45  ;;  %v6229_v43 = vcombine.low %v9915_v18, %v5387_v61  ;;  %v6246_v35 = vcombine.high %v5395_v11, %v5403_v38 }
0x1d21   :  { %v5361_v29 = vpack.c.bf16 %v5345_v63, %v5329_v15  ;;  %v9917_v39 = vpack.c.bf16 %v5353_v42, %v5337_v1  ;;  %v5102_v48 = vpop.f32.mrb[64].mxu0  ;;  %v5317_v47 = vpop.f32.mrb[76].mxu1  ;;  %v4794_v61 = vrot.slane %v9882_v0, %v9156_v3 }
0x1d22   :  { %v5103_v6 = vadd.f32 %v5102_v48, %v4758_v16  ;;  %v5318_v52 = vadd.f32 %v5317_v47, %v4798_v9  ;;  %v5104_v53 = vpop.f32.mrb[65].mxu0  ;;  %v5319_v50 = vpop.f32.mrb[77].mxu1  ;;  %v5404_v48 = vld [vmem:[#allocation13 + $0x1e8] sm:$0xff] }
0x1d23   :  { %v5105_v55 = vadd.f32 %v5104_v53, %v4762_v8  ;;  %v5320_v58 = vadd.f32 %v5319_v50, %v4802_v5  ;;  %v5106_v56 = vpop.f32.mrb[66].mxu0  ;;  %v5321_v20 = vpop.f32.mrb[78].mxu1  ;;  %5648 = vmatprep.mubr.bf16.mxu1 %v5361_v29  ;;  %v5396_v29 = vld [vmem:[#allocation13 + $0x1a8] sm:$0xff]  ;;  %v6245_v50 = vcombine.low %v5395_v11, %v5403_v38 }
0x1d24   :  { %v5107_v14 = vadd.f32 %v5106_v56, %v4758_v16  ;;  %v5322_v57 = vadd.f32 %v5321_v20, %v4798_v9  ;;  %v5108_v31 = vpop.f32.mrb[67].mxu0  ;;  %v5323_v30 = vpop.f32.mrb[79].mxu1  ;;  %5649 = vmatmul.mubr.bf16.vlgmr.msra.gmra.mrb[80].mxu1 %v5360_v23  ;;  %v5330_v41 = vmax.f32 %v5103_v6, 0.0  ;;  %v5340_v40 = vmax.f32 %v5318_v52, 0.0  ;;  %v5380_v16 = vld [vmem:[#allocation13 + $0x128] sm:$0xff]  ;;  %v5389_v6 = vld [vmem:[#allocation13 + $0x170] sm:$0xff] }
0x1d25   :  { %v5109_v7 = vadd.f32 %v5108_v31, %v4762_v8  ;;  %v5324_v44 = vadd.f32 %v5323_v30, %v4802_v5  ;;  %5660 = vmatpush1.bf16.xpose.msra.mxu0 %v6241_v51  ;;  %5699 = vmatpush1.bf16.xpose.msra.mxu1 %v6227_v49  ;;  %v5331_v37 = vmax.f32 %v5105_v55, 0.0  ;;  %v5341_v19 = vmax.f32 %v5320_v58, 0.0  ;;  %v5381_v51 = vld [vmem:[#allocation13 + $0x130] sm:$0xff] }
0x1d26   :  { %v5346_v60 = vmax.f32 %v5107_v14, 0.0  ;;  %v5356_v46 = vmax.f32 %v5322_v57, 0.0  ;;  %5730 = vmatprep.mubr.bf16.mxu1 %v9896_v28  ;;  %5700 = vmatprep.subr.bf16.mxu1 %v6244_v54  ;;  %v6243_v28 = vcombine.low %v9909_v22, %v9911_v25  ;;  %v6232_v45 = vcombine.high %v5380_v16, %v5388_v12 }
0x1d27   :  { %v5347_v10 = vmax.f32 %v5109_v7, 0.0  ;;  %v5357_v36 = vmax.f32 %v5324_v44, 0.0  ;;  %5739 = vmatprep.subr.bf16.mxu0 %v6230_v21  ;;  %v4790_v22 = vrot.slane %v9882_v0, %v9151_v24  ;;  %v6231_v54 = vcombine.low %v5380_v16, %v5388_v12 }
0x1d28   :  { %v5362_v33 = vpack.c.bf16 %v5346_v60, %v5330_v41  ;;  %v9932_v49 = vpack.c.bf16 %v5356_v46, %v5340_v40  ;;  %v6248_v56 = vcombine.high %v5396_v29, %v5404_v48  ;;  %v6234_v14 = vcombine.high %v5381_v51, %v5389_v6  ;;  %v5405_v41 = vld [vmem:[#allocation13 + $0x1f0] sm:$0xff]  ;;  %v5382_v60 = vld [vmem:[#allocation13 + $0x138] sm:$0xff] }
0x1d29   :  { %v5363_v26 = vpack.c.bf16 %v5347_v10, %v5331_v37  ;;  %v9934_v9 = vpack.c.bf16 %v5357_v36, %v5341_v19  ;;  %v5188_v27 = vpop.f32.mrb[68].mxu0  ;;  %v5390_v46 = vld [vmem:[#allocation13 + $0x178] sm:$0xff]  ;;  %v6247_v38 = vcombine.low %v5396_v29, %v5404_v48 }
0x1d2a   :  { %v5189_v8 = vadd.f32 %v5188_v27, %v4774_v62  ;;  %v5190_v5 = vpop.f32.mrb[69].mxu0  ;;  %v6236_v19 = vcombine.high %v5382_v60, %v5390_v46  ;;  %v5406_v10 = vld [vmem:[#allocation13 + $0x1f8] sm:$0xff]  ;;  %v6235_v16 = vcombine.low %v5382_v60, %v5390_v46 }
0x1d2b   :  { %v5191_v2 = vadd.f32 %v5190_v5, %v4778_v59  ;;  %v5192_v32 = vpop.f32.mrb[70].mxu0  ;;  %5689 = vmatprep.mubr.bf16.mxu0 %v5363_v26 }
0x1d2c   :  { %v5193_v15 = vadd.f32 %v5192_v32, %v4774_v62  ;;  %v5194_v1 = vpop.f32.mrb[71].mxu0  ;;  %5690 = vmatmul.mubr.bf16.vlgmr.msra.gmra.mrb[80].mxu0 %v5362_v33  ;;  %v5334_v42 = vmax.f32 %v5189_v8, 0.0  ;;  %v6220_v8 = vld [vmem:[%s9996_s20 + $0x1] ss:$0 sm:$0xff] }
0x1d2d   :  { %v5195_v63 = vadd.f32 %v5194_v1, %v4778_v59  ;;  %5701 = vmatpush1.bf16.xpose.msra.mxu1 %v6243_v28  ;;  %5740 = vmatpush1.bf16.xpose.msra.mxu0 %v6229_v43  ;;  %v5335_v25 = vmax.f32 %v5191_v2, 0.0  ;;  %v5397_v59 = vld [vmem:[#allocation13 + $0x1b0] sm:$0xff] }
0x1d2e   :  { %v5350_v23 = vmax.f32 %v5193_v15, 0.0  ;;  %5741 = vmatprep.subr.bf16.mxu0 %v6246_v35  ;;  %5780 = vmatprep.subr.bf16.mxu1 %v6232_v45  ;;  %v6250_v37 = vcombine.high %v5397_v59, %v5405_v41  ;;  %v6249_v36 = vcombine.low %v5397_v59, %v5405_v41 }
0x1d2f   :  { %v5351_v18 = vmax.f32 %v5195_v63, 0.0 }
0x1d30   :  { %v5366_v47 = vpack.c.bf16 %v5350_v23, %v5334_v42 }
0x1d31   :  { %v5367_v52 = vpack.c.bf16 %v5351_v18, %v5335_v25  ;;  %v5274_v53 = vpop.f32.mrb[72].mxu0 }
0x1d32   :  { %v5275_v55 = vadd.f32 %v5274_v53, %v4790_v22  ;;  %v5276_v58 = vpop.f32.mrb[73].mxu0 }
0x1d33   :  { %v5277_v20 = vadd.f32 %v5276_v58, %v4794_v61  ;;  %v5278_v21 = vpop.f32.mrb[74].mxu0  ;;  %5771 = vmatprep.mubr.bf16.mxu0 %v5367_v52 }
0x1d34   :  { %v5279_v57 = vadd.f32 %v5278_v21, %v4790_v22  ;;  %5731 = vmatmul.mubr.bf16.vlgmr.msra.gmra.mrb[84].mxu1 %v9894_v13  ;;  %v5280_v0 = vpop.f32.mrb[75].mxu0  ;;  %v5338_v30 = vmax.f32 %v5275_v55, 0.0  ;;  %v6233_v13 = vcombine.low %v5381_v51, %v5389_v6 }
0x1d35   :  { %v5281_v31 = vadd.f32 %v5280_v0, %v4794_v61  ;;  %5742 = vmatpush1.bf16.xpose.msra.mxu0 %v6245_v50  ;;  %5781 = vmatpush1.bf16.xpose.msra.mxu1 %v6231_v54  ;;  %v5339_v7 = vmax.f32 %v5277_v20, 0.0 }
0x1d36   :  { %v5354_v62 = vmax.f32 %v5279_v57, 0.0  ;;  %5812 = vmatprep.mubr.bf16.mxu1 %v9917_v39  ;;  %5782 = vmatprep.subr.bf16.mxu1 %v6248_v56  ;;  %v5398_v39 = vld [vmem:[#allocation13 + $0x1b8] sm:$0xff] }
0x1d37   :  { %v5355_v44 = vmax.f32 %v5281_v31, 0.0  ;;  %5821 = vmatprep.subr.bf16.mxu0 %v6234_v14  ;;  %v6252_v12 = vcombine.high %v5398_v39, %v5406_v10  ;;  %v6251_v33 = vcombine.low %v5398_v39, %v5406_v10 }
0x1d38   :  { %v5370_v40 = vpack.c.bf16 %v5354_v62, %v5338_v30 }
0x1d39   :  { %v5371_v11 = vpack.c.bf16 %v5355_v44, %v5339_v7 }
0x1d3c   :  { %5772 = vmatmul.mubr.bf16.vlgmr.msra.gmra.mrb[84].mxu0 %v5366_v47 }
0x1d3d   :  { %5783 = vmatpush1.bf16.xpose.msra.mxu1 %v6247_v38  ;;  %5822 = vmatpush1.bf16.xpose.msra.mxu0 %v6233_v13 }
0x1d3e   :  { %5853 = vmatprep.mubr.bf16.mxu0 %v5371_v11  ;;  %5823 = vmatprep.subr.bf16.mxu0 %v6250_v37 }
0x1d3f   :  { %5862 = vmatprep.subr.bf16.mxu1 %v6236_v19 }
0x1d44   :  { %5813 = vmatmul.mubr.bf16.vlgmr.msra.gmra.mrb[88].mxu1 %v9913_v4 }
0x1d45   :  { %5824 = vmatpush1.bf16.xpose.msra.mxu0 %v6249_v36  ;;  %5863 = vmatpush1.bf16.xpose.msra.mxu1 %v6235_v16 }
0x1d46   :  { %5894 = vmatprep.mubr.bf16.mxu1 %v9934_v9  ;;  %5864 = vmatprep.subr.bf16.mxu1 %v6252_v12 }
0x1d4c   :  { %5854 = vmatmul.mubr.bf16.vlgmr.msra.gmra.mrb[88].mxu0 %v5370_v40 }
0x1d4d   :  { %5865 = vmatpush1.bf16.xpose.msra.mxu1 %v6251_v33 }
0x1d54   :  { %5895 = vmatmul.mubr.bf16.vlgmr.msra.gmra.mrb[92].mxu1 %v9932_v49 }
0x1def   :  { %v5609_v26 = vpop.f32.mrb[76].mxu0 }
0x1df0   :  { %v5611_v27 = vpop.f32.mrb[77].mxu0  ;;  %v5610_v5 = vadd.f32 %v6220_v8, %v5609_v26 }
0x1df1   :  { %v5612_v28 = vpop.f32.mrb[78].mxu0 }
0x1df2   :  { %v5614_v43 = vpop.f32.mrb[79].mxu0  ;;  %v5613_v35 = vadd.f32 %v6220_v8, %v5612_v28 }
0x1df7   :  { %v5650_v4 = vpop.f32.mrb[80].mxu1 }
0x1df8   :  { %v5651_v45 = vadd.f32 %v5650_v4, %v5610_v5  ;;  %v5652_v2 = vpop.f32.mrb[81].mxu1 }
0x1df9   :  { %v5653_v9 = vpop.f32.mrb[82].mxu1 }
0x1dfa   :  { %v5654_v32 = vadd.f32 %v5653_v9, %v5613_v35  ;;  %v5655_v15 = vpop.f32.mrb[83].mxu1  ;;  %v7752_v35 = vld [vmem:[%s9992_s16 + $0x8] sm:$0x3f]  ;;  %s7907_s16 = scalar_lea.vmem %s5951_s4, 256 }
0x1dfb   :  { %p7908_p0 = scmp.ne.s32.totalorder %s5951_s4, %s7907_s16  ;;  %p7913_p2 = scmp.lt.s32.totalorder %s7907_s16, %s7907_s16 }
0x1dfd   :  { %p7914_p3 = por %p7913_p2, %p7912_p1 }
0x1dff   :  { %v5691_v1 = vpop.f32.mrb[80].mxu0  ;;  %p7915_p4 = pnand %p7914_p3, %p7908_p0 }
0x1e00   :  { %v5692_v63 = vadd.f32 %v5691_v1, %v5651_v45  ;;  %v5693_v42 = vpop.f32.mrb[81].mxu0  ;;  %v5934_v45 = vrot.slane %v7752_v35, %v9151_v24 }
0x1e01   :  { %v5694_v49 = vpop.f32.mrb[82].mxu0 }
0x1e02   :  { %v5695_v23 = vadd.f32 %v5694_v49, %v5654_v32  ;;  %v5696_v22 = vpop.f32.mrb[83].mxu0  ;;  %v5940_v32 = vrot.slane %v7752_v35, %v9156_v3 }
0x1e07   :  { %v5732_v25 = vpop.f32.mrb[84].mxu1 }
0x1e08   :  { %v5733_v18 = vadd.f32 %v5732_v25, %v5692_v63  ;;  %v5734_v61 = vpop.f32.mrb[85].mxu1 }
0x1e09   :  { %v5735_v29 = vpop.f32.mrb[86].mxu1 }
0x1e0a   :  { %v5736_v48 = vadd.f32 %v5735_v29, %v5695_v23  ;;  %v5737_v47 = vpop.f32.mrb[87].mxu1 }
0x1e0f   :  { %v5773_v51 = vpop.f32.mrb[84].mxu0 }
0x1e10   :  { %v5774_v6 = vadd.f32 %v5773_v51, %v5733_v18  ;;  %v5775_v52 = vpop.f32.mrb[85].mxu0 }
0x1e11   :  { %v5776_v53 = vpop.f32.mrb[86].mxu0 }
0x1e12   :  { %v5777_v50 = vadd.f32 %v5776_v53, %v5736_v48  ;;  %v5778_v54 = vpop.f32.mrb[87].mxu0 }
0x1e17   :  { %v5814_v55 = vpop.f32.mrb[88].mxu1 }
0x1e18   :  { %v5815_v58 = vadd.f32 %v5814_v55, %v5774_v6  ;;  %v5816_v56 = vpop.f32.mrb[89].mxu1 }
0x1e19   :  { %v5817_v20 = vpop.f32.mrb[90].mxu1 }
0x1e1a   :  { %v5818_v21 = vadd.f32 %v5817_v20, %v5777_v50  ;;  %v5819_v14 = vpop.f32.mrb[91].mxu1 }
0x1e1f   :  { %v5855_v57 = vpop.f32.mrb[88].mxu0 }
0x1e20   :  { %v5856_v0 = vadd.f32 %v5855_v57, %v5815_v58  ;;  %v5857_v31 = vpop.f32.mrb[89].mxu0 }
0x1e21   :  { %v5858_v30 = vpop.f32.mrb[90].mxu0 }
0x1e22   :  { %v5859_v62 = vadd.f32 %v5858_v30, %v5818_v21  ;;  %v5860_v7 = vpop.f32.mrb[91].mxu0 }
0x1e27   :  { %v5896_v44 = vpop.f32.mrb[92].mxu1 }
0x1e28   :  { %v5897_v59 = vadd.f32 %v5896_v44, %v5856_v0  ;;  %v5898_v41 = vpop.f32.mrb[93].mxu1 }
0x1e29   :  { %v5899_v40 = vpop.f32.mrb[94].mxu1 }
0x1e2a   :  { %v5903_v60 = vadd.f32 %v5897_v59, %v9826_v17  ;;  %v5900_v46 = vadd.f32 %v5899_v40, %v5859_v62  ;;  %v5901_v11 = vpop.f32.mrb[95].mxu1 }
0x1e2c   :  { %v5904_v38 = vadd.f32 %v5900_v46, %v9828_v34  ;;  %v5905_v13 = vsel %vm10204_vm11, %v5903_v60, 0.0 }
0x1e2d   :  { %5906 = vadd.xlane.f32.xlu1 %v5905_v13 }
0x1e2e   :  { %v5908_v37 = vsel %vm10205_vm5, %v5904_v38, 0.0 }
0x1e2f   :  { %5909 = vadd.xlane.f32.xlu0 %v5908_v37 }
0x1eba   :  { %v5907_v19 = vpop.xlane.xlu1 %5906 }
0x1ebb   :  { %v5911_v39 = vmul.f32 0.03125, %v5907_v19 }
0x1ebc   :  { %v5910_v10 = vpop.xlane.xlu0 %5909 }
0x1ebd   :  { %v5913_v36 = vsub.f32 %v5903_v60, %v5911_v39  ;;  %v5912_v16 = vmul.f32 0.03125, %v5910_v10 }
0x1ebf   :  { %v5914_v12 = vsub.f32 %v5904_v38, %v5912_v16  ;;  %v5915_v33 = vmul.f32 %v5913_v36, %v5913_v36 }
0x1ec1   :  { %v5917_v26 = vsel %vm10206_vm8, %v5915_v33, 0.0  ;;  %v5916_v17 = vmul.f32 %v5914_v12, %v5914_v12 }
0x1ec2   :  { %5918 = vadd.xlane.f32.xlu1 %v5917_v26 }
0x1ec3   :  { %v5920_v27 = vsel %vm10207_vm3, %v5916_v17, 0.0 }
0x1ec4   :  { %5921 = vadd.xlane.f32.xlu0 %v5920_v27 }
0x1f4f   :  { %v5919_v34 = vpop.xlane.xlu1 %5918 }
0x1f50   :  { %v5923_v28 = vmul.f32 0.03125, %v5919_v34 }
0x1f51   :  { %v5922_v43 = vpop.xlane.xlu0 %5921 }
0x1f52   :  { %v5925_v8 = vadd.f32 1e-05, %v5923_v28  ;;  %v5924_v5 = vmul.f32 0.03125, %v5922_v43 }
0x1f54   :  { %7711 = vrsqrt.f32 %v5925_v8  ;;  %v5926_v4 = vadd.f32 1e-05, %v5924_v5 }
0x1f56   :  { %7713 = vrsqrt.f32 %v5926_v4 }
0x1f5e   :  { %v7712_v2 = vpop.eup %7711 }
0x1f5f   :  { %v5929_v9 = vmul.f32 %v7712_v2, %v5913_v36 }
0x1f60   :  { %v7714_v15 = vpop.eup %7713 }
0x1f61   :  { %v5935_v1 = vmul.f32 %v5934_v45, %v5929_v9  ;;  %v5930_v63 = vmul.f32 %v7714_v15, %v5914_v12 }
0x1f63   :  { %v5936_v42 = vmul.f32 %v5934_v45, %v5930_v63  ;;  %v5941_v49 = vadd.f32 %v5940_v32, %v5935_v1 }
0x1f65   :  { %v5942_v23 = vadd.f32 %v5940_v32, %v5936_v42  ;;  %5943 = vst.msk [vmem:[#allocation14] sm:$0xff] %vm10188_vm0, %v5941_v49 }
0x1f67   :  { %5944 = vst.msk [vmem:[#allocation14 + $0x8] sm:$0xff] %vm10208_vm7, %v5942_v23 }
0x1f68   :  { %7918 = shalt.err (!%p7915_p4)
}
0x1f69   :  { %s7919_s25 = scalar_lea.hbm %s9997_s21, 256 }
0x1f6a   :  { %p7920_p5 = scmp.ne.s32.totalorder %s9997_s21, %s7919_s25  ;;  %p7923_p6 = scmp.lt.u32.totalorder %s7919_s25, %s9997_s21 }
0x1f6c   :  { %p7925_p7 = pnand %p7923_p6, %p7920_p5 }
0x1f6e   :  { %7928 = shalt.err (!%p7925_p7)
}
0x1f6f   :  { %s7959_s10 = smov 128   ;;  %s7960_s28 = smov 8  }
0x1f70   :  { %5956 = dma.vmem_to_hbm [thread:$0]  %s5951_s4, 256, %s9997_s21, [#allocation4], %s7959_s10, %s7959_s10, %s7960_s28  }
0x1f71   :  { %7937 = dma.done.wait [#allocation4], 256  }
0x1f72   :  { %7938 = vsyncadd [#allocation4], 4294967040 }
0x1f73   :  { %5960 = vsyncpa [#allocation3], 1 }
0x1f74   :  { %5961 = vsyncpa [#allocation6], 1 }
0x1f75   :  { %5962 = vsyncpa [#allocation9], 1 }
0x1f76   :  { %5963 = vsyncpa [#allocation12], 1 }
0x1f77   :  { %5964 = vsyncpa [#allocation4], 1 }

</bundles_post_ra>
